<compile_context>
chip_gen: v6e
topology: v6e:2x2x1
jax: 0.10.0
libtpu: 0.0.40
codegen_flags: <defaults>
</compile_context>

<pallas_src>
import functools

import numpy as np
import jax
import jax.numpy as jnp
from jax.experimental import pallas as pl
from jax.experimental.pallas import tpu as pltpu


H = W = 28          # input spatial size (fixed by the 1152-d flatten)
H1O = W1O = 26      # conv1 valid output size
H2O = W2O = 24      # conv2 valid output size
C1, C2, NO = 30, 2, 10
K1 = W1O * C1       # 780  (a1 lane width)
LP = 128            # lane-aligned tap stride for the packed conv2 weights


# ------------------------------ fused kernel -------------------------------- #

def _fused_cnn_kernel(xs_ref, w1_ref, b1_ref, w2_ref, b2_ref,
                      wfc_ref, mask_ref, summ_ref, sel_ref, bfc_ref,
                      o_ref, *, bt):
    """One batch block (bt images), entire forward pass in VMEM.

    Row layout: global row r = b*26 + y  (b = image in block, y = output row).
      xs  : (bt*26, 84)    lanes = (tap i, input column)        [bf16]
      a1  : (bt*26, 780)   lanes = (x1, conv1 channel)
      t   : (bt*26, 384)   lanes = (tap i @ i*128, x2*2 + ch)
      a2  : (bt*26-2, 128) lanes 0..47 = (x2, conv2 channel), rest zero
      out : (bt, 10)
    """
    R1 = bt * H1O
    R2 = R1 - 2

    # ---- conv1: single dot, taps stacked along K (K=84) ----
    a1 = jnp.dot(xs_ref[...], w1_ref[...], preferred_element_type=jnp.float32)
    a1 = jnp.maximum(a1 + b1_ref[...], 0.0)                 # (R1, 780) f32
    a1 = a1.astype(jnp.bfloat16)

    # ---- conv2: one dot against lane-packed taps, combine shifted OUTPUTS ----
    t = jnp.dot(a1, w2_ref[...], preferred_element_type=jnp.float32)  # (R1, 384)
    a2 = (t[0:R2, 0:128]
          + t[1:R2 + 1, 128:256]
          + t[2:R2 + 2, 256:384])                            # (R2, 128), lanes>=48 are 0
    a2 = jnp.maximum(a2 + b2_ref[...], 0.0)
    a2 = a2.astype(jnp.bfloat16)

    # ---- fully connected (flatten folded into remapped weights) ----
    # p[r, y'*10+o] = FC partial of row r assuming it is output row y'
    p = jnp.dot(a2, wfc_ref[...], preferred_element_type=jnp.float32)  # (R2, 240)
    pm = p * mask_ref[...]                                   # keep y' == (r mod 26)
    s = jnp.dot(sel_ref[...], pm, preferred_element_type=jnp.float32)  # (bt, 240)
    o_ref[...] = (jnp.dot(s, summ_ref[...], preferred_element_type=jnp.float32)
                  + bfc_ref[...])                            # (bt, 10)


# --------------------------- parameter preparation -------------------------- #

def init_params(key):
    """Synthetic parameters with the PyTorch module's shapes / init scale."""
    ks = jax.random.split(key, 6)

    def u(k, shape, fan_in):
        bound = 1.0 / np.sqrt(fan_in)
        return jax.random.uniform(k, shape, jnp.float32, -bound, bound)

    return {
        "conv1_w": u(ks[0], (30, 1, 3, 3), 1 * 3 * 3),
        "conv1_b": u(ks[1], (30,), 1 * 3 * 3),
        "conv2_w": u(ks[2], (2, 30, 3, 3), 30 * 3 * 3),
        "conv2_b": u(ks[3], (2,), 30 * 3 * 3),
        "fc_w":    u(ks[4], (10, 1152), 1152),   # PyTorch Linear weight (out, in)
        "fc_b":    u(ks[5], (10,), 1152),
    }


def prepare_params(params, *, bt):
    """One-time reformatting of PyTorch-layout weights into the kernel layout."""
    w1 = np.asarray(params["conv1_w"], np.float32)   # (30, 1, 3, 3)
    b1 = np.asarray(params["conv1_b"], np.float32)
    w2 = np.asarray(params["conv2_w"], np.float32)   # (2, 30, 3, 3)
    b2 = np.asarray(params["conv2_b"], np.float32)
    wf = np.asarray(params["fc_w"], np.float32)      # (10, 1152)
    bf = np.asarray(params["fc_b"], np.float32)

    # conv1: stacked-tap block-Toeplitz (3*28=84, 780)
    #   w1m[i*28 + xin, x1*30 + c] = w1[c, 0, i, xin - x1]
    w1m = np.zeros((3 * W, K1), np.float32)
    for i in range(3):
        for x1 in range(W1O):
            for j in range(3):
                w1m[i * W + x1 + j, x1 * C1:(x1 + 1) * C1] = w1[:, 0, i, j]
    b1m = np.tile(b1, W1O)[None, :]                  # (1, 780)

    # conv2: lane-packed taps (780, 3*128=384); tap i lives at lanes [i*128, i*128+48)
    #   w2m[x1*30 + c, i*128 + x2*2 + o] = w2[o, c, i, x1 - x2]
    w2m = np.zeros((K1, 3 * LP), np.float32)
    for i in range(3):
        for x2 in range(W2O):
            for j in range(3):
                x1 = x2 + j
                w2m[x1 * C1:(x1 + 1) * C1,
                    i * LP + x2 * C2: i * LP + (x2 + 1) * C2] = w2[:, :, i, j].T
    b2m = np.zeros((1, LP), np.float32)
    b2m[0, :W2O * C2] = np.tile(b2, W2O)             # (1, 128), zeros past lane 47

    # FC remap: a2 row (b*26+y) lane (x*2+c) holds relu2[b, c, y, x]; PyTorch flat
    # index is c*576 + y*24 + x.   wfm[x*2+c, y'*10+o] = wf[o, c*576 + y'*24 + x]
    wfm = np.zeros((LP, H2O * NO), np.float32)       # (128, 240); rows >= 48 zero
    for yp in range(H2O):
        for x in range(W2O):
            for c in range(C2):
                wfm[x * C2 + c, yp * NO:(yp + 1) * NO] = wf[:, c * (H2O * W2O) + yp * W2O + x]

    R1 = bt * H1O
    R2 = R1 - 2
    rows_y = np.arange(R2) % H1O                     # output row y of each a2 row
    lane_y = np.arange(H2O * NO) // NO               # y' of each expanded FC lane (0..23)
    mask = (rows_y[:, None] == lane_y[None, :]).astype(np.float32)          # (R2, 240)
    summ = np.tile(np.eye(NO, dtype=np.float32), (H2O, 1))                  # (240, 10)
    sel = (np.arange(R2)[None, :] // H1O == np.arange(bt)[:, None]).astype(np.float32)  # (bt, R2)

    f32 = lambda a: jnp.asarray(a, jnp.float32)
    bf16 = lambda a: jnp.asarray(a, jnp.bfloat16)
    return {"w1": bf16(w1m), "b1": f32(b1m), "w2": bf16(w2m), "b2": f32(b2m),
            "wfc": bf16(wfm), "mask": f32(mask), "sum": f32(summ),
            "sel": f32(sel), "bfc": f32(bf[None, :])}


# --------------------------------- forward ----------------------------------- #

def cnn_forward(prep, x_nchw, *, bt):
    """Forward pass matching Cnn_Model.forward. x: (B, 1, 28, 28) float32."""
    B = x_nchw.shape[0]
    assert B % bt == 0, (B, bt)
    g = B // bt
    R1 = bt * H1O
    R2 = R1 - 2

    # Stack the three vertical conv1 taps along the lane dim in the wrapper
    # (one-time cheap XLA concat): xs[b, y1, i*28 + xin] = x[b, 0, y1+i, xin].
    x2 = x_nchw.reshape(B, H, W).astype(jnp.float32)
    xs = jnp.concatenate([x2[:, 0:H1O, :], x2[:, 1:H1O + 1, :], x2[:, 2:H1O + 2, :]],
                         axis=-1)                           # (B, 26, 84)
    xs = xs.reshape(g, R1, 3 * W).astype(jnp.bfloat16)

    flops = int(2 * g * (R1 * 84 * K1 + R1 * K1 * 3 * LP + R2 * LP * 240
                         + bt * R2 * 240 + bt * 240 * NO))
    bytes_accessed = int(xs.size * 2 + B * NO * 4
                         + sum(int(v.size) * v.dtype.itemsize for v in prep.values()))

    out = pl.pallas_call(
        functools.partial(_fused_cnn_kernel, bt=bt),
        out_shape=jax.ShapeDtypeStruct((g, bt, NO), jnp.float32),
        grid=(g,),
        in_specs=[
            pl.BlockSpec((None, R1, 3 * W), lambda i: (i, 0, 0)),   # stacked input block
            pl.BlockSpec((3 * W, K1), lambda i: (0, 0)),            # conv1 Toeplitz (bf16)
            pl.BlockSpec((1, K1), lambda i: (0, 0)),                # conv1 bias (tiled)
            pl.BlockSpec((K1, 3 * LP), lambda i: (0, 0)),           # conv2 packed taps (bf16)
            pl.BlockSpec((1, LP), lambda i: (0, 0)),                # conv2 bias (tiled, padded)
            pl.BlockSpec((LP, H2O * NO), lambda i: (0, 0)),         # FC remapped weights (bf16)
            pl.BlockSpec((R2, H2O * NO), lambda i: (0, 0)),         # row -> y' mask
            pl.BlockSpec((H2O * NO, NO), lambda i: (0, 0)),         # y'-group summer
            pl.BlockSpec((bt, R2), lambda i: (0, 0)),               # per-image row selector
            pl.BlockSpec((1, NO), lambda i: (0, 0)),                # FC bias
        ],
        out_specs=pl.BlockSpec((None, bt, NO), lambda i: (i, 0, 0)),
        compiler_params=pltpu.CompilerParams(
            dimension_semantics=("parallel",),
            vmem_limit_bytes=32 * 1024 * 1024),
        cost_estimate=pl.CostEstimate(flops=flops, transcendentals=0,
                                      bytes_accessed=bytes_accessed),
    )(xs, prep["w1"], prep["b1"], prep["w2"], prep["b2"],
      prep["wfc"], prep["mask"], prep["sum"], prep["sel"], prep["bfc"])
    return out.reshape(B, NO)


# ------------------------------ plain-JAX reference -------------------------- #

def reference_forward(params, x_nchw):
    dn = ("NCHW", "OIHW", "NCHW")
    y = jax.lax.conv_general_dilated(x_nchw, params["conv1_w"], (1, 1), "VALID",
                                     dimension_numbers=dn)
    y = jnp.maximum(y + params["conv1_b"][None, :, None, None], 0.0)
    y = jax.lax.conv_general_dilated(y, params["conv2_w"], (1, 1), "VALID",
                                     dimension_numbers=dn)
    y = jnp.maximum(y + params["conv2_b"][None, :, None, None], 0.0)
    y = y.reshape(y.shape[0], -1)                      # NCHW flatten == torch view(B, -1)
    return y @ params["fc_w"].T + params["fc_b"]


# ----------------------------------- main ------------------------------------ #

if __name__ == "__main__":
    key = jax.random.PRNGKey(0)
    k_param, k_x = jax.random.split(key)

    params = init_params(k_param)

    # 28x28 spatial size is fixed by the 1152-d flatten.  B=32, BT=16 gives an
    # even grid of 2 (both v7x TensorCores busy) with ~416 matmul rows per step.
    B, BT = 32, 16
    x = jax.random.normal(k_x, (B, 1, 28, 28), dtype=jnp.float32)

    prep = prepare_params(params, bt=BT)           # one-time weight reformatting
    fwd = jax.jit(functools.partial(cnn_forward, bt=BT))

    out = jax.block_until_ready(fwd(prep, x))
    assert out.shape == (B, 10), out.shape
    assert out.dtype == jnp.float32, out.dtype

    ref = jax.block_until_ready(reference_forward(params, x))
    err = float(jnp.max(jnp.abs(out - ref)))
    # bf16 matmul operands with f32 accumulation: small, bounded mismatch vs f32 ref.
    assert err < 2e-2, f"max |kernel - reference| = {err}"

    print("KERNEL_OK")
</pallas_src>

<mosaic_0001>
module attributes {stable_mosaic.version = 11 : i64} {
  func.func @_fused_cnn_kernel(%arg0: i32, %arg1: memref<1x416x84xbf16, #tpu.memory_space<vmem>>, %arg2: memref<84x780xbf16, #tpu.memory_space<vmem>>, %arg3: memref<1x780xf32, #tpu.memory_space<vmem>>, %arg4: memref<780x384xbf16, #tpu.memory_space<vmem>>, %arg5: memref<1x128xf32, #tpu.memory_space<vmem>>, %arg6: memref<128x240xbf16, #tpu.memory_space<vmem>>, %arg7: memref<414x240xf32, #tpu.memory_space<vmem>>, %arg8: memref<240x10xf32, #tpu.memory_space<vmem>>, %arg9: memref<16x414xf32, #tpu.memory_space<vmem>>, %arg10: memref<1x10xf32, #tpu.memory_space<vmem>>, %arg11: memref<1x16x10xf32, #tpu.memory_space<vmem>>) attributes {dimension_semantics = [#tpu.dimension_semantics<parallel>], iteration_bounds = array<i64: 2>, scalar_prefetch = 0 : i64, scratch_operands = 0 : i64, tpu.core_type = #tpu.core_type<tc>, window_params = [{transform_indices = @transform_0, window_bounds = array<i64: 1, 416, 84>}, {pipeline_mode = #tpu.pipeline_mode<synchronous>, transform_indices = @transform_1, window_bounds = array<i64: 84, 780>}, {pipeline_mode = #tpu.pipeline_mode<synchronous>, transform_indices = @transform_2, window_bounds = array<i64: 1, 780>}, {pipeline_mode = #tpu.pipeline_mode<synchronous>, transform_indices = @transform_3, window_bounds = array<i64: 780, 384>}, {pipeline_mode = #tpu.pipeline_mode<synchronous>, transform_indices = @transform_4, window_bounds = array<i64: 1, 128>}, {pipeline_mode = #tpu.pipeline_mode<synchronous>, transform_indices = @transform_5, window_bounds = array<i64: 128, 240>}, {pipeline_mode = #tpu.pipeline_mode<synchronous>, transform_indices = @transform_6, window_bounds = array<i64: 414, 240>}, {pipeline_mode = #tpu.pipeline_mode<synchronous>, transform_indices = @transform_7, window_bounds = array<i64: 240, 10>}, {pipeline_mode = #tpu.pipeline_mode<synchronous>, transform_indices = @transform_8, window_bounds = array<i64: 16, 414>}, {pipeline_mode = #tpu.pipeline_mode<synchronous>, transform_indices = @transform_9, window_bounds = array<i64: 1, 10>}, {transform_indices = @transform_10, window_bounds = array<i64: 1, 16, 10>}]} {
    %c0 = arith.constant 0 : index
    %c0_0 = arith.constant 0 : index
    %c0_1 = arith.constant 0 : index
    %0 = vector.load %arg1[%c0, %c0_0, %c0_1] : memref<1x416x84xbf16, #tpu.memory_space<vmem>>, vector<1x416x84xbf16>
    %1 = vector.shape_cast %0 : vector<1x416x84xbf16> to vector<416x84xbf16>
    %c0_2 = arith.constant 0 : index
    %c0_3 = arith.constant 0 : index
    %2 = vector.load %arg2[%c0_2, %c0_3] : memref<84x780xbf16, #tpu.memory_space<vmem>>, vector<84x780xbf16>
    %cst = arith.constant dense<0.000000e+00> : vector<416x780xf32>
    %3 = tpu.matmul %1, %2, %cst {dimension_numbers = #tpu.dot_dimension_numbers<[1], [0], [0], [1], [0, 0, 1, 1], [], []>} : vector<416x84xbf16>, vector<84x780xbf16>, vector<416x780xf32> -> vector<416x780xf32>
    %c0_4 = arith.constant 0 : index
    %c0_5 = arith.constant 0 : index
    %4 = vector.load %arg3[%c0_4, %c0_5] : memref<1x780xf32, #tpu.memory_space<vmem>>, vector<1x780xf32>
    %5 = vector.broadcast %4 : vector<1x780xf32> to vector<416x780xf32>
    %6 = arith.addf %3, %5 : vector<416x780xf32>
    %cst_6 = arith.constant 0.000000e+00 : f32
    %7 = vector.broadcast %cst_6 : f32 to vector<416x780xf32>
    %8 = arith.maximumf %6, %7 : vector<416x780xf32>
    %9 = arith.truncf %8 : vector<416x780xf32> to vector<416x780xbf16>
    %c0_7 = arith.constant 0 : index
    %c0_8 = arith.constant 0 : index
    %10 = vector.load %arg4[%c0_7, %c0_8] : memref<780x384xbf16, #tpu.memory_space<vmem>>, vector<780x384xbf16>
    %cst_9 = arith.constant dense<0.000000e+00> : vector<416x384xf32>
    %11 = tpu.matmul %9, %10, %cst_9 {dimension_numbers = #tpu.dot_dimension_numbers<[1], [0], [0], [1], [0, 0, 1, 1], [], []>} : vector<416x780xbf16>, vector<780x384xbf16>, vector<416x384xf32> -> vector<416x384xf32>
    %12 = vector.extract_strided_slice %11 {offsets = [0, 0], sizes = [414, 128], strides = [1, 1]} : vector<416x384xf32> to vector<414x128xf32>
    %13 = vector.extract_strided_slice %11 {offsets = [1, 128], sizes = [414, 128], strides = [1, 1]} : vector<416x384xf32> to vector<414x128xf32>
    %14 = arith.addf %12, %13 : vector<414x128xf32>
    %15 = vector.extract_strided_slice %11 {offsets = [2, 256], sizes = [414, 128], strides = [1, 1]} : vector<416x384xf32> to vector<414x128xf32>
    %16 = arith.addf %14, %15 : vector<414x128xf32>
    %c0_10 = arith.constant 0 : index
    %c0_11 = arith.constant 0 : index
    %17 = vector.load %arg5[%c0_10, %c0_11] : memref<1x128xf32, #tpu.memory_space<vmem>>, vector<1x128xf32>
    %18 = vector.broadcast %17 : vector<1x128xf32> to vector<414x128xf32>
    %19 = arith.addf %16, %18 : vector<414x128xf32>
    %cst_12 = arith.constant 0.000000e+00 : f32
    %20 = vector.broadcast %cst_12 : f32 to vector<414x128xf32>
    %21 = arith.maximumf %19, %20 : vector<414x128xf32>
    %22 = arith.truncf %21 : vector<414x128xf32> to vector<414x128xbf16>
    %c0_13 = arith.constant 0 : index
    %c0_14 = arith.constant 0 : index
    %23 = vector.load %arg6[%c0_13, %c0_14] : memref<128x240xbf16, #tpu.memory_space<vmem>>, vector<128x240xbf16>
    %cst_15 = arith.constant dense<0.000000e+00> : vector<414x240xf32>
    %24 = tpu.matmul %22, %23, %cst_15 {dimension_numbers = #tpu.dot_dimension_numbers<[1], [0], [0], [1], [0, 0, 1, 1], [], []>} : vector<414x128xbf16>, vector<128x240xbf16>, vector<414x240xf32> -> vector<414x240xf32>
    %c0_16 = arith.constant 0 : index
    %c0_17 = arith.constant 0 : index
    %25 = vector.load %arg7[%c0_16, %c0_17] : memref<414x240xf32, #tpu.memory_space<vmem>>, vector<414x240xf32>
    %26 = arith.mulf %24, %25 : vector<414x240xf32>
    %c0_18 = arith.constant 0 : index
    %c0_19 = arith.constant 0 : index
    %27 = vector.load %arg9[%c0_18, %c0_19] : memref<16x414xf32, #tpu.memory_space<vmem>>, vector<16x414xf32>
    %cst_20 = arith.constant dense<0.000000e+00> : vector<16x240xf32>
    %28 = tpu.matmul %27, %26, %cst_20 {dimension_numbers = #tpu.dot_dimension_numbers<[1], [0], [0], [1], [0, 0, 1, 1], [], []>} : vector<16x414xf32>, vector<414x240xf32>, vector<16x240xf32> -> vector<16x240xf32>
    %c0_21 = arith.constant 0 : index
    %c0_22 = arith.constant 0 : index
    %29 = vector.load %arg8[%c0_21, %c0_22] : memref<240x10xf32, #tpu.memory_space<vmem>>, vector<240x10xf32>
    %cst_23 = arith.constant dense<0.000000e+00> : vector<16x10xf32>
    %30 = tpu.matmul %28, %29, %cst_23 {dimension_numbers = #tpu.dot_dimension_numbers<[1], [0], [0], [1], [0, 0, 1, 1], [], []>} : vector<16x240xf32>, vector<240x10xf32>, vector<16x10xf32> -> vector<16x10xf32>
    %c0_24 = arith.constant 0 : index
    %c0_25 = arith.constant 0 : index
    %31 = vector.load %arg10[%c0_24, %c0_25] : memref<1x10xf32, #tpu.memory_space<vmem>>, vector<1x10xf32>
    %32 = vector.broadcast %31 : vector<1x10xf32> to vector<16x10xf32>
    %33 = arith.addf %30, %32 : vector<16x10xf32>
    %c0_26 = arith.constant 0 : index
    %c0_27 = arith.constant 0 : index
    %c0_28 = arith.constant 0 : index
    %34 = vector.load %arg11[%c0_26, %c0_27, %c0_28] : memref<1x16x10xf32, #tpu.memory_space<vmem>>, vector<1x16x10xf32>
    %35 = vector.shape_cast %34 : vector<1x16x10xf32> to vector<16x10xf32>
    %36 = vector.shape_cast %33 : vector<16x10xf32> to vector<1x16x10xf32>
    tpu.vector_store %arg11[%c0_26, %c0_27, %c0_28], %36 {strides = array<i32>} : memref<1x16x10xf32, #tpu.memory_space<vmem>>, vector<1x16x10xf32>,
    return
  }
  func.func @transform_0(%arg0: i32) -> (i32, i32, i32) {
    %c0_i32 = arith.constant 0 : i32
    %c0_i32_0 = arith.constant 0 : i32
    %c0_i32_1 = arith.constant 0 : i32
    return %arg0, %c0_i32, %c0_i32_0 : i32, i32, i32
  }
  func.func @transform_1(%arg0: i32) -> (i32, i32) {
    %c0_i32 = arith.constant 0 : i32
    %c0_i32_0 = arith.constant 0 : i32
    %c0_i32_1 = arith.constant 0 : i32
    return %c0_i32, %c0_i32_0 : i32, i32
  }
  func.func @transform_2(%arg0: i32) -> (i32, i32) {
    %c0_i32 = arith.constant 0 : i32
    %c0_i32_0 = arith.constant 0 : i32
    %c0_i32_1 = arith.constant 0 : i32
    return %c0_i32, %c0_i32_0 : i32, i32
  }
  func.func @transform_3(%arg0: i32) -> (i32, i32) {
    %c0_i32 = arith.constant 0 : i32
    %c0_i32_0 = arith.constant 0 : i32
    %c0_i32_1 = arith.constant 0 : i32
    return %c0_i32, %c0_i32_0 : i32, i32
  }
  func.func @transform_4(%arg0: i32) -> (i32, i32) {
    %c0_i32 = arith.constant 0 : i32
    %c0_i32_0 = arith.constant 0 : i32
    %c0_i32_1 = arith.constant 0 : i32
    return %c0_i32, %c0_i32_0 : i32, i32
  }
  func.func @transform_5(%arg0: i32) -> (i32, i32) {
    %c0_i32 = arith.constant 0 : i32
    %c0_i32_0 = arith.constant 0 : i32
    %c0_i32_1 = arith.constant 0 : i32
    return %c0_i32, %c0_i32_0 : i32, i32
  }
  func.func @transform_6(%arg0: i32) -> (i32, i32) {
    %c0_i32 = arith.constant 0 : i32
    %c0_i32_0 = arith.constant 0 : i32
    %c0_i32_1 = arith.constant 0 : i32
    return %c0_i32, %c0_i32_0 : i32, i32
  }
  func.func @transform_7(%arg0: i32) -> (i32, i32) {
    %c0_i32 = arith.constant 0 : i32
    %c0_i32_0 = arith.constant 0 : i32
    %c0_i32_1 = arith.constant 0 : i32
    return %c0_i32, %c0_i32_0 : i32, i32
  }
  func.func @transform_8(%arg0: i32) -> (i32, i32) {
    %c0_i32 = arith.constant 0 : i32
    %c0_i32_0 = arith.constant 0 : i32
    %c0_i32_1 = arith.constant 0 : i32
    return %c0_i32, %c0_i32_0 : i32, i32
  }
  func.func @transform_9(%arg0: i32) -> (i32, i32) {
    %c0_i32 = arith.constant 0 : i32
    %c0_i32_0 = arith.constant 0 : i32
    %c0_i32_1 = arith.constant 0 : i32
    return %c0_i32, %c0_i32_0 : i32, i32
  }
  func.func @transform_10(%arg0: i32) -> (i32, i32, i32) {
    %c0_i32 = arith.constant 0 : i32
    %c0_i32_0 = arith.constant 0 : i32
    %c0_i32_1 = arith.constant 0 : i32
    return %arg0, %c0_i32, %c0_i32_0 : i32, i32, i32
  }
}

</mosaic_0001>

<bundles_post_ra>
// kernel: cnn_forward.1
= control target key start
LH: loop header
LB: loop body
LE: loop exit
PB: predicated region body
PF: predicated region fallthrough
CT: control target
= control target key end

     0   :  { %s8410_s13 = smov 0   ;;  %s12108_s0 = inlined_call_operand.vmem [shape: bf16[2,416,84], index: 0, kind: input, shape index: {}]   ;;  %s12109_s1 = inlined_call_operand.vmem [shape: bf16[84,780], index: 1, kind: input, shape index: {}]   ;;  %s12110_s2 = inlined_call_operand.vmem [shape: f32[1,780], index: 2, kind: input, shape index: {}]   ;;  %s12111_s3 = inlined_call_operand.vmem [shape: bf16[780,384], index: 3, kind: input, shape index: {}]   ;;  %s12112_s4 = inlined_call_operand.vmem [shape: f32[1,128], index: 4, kind: input, shape index: {}]   ;;  %s12113_s5 = inlined_call_operand.vmem [shape: bf16[128,240], index: 5, kind: input, shape index: {}]   ;;  %s12114_s6 = inlined_call_operand.vmem [shape: f32[414,240], index: 6, kind: input, shape index: {}]   ;;  %s12115_s7 = inlined_call_operand.vmem [shape: f32[240,10], index: 7, kind: input, shape index: {}]   ;;  %s12116_s8 = inlined_call_operand.vmem [shape: f32[16,414], index: 8, kind: input, shape index: {}]   ;;  %s12117_s9 = inlined_call_operand.vmem [shape: f32[1,10], index: 9, kind: input, shape index: {}]   ;;  %s12118_s10 = inlined_call_operand.vmem [shape: f32[2,16,10], index: 10, kind: output, shape index: {}]  }
   0x1 LB: > { %s7396_s14 = sadd.s32 4294967295, %s8351_s13   ;;  %p7400_p0 = scmp.ge.s32.totalorder %s8351_s13, 1  ;;  %s8351_s13 = sphi %s8410_s13, %s20_s13  }
   0x2   : > { %p312_p1 = scmp.lt.s32.totalorder %s8351_s13, 3 }
   0x4   : > { %p313_p2 = pnand %p7400_p0, %p312_p1 }
   0x6   : > { %316 = sbr.rel (%p313_p2) target bundleno = 2065 (0x811), region = 60 }
   0xb   : > { %v453_v0 = vld [vmem:[%s12109_s1 + $0x118] sm:$0x33]  ;;  %vm901_vm0 = vcmask 1041408   ;;  %v8010_v3 = vld [vmem:[%s12109_s1 + $0xe4] ss:$28 sps:$4 sm:$0xff]   ;;  %v12119_v4 = vmov 0  }
   0xc   : > { %v7466_v1 = vcombine.high %v453_v0, %v453_v0  ;;  %v7465_v2 = vcombine.low %v453_v0, %v453_v0  ;;  %955 = vmatprep.mubr.bf16.mxu0 %v12119_v4  ;;  %1155 = vmatprep.mubr.bf16.mxu1 %v12119_v4  ;;  %p350_p3 = scmp.lt.s32.totalorder %s7396_s14, 1  ;;  %v8012_v6 = vld [vmem:[%s12109_s1 + $0xe0] ss:$28 sps:$4 sm:$0xff]   ;;  %v8013_v7 = vld [vmem:[%s12109_s1 + $0xac] ss:$28 sps:$4 sm:$0xff]   ;;  %vm822_vm1 = vcmask 687104  }
   0xd   : > { %v8015_v8 = vld [vmem:[%s12109_s1 + $0xa8] ss:$28 sps:$4 sm:$0xff]   ;;  %v8016_v9 = vld [vmem:[%s12109_s1 + $0x74] ss:$28 sps:$4 sm:$0xff]   ;;  %v8019_v11 = vld [vmem:[%s12109_s1 + $0x3c] ss:$28 sps:$4 sm:$0xff]  }
   0xe   : > { %7472 = vmatprep.subr.msk.bf16.mxu0 %vm901_vm0, %v7466_v1  ;;  %7983 = vmatprep.subr.msk.bf16.mxu1 %vm901_vm0, %v7466_v1  ;;  %v903_v5 = vsel %vm901_vm0, %v7465_v2, 0  ;;  %s12987_s14 = smov (!%p350_p3, %s7396_s14), 1  ;;  %v8018_v10 = vld [vmem:[%s12109_s1 + $0x70] ss:$28 sps:$4 sm:$0xff]   ;;  %v8021_v12 = vld [vmem:[%s12109_s1 + $0x38] ss:$28 sps:$4 sm:$0xff]  }
   0xf   : > { %928 = vmatpush1.bf16.msra.mxu0 %v903_v5  ;;  %7989 = vmatpush1.bf16.msra.mxu1 %v903_v5  ;;  %s7997_s23 = smul.u32 208, %s12987_s14  ;;  %v8022_v13 = vld [vmem:[%s12109_s1 + $0x4] ss:$28 sps:$4 sm:$0xff]   ;;  %v8037_v21 = vld [vmem:[%s12109_s1 + $0xec] ss:$28 sps:$4 sm:$0xff]   ;;  %vm3645_vm2 = vcmask 1045504  }
  0x10   : > { %929 = vmatprep.subr.bf16.mxu0 %v8010_v3  ;;  %7984 = vmatprep.subr.bf16.mxu1 %v8010_v3  ;;  %v454_v14 = vld [vmem:[%s12109_s1 + $0x120] sm:$0x33]  ;;  %v8042_v24 = vld [vmem:[%s12109_s1 + $0xb4] ss:$28 sps:$4 sm:$0xff]   ;;  %v455_v25 = vld [vmem:[%s12109_s1 + $0x128] sm:$0x33] }
  0x11   : > { %s8441_s26 = scalar_lea.vmem %s12108_s0, %s7997_s23  ;;  %v8024_v15 = vld [vmem:[%s12109_s1] ss:$28 sps:$4 sm:$0xff]   ;;  %v7468_v16 = vcombine.high %v454_v14, %v454_v14  ;;  %v7467_v17 = vcombine.low %v454_v14, %v454_v14  ;;  %v8035_v22 = vld [vmem:[%s12109_s1 + $0xe8] ss:$28 sps:$4 sm:$0xff]   ;;  %v7470_v27 = vcombine.high %v455_v25, %v455_v25  ;;  %v7469_v28 = vcombine.low %v455_v25, %v455_v25  ;;  %v8040_v29 = vld [vmem:[%s12109_s1 + $0xb0] ss:$28 sps:$4 sm:$0xff]  }
  0x12   : > { %v8468_v18 = vld [vmem:[%s8441_s26] sm:$0xff]   ;;  %v8485_v23 = vld [vmem:[%s8441_s26 + $0x8] sm:$0xff]   ;;  %v8045_v31 = vld [vmem:[%s12109_s1 + $0x7c] ss:$28 sps:$4 sm:$0xff]   ;;  %vm3566_vm3 = vcmask 97280   ;;  %vm5843_vm4 = vcmask 1046528  }
  0x13   : > { %930 = vmatpush1.bf16.msra.mxu0 %v8012_v6  ;;  %7990 = vmatpush1.bf16.msra.mxu1 %v8012_v6  ;;  %v8026_v19 = vld [vmem:[%s8441_s26 + $0xa0] sm:$0xff]   ;;  %v909_v20 = vsel %vm901_vm0, %v7467_v17, 0  ;;  %v8028_v26 = vld [vmem:[%s8441_s26 + $0xa8] sm:$0xff]   ;;  %v915_v30 = vsel %vm901_vm0, %v7469_v28, 0  ;;  %v8066_v33 = vld [vmem:[%s12109_s1 + $0xf4] ss:$28 sps:$4 sm:$0xff]  }
  0x14   : > { %931 = vmatprep.subr.bf16.mxu0 %v8013_v7  ;;  %7985 = vmatprep.subr.bf16.mxu1 %v8013_v7  ;;  %v8064_v32 = vld [vmem:[%s12109_s1 + $0xf0] ss:$28 sps:$4 sm:$0xff]   ;;  %v8043_v35 = vld [vmem:[%s12109_s1 + $0x78] ss:$28 sps:$4 sm:$0xff]   ;;  %v8050_v36 = vld [vmem:[%s12109_s1 + $0x44] ss:$28 sps:$4 sm:$0xff]  }
  0x15   : > { %v8514_v34 = vld [vmem:[%s8441_s26 + $0x10] sm:$0xff]   ;;  %v8048_v38 = vld [vmem:[%s12109_s1 + $0x40] ss:$28 sps:$4 sm:$0xff]   ;;  %v8053_v41 = vld [vmem:[%s12109_s1 + $0xc] ss:$28 sps:$4 sm:$0xff]   ;;  %vm7052_vm5 = vcmask 244736  }
  0x16   : > { %v8030_v37 = vld [vmem:[%s8441_s26 + $0xb0] sm:$0xff]   ;;  %v8073_v39 = vld [vmem:[%s12109_s1 + $0xbc] ss:$28 sps:$4 sm:$0xff]   ;;  %v8051_v42 = vld [vmem:[%s12109_s1 + $0x8] ss:$28 sps:$4 sm:$0xff]   ;;  %vm7256_vm6 = vcmask 916480  }
  0x17   : > { %932 = vmatpush1.bf16.msra.mxu0 %v8015_v8  ;;  %7991 = vmatpush1.bf16.msra.mxu1 %v8015_v8  ;;  %v8071_v40 = vld [vmem:[%s12109_s1 + $0xb8] ss:$28 sps:$4 sm:$0xff]   ;;  %v8078_v43 = vld [vmem:[%s12109_s1 + $0x84] ss:$28 sps:$4 sm:$0xff]   ;;  %v8082_v48 = vld [vmem:[%s12109_s1 + $0x4c] ss:$28 sps:$4 sm:$0xff]  }
  0x18   : > { %933 = vmatprep.subr.bf16.mxu0 %v8016_v9  ;;  %7986 = vmatprep.subr.bf16.mxu1 %v8016_v9  ;;  %v8070_v44 = vld [vmem:[%s12109_s1 + $0x130] ss:$0 sps:$4 sm:$0x33]   ;;  %v8076_v45 = vld [vmem:[%s12109_s1 + $0x80] ss:$28 sps:$4 sm:$0xff]   ;;  %v8584_v54 = vld [vmem:[%s8441_s26 + $0x28] sm:$0xff]  }
  0x19   : > { %v8553_v46 = vld [vmem:[%s8441_s26 + $0x18] sm:$0xff]   ;;  %v8080_v49 = vld [vmem:[%s12109_s1 + $0x48] ss:$28 sps:$4 sm:$0xff]   ;;  %v8085_v50 = vld [vmem:[%s12109_s1 + $0x14] ss:$28 sps:$4 sm:$0xff]   ;;  %v921_v58 = vsel %vm901_vm0, %v8070_v44, 0 }
  0x1a   : > { %v8032_v47 = vld [vmem:[%s8441_s26 + $0xb8] sm:$0xff]   ;;  %v8083_v51 = vld [vmem:[%s12109_s1 + $0x10] ss:$28 sps:$4 sm:$0xff]   ;;  %v8575_v52 = vld [vmem:[%s8441_s26 + $0x20] sm:$0xff]   ;;  %s7805_s24 = sshll.u32 %s12987_s14, 4  ;;  %vm7338_vm7 = vcmask 80896  }
  0x1b   : > { %934 = vmatpush1.bf16.msra.mxu0 %v8018_v10  ;;  %7992 = vmatpush1.bf16.msra.mxu1 %v8018_v10  ;;  %v8039_v53 = vld [vmem:[%s8441_s26 + $0xc0] sm:$0xff]   ;;  %v8047_v55 = vld [vmem:[%s8441_s26 + $0xc8] sm:$0xff]   ;;  %v8593_v56 = vld [vmem:[%s8441_s26 + $0x30] sm:$0xff]   ;;  %s359_s30 = scalar_lea.vmem %s12118_s10, %s7805_s24 }
  0x1c   : > { %935 = vmatprep.subr.bf16.mxu0 %v8019_v11  ;;  %7987 = vmatprep.subr.bf16.mxu1 %v8019_v11  ;;  %v8086_v57 = vld [vmem:[%s12109_s1 + $0xf8] ss:$28 sps:$4 sm:$0xff]   ;;  %v8615_v60 = vld [vmem:[%s8441_s26 + $0x40] sm:$0xff]   ;;  %v8624_v61 = vld [vmem:[%s8441_s26 + $0x48] sm:$0xff]  }
  0x1d   : > { %v8606_v59 = vld [vmem:[%s8441_s26 + $0x38] sm:$0xff]   ;;  %v8633_v62 = vld [vmem:[%s8441_s26 + $0x50] sm:$0xff]   ;;  %v8654_v1 = vld [vmem:[%s8441_s26 + $0x60] sm:$0xff]  }
  0x1e   : > { %v8087_v63 = vld [vmem:[%s12109_s1 + $0xc0] ss:$28 sps:$4 sm:$0xff]   ;;  %v8663_v2 = vld [vmem:[%s8441_s26 + $0x68] sm:$0xff]   ;;  %v8672_v3 = vld [vmem:[%s8441_s26 + $0x70] sm:$0xff]  }
  0x1f   : > { %936 = vmatpush1.bf16.msra.mxu0 %v8021_v12  ;;  %7993 = vmatpush1.bf16.msra.mxu1 %v8021_v12  ;;  %v8645_v0 = vld [vmem:[%s8441_s26 + $0x58] sm:$0xff]   ;;  %v8088_v5 = vld [vmem:[%s12109_s1 + $0x88] ss:$28 sps:$4 sm:$0xff]   ;;  %v8092_v8 = vld [vmem:[%s12109_s1 + $0x50] ss:$28 sps:$4 sm:$0xff]  }
  0x20   : > { %937 = vmatprep.subr.bf16.mxu0 %v8022_v13  ;;  %7988 = vmatprep.subr.bf16.mxu1 %v8022_v13  ;;  %v8091_v6 = vld [vmem:[%s12111_s3 + $0x22c] ss:$12 sps:$4 sm:$0xff]   ;;  %v8069_v10 = vld [vmem:[%s8441_s26 + $0x80] sm:$0xff]   ;;  %v8075_v12 = vld [vmem:[%s8441_s26 + $0x90] sm:$0xff]  }
  0x21   : > { %v8687_v7 = vld [vmem:[%s8441_s26 + $0x78] sm:$0xff]   ;;  %v8074_v11 = vld [vmem:[%s8441_s26 + $0x88] sm:$0xff]  }
  0x22   : > { %v8093_v9 = vld [vmem:[%s12109_s1 + $0x18] ss:$28 sps:$4 sm:$0xff]   ;;  %v8099_v17 = vld [vmem:[%s12111_s3 + $0x1fc] ss:$12 sps:$4 sm:$0xff]  }
  0x23   : > { %938 = vmatpush1.bf16.msra.mxu0 %v8024_v15  ;;  %7994 = vmatpush1.bf16.msra.mxu1 %v8024_v15  ;;  %v8720_v13 = vld [vmem:[%s8441_s26 + $0x98] sm:$0xff]   ;;  %v8089_v14 = vld [vmem:[%s12111_s3 + $0x228] ss:$12 sps:$4 sm:$0xff]  }
  0x24   : > { %7499 = vmatprep.subr.msk.bf16.mxu1 %vm901_vm0, %v7468_v16  ;;  %7526 = vmatprep.subr.msk.bf16.mxu0 %vm901_vm0, %v7470_v27  ;;  %v8096_v15 = vld [vmem:[%s12111_s3 + $0x214] ss:$12 sps:$4 sm:$0xff]   ;;  %v8094_v16 = vld [vmem:[%s12111_s3 + $0x210] ss:$12 sps:$4 sm:$0xff]  }
  0x25   : > { %v8115_v25 = vld [vmem:[%s12111_s3 + $0x1b0] ss:$12 sps:$4 sm:$0xff]  }
  0x26   : > { %7473 = vmatmul.mubr.msk.bf16.vlgmr.msra.gmra.mxu0 %vm822_vm1, %v8468_v18  ;;  %7493 = vmatmul.mubr.msk.bf16.vlgmr.msra.gmra.mxu1 %vm822_vm1, %v8026_v19  ;;  %v8097_v19 = vld [vmem:[%s12111_s3 + $0x1f8] ss:$12 sps:$4 sm:$0xff]  }
  0x27   : > { %965 = vmatprep.mubr.bf16.mxu0 %v12119_v4  ;;  %1165 = vmatprep.mubr.bf16.mxu1 %v12119_v4 }
  0x28   : > { %1221 = vmatpush1.bf16.msra.mxu1 %v909_v20  ;;  %1514 = vmatpush1.bf16.msra.mxu0 %v915_v30  ;;  %v8108_v20 = vld [vmem:[%s12111_s3 + $0xac] ss:$12 sps:$4 sm:$0xff]  }
  0x29   : > { %1222 = vmatprep.subr.bf16.mxu1 %v8037_v21  ;;  %1515 = vmatprep.subr.bf16.mxu0 %v8066_v33  ;;  %v8100_v21 = vld [vmem:[%s12111_s3 + $0x1e0] ss:$12 sps:$4 sm:$0xff]  }
  0x2c   : > { %1223 = vmatpush1.bf16.msra.mxu1 %v8035_v22  ;;  %1516 = vmatpush1.bf16.msra.mxu0 %v8064_v32  ;;  %v8105_v22 = vld [vmem:[%s12111_s3 + $0x1cc] ss:$12 sps:$4 sm:$0xff]  }
  0x2d   : > { %1224 = vmatprep.subr.bf16.mxu1 %v8042_v24  ;;  %1517 = vmatprep.subr.bf16.mxu0 %v8073_v39  ;;  %v459_v24 = vlaneseq }
  0x2e   : > { %7474 = vmatmul.mubr.msk.bf16.gmra.mxu0 %vm822_vm1, %v8485_v23  ;;  %7494 = vmatmul.mubr.msk.bf16.gmra.mxu1 %vm822_vm1, %v8028_v26  ;;  %v8117_v26 = vld [vmem:[%s12111_s3 + $0x1b4] ss:$12 sps:$4 sm:$0xff]  }
  0x2f   : > { %975 = vmatprep.mubr.bf16.mxu0 %v12119_v4  ;;  %1175 = vmatprep.mubr.bf16.mxu1 %v12119_v4  ;;  %v8781_v27 = vshrl.u32 %v459_v24, 7 }
  0x30   : > { %1225 = vmatpush1.bf16.msra.mxu1 %v8040_v29  ;;  %1518 = vmatpush1.bf16.msra.mxu0 %v8071_v40  ;;  %v8792_v29 = vld [vmem:[%s12110_s2] sm:$0x7f] }
  0x31   : > { %1226 = vmatprep.subr.bf16.mxu1 %v8045_v31  ;;  %1519 = vmatprep.subr.bf16.mxu0 %v8078_v43  ;;  %v461_v28 = vsub.s32 0, %v8781_v27  ;;  %v465_v30 = vsub.s32 1, %v8781_v27 }
  0x33   : > { %v8796_v31 = vrot.slane %v8792_v29, %v461_v28 }
  0x34   : > { %1227 = vmatpush1.bf16.msra.mxu1 %v8043_v35  ;;  %1520 = vmatpush1.bf16.msra.mxu0 %v8076_v45 }
  0x35   : > { %1228 = vmatprep.subr.bf16.mxu1 %v8050_v36  ;;  %1521 = vmatprep.subr.bf16.mxu0 %v8082_v48  ;;  %v8127_v36 = vld [vmem:[%s12111_s3 + $0x198] ss:$12 sps:$4 sm:$0xff]  }
  0x36   : > { %7475 = vmatmul.mubr.msk.bf16.gmra.mxu0 %vm822_vm1, %v8514_v34  ;;  %7495 = vmatmul.mubr.msk.bf16.gmra.mxu1 %vm822_vm1, %v8030_v37  ;;  %v8129_v37 = vld [vmem:[%s12111_s3 + $0x19c] ss:$12 sps:$4 sm:$0xff]  }
  0x37   : > { %985 = vmatprep.mubr.bf16.mxu0 %v12119_v4  ;;  %1185 = vmatprep.mubr.bf16.mxu1 %v12119_v4 }
  0x38   : > { %1229 = vmatpush1.bf16.msra.mxu1 %v8048_v38  ;;  %1522 = vmatpush1.bf16.msra.mxu0 %v8080_v49 }
  0x39   : > { %1230 = vmatprep.subr.bf16.mxu1 %v8053_v41  ;;  %1523 = vmatprep.subr.bf16.mxu0 %v8085_v50 }
  0x3c   : > { %1231 = vmatpush1.bf16.msra.mxu1 %v8051_v42  ;;  %1524 = vmatpush1.bf16.msra.mxu0 %v8083_v51 }
  0x3d   : > { %7995 = vmatprep.subr.msk.bf16.mxu1 %vm901_vm0, %v8070_v44  ;;  %3948 = vmatprep.subr.bf16.mxu0 %v8091_v6 }
  0x3e   : > { %7476 = vmatmul.mubr.msk.bf16.gmra.mxu0 %vm822_vm1, %v8553_v46  ;;  %7496 = vmatmul.mubr.msk.bf16.gmra.mxu1 %vm822_vm1, %v8032_v47 }
  0x3f   : > { %995 = vmatprep.mubr.bf16.mxu0 %v12119_v4  ;;  %1195 = vmatprep.mubr.bf16.mxu1 %v12119_v4 }
  0x46   : > { %7477 = vmatmul.mubr.msk.bf16.gmra.mxu0 %vm822_vm1, %v8575_v52  ;;  %7497 = vmatmul.mubr.msk.bf16.gmra.mxu1 %vm822_vm1, %v8039_v53 }
  0x47   : > { %1005 = vmatprep.mubr.bf16.mxu0 %v12119_v4  ;;  %1205 = vmatprep.mubr.bf16.mxu1 %v12119_v4 }
  0x4e   : > { %7478 = vmatmul.mubr.msk.bf16.gmra.mxu0 %vm822_vm1, %v8584_v54  ;;  %7498 = vmatmul.mubr.msk.bf16.gmra.mxu1 %vm822_vm1, %v8047_v55 }
  0x4f   : > { %1015 = vmatprep.mubr.bf16.mxu0 %v12119_v4  ;;  %1248 = vmatprep.mubr.bf16.mxu1 %v12119_v4 }
  0x56   : > { %7479 = vmatmul.mubr.msk.bf16.gmra.mxu0 %vm822_vm1, %v8593_v56  ;;  %7500 = vmatmul.mubr.msk.bf16.vlgmr.msra.gmra.mxu1 %vm822_vm1, %v8468_v18 }
  0x57   : > { %1025 = vmatprep.mubr.bf16.mxu0 %v12119_v4  ;;  %1258 = vmatprep.mubr.bf16.mxu1 %v12119_v4 }
  0x58   : > { %7866 = vmatpush3.bf16.msra.mxu1 %v921_v58 }
  0x59   : > { %7867 = vmatprep.subr.bf16.mxu1 %v8086_v57 }
  0x5c   : > { %7868 = vmatpush3.bf16.msra.mxu1 %v8086_v57 }
  0x5d   : > { %7869 = vmatprep.subr.bf16.mxu1 %v8087_v63 }
  0x5e   : > { %7480 = vmatmul.mubr.msk.bf16.gmra.mxu0 %vm822_vm1, %v8606_v59  ;;  %7501 = vmatmul.mubr.msk.bf16.gmra.mxu1 %vm822_vm1, %v8485_v23 }
  0x5f   : > { %1035 = vmatprep.mubr.bf16.mxu0 %v12119_v4  ;;  %1268 = vmatprep.mubr.bf16.mxu1 %v12119_v4 }
  0x60   : > { %7870 = vmatpush3.bf16.msra.mxu1 %v8087_v63 }
  0x61   : > { %7871 = vmatprep.subr.bf16.mxu1 %v8088_v5 }
  0x64   : > { %7872 = vmatpush3.bf16.msra.mxu1 %v8088_v5 }
  0x65   : > { %7873 = vmatprep.subr.bf16.mxu1 %v8092_v8 }
  0x66   : > { %7481 = vmatmul.mubr.msk.bf16.gmra.mxu0 %vm822_vm1, %v8615_v60  ;;  %7502 = vmatmul.mubr.msk.bf16.gmra.mxu1 %vm822_vm1, %v8514_v34 }
  0x67   : > { %1045 = vmatprep.mubr.bf16.mxu0 %v12119_v4  ;;  %1278 = vmatprep.mubr.bf16.mxu1 %v12119_v4 }
  0x68   : > { %7874 = vmatpush3.bf16.msra.mxu1 %v8092_v8 }
  0x69   : > { %7875 = vmatprep.subr.bf16.mxu1 %v8093_v9 }
  0x6c   : > { %7876 = vmatpush3.bf16.msra.mxu1 %v8093_v9 }
  0x6d   : > { %3655 = vmatprep.subr.bf16.mxu1 %v8108_v20 }
  0x6e   : > { %7482 = vmatmul.mubr.msk.bf16.gmra.mxu0 %vm822_vm1, %v8624_v61  ;;  %7503 = vmatmul.mubr.msk.bf16.gmra.mxu1 %vm822_vm1, %v8553_v46 }
  0x6f   : > { %1055 = vmatprep.mubr.bf16.mxu0 %v12119_v4  ;;  %1288 = vmatprep.mubr.bf16.mxu1 %v12119_v4 }
  0x76   : > { %7483 = vmatmul.mubr.msk.bf16.gmra.mxu0 %vm822_vm1, %v8633_v62  ;;  %7504 = vmatmul.mubr.msk.bf16.gmra.mxu1 %vm822_vm1, %v8575_v52 }
  0x77   : > { %1065 = vmatprep.mubr.bf16.mxu0 %v12119_v4  ;;  %1298 = vmatprep.mubr.bf16.mxu1 %v12119_v4 }
  0x7e   : > { %7484 = vmatmul.mubr.msk.bf16.gmra.mxu0 %vm822_vm1, %v8645_v0  ;;  %7505 = vmatmul.mubr.msk.bf16.gmra.mxu1 %vm822_vm1, %v8584_v54 }
  0x7f   : > { %1075 = vmatprep.mubr.bf16.mxu0 %v12119_v4  ;;  %1308 = vmatprep.mubr.bf16.mxu1 %v12119_v4 }
  0x86   : > { %7485 = vmatmul.mubr.msk.bf16.gmra.mxu0 %vm822_vm1, %v8654_v1  ;;  %7506 = vmatmul.mubr.msk.bf16.gmra.mxu1 %vm822_vm1, %v8593_v56 }
  0x87   : > { %1085 = vmatprep.mubr.bf16.mxu0 %v12119_v4  ;;  %1318 = vmatprep.mubr.bf16.mxu1 %v12119_v4 }
  0x8e   : > { %7486 = vmatmul.mubr.msk.bf16.gmra.mxu0 %vm822_vm1, %v8663_v2  ;;  %7507 = vmatmul.mubr.msk.bf16.gmra.mxu1 %vm822_vm1, %v8606_v59 }
  0x8f   : > { %1095 = vmatprep.mubr.bf16.mxu0 %v12119_v4  ;;  %1328 = vmatprep.mubr.bf16.mxu1 %v12119_v4 }
  0x96   : > { %7487 = vmatmul.mubr.msk.bf16.gmra.mxu0 %vm822_vm1, %v8672_v3  ;;  %7508 = vmatmul.mubr.msk.bf16.gmra.mxu1 %vm822_vm1, %v8615_v60 }
  0x97   : > { %1105 = vmatprep.mubr.bf16.mxu0 %v12119_v4  ;;  %1338 = vmatprep.mubr.bf16.mxu1 %v12119_v4 }
  0x9e   : > { %7488 = vmatmul.mubr.msk.bf16.gmra.mxu0 %vm822_vm1, %v8687_v7  ;;  %7509 = vmatmul.mubr.msk.bf16.gmra.mxu1 %vm822_vm1, %v8624_v61 }
  0x9f   : > { %1115 = vmatprep.mubr.bf16.mxu0 %v12119_v4  ;;  %1348 = vmatprep.mubr.bf16.mxu1 %v12119_v4 }
  0xa6   : > { %7489 = vmatmul.mubr.msk.bf16.gmra.mxu0 %vm822_vm1, %v8069_v10  ;;  %7510 = vmatmul.mubr.msk.bf16.gmra.mxu1 %vm822_vm1, %v8633_v62 }
  0xa7   : > { %1125 = vmatprep.mubr.bf16.mxu0 %v12119_v4  ;;  %1358 = vmatprep.mubr.bf16.mxu1 %v12119_v4 }
  0xae   : > { %7490 = vmatmul.mubr.msk.bf16.gmra.mxu0 %vm822_vm1, %v8074_v11  ;;  %7511 = vmatmul.mubr.msk.bf16.gmra.mxu1 %vm822_vm1, %v8645_v0 }
  0xaf   : > { %1135 = vmatprep.mubr.bf16.mxu0 %v12119_v4  ;;  %1368 = vmatprep.mubr.bf16.mxu1 %v12119_v4 }
  0xb6   : > { %7491 = vmatmul.mubr.msk.bf16.gmra.mxu0 %vm822_vm1, %v8075_v12  ;;  %7512 = vmatmul.mubr.msk.bf16.gmra.mxu1 %vm822_vm1, %v8654_v1 }
  0xb7   : > { %1145 = vmatprep.mubr.bf16.mxu0 %v12119_v4  ;;  %1378 = vmatprep.mubr.bf16.mxu1 %v12119_v4 }
  0xbe   : > { %7492 = vmatmul.mubr.msk.bf16.gmra.mxu0 %vm822_vm1, %v8720_v13  ;;  %7513 = vmatmul.mubr.msk.bf16.gmra.mxu1 %vm822_vm1, %v8663_v2 }
  0xbf   : > { %1388 = vmatprep.mubr.bf16.mxu1 %v12119_v4  ;;  %1541 = vmatprep.mubr.bf16.mxu0 %v12119_v4 }
  0xc6   : > { %7514 = vmatmul.mubr.msk.bf16.gmra.mxu1 %vm822_vm1, %v8672_v3  ;;  %7527 = vmatmul.mubr.msk.bf16.vlgmr.msra.gmra.mxu0 %vm822_vm1, %v8468_v18  ;;  %v8102_v18 = vld [vmem:[%s12111_s3 + $0x1e4] ss:$12 sps:$4 sm:$0xff]  }
  0xc7   : > { %1398 = vmatprep.mubr.bf16.mxu1 %v12119_v4  ;;  %1551 = vmatprep.mubr.bf16.mxu0 %v12119_v4 }
  0xc8   : > { %3949 = vmatpush1.bf16.msra.mxu0 %v8089_v14 }
  0xc9   : > { %3950 = vmatprep.subr.bf16.mxu0 %v8096_v15 }
  0xcc   : > { %3951 = vmatpush1.bf16.msra.mxu0 %v8094_v16 }
  0xcd   : > { %3952 = vmatprep.subr.bf16.mxu0 %v8099_v17 }
  0xce   : > { %7515 = vmatmul.mubr.msk.bf16.gmra.mxu1 %vm822_vm1, %v8687_v7  ;;  %7528 = vmatmul.mubr.msk.bf16.gmra.mxu0 %vm822_vm1, %v8485_v23  ;;  %v8103_v23 = vld [vmem:[%s12111_s3 + $0x1c8] ss:$12 sps:$4 sm:$0xff]  }
  0xcf   : > { %1408 = vmatprep.mubr.bf16.mxu1 %v12119_v4  ;;  %1561 = vmatprep.mubr.bf16.mxu0 %v12119_v4 }
  0xd0   : > { %3953 = vmatpush1.bf16.msra.mxu0 %v8097_v19 }
  0xd1   : > { %3954 = vmatprep.subr.bf16.mxu0 %v8102_v18 }
  0xd4   : > { %3955 = vmatpush1.bf16.msra.mxu0 %v8100_v21  ;;  %v8139_v21 = vld [vmem:[%s12111_s3 + $0x180] ss:$12 sps:$4 sm:$0xff]  }
  0xd5   : > { %3956 = vmatprep.subr.bf16.mxu0 %v8105_v22 }
  0xd6   : > { %7516 = vmatmul.mubr.msk.bf16.gmra.mxu1 %vm822_vm1, %v8069_v10  ;;  %7529 = vmatmul.mubr.msk.bf16.gmra.mxu0 %vm822_vm1, %v8514_v34  ;;  %v8802_v34 = vrot.slane %v8792_v29, %v465_v30 }
  0xd7   : > { %1418 = vmatprep.mubr.bf16.mxu1 %v12119_v4  ;;  %1571 = vmatprep.mubr.bf16.mxu0 %v12119_v4 }
  0xd8   : > { %3957 = vmatpush1.bf16.msra.mxu0 %v8103_v23 }
  0xd9   : > { %3958 = vmatprep.subr.bf16.mxu0 %v8117_v26 }
  0xdc   : > { %3959 = vmatpush1.bf16.msra.mxu0 %v8115_v25 }
  0xdd   : > { %3960 = vmatprep.subr.bf16.mxu0 %v8129_v37 }
  0xde   : > { %7517 = vmatmul.mubr.msk.bf16.gmra.mxu1 %vm822_vm1, %v8074_v11  ;;  %7530 = vmatmul.mubr.msk.bf16.gmra.mxu0 %vm822_vm1, %v8553_v46 }
  0xdf   : > { %1428 = vmatprep.mubr.bf16.mxu1 %v12119_v4  ;;  %1581 = vmatprep.mubr.bf16.mxu0 %v12119_v4 }
  0xe0   : > { %3961 = vmatpush1.bf16.msra.mxu0 %v8127_v36  ;;  %v8150_v36 = vld [vmem:[%s12111_s3 + $0x2ec] ss:$12 sps:$4 sm:$0xff]  }
  0xe6   : > { %v957_v32 = vpop.f32.mrf.mxu0  ;;  %v1157_v33 = vpop.f32.mrf.mxu1  ;;  %7518 = vmatmul.mubr.msk.bf16.gmra.mxu1 %vm822_vm1, %v8075_v12  ;;  %7531 = vmatmul.mubr.msk.bf16.gmra.mxu0 %vm822_vm1, %v8575_v52 }
  0xe7   : > { %v1158_v35 = vadd.f32 %v1157_v33, %v8796_v31  ;;  %1438 = vmatprep.mubr.bf16.mxu1 %v12119_v4  ;;  %1591 = vmatprep.mubr.bf16.mxu0 %v12119_v4  ;;  %v958_v38 = vadd.f32 %v957_v32, %v8796_v31 }
  0xe8   : > { %v959_v39 = vpop.f32.mrf.mxu0  ;;  %v1159_v40 = vpop.f32.mrf.mxu1 }
  0xe9   : > { %v960_v41 = vadd.f32 %v959_v39, %v8802_v34  ;;  %v1160_v42 = vadd.f32 %v1159_v40, %v8802_v34  ;;  %v2323_v45 = vmax.f32 %v1158_v35, 0.0  ;;  %v2043_v48 = vmax.f32 %v958_v38, 0.0 }
  0xea   : > { %v961_v43 = vpop.f32.mrf.mxu0  ;;  %v1161_v44 = vpop.f32.mrf.mxu1 }
  0xeb   : > { %v962_v46 = vadd.f32 %v961_v43, %v8796_v31  ;;  %v1162_v47 = vadd.f32 %v1161_v44, %v8796_v31  ;;  %v2044_v57 = vmax.f32 %v960_v41, 0.0  ;;  %v2324_v58 = vmax.f32 %v1160_v42, 0.0  ;;  %v8311_v41 = vld [vmem:[%s8441_s26 + $0xa0] sm:$0xff]   ;;  %v8148_v42 = vld [vmem:[%s12111_s3 + $0x2e8] ss:$12 sps:$4 sm:$0xff]  }
  0xec   : > { %v963_v49 = vpop.f32.mrf.mxu0  ;;  %v1163_v50 = vpop.f32.mrf.mxu1 }
  0xed   : > { %v2050_v51 = vmax.f32 %v962_v46, 0.0  ;;  %v2330_v52 = vmax.f32 %v1162_v47, 0.0  ;;  %v964_v53 = vadd.f32 %v963_v49, %v8802_v34  ;;  %v1164_v55 = vadd.f32 %v1163_v50, %v8802_v34  ;;  %v8156_v50 = vld [vmem:[%s12111_s3 + $0x2d4] ss:$12 sps:$4 sm:$0xff]  }
  0xee   : > { %v967_v63 = vpop.f32.mrf.mxu0  ;;  %v1167_v5 = vpop.f32.mrf.mxu1  ;;  %7519 = vmatmul.mubr.msk.bf16.gmra.mxu1 %vm822_vm1, %v8720_v13  ;;  %7532 = vmatmul.mubr.msk.bf16.gmra.mxu0 %vm822_vm1, %v8584_v54  ;;  %v8141_v54 = vld [vmem:[%s12111_s3 + $0x184] ss:$12 sps:$4 sm:$0xff]  }
  0xef   : > { %v8824_v6 = vpack.c.bf16 %v2050_v51, %v2043_v48  ;;  %v8826_v8 = vpack.c.bf16 %v2330_v52, %v2323_v45  ;;  %v2051_v9 = vmax.f32 %v964_v53, 0.0  ;;  %v2331_v10 = vmax.f32 %v1164_v55, 0.0  ;;  %1448 = vmatprep.mubr.bf16.mxu1 %v12119_v4  ;;  %1601 = vmatprep.mubr.bf16.mxu0 %v12119_v4 }
  0xf0   : > { %v968_v11 = vadd.f32 %v967_v63, %v8796_v31  ;;  %v1168_v12 = vadd.f32 %v1167_v5, %v8796_v31  ;;  %v969_v14 = vpop.f32.mrf.mxu0  ;;  %v1169_v15 = vpop.f32.mrf.mxu1  ;;  %3962 = vmatprep.subr.bf16.mxu0 %v8141_v54  ;;  %v8154_v63 = vld [vmem:[%s12111_s3 + $0x2d0] ss:$12 sps:$4 sm:$0xff]  }
  0xf1   : > { %12301 = vst [vmem:[#allocation2_spill] sm:$0xff] %v8824_v6  ;;  %12302 = vst [vmem:[#allocation3_spill] sm:$0xff] %v8826_v8  ;;  %v8835_v13 = vpack.c.bf16 %v2051_v9, %v2044_v57  ;;  %v8837_v16 = vpack.c.bf16 %v2331_v10, %v2324_v58  ;;  %v970_v17 = vadd.f32 %v969_v14, %v8802_v34  ;;  %3963 = vmatpush1.bf16.msra.mxu0 %v8139_v21 }
  0xf2   : > { %v1170_v19 = vadd.f32 %v1169_v15, %v8802_v34  ;;  %v971_v18 = vpop.f32.mrf.mxu0  ;;  %v1171_v20 = vpop.f32.mrf.mxu1  ;;  %v2337_v22 = vmax.f32 %v1168_v12, 0.0  ;;  %v2057_v25 = vmax.f32 %v968_v11, 0.0  ;;  %3964 = vmatprep.subr.bf16.mxu0 %v8150_v36 }
  0xf3   : > { %12303 = vst [vmem:[#allocation4_spill] sm:$0xff] %v8835_v13  ;;  %12304 = vst [vmem:[#allocation5_spill] sm:$0xff] %v8837_v16  ;;  %v972_v23 = vadd.f32 %v971_v18, %v8796_v31  ;;  %v1172_v24 = vadd.f32 %v1171_v20, %v8796_v31  ;;  %v2058_v37 = vmax.f32 %v970_v17, 0.0  ;;  %v8162_v18 = vld [vmem:[%s12111_s3 + $0x2bc] ss:$12 sps:$4 sm:$0xff]  }
  0xf4   : > { %v973_v26 = vpop.f32.mrf.mxu0  ;;  %v1173_v28 = vpop.f32.mrf.mxu1  ;;  %v2338_v38 = vmax.f32 %v1170_v19, 0.0 }
  0xf5   : > { %v2064_v30 = vmax.f32 %v972_v23, 0.0  ;;  %v2344_v32 = vmax.f32 %v1172_v24, 0.0  ;;  %v974_v33 = vadd.f32 %v973_v26, %v8802_v34  ;;  %v1174_v35 = vadd.f32 %v1173_v28, %v8802_v34  ;;  %3965 = vmatpush2.bf16.msra.mxu0 %v8148_v42  ;;  %v8312_v24 = vld [vmem:[%s8441_s26 + $0xa8] sm:$0xff]  }
  0xf6   : > { %v977_v39 = vpop.f32.mrf.mxu0  ;;  %v1177_v40 = vpop.f32.mrf.mxu1  ;;  %7520 = vmatmul.mubr.msk.bf16.gmra.mxu1 %vm822_vm1, %v8311_v41  ;;  %7533 = vmatmul.mubr.msk.bf16.gmra.mxu0 %vm822_vm1, %v8593_v56 }
  0xf7   : > { %v8858_v43 = vpack.c.bf16 %v2064_v30, %v2057_v25  ;;  %v8860_v44 = vpack.c.bf16 %v2344_v32, %v2337_v22  ;;  %v2065_v45 = vmax.f32 %v974_v33, 0.0  ;;  %v2345_v46 = vmax.f32 %v1174_v35, 0.0  ;;  %1458 = vmatprep.mubr.bf16.mxu1 %v12119_v4  ;;  %1611 = vmatprep.mubr.bf16.mxu0 %v12119_v4  ;;  %v8160_v25 = vld [vmem:[%s12111_s3 + $0x2b8] ss:$12 sps:$4 sm:$0xff]  }
  0xf8   : > { %v978_v47 = vadd.f32 %v977_v39, %v8796_v31  ;;  %v1178_v48 = vadd.f32 %v1177_v40, %v8796_v31  ;;  %v979_v49 = vpop.f32.mrf.mxu0  ;;  %v1179_v56 = vpop.f32.mrf.mxu1  ;;  %3966 = vmatprep.subr.bf16.mxu0 %v8156_v50 }
  0xf9   : > { %12305 = vst [vmem:[#allocation6_spill] sm:$0xff] %v8858_v43  ;;  %12306 = vst [vmem:[#allocation7_spill] sm:$0xff] %v8860_v44  ;;  %v8869_v51 = vpack.c.bf16 %v2065_v45, %v2058_v37  ;;  %v8871_v52 = vpack.c.bf16 %v2345_v46, %v2338_v38  ;;  %v980_v53 = vadd.f32 %v979_v49, %v8802_v34  ;;  %3967 = vmatpush2.bf16.msra.mxu0 %v8154_v63  ;;  %v8168_v37 = vld [vmem:[%s12111_s3 + $0x2a4] ss:$12 sps:$4 sm:$0xff]   ;;  %v8166_v46 = vld [vmem:[%s12111_s3 + $0x2a0] ss:$12 sps:$4 sm:$0xff]  }
  0xfa   : > { %v1180_v55 = vadd.f32 %v1179_v56, %v8802_v34  ;;  %v981_v57 = vpop.f32.mrf.mxu0  ;;  %v1181_v58 = vpop.f32.mrf.mxu1  ;;  %v2351_v5 = vmax.f32 %v1178_v48, 0.0  ;;  %v2071_v11 = vmax.f32 %v978_v47, 0.0  ;;  %3968 = vmatprep.subr.bf16.mxu0 %v8162_v18 }
  0xfb   : > { %12307 = vst [vmem:[#allocation8_spill] sm:$0xff] %v8869_v51  ;;  %12308 = vst [vmem:[#allocation9_spill] sm:$0xff] %v8871_v52  ;;  %v982_v9 = vadd.f32 %v981_v57, %v8796_v31  ;;  %v1182_v10 = vadd.f32 %v1181_v58, %v8796_v31  ;;  %v2072_v20 = vmax.f32 %v980_v53, 0.0 }
  0xfc   : > { %v983_v12 = vpop.f32.mrf.mxu0  ;;  %v1183_v14 = vpop.f32.mrf.mxu1  ;;  %v2352_v21 = vmax.f32 %v1180_v55, 0.0 }
  0xfd   : > { %v2078_v15 = vmax.f32 %v982_v9, 0.0  ;;  %v2358_v54 = vmax.f32 %v1182_v10, 0.0  ;;  %v984_v17 = vadd.f32 %v983_v12, %v8802_v34  ;;  %v1184_v19 = vadd.f32 %v1183_v14, %v8802_v34  ;;  %3969 = vmatpush2.bf16.msra.mxu0 %v8160_v25  ;;  %v8313_v14 = vld [vmem:[%s8441_s26 + $0xb0] sm:$0xff]  }
  0xfe   : > { %v987_v22 = vpop.f32.mrf.mxu0  ;;  %v1187_v23 = vpop.f32.mrf.mxu1  ;;  %7521 = vmatmul.mubr.msk.bf16.gmra.mxu1 %vm822_vm1, %v8312_v24  ;;  %7534 = vmatmul.mubr.msk.bf16.gmra.mxu0 %vm822_vm1, %v8606_v59 }
  0xff   : > { %v8892_v26 = vpack.c.bf16 %v2078_v15, %v2071_v11  ;;  %v8894_v28 = vpack.c.bf16 %v2358_v54, %v2351_v5  ;;  %v2079_v30 = vmax.f32 %v984_v17, 0.0  ;;  %v2359_v32 = vmax.f32 %v1184_v19, 0.0  ;;  %1468 = vmatprep.mubr.bf16.mxu1 %v12119_v4  ;;  %1621 = vmatprep.mubr.bf16.mxu0 %v12119_v4  ;;  %v8174_v5 = vld [vmem:[%s12111_s3 + $0x28c] ss:$12 sps:$4 sm:$0xff]   ;;  %v8172_v15 = vld [vmem:[%s12111_s3 + $0x288] ss:$12 sps:$4 sm:$0xff]  }
 0x100   : > { %v988_v33 = vadd.f32 %v987_v22, %v8796_v31  ;;  %v1188_v35 = vadd.f32 %v1187_v23, %v8796_v31  ;;  %v989_v36 = vpop.f32.mrf.mxu0  ;;  %v1189_v59 = vpop.f32.mrf.mxu1  ;;  %3970 = vmatprep.subr.bf16.mxu0 %v8168_v37  ;;  %v8180_v23 = vld [vmem:[%s12111_s3 + $0x274] ss:$12 sps:$4 sm:$0xff]  }
 0x101   : > { %12309 = vst [vmem:[#allocation10_spill] sm:$0xff] %v8892_v26  ;;  %12310 = vst [vmem:[#allocation11_spill] sm:$0xff] %v8894_v28  ;;  %v8903_v38 = vpack.c.bf16 %v2079_v30, %v2072_v20  ;;  %v8905_v39 = vpack.c.bf16 %v2359_v32, %v2352_v21  ;;  %v990_v40 = vadd.f32 %v989_v36, %v8802_v34  ;;  %3971 = vmatpush2.bf16.msra.mxu0 %v8166_v46  ;;  %v8178_v36 = vld [vmem:[%s12111_s3 + $0x270] ss:$12 sps:$4 sm:$0xff]  }
 0x102   : > { %v1190_v41 = vadd.f32 %v1189_v59, %v8802_v34  ;;  %v991_v42 = vpop.f32.mrf.mxu0  ;;  %v1191_v45 = vpop.f32.mrf.mxu1  ;;  %v2365_v47 = vmax.f32 %v1188_v35, 0.0  ;;  %v2085_v56 = vmax.f32 %v988_v33, 0.0  ;;  %3972 = vmatprep.subr.bf16.mxu0 %v8174_v5 }
 0x103   : > { %12311 = vst [vmem:[#allocation12_spill] sm:$0xff] %v8903_v38  ;;  %12312 = vst [vmem:[#allocation13_spill] sm:$0xff] %v8905_v39  ;;  %v992_v48 = vadd.f32 %v991_v42, %v8796_v31  ;;  %v1192_v49 = vadd.f32 %v1191_v45, %v8796_v31  ;;  %v2086_v9 = vmax.f32 %v990_v40, 0.0 }
 0x104   : > { %v993_v50 = vpop.f32.mrf.mxu0  ;;  %v1193_v53 = vpop.f32.mrf.mxu1  ;;  %v2366_v10 = vmax.f32 %v1190_v41, 0.0 }
 0x105   : > { %v2092_v55 = vmax.f32 %v992_v48, 0.0  ;;  %v2372_v57 = vmax.f32 %v1192_v49, 0.0  ;;  %v994_v58 = vadd.f32 %v993_v50, %v8802_v34  ;;  %v1194_v63 = vadd.f32 %v1193_v53, %v8802_v34  ;;  %3973 = vmatpush2.bf16.msra.mxu0 %v8172_v15 }
 0x106   : > { %v997_v11 = vpop.f32.mrf.mxu0  ;;  %v1197_v12 = vpop.f32.mrf.mxu1  ;;  %7522 = vmatmul.mubr.msk.bf16.gmra.mxu1 %vm822_vm1, %v8313_v14  ;;  %7535 = vmatmul.mubr.msk.bf16.gmra.mxu0 %vm822_vm1, %v8615_v60 }
 0x107   : > { %v8926_v54 = vpack.c.bf16 %v2092_v55, %v2085_v56  ;;  %v8928_v17 = vpack.c.bf16 %v2372_v57, %v2365_v47  ;;  %v2093_v19 = vmax.f32 %v994_v58, 0.0  ;;  %v2373_v18 = vmax.f32 %v1194_v63, 0.0  ;;  %1478 = vmatprep.mubr.bf16.mxu1 %v12119_v4  ;;  %1631 = vmatprep.mubr.bf16.mxu0 %v12119_v4  ;;  %v8183_v56 = vld [vmem:[%s12111_s3 + $0x25c] ss:$12 sps:$4 sm:$0xff]   ;;  %v8181_v63 = vld [vmem:[%s12111_s3 + $0x258] ss:$12 sps:$4 sm:$0xff]  }
 0x108   : > { %v998_v20 = vadd.f32 %v997_v11, %v8796_v31  ;;  %v1198_v21 = vadd.f32 %v1197_v12, %v8796_v31  ;;  %v999_v22 = vpop.f32.mrf.mxu0  ;;  %v1199_v60 = vpop.f32.mrf.mxu1  ;;  %3974 = vmatprep.subr.bf16.mxu0 %v8180_v23  ;;  %v8314_v58 = vld [vmem:[%s8441_s26 + $0xb8] sm:$0xff]  }
 0x109   : > { %12313 = vst [vmem:[#allocation14_spill] sm:$0xff] %v8926_v54  ;;  %12314 = vst [vmem:[#allocation15_spill] sm:$0xff] %v8928_v17  ;;  %v8937_v24 = vpack.c.bf16 %v2093_v19, %v2086_v9  ;;  %v8939_v25 = vpack.c.bf16 %v2373_v18, %v2366_v10  ;;  %v1000_v30 = vadd.f32 %v999_v22, %v8802_v34  ;;  %3975 = vmatpush2.bf16.msra.mxu0 %v8178_v36  ;;  %v8186_v18 = vld [vmem:[%s12111_s3 + $0x244] ss:$12 sps:$4 sm:$0xff]  }
 0x10a   : > { %v1200_v32 = vadd.f32 %v1199_v60, %v8802_v34  ;;  %v1001_v33 = vpop.f32.mrf.mxu0  ;;  %v1201_v35 = vpop.f32.mrf.mxu1  ;;  %v2379_v59 = vmax.f32 %v1198_v21, 0.0  ;;  %v2099_v41 = vmax.f32 %v998_v20, 0.0  ;;  %v469_v19 = vsub.s32 2, %v8781_v27  ;;  %3976 = vmatprep.subr.bf16.mxu0 %v8183_v56 }
 0x10b   : > { %12315 = vst [vmem:[#allocation16_spill] sm:$0xff] %v8937_v24  ;;  %12316 = vst [vmem:[#allocation17_spill] sm:$0xff] %v8939_v25  ;;  %v1002_v37 = vadd.f32 %v1001_v33, %v8796_v31  ;;  %v1202_v40 = vadd.f32 %v1201_v35, %v8796_v31  ;;  %v2100_v50 = vmax.f32 %v1000_v30, 0.0  ;;  %v8184_v33 = vld [vmem:[%s12111_s3 + $0x240] ss:$12 sps:$4 sm:$0xff]  }
 0x10c   : > { %v1003_v42 = vpop.f32.mrf.mxu0  ;;  %v1203_v45 = vpop.f32.mrf.mxu1  ;;  %v2380_v53 = vmax.f32 %v1200_v32, 0.0  ;;  %v473_v32 = vsub.s32 3, %v8781_v27 }
 0x10d   : > { %v2106_v46 = vmax.f32 %v1002_v37, 0.0  ;;  %v2386_v47 = vmax.f32 %v1202_v40, 0.0  ;;  %v1004_v48 = vadd.f32 %v1003_v42, %v8802_v34  ;;  %v1204_v49 = vadd.f32 %v1203_v45, %v8802_v34  ;;  %3977 = vmatpush2.bf16.msra.mxu0 %v8181_v63 }
 0x10e   : > { %v1007_v55 = vpop.f32.mrf.mxu0  ;;  %v1207_v57 = vpop.f32.mrf.mxu1  ;;  %7523 = vmatmul.mubr.msk.bf16.gmra.mxu1 %vm822_vm1, %v8314_v58  ;;  %7536 = vmatmul.mubr.msk.bf16.gmra.mxu0 %vm822_vm1, %v8624_v61  ;;  %v8985_v42 = vrot.slane %v8792_v29, %v469_v19 }
 0x10f   : > { %v8960_v5 = vpack.c.bf16 %v2106_v46, %v2099_v41  ;;  %v8962_v9 = vpack.c.bf16 %v2386_v47, %v2379_v59  ;;  %v2107_v10 = vmax.f32 %v1004_v48, 0.0  ;;  %v2387_v11 = vmax.f32 %v1204_v49, 0.0  ;;  %1488 = vmatprep.mubr.bf16.mxu1 %v12119_v4  ;;  %1641 = vmatprep.mubr.bf16.mxu0 %v12119_v4 }
 0x110   : > { %v1008_v12 = vadd.f32 %v1007_v55, %v8796_v31  ;;  %v1208_v14 = vadd.f32 %v1207_v57, %v8796_v31  ;;  %v1009_v15 = vpop.f32.mrf.mxu0  ;;  %v1209_v61 = vpop.f32.mrf.mxu1  ;;  %3978 = vmatprep.subr.bf16.mxu0 %v8186_v18  ;;  %v8990_v55 = vld [vmem:[%s8441_s26 + $0xc0] sm:$0xff]   ;;  %v8997_v57 = vrot.slane %v8792_v29, %v473_v32 }
 0x111   : > { %12317 = vst [vmem:[#allocation18_spill] sm:$0xff] %v8960_v5  ;;  %12318 = vst [vmem:[#allocation19_spill] sm:$0xff] %v8962_v9  ;;  %v8972_v20 = vpack.c.bf16 %v2107_v10, %v2100_v50  ;;  %v8974_v21 = vpack.c.bf16 %v2387_v11, %v2380_v53  ;;  %v1010_v22 = vadd.f32 %v1009_v15, %v8802_v34  ;;  %3979 = vmatpush2.bf16.msra.mxu0 %v8184_v33 }
 0x112   : > { %v1210_v60 = vadd.f32 %v1209_v61, %v8802_v34  ;;  %v1011_v23 = vpop.f32.mrf.mxu0  ;;  %v1211_v30 = vpop.f32.mrf.mxu1  ;;  %v2393_v35 = vmax.f32 %v1208_v14, 0.0  ;;  %v2113_v37 = vmax.f32 %v1008_v12, 0.0 }
 0x113   : > { %12319 = vst [vmem:[#allocation20_spill] sm:$0xff] %v8972_v20  ;;  %12320 = vst [vmem:[#allocation21_spill] sm:$0xff] %v8974_v21  ;;  %v1012_v36 = vadd.f32 %v1011_v23, %v8796_v31  ;;  %v1212_v59 = vadd.f32 %v1211_v30, %v8796_v31  ;;  %v2114_v49 = vmax.f32 %v1010_v22, 0.0 }
 0x114   : > { %v1013_v40 = vpop.f32.mrf.mxu0  ;;  %v1213_v41 = vpop.f32.mrf.mxu1  ;;  %v2394_v56 = vmax.f32 %v1210_v60, 0.0 }
 0x115   : > { %v2120_v45 = vmax.f32 %v1012_v36, 0.0  ;;  %v2400_v46 = vmax.f32 %v1212_v59, 0.0  ;;  %v1014_v47 = vadd.f32 %v1013_v40, %v8802_v34  ;;  %v1214_v48 = vadd.f32 %v1213_v41, %v8802_v34 }
 0x116   : > { %v1017_v50 = vpop.f32.mrf.mxu0  ;;  %v1250_v53 = vpop.f32.mrf.mxu1  ;;  %7524 = vmatmul.mubr.msk.bf16.gmra.mxu1 %vm822_vm1, %v8990_v55  ;;  %7537 = vmatmul.mubr.msk.bf16.gmra.mxu0 %vm822_vm1, %v8633_v62 }
 0x117   : > { %v8999_v58 = vpack.c.bf16 %v2120_v45, %v2113_v37  ;;  %v9001_v63 = vpack.c.bf16 %v2400_v46, %v2393_v35  ;;  %v2121_v10 = vmax.f32 %v1014_v47, 0.0  ;;  %v2401_v11 = vmax.f32 %v1214_v48, 0.0  ;;  %1498 = vmatprep.mubr.bf16.mxu1 %v12119_v4  ;;  %1651 = vmatprep.mubr.bf16.mxu0 %v12119_v4 }
 0x118   : > { %v1018_v12 = vadd.f32 %v1017_v50, %v8796_v31  ;;  %v1251_v14 = vadd.f32 %v1250_v53, %v8985_v42  ;;  %v1019_v15 = vpop.f32.mrf.mxu0  ;;  %v1252_v61 = vpop.f32.mrf.mxu1 }
 0x119   : > { %12321 = vst [vmem:[#allocation22_spill] sm:$0xff] %v8999_v58  ;;  %12322 = vst [vmem:[#allocation23_spill] sm:$0xff] %v9001_v63  ;;  %v9007_v62 = vpack.c.bf16 %v2121_v10, %v2114_v49  ;;  %v9009_v29 = vpack.c.bf16 %v2401_v11, %v2394_v56  ;;  %v1020_v19 = vadd.f32 %v1019_v15, %v8802_v34  ;;  %v9018_v49 = vld [vmem:[%s8441_s26 + $0xc8] sm:$0xff]   ;;  %v8317_v11 = vld [vmem:[%s8441_s26] sm:$0xff]  }
 0x11a   : > { %v1253_v18 = vadd.f32 %v1252_v61, %v8997_v57  ;;  %v1021_v22 = vpop.f32.mrf.mxu0  ;;  %v1254_v60 = vpop.f32.mrf.mxu1  ;;  %v2045_v23 = vmax.f32 %v1251_v14, 0.0  ;;  %v2127_v33 = vmax.f32 %v1018_v12, 0.0 }
 0x11b   : > { %12323 = vst [vmem:[#allocation24_spill] sm:$0xff] %v9007_v62  ;;  %12324 = vst [vmem:[#allocation25_spill] sm:$0xff] %v9009_v29  ;;  %v1022_v30 = vadd.f32 %v1021_v22, %v8796_v31  ;;  %v1255_v32 = vadd.f32 %v1254_v60, %v8985_v42  ;;  %v2128_v45 = vmax.f32 %v1020_v19, 0.0  ;;  %v8323_v29 = vld [vmem:[%s8441_s26 + $0x30] sm:$0xff]  }
 0x11c   : > { %v1023_v35 = vpop.f32.mrf.mxu0  ;;  %v1256_v36 = vpop.f32.mrf.mxu1  ;;  %v2046_v46 = vmax.f32 %v1253_v18, 0.0 }
 0x11d   : > { %v2134_v59 = vmax.f32 %v1022_v30, 0.0  ;;  %v2052_v37 = vmax.f32 %v1255_v32, 0.0  ;;  %v1024_v40 = vadd.f32 %v1023_v35, %v8802_v34  ;;  %v1257_v41 = vadd.f32 %v1256_v36, %v8997_v57 }
 0x11e   : > { %v1027_v47 = vpop.f32.mrf.mxu0  ;;  %v1260_v48 = vpop.f32.mrf.mxu1  ;;  %7525 = vmatmul.mubr.msk.bf16.gmra.mxu1 %vm822_vm1, %v9018_v49  ;;  %7538 = vmatmul.mubr.msk.bf16.gmra.mxu0 %vm822_vm1, %v8645_v0 }
 0x11f   : > { %v9024_v56 = vpack.c.bf16 %v2134_v59, %v2127_v33  ;;  %v9026_v50 = vpack.c.bf16 %v2052_v37, %v2045_v23  ;;  %v2135_v53 = vmax.f32 %v1024_v40, 0.0  ;;  %v2053_v10 = vmax.f32 %v1257_v41, 0.0  ;;  %1661 = vmatprep.mubr.bf16.mxu0 %v12119_v4  ;;  %7877 = vmatprep.mubr.msk.bf16.mxu1 %vm822_vm1, %v8317_v11  ;;  %v8106_v37 = vld [vmem:[%s12111_s3 + $0xa8] ss:$12 sps:$4 sm:$0xff]  }
 0x120   : > { %v1028_v12 = vadd.f32 %v1027_v47, %v8796_v31  ;;  %v1261_v14 = vadd.f32 %v1260_v48, %v8985_v42  ;;  %v1029_v15 = vpop.f32.mrf.mxu0  ;;  %v1262_v61 = vpop.f32.mrf.mxu1  ;;  %v8111_v47 = vld [vmem:[%s12111_s3 + $0x94] ss:$12 sps:$4 sm:$0xff]  }
 0x121   : > { %12325 = vst [vmem:[#allocation26_spill] sm:$0xff] %v9024_v56  ;;  %12326 = vst [vmem:[#allocation27_spill] sm:$0xff] %v9026_v50  ;;  %v9033_v19 = vpack.c.bf16 %v2053_v10, %v2046_v46  ;;  %v9035_v0 = vpack.c.bf16 %v2135_v53, %v2128_v45  ;;  %v1030_v18 = vadd.f32 %v1029_v15, %v8802_v34 }
 0x122   : > { %v1263_v22 = vadd.f32 %v1262_v61, %v8997_v57  ;;  %v1031_v60 = vpop.f32.mrf.mxu0  ;;  %v1264_v23 = vpop.f32.mrf.mxu1  ;;  %v2059_v30 = vmax.f32 %v1261_v14, 0.0  ;;  %v2141_v35 = vmax.f32 %v1028_v12, 0.0  ;;  %v8318_v12 = vld [vmem:[%s8441_s26 + $0x8] sm:$0xff]  }
 0x123   : > { %12327 = vst [vmem:[#allocation28_spill] sm:$0xff] %v9033_v19  ;;  %12328 = vst [vmem:[#allocation29_spill] sm:$0xff] %v9035_v0  ;;  %v1032_v32 = vadd.f32 %v1031_v60, %v8796_v31  ;;  %v1265_v33 = vadd.f32 %v1264_v23, %v8985_v42  ;;  %v2142_v48 = vmax.f32 %v1030_v18, 0.0  ;;  %v8319_v23 = vld [vmem:[%s8441_s26 + $0x10] sm:$0xff]  }
 0x124   : > { %v1033_v36 = vpop.f32.mrf.mxu0  ;;  %v1266_v59 = vpop.f32.mrf.mxu1  ;;  %v2060_v53 = vmax.f32 %v1263_v22, 0.0 }
 0x125   : > { %v2148_v40 = vmax.f32 %v1032_v32, 0.0  ;;  %v2066_v41 = vmax.f32 %v1265_v33, 0.0  ;;  %v1034_v45 = vadd.f32 %v1033_v36, %v8802_v34  ;;  %v1267_v46 = vadd.f32 %v1266_v59, %v8997_v57  ;;  %v8109_v33 = vld [vmem:[%s12111_s3 + $0x90] ss:$12 sps:$4 sm:$0xff]  }
 0x126   : > { %v1037_v10 = vpop.f32.mrf.mxu0  ;;  %v1270_v11 = vpop.f32.mrf.mxu1  ;;  %7539 = vmatmul.mubr.msk.bf16.gmra.mxu0 %vm822_vm1, %v8654_v1  ;;  %7878 = vmatmul.mubr.msk.bf16.vlgmr.msra.gmra.mxu1 %vm822_vm1, %v8318_v12 }
 0x127   : > { %v9053_v14 = vpack.c.bf16 %v2148_v40, %v2141_v35  ;;  %v9055_v15 = vpack.c.bf16 %v2066_v41, %v2059_v30  ;;  %v2149_v61 = vmax.f32 %v1034_v45, 0.0  ;;  %v2067_v60 = vmax.f32 %v1267_v46, 0.0  ;;  %1671 = vmatprep.mubr.bf16.mxu0 %v12119_v4  ;;  %7881 = vmatprep.mubr.msk.bf16.mxu1 %vm822_vm1, %v8319_v23  ;;  %v8114_v30 = vld [vmem:[%s12111_s3 + $0x7c] ss:$12 sps:$4 sm:$0xff]  }
 0x128   : > { %v1038_v18 = vadd.f32 %v1037_v10, %v8796_v31  ;;  %v1271_v22 = vadd.f32 %v1270_v11, %v8985_v42  ;;  %v1039_v32 = vpop.f32.mrf.mxu0  ;;  %v1272_v1 = vpop.f32.mrf.mxu1  ;;  %3656 = vmatpush1.bf16.msra.mxu1 %v8106_v37 }
 0x129   : > { %12329 = vst [vmem:[#allocation30_spill] sm:$0xff] %v9053_v14  ;;  %12330 = vst [vmem:[#allocation31_spill] sm:$0xff] %v9055_v15  ;;  %3657 = vmatprep.subr.bf16.mxu1 %v8111_v47  ;;  %v9068_v35 = vpack.c.bf16 %v2067_v60, %v2060_v53  ;;  %v9070_v36 = vpack.c.bf16 %v2149_v61, %v2142_v48  ;;  %v1040_v59 = vadd.f32 %v1039_v32, %v8802_v34  ;;  %v8112_v48 = vld [vmem:[%s12111_s3 + $0x78] ss:$12 sps:$4 sm:$0xff]  }
 0x12a   : > { %v1273_v40 = vadd.f32 %v1272_v1, %v8997_v57  ;;  %v1041_v41 = vpop.f32.mrf.mxu0  ;;  %v1274_v45 = vpop.f32.mrf.mxu1  ;;  %v2073_v37 = vmax.f32 %v1271_v22, 0.0  ;;  %v2155_v47 = vmax.f32 %v1038_v18, 0.0  ;;  %v8120_v18 = vld [vmem:[%s12111_s3 + $0x64] ss:$12 sps:$4 sm:$0xff]  }
 0x12b   : > { %12331 = vst [vmem:[#allocation32_spill] sm:$0xff] %v9068_v35  ;;  %12332 = vst [vmem:[#allocation33_spill] sm:$0xff] %v9070_v36  ;;  %v1042_v46 = vadd.f32 %v1041_v41, %v8796_v31  ;;  %v1275_v10 = vadd.f32 %v1274_v45, %v8985_v42  ;;  %v2156_v22 = vmax.f32 %v1040_v59, 0.0  ;;  %v8320_v41 = vld [vmem:[%s8441_s26 + $0x18] sm:$0xff]  }
 0x12c   : > { %v1043_v11 = vpop.f32.mrf.mxu0  ;;  %v1276_v12 = vpop.f32.mrf.mxu1  ;;  %3658 = vmatpush1.bf16.msra.mxu1 %v8109_v33  ;;  %v2074_v32 = vmax.f32 %v1273_v40, 0.0 }
 0x12d   : > { %v2162_v53 = vmax.f32 %v1042_v46, 0.0  ;;  %v2080_v61 = vmax.f32 %v1275_v10, 0.0  ;;  %v1044_v60 = vadd.f32 %v1043_v11, %v8802_v34  ;;  %v1277_v23 = vadd.f32 %v1276_v12, %v8997_v57  ;;  %3659 = vmatprep.subr.bf16.mxu1 %v8114_v30  ;;  %v8321_v11 = vld [vmem:[%s8441_s26 + $0x20] sm:$0xff]  }
 0x12e   : > { %v1047_v1 = vpop.f32.mrf.mxu0  ;;  %v1280_v33 = vpop.f32.mrf.mxu1  ;;  %7540 = vmatmul.mubr.msk.bf16.gmra.mxu0 %vm822_vm1, %v8663_v2  ;;  %7882 = vmatmul.mubr.msk.bf16.gmra.mxu1 %vm822_vm1, %v8320_v41 }
 0x12f   : > { %v9088_v45 = vpack.c.bf16 %v2162_v53, %v2155_v47  ;;  %v9090_v46 = vpack.c.bf16 %v2080_v61, %v2073_v37  ;;  %v2163_v10 = vmax.f32 %v1044_v60, 0.0  ;;  %v2081_v30 = vmax.f32 %v1277_v23, 0.0  ;;  %1681 = vmatprep.mubr.bf16.mxu0 %v12119_v4  ;;  %7885 = vmatprep.mubr.msk.bf16.mxu1 %vm822_vm1, %v8321_v11  ;;  %v8118_v47 = vld [vmem:[%s12111_s3 + $0x60] ss:$12 sps:$4 sm:$0xff]  }
 0x130   : > { %v1048_v59 = vadd.f32 %v1047_v1, %v8796_v31  ;;  %v1281_v40 = vadd.f32 %v1280_v33, %v8985_v42  ;;  %v1049_v12 = vpop.f32.mrf.mxu0  ;;  %v1282_v2 = vpop.f32.mrf.mxu1  ;;  %3660 = vmatpush1.bf16.msra.mxu1 %v8112_v48  ;;  %v8123_v37 = vld [vmem:[%s12111_s3 + $0x4c] ss:$12 sps:$4 sm:$0xff]  }
 0x131   : > { %12333 = vst [vmem:[#allocation34_spill] sm:$0xff] %v9088_v45  ;;  %12334 = vst [vmem:[#allocation35_spill] sm:$0xff] %v9090_v46  ;;  %3661 = vmatprep.subr.bf16.mxu1 %v8120_v18  ;;  %v9103_v53 = vpack.c.bf16 %v2081_v30, %v2074_v32  ;;  %v9105_v61 = vpack.c.bf16 %v2163_v10, %v2156_v22  ;;  %v1050_v60 = vadd.f32 %v1049_v12, %v8802_v34  ;;  %v8121_v22 = vld [vmem:[%s12111_s3 + $0x48] ss:$12 sps:$4 sm:$0xff]  }
 0x132   : > { %v1283_v23 = vadd.f32 %v1282_v2, %v8997_v57  ;;  %v1051_v1 = vpop.f32.mrf.mxu0  ;;  %v1284_v33 = vpop.f32.mrf.mxu1  ;;  %v2087_v48 = vmax.f32 %v1281_v40, 0.0  ;;  %v2169_v18 = vmax.f32 %v1048_v59, 0.0  ;;  %v8126_v59 = vld [vmem:[%s12111_s3 + $0x34] ss:$12 sps:$4 sm:$0xff]  }
 0x133   : > { %12335 = vst [vmem:[#allocation36_spill] sm:$0xff] %v9103_v53  ;;  %12336 = vst [vmem:[#allocation37_spill] sm:$0xff] %v9105_v61  ;;  %v1052_v41 = vadd.f32 %v1051_v1, %v8796_v31  ;;  %v1285_v11 = vadd.f32 %v1284_v33, %v8985_v42  ;;  %v2170_v12 = vmax.f32 %v1050_v60, 0.0  ;;  %v8322_v33 = vld [vmem:[%s8441_s26 + $0x28] sm:$0xff]  }
 0x134   : > { %v1053_v4 = vpop.f32.mrf.mxu0  ;;  %v1286_v63 = vpop.f32.mrf.mxu1  ;;  %3662 = vmatpush1.bf16.msra.mxu1 %v8118_v47  ;;  %v2088_v2 = vmax.f32 %v1283_v23, 0.0 }
 0x135   : > { %v2176_v32 = vmax.f32 %v1052_v41, 0.0  ;;  %v2094_v10 = vmax.f32 %v1285_v11, 0.0  ;;  %v1054_v30 = vadd.f32 %v1053_v4, %v8802_v34  ;;  %v1287_v40 = vadd.f32 %v1286_v63, %v8997_v57  ;;  %3663 = vmatprep.subr.bf16.mxu1 %v8123_v37 }
 0x136   : > { %v1057_v1 = vpop.f32.mrf.mxu0  ;;  %v1290_v47 = vpop.f32.mrf.mxu1  ;;  %7541 = vmatmul.mubr.msk.bf16.gmra.mxu0 %vm822_vm1, %v8672_v3  ;;  %7886 = vmatmul.mubr.msk.bf16.gmra.mxu1 %vm822_vm1, %v8322_v33  ;;  %v12339_v11 = vmov 0  }
 0x137   : > { %v9123_v41 = vpack.c.bf16 %v2176_v32, %v2169_v18  ;;  %v9125_v4 = vpack.c.bf16 %v2094_v10, %v2087_v48  ;;  %v2177_v63 = vmax.f32 %v1054_v30, 0.0  ;;  %v2095_v37 = vmax.f32 %v1287_v40, 0.0  ;;  %1691 = vmatprep.mubr.bf16.mxu0 %v12339_v11  ;;  %7889 = vmatprep.mubr.msk.bf16.mxu1 %vm822_vm1, %v8323_v29  ;;  %v8124_v18 = vld [vmem:[%s12111_s3 + $0x30] ss:$12 sps:$4 sm:$0xff]  }
 0x138   : > { %v1058_v60 = vadd.f32 %v1057_v1, %v8796_v31  ;;  %v1291_v23 = vadd.f32 %v1290_v47, %v8985_v42  ;;  %v1059_v9 = vpop.f32.mrf.mxu0  ;;  %v1292_v3 = vpop.f32.mrf.mxu1  ;;  %3664 = vmatpush1.bf16.msra.mxu1 %v8121_v22  ;;  %v8132_v48 = vld [vmem:[%s12111_s3 + $0x1c] ss:$12 sps:$4 sm:$0xff]  }
 0x139   : > { %12337 = vst [vmem:[#allocation38_spill] sm:$0xff] %v9123_v41  ;;  %12338 = vst [vmem:[#allocation39_spill] sm:$0xff] %v9125_v4  ;;  %3665 = vmatprep.subr.bf16.mxu1 %v8126_v59  ;;  %v9138_v32 = vpack.c.bf16 %v2095_v37, %v2088_v2  ;;  %v9140_v10 = vpack.c.bf16 %v2177_v63, %v2170_v12  ;;  %v1060_v29 = vadd.f32 %v1059_v9, %v8802_v34  ;;  %v8130_v12 = vld [vmem:[%s12111_s3 + $0x18] ss:$12 sps:$4 sm:$0xff]  }
 0x13a   : > { %v1293_v30 = vadd.f32 %v1292_v3, %v8997_v57  ;;  %v1061_v40 = vpop.f32.mrf.mxu0  ;;  %v1294_v1 = vpop.f32.mrf.mxu1  ;;  %v2101_v22 = vmax.f32 %v1291_v23, 0.0  ;;  %v2183_v59 = vmax.f32 %v1058_v60, 0.0  ;;  %v8135_v60 = vld [vmem:[%s12111_s3 + $0x4] ss:$12 sps:$4 sm:$0xff]  }
 0x13b   : > { %12340 = vst [vmem:[#allocation40_spill] sm:$0xff] %v9138_v32  ;;  %12341 = vst [vmem:[#allocation41_spill] sm:$0xff] %v9140_v10  ;;  %v1062_v47 = vadd.f32 %v1061_v40, %v8796_v31  ;;  %v1295_v33 = vadd.f32 %v1294_v1, %v8985_v42  ;;  %v2184_v23 = vmax.f32 %v1060_v29, 0.0  ;;  %v8324_v1 = vld [vmem:[%s8441_s26 + $0x38] sm:$0xff]  }
 0x13c   : > { %v1063_v21 = vpop.f32.mrf.mxu0  ;;  %v1296_v17 = vpop.f32.mrf.mxu1  ;;  %3666 = vmatpush1.bf16.msra.mxu1 %v8124_v18  ;;  %v2102_v3 = vmax.f32 %v1293_v30, 0.0 }
 0x13d   : > { %v2190_v2 = vmax.f32 %v1062_v47, 0.0  ;;  %v2108_v9 = vmax.f32 %v1295_v33, 0.0  ;;  %v1064_v63 = vadd.f32 %v1063_v21, %v8802_v34  ;;  %v1297_v37 = vadd.f32 %v1296_v17, %v8997_v57  ;;  %3667 = vmatprep.subr.bf16.mxu1 %v8132_v48  ;;  %v8325_v33 = vld [vmem:[%s8441_s26 + $0x40] sm:$0xff]  }
 0x13e   : > { %v1067_v40 = vpop.f32.mrf.mxu0  ;;  %v1300_v18 = vpop.f32.mrf.mxu1  ;;  %7542 = vmatmul.mubr.msk.bf16.gmra.mxu0 %vm822_vm1, %v8687_v7  ;;  %7890 = vmatmul.mubr.msk.bf16.gmra.mxu1 %vm822_vm1, %v8324_v1 }
 0x13f   : > { %v9158_v47 = vpack.c.bf16 %v2190_v2, %v2183_v59  ;;  %v9160_v21 = vpack.c.bf16 %v2108_v9, %v2101_v22  ;;  %v2191_v17 = vmax.f32 %v1064_v63, 0.0  ;;  %v2109_v48 = vmax.f32 %v1297_v37, 0.0  ;;  %1701 = vmatprep.mubr.bf16.mxu0 %v12339_v11  ;;  %7893 = vmatprep.mubr.msk.bf16.mxu1 %vm822_vm1, %v8325_v33  ;;  %v8133_v59 = vld [vmem:[%s12111_s3] ss:$12 sps:$4 sm:$0xff]  }
 0x140   : > { %v1068_v29 = vadd.f32 %v1067_v40, %v8796_v31  ;;  %v1301_v30 = vadd.f32 %v1300_v18, %v8985_v42  ;;  %v1069_v25 = vpop.f32.mrf.mxu0  ;;  %v1302_v7 = vpop.f32.mrf.mxu1  ;;  %3668 = vmatpush1.bf16.msra.mxu1 %v8130_v12  ;;  %v8138_v22 = vld [vmem:[%s12111_s3 + $0x16c] ss:$12 sps:$4 sm:$0xff]  }
 0x141   : > { %12342 = vst [vmem:[#allocation42_spill] sm:$0xff] %v9158_v47  ;;  %12343 = vst [vmem:[#allocation43_spill] sm:$0xff] %v9160_v21  ;;  %3669 = vmatprep.subr.bf16.mxu1 %v8135_v60  ;;  %v9173_v2 = vpack.c.bf16 %v2109_v48, %v2102_v3  ;;  %v9175_v9 = vpack.c.bf16 %v2191_v17, %v2184_v23  ;;  %v1070_v63 = vadd.f32 %v1069_v25, %v8802_v34  ;;  %v8136_v23 = vld [vmem:[%s12111_s3 + $0x168] ss:$12 sps:$4 sm:$0xff]  }
 0x142   : > { %v1303_v37 = vadd.f32 %v1302_v7, %v8997_v57  ;;  %v1071_v40 = vpop.f32.mrf.mxu0  ;;  %v1304_v18 = vpop.f32.mrf.mxu1  ;;  %v2115_v12 = vmax.f32 %v1301_v30, 0.0  ;;  %v2197_v60 = vmax.f32 %v1068_v29, 0.0  ;;  %v8144_v29 = vld [vmem:[%s12111_s3 + $0x154] ss:$12 sps:$4 sm:$0xff]  }
 0x143   : > { %12344 = vst [vmem:[#allocation44_spill] sm:$0xff] %v9173_v2  ;;  %12345 = vst [vmem:[#allocation45_spill] sm:$0xff] %v9175_v9  ;;  %v1072_v1 = vadd.f32 %v1071_v40, %v8796_v31  ;;  %v1305_v33 = vadd.f32 %v1304_v18, %v8985_v42  ;;  %v2198_v30 = vmax.f32 %v1070_v63, 0.0  ;;  %v9190_v18 = vld [vmem:[%s8441_s26 + $0x80] sm:$0xff]   ;;  %v8328_v63 = vld [vmem:[%s8441_s26 + $0x50] sm:$0xff]  }
 0x144   : > { %v1073_v28 = vpop.f32.mrf.mxu0  ;;  %v1306_v39 = vpop.f32.mrf.mxu1  ;;  %3670 = vmatpush1.bf16.msra.mxu1 %v8133_v59  ;;  %v2116_v7 = vmax.f32 %v1303_v37, 0.0 }
 0x145   : > { %v2204_v25 = vmax.f32 %v1072_v1, 0.0  ;;  %v2122_v3 = vmax.f32 %v1305_v33, 0.0  ;;  %v1074_v17 = vadd.f32 %v1073_v28, %v8802_v34  ;;  %v1307_v48 = vadd.f32 %v1306_v39, %v8997_v57  ;;  %3671 = vmatprep.subr.bf16.mxu1 %v8138_v22  ;;  %v8327_v1 = vld [vmem:[%s8441_s26 + $0x48] sm:$0xff]  }
 0x146   : > { %v1077_v40 = vpop.f32.mrf.mxu0  ;;  %v1310_v59 = vpop.f32.mrf.mxu1  ;;  %7543 = vmatmul.mubr.msk.bf16.gmra.mxu0 %vm822_vm1, %v9190_v18  ;;  %7894 = vmatmul.mubr.msk.bf16.gmra.mxu1 %vm822_vm1, %v8327_v1 }
 0x147   : > { %v9196_v28 = vpack.c.bf16 %v2204_v25, %v2197_v60  ;;  %v9198_v39 = vpack.c.bf16 %v2122_v3, %v2115_v12  ;;  %v2205_v22 = vmax.f32 %v1074_v17, 0.0  ;;  %v2123_v33 = vmax.f32 %v1307_v48, 0.0  ;;  %1711 = vmatprep.mubr.bf16.mxu0 %v12339_v11  ;;  %7897 = vmatprep.mubr.msk.bf16.mxu1 %vm822_vm1, %v8328_v63  ;;  %v8142_v60 = vld [vmem:[%s12111_s3 + $0x150] ss:$12 sps:$4 sm:$0xff]  }
 0x148   : > { %v1078_v37 = vadd.f32 %v1077_v40, %v8796_v31  ;;  %v1311_v44 = vadd.f32 %v1310_v59, %v8985_v42  ;;  %v1079_v52 = vpop.f32.mrf.mxu0  ;;  %v1312_v8 = vpop.f32.mrf.mxu1  ;;  %3672 = vmatpush2.bf16.msra.mxu1 %v8136_v23  ;;  %v8147_v12 = vld [vmem:[%s12111_s3 + $0x13c] ss:$12 sps:$4 sm:$0xff]  }
 0x149   : > { %12346 = vst [vmem:[#allocation46_spill] sm:$0xff] %v9196_v28  ;;  %12347 = vst [vmem:[#allocation47_spill] sm:$0xff] %v9198_v39  ;;  %3673 = vmatprep.subr.bf16.mxu1 %v8144_v29  ;;  %v9211_v25 = vpack.c.bf16 %v2123_v33, %v2116_v7  ;;  %v9213_v3 = vpack.c.bf16 %v2205_v22, %v2198_v30  ;;  %v1080_v17 = vadd.f32 %v1079_v52, %v8802_v34  ;;  %v8145_v30 = vld [vmem:[%s12111_s3 + $0x138] ss:$12 sps:$4 sm:$0xff]  }
 0x14a   : > { %v1313_v48 = vadd.f32 %v1312_v8, %v8997_v57  ;;  %v1081_v40 = vpop.f32.mrf.mxu0  ;;  %v1314_v59 = vpop.f32.mrf.mxu1  ;;  %v2129_v23 = vmax.f32 %v1311_v44, 0.0  ;;  %v2211_v29 = vmax.f32 %v1078_v37, 0.0  ;;  %v8153_v22 = vld [vmem:[%s12111_s3 + $0x124] ss:$12 sps:$4 sm:$0xff]  }
 0x14b   : > { %12348 = vst [vmem:[#allocation48_spill] sm:$0xff] %v9211_v25  ;;  %12349 = vst [vmem:[#allocation49_spill] sm:$0xff] %v9213_v3  ;;  %v1082_v1 = vadd.f32 %v1081_v40, %v8796_v31  ;;  %v1315_v63 = vadd.f32 %v1314_v59, %v8985_v42  ;;  %v2212_v33 = vmax.f32 %v1080_v17, 0.0  ;;  %v9228_v59 = vld [vmem:[%s8441_s26 + $0x88] sm:$0xff]   ;;  %v8331_v17 = vld [vmem:[%s8441_s26 + $0x60] sm:$0xff]  }
 0x14c   : > { %v1083_v16 = vpop.f32.mrf.mxu0  ;;  %v1316_v28 = vpop.f32.mrf.mxu1  ;;  %3674 = vmatpush2.bf16.msra.mxu1 %v8142_v60  ;;  %v2130_v37 = vmax.f32 %v1313_v48, 0.0 }
 0x14d   : > { %v2218_v52 = vmax.f32 %v1082_v1, 0.0  ;;  %v2136_v7 = vmax.f32 %v1315_v63, 0.0  ;;  %v1084_v8 = vadd.f32 %v1083_v16, %v8802_v34  ;;  %v1317_v44 = vadd.f32 %v1316_v28, %v8997_v57  ;;  %3675 = vmatprep.subr.bf16.mxu1 %v8147_v12  ;;  %v8330_v1 = vld [vmem:[%s8441_s26 + $0x58] sm:$0xff]  }
 0x14e   : > { %v1087_v40 = vpop.f32.mrf.mxu0  ;;  %v1320_v60 = vpop.f32.mrf.mxu1  ;;  %7544 = vmatmul.mubr.msk.bf16.gmra.mxu0 %vm822_vm1, %v9228_v59  ;;  %7898 = vmatmul.mubr.msk.bf16.gmra.mxu1 %vm822_vm1, %v8330_v1 }
 0x14f   : > { %v9234_v16 = vpack.c.bf16 %v2218_v52, %v2211_v29  ;;  %v9236_v28 = vpack.c.bf16 %v2136_v7, %v2129_v23  ;;  %v2219_v12 = vmax.f32 %v1084_v8, 0.0  ;;  %v2137_v63 = vmax.f32 %v1317_v44, 0.0  ;;  %1721 = vmatprep.mubr.bf16.mxu0 %v12339_v11  ;;  %7901 = vmatprep.mubr.msk.bf16.mxu1 %vm822_vm1, %v8331_v17  ;;  %v8151_v29 = vld [vmem:[%s12111_s3 + $0x120] ss:$12 sps:$4 sm:$0xff]  }
 0x150   : > { %v1088_v48 = vadd.f32 %v1087_v40, %v8796_v31  ;;  %v1321_v3 = vadd.f32 %v1320_v60, %v8985_v42  ;;  %v1089_v47 = vpop.f32.mrf.mxu0  ;;  %v1322_v9 = vpop.f32.mrf.mxu1  ;;  %3676 = vmatpush2.bf16.msra.mxu1 %v8145_v30  ;;  %v8159_v23 = vld [vmem:[%s12111_s3 + $0x10c] ss:$12 sps:$4 sm:$0xff]  }
 0x151   : > { %12350 = vst [vmem:[#allocation50_spill] sm:$0xff] %v9234_v16  ;;  %12351 = vst [vmem:[#allocation51_spill] sm:$0xff] %v9236_v28  ;;  %3677 = vmatprep.subr.bf16.mxu1 %v8153_v22  ;;  %v9249_v52 = vpack.c.bf16 %v2137_v63, %v2130_v37  ;;  %v9251_v7 = vpack.c.bf16 %v2219_v12, %v2212_v33  ;;  %v1090_v8 = vadd.f32 %v1089_v47, %v8802_v34  ;;  %v8157_v33 = vld [vmem:[%s12111_s3 + $0x108] ss:$12 sps:$4 sm:$0xff]  }
 0x152   : > { %v1323_v44 = vadd.f32 %v1322_v9, %v8997_v57  ;;  %v1091_v40 = vpop.f32.mrf.mxu0  ;;  %v1324_v60 = vpop.f32.mrf.mxu1  ;;  %v2143_v30 = vmax.f32 %v1321_v3, 0.0  ;;  %v2225_v22 = vmax.f32 %v1088_v48, 0.0  ;;  %v8165_v12 = vld [vmem:[%s12111_s3 + $0xf4] ss:$12 sps:$4 sm:$0xff]  }
 0x153   : > { %12352 = vst [vmem:[#allocation52_spill] sm:$0xff] %v9249_v52  ;;  %12353 = vst [vmem:[#allocation53_spill] sm:$0xff] %v9251_v7  ;;  %v1092_v1 = vadd.f32 %v1091_v40, %v8796_v31  ;;  %v1325_v17 = vadd.f32 %v1324_v60, %v8985_v42  ;;  %v2226_v63 = vmax.f32 %v1090_v8, 0.0  ;;  %v9266_v60 = vld [vmem:[%s8441_s26 + $0x90] sm:$0xff]  }
 0x154   : > { %v1093_v16 = vpop.f32.mrf.mxu0  ;;  %v1326_v41 = vpop.f32.mrf.mxu1  ;;  %3678 = vmatpush2.bf16.msra.mxu1 %v8151_v29  ;;  %v2144_v48 = vmax.f32 %v1323_v44, 0.0  ;;  %v8334_v8 = vld [vmem:[%s8441_s26 + $0x70] sm:$0xff]  }
 0x155   : > { %v2232_v47 = vmax.f32 %v1092_v1, 0.0  ;;  %v2150_v37 = vmax.f32 %v1325_v17, 0.0  ;;  %v1094_v9 = vadd.f32 %v1093_v16, %v8802_v34  ;;  %v1327_v3 = vadd.f32 %v1326_v41, %v8997_v57  ;;  %3679 = vmatprep.subr.bf16.mxu1 %v8159_v23  ;;  %v8333_v1 = vld [vmem:[%s8441_s26 + $0x68] sm:$0xff]  }
 0x156   : > { %v1097_v40 = vpop.f32.mrf.mxu0  ;;  %v1330_v29 = vpop.f32.mrf.mxu1  ;;  %7545 = vmatmul.mubr.msk.bf16.gmra.mxu0 %vm822_vm1, %v9266_v60  ;;  %7902 = vmatmul.mubr.msk.bf16.gmra.mxu1 %vm822_vm1, %v8333_v1 }
 0x157   : > { %v9272_v16 = vpack.c.bf16 %v2232_v47, %v2225_v22  ;;  %v9274_v41 = vpack.c.bf16 %v2150_v37, %v2143_v30  ;;  %v2233_v23 = vmax.f32 %v1094_v9, 0.0  ;;  %v2151_v17 = vmax.f32 %v1327_v3, 0.0  ;;  %1731 = vmatprep.mubr.bf16.mxu0 %v12339_v11  ;;  %7905 = vmatprep.mubr.msk.bf16.mxu1 %vm822_vm1, %v8334_v8  ;;  %v8163_v22 = vld [vmem:[%s12111_s3 + $0xf0] ss:$12 sps:$4 sm:$0xff]  }
 0x158   : > { %v1098_v44 = vadd.f32 %v1097_v40, %v8796_v31  ;;  %v1331_v7 = vadd.f32 %v1330_v29, %v8985_v42  ;;  %v1099_v10 = vpop.f32.mrf.mxu0  ;;  %v1332_v45 = vpop.f32.mrf.mxu1  ;;  %3680 = vmatpush2.bf16.msra.mxu1 %v8157_v33  ;;  %v8171_v30 = vld [vmem:[%s12111_s3 + $0xdc] ss:$12 sps:$4 sm:$0xff]  }
 0x159   : > { %12354 = vst [vmem:[#allocation54_spill] sm:$0xff] %v9272_v16  ;;  %12355 = vst [vmem:[#allocation55_spill] sm:$0xff] %v9274_v41  ;;  %3681 = vmatprep.subr.bf16.mxu1 %v8165_v12  ;;  %v9287_v47 = vpack.c.bf16 %v2151_v17, %v2144_v48  ;;  %v9289_v37 = vpack.c.bf16 %v2233_v23, %v2226_v63  ;;  %v1100_v9 = vadd.f32 %v1099_v10, %v8802_v34  ;;  %v8169_v63 = vld [vmem:[%s12111_s3 + $0xd8] ss:$12 sps:$4 sm:$0xff]  }
 0x15a   : > { %v1333_v3 = vadd.f32 %v1332_v45, %v8997_v57  ;;  %v1101_v40 = vpop.f32.mrf.mxu0  ;;  %v1334_v29 = vpop.f32.mrf.mxu1  ;;  %v2157_v33 = vmax.f32 %v1331_v7, 0.0  ;;  %v2239_v12 = vmax.f32 %v1098_v44, 0.0  ;;  %v8177_v23 = vld [vmem:[%s12111_s3 + $0xc4] ss:$12 sps:$4 sm:$0xff]  }
 0x15b   : > { %12356 = vst [vmem:[#allocation56_spill] sm:$0xff] %v9287_v47  ;;  %12357 = vst [vmem:[#allocation57_spill] sm:$0xff] %v9289_v37  ;;  %v1102_v1 = vadd.f32 %v1101_v40, %v8796_v31  ;;  %v1335_v8 = vadd.f32 %v1334_v29, %v8985_v42  ;;  %v2240_v17 = vmax.f32 %v1100_v9, 0.0 }
 0x15c   : > { %v1103_v16 = vpop.f32.mrf.mxu0  ;;  %v1336_v41 = vpop.f32.mrf.mxu1  ;;  %3682 = vmatpush2.bf16.msra.mxu1 %v8163_v22  ;;  %v2158_v44 = vmax.f32 %v1333_v3, 0.0  ;;  %v9304_v22 = vld [vmem:[%s8441_s26 + $0x98] sm:$0xff]  }
 0x15d   : > { %v2246_v10 = vmax.f32 %v1102_v1, 0.0  ;;  %v2164_v48 = vmax.f32 %v1335_v8, 0.0  ;;  %v1104_v45 = vadd.f32 %v1103_v16, %v8802_v34  ;;  %v1337_v7 = vadd.f32 %v1336_v41, %v8997_v57  ;;  %3683 = vmatprep.subr.bf16.mxu1 %v8171_v30  ;;  %v8336_v1 = vld [vmem:[%s8441_s26 + $0x78] sm:$0xff]  }
 0x15e   : > { %v1107_v40 = vpop.f32.mrf.mxu0  ;;  %v1340_v29 = vpop.f32.mrf.mxu1  ;;  %7546 = vmatmul.mubr.msk.bf16.gmra.mxu0 %vm822_vm1, %v9304_v22  ;;  %7906 = vmatmul.mubr.msk.bf16.gmra.mxu1 %vm822_vm1, %v8336_v1 }
 0x15f   : > { %v9310_v16 = vpack.c.bf16 %v2246_v10, %v2239_v12  ;;  %v9312_v41 = vpack.c.bf16 %v2164_v48, %v2157_v33  ;;  %v2247_v30 = vmax.f32 %v1104_v45, 0.0  ;;  %v2165_v8 = vmax.f32 %v1337_v7, 0.0  ;;  %1741 = vmatprep.mubr.bf16.mxu0 %v12339_v11  ;;  %7909 = vmatprep.mubr.msk.bf16.mxu1 %vm822_vm1, %v9190_v18  ;;  %v8175_v12 = vld [vmem:[%s12111_s3 + $0xc0] ss:$12 sps:$4 sm:$0xff]  }
 0x160   : > { %v1108_v9 = vadd.f32 %v1107_v40, %v8796_v31  ;;  %v1341_v3 = vadd.f32 %v1340_v29, %v8985_v42  ;;  %v1109_v37 = vpop.f32.mrf.mxu0  ;;  %v1342_v47 = vpop.f32.mrf.mxu1  ;;  %3684 = vmatpush2.bf16.msra.mxu1 %v8169_v63 }
 0x161   : > { %12358 = vst [vmem:[#allocation58_spill] sm:$0xff] %v9310_v16  ;;  %12359 = vst [vmem:[#allocation59_spill] sm:$0xff] %v9312_v41  ;;  %3685 = vmatprep.subr.bf16.mxu1 %v8177_v23  ;;  %v9322_v33 = vpack.c.bf16 %v2165_v8, %v2158_v44  ;;  %v9324_v10 = vpack.c.bf16 %v2247_v30, %v2240_v17  ;;  %v1110_v48 = vadd.f32 %v1109_v37, %v8802_v34  ;;  %v8189_v23 = vld [vmem:[%s12111_s3 + $0x3ac] ss:$12 sps:$4 sm:$0xff]  }
 0x162   : > { %v1343_v18 = vadd.f32 %v1342_v47, %v8997_v57  ;;  %v1111_v45 = vpop.f32.mrf.mxu0  ;;  %v1344_v7 = vpop.f32.mrf.mxu1  ;;  %v2171_v40 = vmax.f32 %v1341_v3, 0.0  ;;  %v2253_v44 = vmax.f32 %v1108_v9, 0.0 }
 0x163   : > { %12360 = vst [vmem:[#allocation60_spill] sm:$0xff] %v9322_v33  ;;  %12361 = vst [vmem:[#allocation61_spill] sm:$0xff] %v9324_v10  ;;  %v1112_v29 = vadd.f32 %v1111_v45, %v8796_v31  ;;  %v1345_v63 = vadd.f32 %v1344_v7, %v8985_v42  ;;  %v2254_v3 = vmax.f32 %v1110_v48, 0.0  ;;  %v8337_v7 = vld [vmem:[%s8441_s26 + $0xa0] sm:$0xff]  }
 0x164   : > { %v1113_v1 = vpop.f32.mrf.mxu0  ;;  %v1346_v17 = vpop.f32.mrf.mxu1  ;;  %3686 = vmatpush2.bf16.msra.mxu1 %v8175_v12  ;;  %v2172_v45 = vmax.f32 %v1343_v18, 0.0  ;;  %v8190_v48 = vld [vmem:[%s12111_s3 + $0x484] ss:$12 sps:$4 sm:$0x3f]  }
 0x165   : > { %v2260_v30 = vmax.f32 %v1112_v29, 0.0  ;;  %v2178_v37 = vmax.f32 %v1345_v63, 0.0  ;;  %v1114_v47 = vadd.f32 %v1113_v1, %v8802_v34  ;;  %v1347_v8 = vadd.f32 %v1346_v17, %v8997_v57  ;;  %4241 = vmatprep.subr.bf16.mxu1 %v8189_v23  ;;  %7726 = vmatprep.subr.msk.bf16.mxu0 %vm3645_vm2, %v8190_v48 }
 0x166   : > { %v1117_v16 = vpop.f32.mrf.mxu0  ;;  %v1350_v10 = vpop.f32.mrf.mxu1  ;;  %7547 = vmatmul.mubr.msk.bf16.gmra.mxu0 %vm822_vm1, %v8337_v7  ;;  %7910 = vmatmul.mubr.msk.bf16.gmra.mxu1 %vm822_vm1, %v9228_v59 }
 0x167   : > { %v9339_v9 = vpack.c.bf16 %v2260_v30, %v2253_v44  ;;  %v9341_v12 = vpack.c.bf16 %v2178_v37, %v2171_v40  ;;  %v2261_v29 = vmax.f32 %v1114_v47, 0.0  ;;  %v2179_v63 = vmax.f32 %v1347_v8, 0.0  ;;  %1751 = vmatprep.mubr.bf16.mxu0 %v12339_v11  ;;  %7913 = vmatprep.mubr.msk.bf16.mxu1 %vm822_vm1, %v9266_v60 }
 0x168   : > { %v1118_v18 = vadd.f32 %v1117_v16, %v8796_v31  ;;  %v1351_v23 = vadd.f32 %v1350_v10, %v8985_v42  ;;  %v1119_v59 = vpop.f32.mrf.mxu0  ;;  %v1352_v44 = vpop.f32.mrf.mxu1 }
 0x169   : > { %12362 = vst [vmem:[#allocation62_spill] sm:$0xff] %v9339_v9  ;;  %12363 = vst [vmem:[#allocation63_spill] sm:$0xff] %v9341_v12  ;;  %v9351_v40 = vpack.c.bf16 %v2179_v63, %v2172_v45  ;;  %v9354_v1 = vpack.c.bf16 %v2261_v29, %v2254_v3  ;;  %v1120_v17 = vadd.f32 %v1119_v59, %v8802_v34 }
 0x16a   : > { %v1353_v60 = vadd.f32 %v1352_v44, %v8997_v57  ;;  %v1121_v30 = vpop.f32.mrf.mxu0  ;;  %v1354_v37 = vpop.f32.mrf.mxu1  ;;  %v2185_v47 = vmax.f32 %v1351_v23, 0.0  ;;  %v2267_v8 = vmax.f32 %v1118_v18, 0.0 }
 0x16b   : > { %12364 = vst [vmem:[#allocation64_spill] sm:$0xff] %v9351_v40  ;;  %12365 = vst [vmem:[#allocation65_spill] sm:$0xff] %v9354_v1  ;;  %v1122_v16 = vadd.f32 %v1121_v30, %v8796_v31  ;;  %v1355_v10 = vadd.f32 %v1354_v37, %v8985_v42  ;;  %v2268_v48 = vmax.f32 %v1120_v17, 0.0  ;;  %v8338_v40 = vld [vmem:[%s8441_s26 + $0xa8] sm:$0xff]  }
 0x16c   : > { %v1123_v9 = vpop.f32.mrf.mxu0  ;;  %v1356_v45 = vpop.f32.mrf.mxu1  ;;  %v2186_v59 = vmax.f32 %v1353_v60, 0.0 }
 0x16d   : > { %v2274_v63 = vmax.f32 %v1122_v16, 0.0  ;;  %v2192_v12 = vmax.f32 %v1355_v10, 0.0  ;;  %v1124_v3 = vadd.f32 %v1123_v9, %v8802_v34  ;;  %v1357_v29 = vadd.f32 %v1356_v45, %v8997_v57 }
 0x16e   : > { %v1127_v44 = vpop.f32.mrf.mxu0  ;;  %v1360_v1 = vpop.f32.mrf.mxu1  ;;  %7548 = vmatmul.mubr.msk.bf16.gmra.mxu0 %vm822_vm1, %v8338_v40  ;;  %7914 = vmatmul.mubr.msk.bf16.gmra.mxu1 %vm822_vm1, %v9304_v22 }
 0x16f   : > { %v9366_v23 = vpack.c.bf16 %v2274_v63, %v2267_v8  ;;  %v9368_v18 = vpack.c.bf16 %v2192_v12, %v2185_v47  ;;  %v2275_v30 = vmax.f32 %v1124_v3, 0.0  ;;  %v2193_v37 = vmax.f32 %v1357_v29, 0.0  ;;  %1761 = vmatprep.mubr.bf16.mxu0 %v12339_v11  ;;  %7917 = vmatprep.mubr.msk.bf16.mxu1 %vm822_vm1, %v8337_v7 }
 0x170   : > { %v1128_v9 = vadd.f32 %v1127_v44, %v8796_v31  ;;  %v1361_v17 = vadd.f32 %v1360_v1, %v8985_v42  ;;  %v1129_v60 = vpop.f32.mrf.mxu0  ;;  %v1362_v16 = vpop.f32.mrf.mxu1 }
 0x171   : > { %12366 = vst [vmem:[#allocation66_spill] sm:$0xff] %v9366_v23  ;;  %12367 = vst [vmem:[#allocation67_spill] sm:$0xff] %v9368_v18  ;;  %v9374_v10 = vpack.c.bf16 %v2193_v37, %v2186_v59  ;;  %v9376_v45 = vpack.c.bf16 %v2275_v30, %v2268_v48  ;;  %v1130_v22 = vadd.f32 %v1129_v60, %v8802_v34  ;;  %v8339_v18 = vld [vmem:[%s8441_s26 + $0xb0] sm:$0xff]  }
 0x172   : > { %v1363_v12 = vadd.f32 %v1362_v16, %v8997_v57  ;;  %v1131_v47 = vpop.f32.mrf.mxu0  ;;  %v1364_v8 = vpop.f32.mrf.mxu1  ;;  %v2199_v63 = vmax.f32 %v1361_v17, 0.0  ;;  %v2281_v29 = vmax.f32 %v1128_v9, 0.0 }
 0x173   : > { %12368 = vst [vmem:[#allocation68_spill] sm:$0xff] %v9374_v10  ;;  %12369 = vst [vmem:[#allocation69_spill] sm:$0xff] %v9376_v45  ;;  %v1132_v7 = vadd.f32 %v1131_v47, %v8796_v31  ;;  %v1365_v3 = vadd.f32 %v1364_v8, %v8985_v42  ;;  %v2282_v37 = vmax.f32 %v1130_v22, 0.0 }
 0x174   : > { %v1133_v1 = vpop.f32.mrf.mxu0  ;;  %v1366_v44 = vpop.f32.mrf.mxu1  ;;  %v2200_v60 = vmax.f32 %v1363_v12, 0.0 }
 0x175   : > { %v2288_v23 = vmax.f32 %v1132_v7, 0.0  ;;  %v2206_v59 = vmax.f32 %v1365_v3, 0.0  ;;  %v1134_v48 = vadd.f32 %v1133_v1, %v8802_v34  ;;  %v1367_v30 = vadd.f32 %v1366_v44, %v8997_v57 }
 0x176   : > { %v1137_v16 = vpop.f32.mrf.mxu0  ;;  %v1370_v45 = vpop.f32.mrf.mxu1  ;;  %7549 = vmatmul.mubr.msk.bf16.gmra.mxu0 %vm822_vm1, %v8339_v18  ;;  %7918 = vmatmul.mubr.msk.bf16.gmra.mxu1 %vm822_vm1, %v8338_v40 }
 0x177   : > { %v9387_v17 = vpack.c.bf16 %v2288_v23, %v2281_v29  ;;  %v9389_v9 = vpack.c.bf16 %v2206_v59, %v2199_v63  ;;  %v2289_v47 = vmax.f32 %v1134_v48, 0.0  ;;  %v2207_v8 = vmax.f32 %v1367_v30, 0.0  ;;  %1771 = vmatprep.mubr.bf16.mxu0 %v12339_v11  ;;  %7921 = vmatprep.mubr.msk.bf16.mxu1 %vm822_vm1, %v8339_v18 }
 0x178   : > { %v1138_v22 = vadd.f32 %v1137_v16, %v8796_v31  ;;  %v1371_v12 = vadd.f32 %v1370_v45, %v8985_v42  ;;  %v1139_v7 = vpop.f32.mrf.mxu0  ;;  %v1372_v3 = vpop.f32.mrf.mxu1 }
 0x179   : > { %12370 = vst [vmem:[#allocation70_spill] sm:$0xff] %v9387_v17  ;;  %12371 = vst [vmem:[#allocation71_spill] sm:$0xff] %v9389_v9  ;;  %v9395_v1 = vpack.c.bf16 %v2207_v8, %v2200_v60  ;;  %v9397_v44 = vpack.c.bf16 %v2289_v47, %v2282_v37  ;;  %v1140_v40 = vadd.f32 %v1139_v7, %v8802_v34  ;;  %v8340_v9 = vld [vmem:[%s8441_s26 + $0xb8] sm:$0xff]  }
 0x17a   : > { %v1373_v23 = vadd.f32 %v1372_v3, %v8997_v57  ;;  %v1141_v63 = vpop.f32.mrf.mxu0  ;;  %v1374_v29 = vpop.f32.mrf.mxu1  ;;  %v2213_v59 = vmax.f32 %v1371_v12, 0.0  ;;  %v2295_v30 = vmax.f32 %v1138_v22, 0.0 }
 0x17b   : > { %12372 = vst [vmem:[#allocation72_spill] sm:$0xff] %v9395_v1  ;;  %12373 = vst [vmem:[#allocation73_spill] sm:$0xff] %v9397_v44  ;;  %v1142_v18 = vadd.f32 %v1141_v63, %v8796_v31  ;;  %v1375_v48 = vadd.f32 %v1374_v29, %v8985_v42  ;;  %v2296_v8 = vmax.f32 %v1140_v40, 0.0 }
 0x17c   : > { %v1143_v45 = vpop.f32.mrf.mxu0  ;;  %v1376_v16 = vpop.f32.mrf.mxu1  ;;  %v2214_v7 = vmax.f32 %v1373_v23, 0.0 }
 0x17d   : > { %v2302_v17 = vmax.f32 %v1142_v18, 0.0  ;;  %v2220_v60 = vmax.f32 %v1375_v48, 0.0  ;;  %v1144_v37 = vadd.f32 %v1143_v45, %v8802_v34  ;;  %v1377_v47 = vadd.f32 %v1376_v16, %v8997_v57 }
 0x17e   : > { %v1147_v3 = vpop.f32.mrf.mxu0  ;;  %v1380_v44 = vpop.f32.mrf.mxu1  ;;  %7550 = vmatmul.mubr.msk.bf16.gmra.mxu0 %vm822_vm1, %v8340_v9  ;;  %7922 = vmatmul.mubr.msk.bf16.gmra.mxu1 %vm822_vm1, %v8340_v9  ;;  %v477_v45 = vsub.s32 4, %v8781_v27 }
 0x17f   : > { %v9408_v12 = vpack.c.bf16 %v2302_v17, %v2295_v30  ;;  %v9410_v22 = vpack.c.bf16 %v2220_v60, %v2213_v59  ;;  %v2303_v63 = vmax.f32 %v1144_v37, 0.0  ;;  %v2221_v29 = vmax.f32 %v1377_v47, 0.0  ;;  %1781 = vmatprep.mubr.bf16.mxu0 %v12339_v11  ;;  %7925 = vmatprep.mubr.msk.bf16.mxu1 %vm822_vm1, %v8990_v55 }
 0x180   : > { %v1148_v40 = vadd.f32 %v1147_v3, %v8796_v31  ;;  %v1381_v23 = vadd.f32 %v1380_v44, %v8985_v42  ;;  %v1149_v18 = vpop.f32.mrf.mxu0  ;;  %v1382_v48 = vpop.f32.mrf.mxu1  ;;  %v481_v55 = vsub.s32 5, %v8781_v27 }
 0x181   : > { %12374 = vst [vmem:[#allocation74_spill] sm:$0xff] %v9408_v12  ;;  %12375 = vst [vmem:[#allocation75_spill] sm:$0xff] %v9410_v22  ;;  %v9418_v9 = vpack.c.bf16 %v2221_v29, %v2214_v7  ;;  %v9420_v17 = vpack.c.bf16 %v2303_v63, %v2296_v8  ;;  %v1150_v59 = vadd.f32 %v1149_v18, %v8802_v34  ;;  %v9430_v8 = vld [vmem:[%s12110_s2] sm:$0x7f] }
 0x182   : > { %v1383_v30 = vadd.f32 %v1382_v48, %v8997_v57  ;;  %v1151_v16 = vpop.f32.mrf.mxu0  ;;  %v1384_v60 = vpop.f32.mrf.mxu1  ;;  %v2227_v37 = vmax.f32 %v1381_v23, 0.0  ;;  %v2309_v3 = vmax.f32 %v1148_v40, 0.0  ;;  %v9433_v63 = vrot.slane %v9430_v8, %v477_v45 }
 0x183   : > { %12376 = vst [vmem:[#allocation76_spill] sm:$0xff] %v9418_v9  ;;  %12377 = vst [vmem:[#allocation77_spill] sm:$0xff] %v9420_v17  ;;  %v1152_v44 = vadd.f32 %v1151_v16, %v8796_v31  ;;  %v1385_v47 = vadd.f32 %v1384_v60, %v8985_v42  ;;  %v2310_v31 = vmax.f32 %v1150_v59, 0.0  ;;  %v8342_v17 = vld [vmem:[%s8441_s26 + $0xc0] sm:$0xff]   ;;  %v9442_v22 = vrot.slane %v9430_v8, %v481_v55 }
 0x184   : > { %v1153_v12 = vpop.f32.mrf.mxu0  ;;  %v1386_v7 = vpop.f32.mrf.mxu1  ;;  %v2228_v16 = vmax.f32 %v1383_v30, 0.0 }
 0x185   : > { %v2316_v29 = vmax.f32 %v1152_v44, 0.0  ;;  %v2234_v18 = vmax.f32 %v1385_v47, 0.0  ;;  %v1154_v23 = vadd.f32 %v1153_v12, %v8802_v34  ;;  %v1387_v48 = vadd.f32 %v1386_v7, %v8997_v57 }
 0x186   : > { %v1390_v60 = vpop.f32.mrf.mxu1  ;;  %v1543_v40 = vpop.f32.mrf.mxu0  ;;  %7551 = vmatmul.mubr.msk.bf16.gmra.mxu0 %vm822_vm1, %v8342_v17  ;;  %7926 = vmatmul.mubr.msk.bf16.gmra.mxu1 %vm822_vm1, %v9018_v49 }
 0x187   : > { %v9444_v45 = vpack.c.bf16 %v2316_v29, %v2309_v3  ;;  %v9446_v44 = vpack.c.bf16 %v2234_v18, %v2227_v37  ;;  %v2317_v34 = vmax.f32 %v1154_v23, 0.0  ;;  %v2235_v12 = vmax.f32 %v1387_v48, 0.0  ;;  %3687 = vmatprep.mubr.bf16.mxu1 %v8835_v13  ;;  %1791 = vmatprep.mubr.bf16.mxu0 %v12339_v11 }
 0x188   : > { %v1391_v59 = vadd.f32 %v1390_v60, %v8985_v42  ;;  %v1544_v17 = vadd.f32 %v1543_v40, %v9433_v63  ;;  %v1392_v30 = vpop.f32.mrf.mxu1  ;;  %v1545_v47 = vpop.f32.mrf.mxu0 }
 0x189   : > { %12378 = vst [vmem:[#allocation78_spill] sm:$0xff] %v9444_v45  ;;  %12379 = vst [vmem:[#allocation79_spill] sm:$0xff] %v9446_v44  ;;  %v9452_v49 = vpack.c.bf16 %v2235_v12, %v2228_v16  ;;  %v9454_v55 = vpack.c.bf16 %v2317_v34, %v2310_v31  ;;  %v1393_v3 = vadd.f32 %v1392_v30, %v8997_v57  ;;  %v8187_v31 = vld [vmem:[%s12111_s3 + $0x3a8] ss:$12 sps:$4 sm:$0xff]  }
 0x18a   : > { %v1546_v37 = vadd.f32 %v1545_v47, %v9442_v22  ;;  %v1394_v7 = vpop.f32.mrf.mxu1  ;;  %v1547_v29 = vpop.f32.mrf.mxu0  ;;  %v2241_v18 = vmax.f32 %v1391_v59, 0.0  ;;  %v2047_v60 = vmax.f32 %v1544_v17, 0.0  ;;  %v8195_v59 = vld [vmem:[%s12111_s3 + $0x394] ss:$12 sps:$4 sm:$0xff]   ;;  %v8343_v45 = vld [vmem:[%s8441_s26 + $0xc8] sm:$0xff]  }
 0x18b   : > { %12380 = vst [vmem:[#allocation80_spill] sm:$0xff] %v9452_v49  ;;  %12381 = vst [vmem:[#allocation81_spill] sm:$0xff] %v9454_v55  ;;  %v1395_v23 = vadd.f32 %v1394_v7, %v8985_v42  ;;  %v1548_v48 = vadd.f32 %v1547_v29, %v9433_v63  ;;  %v2242_v47 = vmax.f32 %v1393_v3, 0.0 }
 0x18c   : > { %v1396_v40 = vpop.f32.mrf.mxu1  ;;  %v1549_v13 = vpop.f32.mrf.mxu0  ;;  %v2048_v7 = vmax.f32 %v1546_v37, 0.0 }
 0x18d   : > { %v2248_v16 = vmax.f32 %v1395_v23, 0.0  ;;  %v2054_v34 = vmax.f32 %v1548_v48, 0.0  ;;  %v1397_v12 = vadd.f32 %v1396_v40, %v8997_v57  ;;  %v1550_v30 = vadd.f32 %v1549_v13, %v9442_v22 }
 0x18e   : > { %v1400_v29 = vpop.f32.mrf.mxu1  ;;  %v1553_v17 = vpop.f32.mrf.mxu0  ;;  %7552 = vmatmul.mubr.msk.bf16.gmra.mxu0 %vm822_vm1, %v8343_v45  ;;  %3688 = vmatmul.mubr.bf16.vlgmr.msra.gmra.mxu1 %v8824_v6  ;;  %v8192_v45 = vld [vmem:[%s12111_s3 + $0x480] ss:$12 sps:$4 sm:$0x3f]  }
 0x18f   : > { %v9471_v55 = vpack.c.bf16 %v2248_v16, %v2241_v18  ;;  %v9473_v23 = vpack.c.bf16 %v2054_v34, %v2047_v60  ;;  %v2249_v48 = vmax.f32 %v1397_v12, 0.0  ;;  %v2055_v40 = vmax.f32 %v1550_v30, 0.0  ;;  %3697 = vmatprep.mubr.bf16.mxu1 %v8869_v51  ;;  %3980 = vmatprep.mubr.bf16.mxu0 %v9033_v19  ;;  %v8193_v18 = vld [vmem:[%s12111_s3 + $0x390] ss:$12 sps:$4 sm:$0xff]  }
 0x190   : > { %v1401_v13 = vadd.f32 %v1400_v29, %v8985_v42  ;;  %v1554_v3 = vadd.f32 %v1553_v17, %v9433_v63  ;;  %v1402_v37 = vpop.f32.mrf.mxu1  ;;  %v1555_v44 = vpop.f32.mrf.mxu0  ;;  %4242 = vmatpush1.bf16.msra.mxu1 %v8187_v31  ;;  %v8198_v60 = vld [vmem:[%s12111_s3 + $0x37c] ss:$12 sps:$4 sm:$0xff]  }
 0x191   : > { %12382 = vst [vmem:[#allocation82_spill] sm:$0xff] %v9471_v55  ;;  %12383 = vst [vmem:[#allocation83_spill] sm:$0xff] %v9473_v23  ;;  %4243 = vmatprep.subr.bf16.mxu1 %v8195_v59  ;;  %v9488_v16 = vpack.c.bf16 %v2249_v48, %v2242_v47  ;;  %v9490_v34 = vpack.c.bf16 %v2055_v40, %v2048_v7  ;;  %v1403_v12 = vadd.f32 %v1402_v37, %v8997_v57  ;;  %v8196_v47 = vld [vmem:[%s12111_s3 + $0x378] ss:$12 sps:$4 sm:$0xff]  }
 0x192   : > { %v1556_v31 = vadd.f32 %v1555_v44, %v9442_v22  ;;  %v1404_v30 = vpop.f32.mrf.mxu1  ;;  %v1557_v29 = vpop.f32.mrf.mxu0  ;;  %v2255_v17 = vmax.f32 %v1401_v13, 0.0  ;;  %v2061_v59 = vmax.f32 %v1554_v3, 0.0  ;;  %v3647_v55 = vsel %vm3645_vm2, %v8192_v45, 0  ;;  %v8201_v13 = vld [vmem:[%s12111_s3 + $0x364] ss:$12 sps:$4 sm:$0xff]  }
 0x193   : > { %12384 = vst [vmem:[#allocation84_spill] sm:$0xff] %v9488_v16  ;;  %12385 = vst [vmem:[#allocation85_spill] sm:$0xff] %v9490_v34  ;;  %v1405_v19 = vadd.f32 %v1404_v30, %v8985_v42  ;;  %v1558_v51 = vadd.f32 %v1557_v29, %v9433_v63  ;;  %v2256_v3 = vmax.f32 %v1403_v12, 0.0  ;;  %v8199_v29 = vld [vmem:[%s12111_s3 + $0x360] ss:$12 sps:$4 sm:$0xff]  }
 0x194   : > { %v1406_v6 = vpop.f32.mrf.mxu1  ;;  %v1559_v23 = vpop.f32.mrf.mxu0  ;;  %4244 = vmatpush1.bf16.msra.mxu1 %v8193_v18  ;;  %v2062_v37 = vmax.f32 %v1556_v31, 0.0 }
 0x195   : > { %v2262_v7 = vmax.f32 %v1405_v19, 0.0  ;;  %v2068_v48 = vmax.f32 %v1558_v51, 0.0  ;;  %v1407_v44 = vadd.f32 %v1406_v6, %v8997_v57  ;;  %v1560_v40 = vadd.f32 %v1559_v23, %v9442_v22  ;;  %4245 = vmatprep.subr.bf16.mxu1 %v8198_v60 }
 0x196   : > { %v1410_v30 = vpop.f32.mrf.mxu1  ;;  %v1563_v45 = vpop.f32.mrf.mxu0  ;;  %3698 = vmatmul.mubr.bf16.gmra.mxu1 %v8858_v43  ;;  %3981 = vmatmul.mubr.bf16.vlgmr.msra.gmra.mxu0 %v9026_v50 }
 0x197   : > { %v9507_v18 = vpack.c.bf16 %v2262_v7, %v2255_v17  ;;  %v9509_v51 = vpack.c.bf16 %v2068_v48, %v2061_v59  ;;  %v2263_v6 = vmax.f32 %v1407_v44, 0.0  ;;  %v2069_v19 = vmax.f32 %v1560_v40, 0.0  ;;  %3707 = vmatprep.mubr.bf16.mxu1 %v8903_v38  ;;  %3990 = vmatprep.mubr.bf16.mxu0 %v9068_v35  ;;  %v8204_v59 = vld [vmem:[%s12111_s3 + $0x34c] ss:$12 sps:$4 sm:$0xff]  }
 0x198   : > { %v1411_v23 = vadd.f32 %v1410_v30, %v8985_v42  ;;  %v1564_v60 = vadd.f32 %v1563_v45, %v9433_v63  ;;  %v1412_v12 = vpop.f32.mrf.mxu1  ;;  %v1565_v31 = vpop.f32.mrf.mxu0  ;;  %4549 = vmatpush1.bf16.msra.mxu0 %v3647_v55  ;;  %4246 = vmatpush1.bf16.msra.mxu1 %v8196_v47 }
 0x199   : > { %12386 = vst [vmem:[#allocation86_spill] sm:$0xff] %v9507_v18  ;;  %12387 = vst [vmem:[#allocation87_spill] sm:$0xff] %v9509_v51  ;;  %v9518_v17 = vpack.c.bf16 %v2263_v6, %v2256_v3  ;;  %4247 = vmatprep.subr.bf16.mxu1 %v8201_v13  ;;  %v9523_v7 = vpack.c.bf16 %v2069_v19, %v2062_v37  ;;  %v1413_v48 = vadd.f32 %v1412_v12, %v8997_v57  ;;  %v8202_v37 = vld [vmem:[%s12111_s3 + $0x348] ss:$12 sps:$4 sm:$0xff]  }
 0x19a   : > { %v1566_v44 = vadd.f32 %v1565_v31, %v9442_v22  ;;  %v1414_v40 = vpop.f32.mrf.mxu1  ;;  %v1567_v55 = vpop.f32.mrf.mxu0  ;;  %5068 = vmatprep.subr.bf16.mxu0 %v12339_v11  ;;  %v2269_v47 = vmax.f32 %v1411_v23, 0.0  ;;  %v2075_v13 = vmax.f32 %v1564_v60, 0.0 }
 0x19b   : > { %12388 = vst [vmem:[#allocation88_spill] sm:$0xff] %v9518_v17  ;;  %12389 = vst [vmem:[#allocation89_spill] sm:$0xff] %v9523_v7  ;;  %v1415_v30 = vadd.f32 %v1414_v40, %v8985_v42  ;;  %v1568_v3 = vadd.f32 %v1567_v55, %v9433_v63  ;;  %v2270_v23 = vmax.f32 %v1413_v48, 0.0 }
 0x19c   : > { %v1416_v45 = vpop.f32.mrf.mxu1  ;;  %v1569_v6 = vpop.f32.mrf.mxu0  ;;  %4248 = vmatpush1.bf16.msra.mxu1 %v8199_v29  ;;  %v2076_v38 = vmax.f32 %v1566_v44, 0.0 }
 0x19d   : > { %v2276_v19 = vmax.f32 %v1415_v30, 0.0  ;;  %v2082_v12 = vmax.f32 %v1568_v3, 0.0  ;;  %v1417_v31 = vadd.f32 %v1416_v45, %v8997_v57  ;;  %v1570_v35 = vadd.f32 %v1569_v6, %v9442_v22  ;;  %4249 = vmatprep.subr.bf16.mxu1 %v8204_v59 }
 0x19e   : > { %v1420_v40 = vpop.f32.mrf.mxu1  ;;  %v1573_v50 = vpop.f32.mrf.mxu0  ;;  %3708 = vmatmul.mubr.bf16.gmra.mxu1 %v8892_v26  ;;  %3991 = vmatmul.mubr.bf16.gmra.mxu0 %v9055_v15 }
 0x19f   : > { %v9537_v60 = vpack.c.bf16 %v2276_v19, %v2269_v47  ;;  %v9539_v29 = vpack.c.bf16 %v2082_v12, %v2075_v13  ;;  %v2277_v55 = vmax.f32 %v1417_v31, 0.0  ;;  %v2083_v30 = vmax.f32 %v1570_v35, 0.0  ;;  %3717 = vmatprep.mubr.bf16.mxu1 %v8937_v24  ;;  %4000 = vmatprep.mubr.bf16.mxu0 %v9103_v53 }
 0x1a0   : > { %v1421_v59 = vadd.f32 %v1420_v40, %v8985_v42  ;;  %v1574_v48 = vadd.f32 %v1573_v50, %v9433_v63  ;;  %v1422_v44 = vpop.f32.mrf.mxu1  ;;  %v1575_v3 = vpop.f32.mrf.mxu0  ;;  %4250 = vmatpush1.bf16.msra.mxu1 %v8202_v37 }
 0x1a1   : > { %12390 = vst [vmem:[#allocation90_spill] sm:$0xff] %v9537_v60  ;;  %12391 = vst [vmem:[#allocation91_spill] sm:$0xff] %v9539_v29  ;;  %v9545_v45 = vpack.c.bf16 %v2277_v55, %v2270_v23  ;;  %v9547_v6 = vpack.c.bf16 %v2083_v30, %v2076_v38  ;;  %v1423_v47 = vadd.f32 %v1422_v44, %v8997_v57 }
 0x1a2   : > { %v1576_v13 = vadd.f32 %v1575_v3, %v9442_v22  ;;  %v1424_v35 = vpop.f32.mrf.mxu1  ;;  %v1577_v19 = vpop.f32.mrf.mxu0  ;;  %v2283_v12 = vmax.f32 %v1421_v59, 0.0  ;;  %v2089_v53 = vmax.f32 %v1574_v48, 0.0 }
 0x1a3   : > { %12392 = vst [vmem:[#allocation92_spill] sm:$0xff] %v9545_v45  ;;  %12393 = vst [vmem:[#allocation93_spill] sm:$0xff] %v9547_v6  ;;  %v1425_v31 = vadd.f32 %v1424_v35, %v8985_v42  ;;  %v1578_v40 = vadd.f32 %v1577_v19, %v9433_v63  ;;  %v2284_v55 = vmax.f32 %v1423_v47, 0.0  ;;  %v8207_v47 = vld [vmem:[%s12111_s3 + $0x334] ss:$12 sps:$4 sm:$0xff]  }
 0x1a4   : > { %v1426_v50 = vpop.f32.mrf.mxu1  ;;  %v1579_v24 = vpop.f32.mrf.mxu0  ;;  %v2090_v30 = vmax.f32 %v1576_v13, 0.0  ;;  %4251 = vmatprep.subr.bf16.mxu1 %v8207_v47 }
 0x1a5   : > { %v2290_v15 = vmax.f32 %v1425_v31, 0.0  ;;  %v2096_v37 = vmax.f32 %v1578_v40, 0.0  ;;  %v1427_v23 = vadd.f32 %v1426_v50, %v8997_v57  ;;  %v1580_v38 = vadd.f32 %v1579_v24, %v9442_v22  ;;  %v8205_v24 = vld [vmem:[%s12111_s3 + $0x330] ss:$12 sps:$4 sm:$0xff]  }
 0x1a6   : > { %v1430_v44 = vpop.f32.mrf.mxu1  ;;  %v1583_v3 = vpop.f32.mrf.mxu0  ;;  %3718 = vmatmul.mubr.bf16.gmra.mxu1 %v8926_v54  ;;  %4001 = vmatmul.mubr.bf16.gmra.mxu0 %v9090_v46 }
 0x1a7   : > { %v9557_v59 = vpack.c.bf16 %v2290_v15, %v2283_v12  ;;  %v9559_v35 = vpack.c.bf16 %v2096_v37, %v2089_v53  ;;  %v2291_v48 = vmax.f32 %v1427_v23, 0.0  ;;  %v2097_v19 = vmax.f32 %v1580_v38, 0.0  ;;  %3727 = vmatprep.mubr.bf16.mxu1 %v8972_v20  ;;  %4010 = vmatprep.mubr.bf16.mxu0 %v9138_v32 }
 0x1a8   : > { %v1431_v13 = vadd.f32 %v1430_v44, %v8985_v42  ;;  %v1584_v15 = vadd.f32 %v1583_v3, %v9433_v63  ;;  %v1432_v53 = vpop.f32.mrf.mxu1  ;;  %v1585_v12 = vpop.f32.mrf.mxu0  ;;  %4252 = vmatpush1.bf16.msra.mxu1 %v8205_v24 }
 0x1a9   : > { %12394 = vst [vmem:[#allocation94_spill] sm:$0xff] %v9557_v59  ;;  %12395 = vst [vmem:[#allocation95_spill] sm:$0xff] %v9559_v35  ;;  %v9571_v31 = vpack.c.bf16 %v2291_v48, %v2284_v55  ;;  %v9573_v40 = vpack.c.bf16 %v2097_v19, %v2090_v30  ;;  %v1433_v50 = vadd.f32 %v1432_v53, %v8997_v57 }
 0x1aa   : > { %v1586_v37 = vadd.f32 %v1585_v12, %v9442_v22  ;;  %v1434_v23 = vpop.f32.mrf.mxu1  ;;  %v1587_v38 = vpop.f32.mrf.mxu0  ;;  %v2297_v32 = vmax.f32 %v1431_v13, 0.0  ;;  %v2103_v3 = vmax.f32 %v1584_v15, 0.0 }
 0x1ab   : > { %12396 = vst [vmem:[#allocation96_spill] sm:$0xff] %v9571_v31  ;;  %12397 = vst [vmem:[#allocation97_spill] sm:$0xff] %v9573_v40  ;;  %v1435_v20 = vadd.f32 %v1434_v23, %v8985_v42  ;;  %v1588_v44 = vadd.f32 %v1587_v38, %v9433_v63  ;;  %v2298_v47 = vmax.f32 %v1433_v50, 0.0 }
 0x1ac   : > { %v1436_v46 = vpop.f32.mrf.mxu1  ;;  %v1589_v54 = vpop.f32.mrf.mxu0  ;;  %v2104_v53 = vmax.f32 %v1586_v37, 0.0 }
 0x1ad   : > { %v2304_v55 = vmax.f32 %v1435_v20, 0.0  ;;  %v2110_v48 = vmax.f32 %v1588_v44, 0.0  ;;  %v1437_v30 = vadd.f32 %v1436_v46, %v8997_v57  ;;  %v1590_v19 = vadd.f32 %v1589_v54, %v9442_v22 }
 0x1ae   : > { %v1440_v12 = vpop.f32.mrf.mxu1  ;;  %v1593_v26 = vpop.f32.mrf.mxu0  ;;  %3728 = vmatmul.mubr.bf16.gmra.mxu1 %v8960_v5  ;;  %4011 = vmatmul.mubr.bf16.gmra.mxu0 %v9125_v4 }
 0x1af   : > { %v9583_v24 = vpack.c.bf16 %v2304_v55, %v2297_v32  ;;  %v9585_v13 = vpack.c.bf16 %v2110_v48, %v2103_v3  ;;  %v2305_v15 = vmax.f32 %v1437_v30, 0.0  ;;  %v2111_v23 = vmax.f32 %v1590_v19, 0.0  ;;  %3737 = vmatprep.mubr.bf16.mxu1 %v9007_v62  ;;  %4020 = vmatprep.mubr.bf16.mxu0 %v9173_v2  ;;  %v8208_v48 = vld [vmem:[%s12111_s3 + $0x318] ss:$12 sps:$4 sm:$0xff]  }
 0x1b0   : > { %v1441_v54 = vadd.f32 %v1440_v12, %v8985_v42  ;;  %v1594_v20 = vadd.f32 %v1593_v26, %v9433_v63  ;;  %v1442_v46 = vpop.f32.mrf.mxu1  ;;  %v1595_v50 = vpop.f32.mrf.mxu0  ;;  %v8210_v26 = vld [vmem:[%s12111_s3 + $0x31c] ss:$12 sps:$4 sm:$0xff]  }
 0x1b1   : > { %12398 = vst [vmem:[#allocation98_spill] sm:$0xff] %v9583_v24  ;;  %12399 = vst [vmem:[#allocation99_spill] sm:$0xff] %v9585_v13  ;;  %v9591_v37 = vpack.c.bf16 %v2305_v15, %v2298_v47  ;;  %v9593_v38 = vpack.c.bf16 %v2111_v23, %v2104_v53  ;;  %v1443_v32 = vadd.f32 %v1442_v46, %v8997_v57  ;;  %4253 = vmatprep.subr.bf16.mxu1 %v8210_v26 }
 0x1b2   : > { %v1596_v44 = vadd.f32 %v1595_v50, %v9442_v22  ;;  %v1444_v3 = vpop.f32.mrf.mxu1  ;;  %v1597_v55 = vpop.f32.mrf.mxu0  ;;  %v2311_v30 = vmax.f32 %v1441_v54, 0.0  ;;  %v2117_v53 = vmax.f32 %v1594_v20, 0.0  ;;  %4254 = vmatpush1.bf16.msra.mxu1 %v8208_v48 }
 0x1b3   : > { %12400 = vst [vmem:[#allocation100_spill] sm:$0xff] %v9591_v37  ;;  %12401 = vst [vmem:[#allocation101_spill] sm:$0xff] %v9593_v38  ;;  %v1445_v19 = vadd.f32 %v1444_v3, %v8985_v42  ;;  %v1598_v47 = vadd.f32 %v1597_v55, %v9433_v63  ;;  %v2312_v62 = vmax.f32 %v1443_v32, 0.0 }
 0x1b4   : > { %v1446_v12 = vpop.f32.mrf.mxu1  ;;  %v1599_v15 = vpop.f32.mrf.mxu0  ;;  %v2118_v4 = vmax.f32 %v1596_v44, 0.0 }
 0x1b5   : > { %v2318_v23 = vmax.f32 %v1445_v19, 0.0  ;;  %v2124_v46 = vmax.f32 %v1598_v47, 0.0  ;;  %v1447_v50 = vadd.f32 %v1446_v12, %v8997_v57  ;;  %v1600_v2 = vadd.f32 %v1599_v15, %v9442_v22 }
 0x1b6   : > { %v1450_v5 = vpop.f32.mrf.mxu1  ;;  %v1603_v43 = vpop.f32.mrf.mxu0  ;;  %3738 = vmatmul.mubr.bf16.gmra.mxu1 %v8999_v58  ;;  %4021 = vmatmul.mubr.bf16.gmra.mxu0 %v9160_v21 }
 0x1b7   : > { %v9609_v54 = vpack.c.bf16 %v2318_v23, %v2311_v30  ;;  %v9611_v20 = vpack.c.bf16 %v2124_v46, %v2117_v53  ;;  %v2319_v3 = vmax.f32 %v1447_v50, 0.0  ;;  %v2125_v55 = vmax.f32 %v1600_v2, 0.0  ;;  %3747 = vmatprep.mubr.bf16.mxu1 %v9035_v0  ;;  %4030 = vmatprep.mubr.bf16.mxu0 %v9211_v25  ;;  %v8213_v30 = vld [vmem:[%s12111_s3 + $0x304] ss:$12 sps:$4 sm:$0xff]   ;;  %v8216_v25 = vld [vmem:[%s12111_s3 + $0x46c] ss:$12 sps:$4 sm:$0xff]  }
 0x1b8   : > { %v1451_v48 = vadd.f32 %v1450_v5, %v8985_v42  ;;  %v1604_v32 = vadd.f32 %v1603_v43, %v9433_v63  ;;  %v1452_v44 = vpop.f32.mrf.mxu1  ;;  %v1605_v26 = vpop.f32.mrf.mxu0  ;;  %v8211_v43 = vld [vmem:[%s12111_s3 + $0x300] ss:$12 sps:$4 sm:$0xff]   ;;  %4255 = vmatprep.subr.bf16.mxu1 %v8213_v30 }
 0x1b9   : > { %12402 = vst [vmem:[#allocation102_spill] sm:$0xff] %v9609_v54  ;;  %12403 = vst [vmem:[#allocation103_spill] sm:$0xff] %v9611_v20  ;;  %v9617_v19 = vpack.c.bf16 %v2319_v3, %v2312_v62  ;;  %v9622_v47 = vpack.c.bf16 %v2125_v55, %v2118_v4  ;;  %v1453_v2 = vadd.f32 %v1452_v44, %v8997_v57  ;;  %4256 = vmatpush1.bf16.msra.mxu1 %v8211_v43 }
 0x1ba   : > { %v1606_v53 = vadd.f32 %v1605_v26, %v9442_v22  ;;  %v1454_v12 = vpop.f32.mrf.mxu1  ;;  %v1607_v15 = vpop.f32.mrf.mxu0  ;;  %v2325_v5 = vmax.f32 %v1451_v48, 0.0  ;;  %v2131_v46 = vmax.f32 %v1604_v32, 0.0  ;;  %v8214_v32 = vld [vmem:[%s12111_s3 + $0x468] ss:$12 sps:$4 sm:$0xff]   ;;  %4257 = vmatprep.subr.bf16.mxu1 %v8216_v25 }
 0x1bb   : > { %12404 = vst [vmem:[#allocation104_spill] sm:$0xff] %v9617_v19  ;;  %12405 = vst [vmem:[#allocation105_spill] sm:$0xff] %v9622_v47  ;;  %v1455_v62 = vadd.f32 %v1454_v12, %v8985_v42  ;;  %v1608_v23 = vadd.f32 %v1607_v15, %v9433_v63  ;;  %v2326_v48 = vmax.f32 %v1453_v2, 0.0 }
 0x1bc   : > { %v1456_v50 = vpop.f32.mrf.mxu1  ;;  %v1609_v4 = vpop.f32.mrf.mxu0  ;;  %v2132_v0 = vmax.f32 %v1606_v53, 0.0 }
 0x1bd   : > { %v2332_v3 = vmax.f32 %v1455_v62, 0.0  ;;  %v2138_v55 = vmax.f32 %v1608_v23, 0.0  ;;  %v1457_v44 = vadd.f32 %v1456_v50, %v8997_v57  ;;  %v1610_v26 = vadd.f32 %v1609_v4, %v9442_v22  ;;  %4258 = vmatpush2.bf16.msra.mxu1 %v8214_v32 }
 0x1be   : > { %v1460_v12 = vpop.f32.mrf.mxu1  ;;  %v1613_v21 = vpop.f32.mrf.mxu0  ;;  %3748 = vmatmul.mubr.bf16.gmra.mxu1 %v9024_v56  ;;  %4031 = vmatmul.mubr.bf16.gmra.mxu0 %v9198_v39 }
 0x1bf   : > { %v9641_v30 = vpack.c.bf16 %v2332_v3, %v2325_v5  ;;  %v9643_v15 = vpack.c.bf16 %v2138_v55, %v2131_v46  ;;  %v2333_v43 = vmax.f32 %v1457_v44, 0.0  ;;  %v2139_v62 = vmax.f32 %v1610_v26, 0.0  ;;  %3757 = vmatprep.mubr.bf16.mxu1 %v9070_v36  ;;  %4040 = vmatprep.mubr.bf16.mxu0 %v9249_v52  ;;  %v8219_v5 = vld [vmem:[%s12111_s3 + $0x454] ss:$12 sps:$4 sm:$0xff]   ;;  %v8222_v36 = vld [vmem:[%s12111_s3 + $0x43c] ss:$12 sps:$4 sm:$0xff]  }
 0x1c0   : > { %v1461_v2 = vadd.f32 %v1460_v12, %v8985_v42  ;;  %v1614_v53 = vadd.f32 %v1613_v21, %v9433_v63  ;;  %v1462_v23 = vpop.f32.mrf.mxu1  ;;  %v1615_v50 = vpop.f32.mrf.mxu0  ;;  %v8217_v21 = vld [vmem:[%s12111_s3 + $0x450] ss:$12 sps:$4 sm:$0xff]   ;;  %4259 = vmatprep.subr.bf16.mxu1 %v8219_v5 }
 0x1c1   : > { %12406 = vst [vmem:[#allocation106_spill] sm:$0xff] %v9641_v30  ;;  %12407 = vst [vmem:[#allocation107_spill] sm:$0xff] %v9643_v15  ;;  %v9649_v4 = vpack.c.bf16 %v2333_v43, %v2326_v48  ;;  %v9654_v46 = vpack.c.bf16 %v2139_v62, %v2132_v0  ;;  %v1463_v3 = vadd.f32 %v1462_v23, %v8997_v57  ;;  %4260 = vmatpush2.bf16.msra.mxu1 %v8217_v21 }
 0x1c2   : > { %v1616_v55 = vadd.f32 %v1615_v50, %v9442_v22  ;;  %v1464_v44 = vpop.f32.mrf.mxu1  ;;  %v1617_v26 = vpop.f32.mrf.mxu0  ;;  %v2339_v25 = vmax.f32 %v1461_v2, 0.0  ;;  %v2145_v32 = vmax.f32 %v1614_v53, 0.0  ;;  %v8220_v53 = vld [vmem:[%s12111_s3 + $0x438] ss:$12 sps:$4 sm:$0xff]   ;;  %4261 = vmatprep.subr.bf16.mxu1 %v8222_v36 }
 0x1c3   : > { %12408 = vst [vmem:[#allocation108_spill] sm:$0xff] %v9649_v4  ;;  %12409 = vst [vmem:[#allocation109_spill] sm:$0xff] %v9654_v46  ;;  %v1465_v48 = vadd.f32 %v1464_v44, %v8985_v42  ;;  %v1618_v12 = vadd.f32 %v1617_v26, %v9433_v63  ;;  %v2340_v2 = vmax.f32 %v1463_v3, 0.0  ;;  %v12412_v3 = vld [vmem:[#allocation56_spill] sm:$0xff] }
 0x1c4   : > { %v1466_v43 = vpop.f32.mrf.mxu1  ;;  %v1619_v0 = vpop.f32.mrf.mxu0  ;;  %v2146_v39 = vmax.f32 %v1616_v55, 0.0 }
 0x1c5   : > { %v2346_v62 = vmax.f32 %v1465_v48, 0.0  ;;  %v2152_v52 = vmax.f32 %v1618_v12, 0.0  ;;  %v1467_v23 = vadd.f32 %v1466_v43, %v8997_v57  ;;  %v1620_v50 = vadd.f32 %v1619_v0, %v9442_v22  ;;  %4262 = vmatpush2.bf16.msra.mxu1 %v8220_v53 }
 0x1c6   : > { %v1470_v44 = vpop.f32.mrf.mxu1  ;;  %v1623_v56 = vpop.f32.mrf.mxu0  ;;  %3758 = vmatmul.mubr.bf16.gmra.mxu1 %v9053_v14  ;;  %4041 = vmatmul.mubr.bf16.gmra.mxu0 %v9236_v28 }
 0x1c7   : > { %v9673_v5 = vpack.c.bf16 %v2346_v62, %v2339_v25  ;;  %v9675_v26 = vpack.c.bf16 %v2152_v52, %v2145_v32  ;;  %v2347_v21 = vmax.f32 %v1467_v23, 0.0  ;;  %v2153_v48 = vmax.f32 %v1620_v50, 0.0  ;;  %3767 = vmatprep.mubr.bf16.mxu1 %v9105_v61  ;;  %4050 = vmatprep.mubr.bf16.mxu0 %v12412_v3  ;;  %v8225_v52 = vld [vmem:[%s12111_s3 + $0x424] ss:$12 sps:$4 sm:$0xff]   ;;  %v8228_v61 = vld [vmem:[%s12111_s3 + $0x40c] ss:$12 sps:$4 sm:$0xff]  }
 0x1c8   : > { %v1471_v55 = vadd.f32 %v1470_v44, %v8985_v42  ;;  %v1624_v12 = vadd.f32 %v1623_v56, %v9433_v63  ;;  %v1472_v43 = vpop.f32.mrf.mxu1  ;;  %v1625_v0 = vpop.f32.mrf.mxu0  ;;  %v8223_v56 = vld [vmem:[%s12111_s3 + $0x420] ss:$12 sps:$4 sm:$0xff]   ;;  %4263 = vmatprep.subr.bf16.mxu1 %v8225_v52  ;;  %v8226_v52 = vld [vmem:[%s12111_s3 + $0x408] ss:$12 sps:$4 sm:$0xff]  }
 0x1c9   : > { %12410 = vst [vmem:[#allocation110_spill] sm:$0xff] %v9673_v5  ;;  %12411 = vst [vmem:[#allocation111_spill] sm:$0xff] %v9675_v26  ;;  %v9681_v28 = vpack.c.bf16 %v2347_v21, %v2340_v2  ;;  %v9686_v25 = vpack.c.bf16 %v2153_v48, %v2146_v39  ;;  %v1473_v32 = vadd.f32 %v1472_v43, %v8997_v57  ;;  %4264 = vmatpush2.bf16.msra.mxu1 %v8223_v56 }
 0x1ca   : > { %v1626_v62 = vadd.f32 %v1625_v0, %v9442_v22  ;;  %v1474_v23 = vpop.f32.mrf.mxu1  ;;  %v1627_v50 = vpop.f32.mrf.mxu0  ;;  %v2353_v36 = vmax.f32 %v1471_v55, 0.0  ;;  %v2159_v53 = vmax.f32 %v1624_v12, 0.0  ;;  %v12416_v12 = vld [vmem:[#allocation55_spill] sm:$0xff]  ;;  %4265 = vmatprep.subr.bf16.mxu1 %v8228_v61 }
 0x1cb   : > { %12413 = vst [vmem:[#allocation112_spill] sm:$0xff] %v9681_v28  ;;  %12414 = vst [vmem:[#allocation113_spill] sm:$0xff] %v9686_v25  ;;  %v1475_v2 = vadd.f32 %v1474_v23, %v8985_v42  ;;  %v1628_v44 = vadd.f32 %v1627_v50, %v9433_v63  ;;  %v2354_v55 = vmax.f32 %v1473_v32, 0.0  ;;  %v12415_v50 = vld [vmem:[#allocation34_spill] sm:$0xff] }
 0x1cc   : > { %v1476_v21 = vpop.f32.mrf.mxu1  ;;  %v1629_v39 = vpop.f32.mrf.mxu0  ;;  %v2160_v14 = vmax.f32 %v1626_v62, 0.0 }
 0x1cd   : > { %v2360_v48 = vmax.f32 %v1475_v2, 0.0  ;;  %v2166_v3 = vmax.f32 %v1628_v44, 0.0  ;;  %v1477_v43 = vadd.f32 %v1476_v21, %v8997_v57  ;;  %v1630_v0 = vadd.f32 %v1629_v39, %v9442_v22  ;;  %v12419_v39 = vld [vmem:[#allocation41_spill] sm:$0xff]  ;;  %4266 = vmatpush2.bf16.msra.mxu1 %v8226_v52 }
 0x1ce   : > { %v1480_v23 = vpop.f32.mrf.mxu1  ;;  %v1633_v58 = vpop.f32.mrf.mxu0  ;;  %3768 = vmatmul.mubr.bf16.gmra.mxu1 %v12415_v50  ;;  %4051 = vmatmul.mubr.bf16.gmra.mxu0 %v12416_v12 }
 0x1cf   : > { %v9705_v2 = vpack.c.bf16 %v2360_v48, %v2353_v36  ;;  %v9707_v44 = vpack.c.bf16 %v2166_v3, %v2159_v53  ;;  %v2361_v56 = vmax.f32 %v1477_v43, 0.0  ;;  %v2167_v21 = vmax.f32 %v1630_v0, 0.0  ;;  %3777 = vmatprep.mubr.bf16.mxu1 %v12419_v39  ;;  %4060 = vmatprep.mubr.bf16.mxu0 %v9322_v33  ;;  %v8231_v3 = vld [vmem:[%s12111_s3 + $0x3f4] ss:$12 sps:$4 sm:$0xff]   ;;  %v8234_v39 = vld [vmem:[%s12111_s3 + $0x3dc] ss:$12 sps:$4 sm:$0xff]  }
 0x1d0   : > { %v1481_v32 = vadd.f32 %v1480_v23, %v8985_v42  ;;  %v1634_v62 = vadd.f32 %v1633_v58, %v9433_v63  ;;  %v1482_v50 = vpop.f32.mrf.mxu1  ;;  %v1635_v12 = vpop.f32.mrf.mxu0  ;;  %v8229_v58 = vld [vmem:[%s12111_s3 + $0x3f0] ss:$12 sps:$4 sm:$0xff]   ;;  %4267 = vmatprep.subr.bf16.mxu1 %v8231_v3 }
 0x1d1   : > { %12417 = vst [vmem:[#allocation114_spill] sm:$0xff] %v9705_v2  ;;  %12418 = vst [vmem:[#allocation115_spill] sm:$0xff] %v9707_v44  ;;  %v9713_v26 = vpack.c.bf16 %v2361_v56, %v2354_v55  ;;  %v9718_v36 = vpack.c.bf16 %v2167_v21, %v2160_v14  ;;  %v1483_v53 = vadd.f32 %v1482_v50, %v8997_v57  ;;  %4268 = vmatpush2.bf16.msra.mxu1 %v8229_v58 }
 0x1d2   : > { %v1636_v48 = vadd.f32 %v1635_v12, %v9442_v22  ;;  %v1484_v43 = vpop.f32.mrf.mxu1  ;;  %v1637_v0 = vpop.f32.mrf.mxu0  ;;  %v2367_v61 = vmax.f32 %v1481_v32, 0.0  ;;  %v2173_v52 = vmax.f32 %v1634_v62, 0.0  ;;  %v8232_v62 = vld [vmem:[%s12111_s3 + $0x3d8] ss:$12 sps:$4 sm:$0xff]   ;;  %4269 = vmatprep.subr.bf16.mxu1 %v8234_v39 }
 0x1d3   : > { %12420 = vst [vmem:[#allocation116_spill] sm:$0xff] %v9713_v26  ;;  %12421 = vst [vmem:[#allocation117_spill] sm:$0xff] %v9718_v36  ;;  %v1485_v55 = vadd.f32 %v1484_v43, %v8985_v42  ;;  %v1638_v23 = vadd.f32 %v1637_v0, %v9433_v63  ;;  %v2368_v32 = vmax.f32 %v1483_v53, 0.0  ;;  %v12422_v0 = vld [vmem:[#allocation38_spill] sm:$0xff]  ;;  %v12426_v53 = vld [vmem:[#allocation64_spill] sm:$0xff] }
 0x1d4   : > { %v1486_v56 = vpop.f32.mrf.mxu1  ;;  %v1639_v14 = vpop.f32.mrf.mxu0  ;;  %v2174_v44 = vmax.f32 %v1636_v48, 0.0 }
 0x1d5   : > { %v2374_v21 = vmax.f32 %v1485_v55, 0.0  ;;  %v2180_v33 = vmax.f32 %v1638_v23, 0.0  ;;  %v1487_v50 = vadd.f32 %v1486_v56, %v8997_v57  ;;  %v1640_v12 = vadd.f32 %v1639_v14, %v9442_v22  ;;  %v12425_v56 = vld [vmem:[#allocation45_spill] sm:$0xff]  ;;  %4270 = vmatpush2.bf16.msra.mxu1 %v8232_v62 }
 0x1d6   : > { %v1490_v43 = vpop.f32.mrf.mxu1  ;;  %v1643_v36 = vpop.f32.mrf.mxu0  ;;  %3778 = vmatmul.mubr.bf16.gmra.mxu1 %v12422_v0  ;;  %4061 = vmatmul.mubr.bf16.gmra.mxu0 %v9312_v41 }
 0x1d7   : > { %v9737_v3 = vpack.c.bf16 %v2374_v21, %v2367_v61  ;;  %v9739_v55 = vpack.c.bf16 %v2180_v33, %v2173_v52  ;;  %v2375_v58 = vmax.f32 %v1487_v50, 0.0  ;;  %v2181_v23 = vmax.f32 %v1640_v12, 0.0  ;;  %3787 = vmatprep.mubr.bf16.mxu1 %v12425_v56  ;;  %4070 = vmatprep.mubr.bf16.mxu0 %v12426_v53  ;;  %v8237_v33 = vld [vmem:[%s12111_s3 + $0x3c4] ss:$12 sps:$4 sm:$0xff]  }
 0x1d8   : > { %v1491_v48 = vadd.f32 %v1490_v43, %v8985_v42  ;;  %v1644_v14 = vadd.f32 %v1643_v36, %v9433_v63  ;;  %v1492_v0 = vpop.f32.mrf.mxu1  ;;  %v1645_v41 = vpop.f32.mrf.mxu0  ;;  %v8235_v36 = vld [vmem:[%s12111_s3 + $0x3c0] ss:$12 sps:$4 sm:$0xff]   ;;  %4271 = vmatprep.subr.bf16.mxu1 %v8237_v33 }
 0x1d9   : > { %12423 = vst [vmem:[#allocation118_spill] sm:$0xff] %v9737_v3  ;;  %12424 = vst [vmem:[#allocation119_spill] sm:$0xff] %v9739_v55  ;;  %v9745_v25 = vpack.c.bf16 %v2375_v58, %v2368_v32  ;;  %v9750_v61 = vpack.c.bf16 %v2181_v23, %v2174_v44  ;;  %v1493_v52 = vadd.f32 %v1492_v0, %v8997_v57  ;;  %4272 = vmatpush2.bf16.msra.mxu1 %v8235_v36 }
 0x1da   : > { %v1646_v21 = vadd.f32 %v1645_v41, %v9442_v22  ;;  %v1494_v50 = vpop.f32.mrf.mxu1  ;;  %v1647_v12 = vpop.f32.mrf.mxu0  ;;  %v2381_v39 = vmax.f32 %v1491_v48, 0.0  ;;  %v2187_v62 = vmax.f32 %v1644_v14, 0.0  ;;  %v12429_v48 = vld [vmem:[#allocation42_spill] sm:$0xff]  ;;  %4827 = vmatprep.subr.bf16.mxu1 %v12339_v11 }
 0x1db   : > { %12427 = vst [vmem:[#allocation120_spill] sm:$0xff] %v9745_v25  ;;  %12428 = vst [vmem:[#allocation121_spill] sm:$0xff] %v9750_v61  ;;  %v1495_v32 = vadd.f32 %v1494_v50, %v8985_v42  ;;  %v1648_v43 = vadd.f32 %v1647_v12, %v9433_v63  ;;  %v2382_v56 = vmax.f32 %v1493_v52, 0.0  ;;  %v12430_v50 = vld [vmem:[#allocation63_spill] sm:$0xff] }
 0x1dc   : > { %v1496_v58 = vpop.f32.mrf.mxu1  ;;  %v1649_v44 = vpop.f32.mrf.mxu0  ;;  %v2188_v55 = vmax.f32 %v1646_v21, 0.0 }
 0x1dd   : > { %v2388_v23 = vmax.f32 %v1495_v32, 0.0  ;;  %v2194_v53 = vmax.f32 %v1648_v43, 0.0  ;;  %v1497_v0 = vadd.f32 %v1496_v58, %v8997_v57  ;;  %v1650_v41 = vadd.f32 %v1649_v44, %v9442_v22  ;;  %v12433_v43 = vld [vmem:[#allocation49_spill] sm:$0xff] }
 0x1de   : > { %v1500_v61 = vpop.f32.mrf.mxu1  ;;  %v1653_v15 = vpop.f32.mrf.mxu0  ;;  %3788 = vmatmul.mubr.bf16.gmra.mxu1 %v12429_v48  ;;  %4071 = vmatmul.mubr.bf16.gmra.mxu0 %v12430_v50  ;;  %v485_v44 = vsub.s32 6, %v8781_v27 }
 0x1df   : > { %v9763_v12 = vpack.c.bf16 %v2388_v23, %v2381_v39  ;;  %v9765_v14 = vpack.c.bf16 %v2194_v53, %v2187_v62  ;;  %v2389_v33 = vmax.f32 %v1497_v0, 0.0  ;;  %v2195_v32 = vmax.f32 %v1650_v41, 0.0  ;;  %3797 = vmatprep.mubr.bf16.mxu1 %v12433_v43  ;;  %4080 = vmatprep.mubr.bf16.mxu0 %v9374_v10 }
 0x1e0   : > { %v1501_v36 = vadd.f32 %v1500_v61, %v8985_v42  ;;  %v1654_v52 = vadd.f32 %v1653_v15, %v9433_v63  ;;  %v1502_v21 = vpop.f32.mrf.mxu1  ;;  %v1655_v58 = vpop.f32.mrf.mxu0  ;;  %v9782_v48 = vrot.slane %v9430_v8, %v485_v44 }
 0x1e1   : > { %12431 = vst [vmem:[#allocation122_spill] sm:$0xff] %v9763_v12  ;;  %12432 = vst [vmem:[#allocation123_spill] sm:$0xff] %v9765_v14  ;;  %v9773_v39 = vpack.c.bf16 %v2389_v33, %v2382_v56  ;;  %v9775_v53 = vpack.c.bf16 %v2195_v32, %v2188_v55  ;;  %v1503_v62 = vadd.f32 %v1502_v21, %v8997_v57 }
 0x1e2   : > { %v1656_v23 = vadd.f32 %v1655_v58, %v9442_v22  ;;  %v1504_v0 = vpop.f32.mrf.mxu1  ;;  %v1657_v41 = vpop.f32.mrf.mxu0  ;;  %v2395_v10 = vmax.f32 %v1501_v36, 0.0  ;;  %v2201_v43 = vmax.f32 %v1654_v52, 0.0 }
 0x1e3   : > { %12434 = vst [vmem:[#allocation124_spill] sm:$0xff] %v9773_v39  ;;  %12435 = vst [vmem:[#allocation125_spill] sm:$0xff] %v9775_v53  ;;  %v1505_v61 = vadd.f32 %v1504_v0, %v8985_v42  ;;  %v1658_v15 = vadd.f32 %v1657_v41, %v9433_v63  ;;  %v2396_v21 = vmax.f32 %v1503_v62, 0.0  ;;  %v12436_v53 = vld [vmem:[#allocation46_spill] sm:$0xff]  ;;  %v12437_v42 = vld [vmem:[#allocation67_spill] sm:$0xff] }
 0x1e4   : > { %v1506_v50 = vpop.f32.mrf.mxu1  ;;  %v1659_v27 = vpop.f32.mrf.mxu0  ;;  %v2202_v58 = vmax.f32 %v1656_v23, 0.0  ;;  %v12440_v41 = vld [vmem:[#allocation53_spill] sm:$0xff] }
 0x1e5   : > { %v2402_v56 = vmax.f32 %v1505_v61, 0.0  ;;  %v2208_v55 = vmax.f32 %v1658_v15, 0.0  ;;  %v1507_v33 = vadd.f32 %v1506_v50, %v8997_v57  ;;  %v1660_v32 = vadd.f32 %v1659_v27, %v9442_v22 }
 0x1e6   : > { %v1663_v14 = vpop.f32.mrf.mxu0  ;;  %v7879_v36 = vpop.f32.mrf.mxu1  ;;  %3798 = vmatmul.mubr.bf16.gmra.mxu1 %v12436_v53  ;;  %4081 = vmatmul.mubr.bf16.gmra.mxu0 %v12437_v42  ;;  %v12443_v53 = vld [vmem:[#allocation50_spill] sm:$0xff] }
 0x1e7   : > { %v9788_v52 = vpack.c.bf16 %v2402_v56, %v2395_v10  ;;  %v9790_v0 = vpack.c.bf16 %v2208_v55, %v2201_v43  ;;  %v2403_v8 = vmax.f32 %v1507_v33, 0.0  ;;  %v2209_v44 = vmax.f32 %v1660_v32, 0.0  ;;  %3807 = vmatprep.mubr.bf16.mxu1 %v12440_v41  ;;  %4090 = vmatprep.mubr.bf16.mxu0 %v9395_v1 }
 0x1e8   : > { %v1664_v57 = vadd.f32 %v1663_v14, %v9433_v63  ;;  %v1845_v50 = vadd.f32 %v7879_v36, %v9782_v48  ;;  %v1665_v62 = vpop.f32.mrf.mxu0  ;;  %v1836_v23 = vpop.f32.mrf.mxu1 }
 0x1e9   : > { %12438 = vst [vmem:[#allocation126_spill] sm:$0xff] %v9788_v52  ;;  %12439 = vst [vmem:[#allocation127_spill] sm:$0xff] %v9790_v0  ;;  %v9796_v61 = vpack.c.bf16 %v2403_v8, %v2396_v21  ;;  %v9798_v15 = vpack.c.bf16 %v2209_v44, %v2202_v58  ;;  %v1666_v10 = vadd.f32 %v1665_v62, %v9442_v22 }
 0x1ea   : > { %v1837_v43 = vadd.f32 %v1836_v23, %v9782_v48  ;;  %v1667_v27 = vpop.f32.mrf.mxu0  ;;  %v7880_v56 = vpop.f32.mrf.mxu1  ;;  %v2063_v55 = vmax.f32 %v1845_v50, 0.0  ;;  %v2215_v14 = vmax.f32 %v1664_v57, 0.0  ;;  %v12444_v50 = vld [vmem:[#allocation71_spill] sm:$0xff] }
 0x1eb   : > { %12441 = vst [vmem:[#allocation128_spill] sm:$0xff] %v9796_v61  ;;  %12442 = vst [vmem:[#allocation129_spill] sm:$0xff] %v9798_v15  ;;  %v1668_v33 = vadd.f32 %v1667_v27, %v9433_v63  ;;  %v1848_v32 = vadd.f32 %v7880_v56, %v9782_v48  ;;  %v2216_v8 = vmax.f32 %v1666_v10, 0.0 }
 0x1ec   : > { %v1669_v1 = vpop.f32.mrf.mxu0  ;;  %v1839_v36 = vpop.f32.mrf.mxu1  ;;  %v2049_v44 = vmax.f32 %v1837_v43, 0.0 }
 0x1ed   : > { %v2222_v41 = vmax.f32 %v1668_v33, 0.0  ;;  %v2070_v42 = vmax.f32 %v1848_v32, 0.0  ;;  %v1670_v21 = vadd.f32 %v1669_v1, %v9442_v22  ;;  %v1840_v58 = vadd.f32 %v1839_v36, %v9782_v48  ;;  %v12447_v33 = vld [vmem:[#allocation57_spill] sm:$0xff] }
 0x1ee   : > { %v1673_v62 = vpop.f32.mrf.mxu0  ;;  %v7883_v23 = vpop.f32.mrf.mxu1  ;;  %3808 = vmatmul.mubr.bf16.gmra.mxu1 %v12443_v53  ;;  %4091 = vmatmul.mubr.bf16.gmra.mxu0 %v12444_v50 }
 0x1ef   : > { %v9808_v27 = vpack.c.bf16 %v2222_v41, %v2215_v14  ;;  %v9810_v56 = vpack.c.bf16 %v2070_v42, %v2063_v55  ;;  %v2223_v57 = vmax.f32 %v1670_v21, 0.0  ;;  %v2056_v0 = vmax.f32 %v1840_v58, 0.0  ;;  %3817 = vmatprep.mubr.bf16.mxu1 %v12447_v33  ;;  %4100 = vmatprep.mubr.bf16.mxu0 %v9418_v9 }
 0x1f0   : > { %v1674_v1 = vadd.f32 %v1673_v62, %v9433_v63  ;;  %v1861_v10 = vadd.f32 %v7883_v23, %v9782_v48  ;;  %v1675_v43 = vpop.f32.mrf.mxu0  ;;  %v1852_v32 = vpop.f32.mrf.mxu1 }
 0x1f1   : > { %12445 = vst [vmem:[#allocation130_spill] sm:$0xff] %v9808_v27  ;;  %12446 = vst [vmem:[#allocation131_spill] sm:$0xff] %v9810_v56  ;;  %v9816_v36 = vpack.c.bf16 %v2056_v0, %v2049_v44  ;;  %v9818_v53 = vpack.c.bf16 %v2223_v57, %v2216_v8  ;;  %v1676_v41 = vadd.f32 %v1675_v43, %v9442_v22 }
 0x1f2   : > { %v1853_v42 = vadd.f32 %v1852_v32, %v9782_v48  ;;  %v1677_v55 = vpop.f32.mrf.mxu0  ;;  %v7884_v14 = vpop.f32.mrf.mxu1  ;;  %v2091_v21 = vmax.f32 %v1861_v10, 0.0  ;;  %v2229_v62 = vmax.f32 %v1674_v1, 0.0  ;;  %v12451_v10 = vld [vmem:[#allocation75_spill] sm:$0xff] }
 0x1f3   : > { %12448 = vst [vmem:[#allocation132_spill] sm:$0xff] %v9816_v36  ;;  %12449 = vst [vmem:[#allocation133_spill] sm:$0xff] %v9818_v53  ;;  %v1678_v58 = vadd.f32 %v1677_v55, %v9433_v63  ;;  %v1864_v9 = vadd.f32 %v7884_v14, %v9782_v48  ;;  %v2230_v44 = vmax.f32 %v1676_v41, 0.0  ;;  %v12450_v53 = vld [vmem:[#allocation54_spill] sm:$0xff] }
 0x1f4   : > { %v1679_v33 = vpop.f32.mrf.mxu0  ;;  %v1855_v23 = vpop.f32.mrf.mxu1  ;;  %v2077_v57 = vmax.f32 %v1853_v42, 0.0 }
 0x1f5   : > { %v2236_v50 = vmax.f32 %v1678_v58, 0.0  ;;  %v2098_v27 = vmax.f32 %v1864_v9, 0.0  ;;  %v1680_v0 = vadd.f32 %v1679_v33, %v9442_v22  ;;  %v1856_v8 = vadd.f32 %v1855_v23, %v9782_v48  ;;  %v12454_v58 = vld [vmem:[#allocation61_spill] sm:$0xff] }
 0x1f6   : > { %v1683_v43 = vpop.f32.mrf.mxu0  ;;  %v7887_v32 = vpop.f32.mrf.mxu1  ;;  %3818 = vmatmul.mubr.bf16.gmra.mxu1 %v12450_v53  ;;  %4101 = vmatmul.mubr.bf16.gmra.mxu0 %v12451_v10 }
 0x1f7   : > { %v9828_v55 = vpack.c.bf16 %v2236_v50, %v2229_v62  ;;  %v9830_v14 = vpack.c.bf16 %v2098_v27, %v2091_v21  ;;  %v2237_v1 = vmax.f32 %v1680_v0, 0.0  ;;  %v2084_v15 = vmax.f32 %v1856_v8, 0.0  ;;  %3827 = vmatprep.mubr.bf16.mxu1 %v12454_v58  ;;  %4110 = vmatprep.mubr.bf16.mxu0 %v9452_v49 }
 0x1f8   : > { %v1684_v9 = vadd.f32 %v1683_v43, %v9433_v63  ;;  %v1877_v33 = vadd.f32 %v7887_v32, %v9782_v48  ;;  %v1685_v41 = vpop.f32.mrf.mxu0  ;;  %v1868_v42 = vpop.f32.mrf.mxu1 }
 0x1f9   : > { %12452 = vst [vmem:[#allocation134_spill] sm:$0xff] %v9828_v55  ;;  %12453 = vst [vmem:[#allocation135_spill] sm:$0xff] %v9830_v14  ;;  %v9836_v23 = vpack.c.bf16 %v2084_v15, %v2077_v57  ;;  %v9838_v53 = vpack.c.bf16 %v2237_v1, %v2230_v44  ;;  %v1686_v50 = vadd.f32 %v1685_v41, %v9442_v22 }
 0x1fa   : > { %v1869_v27 = vadd.f32 %v1868_v42, %v9782_v48  ;;  %v1687_v21 = vpop.f32.mrf.mxu0  ;;  %v7888_v62 = vpop.f32.mrf.mxu1  ;;  %v2119_v0 = vmax.f32 %v1877_v33, 0.0  ;;  %v2243_v43 = vmax.f32 %v1684_v9, 0.0  ;;  %v12458_v33 = vld [vmem:[#allocation79_spill] sm:$0xff] }
 0x1fb   : > { %12455 = vst [vmem:[#allocation136_spill] sm:$0xff] %v9836_v23  ;;  %12456 = vst [vmem:[#allocation137_spill] sm:$0xff] %v9838_v53  ;;  %v1688_v8 = vadd.f32 %v1687_v21, %v9433_v63  ;;  %v1880_v49 = vadd.f32 %v7888_v62, %v9782_v48  ;;  %v2244_v57 = vmax.f32 %v1686_v50, 0.0  ;;  %v12457_v53 = vld [vmem:[#allocation58_spill] sm:$0xff] }
 0x1fc   : > { %v1689_v58 = vpop.f32.mrf.mxu0  ;;  %v1871_v32 = vpop.f32.mrf.mxu1  ;;  %v2105_v1 = vmax.f32 %v1869_v27, 0.0 }
 0x1fd   : > { %v2250_v10 = vmax.f32 %v1688_v8, 0.0  ;;  %v2126_v55 = vmax.f32 %v1880_v49, 0.0  ;;  %v1690_v15 = vadd.f32 %v1689_v58, %v9442_v22  ;;  %v1872_v44 = vadd.f32 %v1871_v32, %v9782_v48  ;;  %v12461_v8 = vld [vmem:[#allocation65_spill] sm:$0xff] }
 0x1fe   : > { %v1693_v41 = vpop.f32.mrf.mxu0  ;;  %v7891_v42 = vpop.f32.mrf.mxu1  ;;  %3828 = vmatmul.mubr.bf16.gmra.mxu1 %v12457_v53  ;;  %4111 = vmatmul.mubr.bf16.gmra.mxu0 %v12458_v33 }
 0x1ff   : > { %v9848_v21 = vpack.c.bf16 %v2250_v10, %v2243_v43  ;;  %v9850_v62 = vpack.c.bf16 %v2126_v55, %v2119_v0  ;;  %v2251_v9 = vmax.f32 %v1690_v15, 0.0  ;;  %v2112_v46 = vmax.f32 %v1872_v44, 0.0  ;;  %3837 = vmatprep.mubr.bf16.mxu1 %v12461_v8  ;;  %4120 = vmatprep.mubr.bf16.mxu0 %v9488_v16 }
 0x200   : > { %v1694_v49 = vadd.f32 %v1693_v41, %v9433_v63  ;;  %v1893_v58 = vadd.f32 %v7891_v42, %v9782_v48  ;;  %v1695_v50 = vpop.f32.mrf.mxu0  ;;  %v1884_v27 = vpop.f32.mrf.mxu1 }
 0x201   : > { %12459 = vst [vmem:[#allocation138_spill] sm:$0xff] %v9848_v21  ;;  %12460 = vst [vmem:[#allocation139_spill] sm:$0xff] %v9850_v62  ;;  %v9856_v32 = vpack.c.bf16 %v2112_v46, %v2105_v1  ;;  %v9858_v53 = vpack.c.bf16 %v2251_v9, %v2244_v57  ;;  %v1696_v10 = vadd.f32 %v1695_v50, %v9442_v22 }
 0x202   : > { %v1885_v55 = vadd.f32 %v1884_v27, %v9782_v48  ;;  %v1697_v0 = vpop.f32.mrf.mxu0  ;;  %v7892_v43 = vpop.f32.mrf.mxu1  ;;  %v2147_v15 = vmax.f32 %v1893_v58, 0.0  ;;  %v2257_v41 = vmax.f32 %v1694_v49, 0.0  ;;  %v12465_v58 = vld [vmem:[#allocation82_spill] sm:$0xff] }
 0x203   : > { %12462 = vst [vmem:[#allocation140_spill] sm:$0xff] %v9856_v32  ;;  %12463 = vst [vmem:[#allocation141_spill] sm:$0xff] %v9858_v53  ;;  %v1698_v44 = vadd.f32 %v1697_v0, %v9433_v63  ;;  %v1896_v16 = vadd.f32 %v7892_v43, %v9782_v48  ;;  %v2258_v1 = vmax.f32 %v1696_v10, 0.0  ;;  %v12464_v53 = vld [vmem:[#allocation62_spill] sm:$0xff] }
 0x204   : > { %v1699_v8 = vpop.f32.mrf.mxu0  ;;  %v1887_v42 = vpop.f32.mrf.mxu1  ;;  %v2133_v9 = vmax.f32 %v1885_v55, 0.0 }
 0x205   : > { %v2264_v33 = vmax.f32 %v1698_v44, 0.0  ;;  %v2154_v21 = vmax.f32 %v1896_v16, 0.0  ;;  %v1700_v46 = vadd.f32 %v1699_v8, %v9442_v22  ;;  %v1888_v57 = vadd.f32 %v1887_v42, %v9782_v48  ;;  %v12468_v44 = vld [vmem:[#allocation69_spill] sm:$0xff] }
 0x206   : > { %v1703_v50 = vpop.f32.mrf.mxu0  ;;  %v7895_v27 = vpop.f32.mrf.mxu1  ;;  %3838 = vmatmul.mubr.bf16.gmra.mxu1 %v12464_v53  ;;  %4121 = vmatmul.mubr.bf16.gmra.mxu0 %v12465_v58 }
 0x207   : > { %v9868_v0 = vpack.c.bf16 %v2264_v33, %v2257_v41  ;;  %v9870_v43 = vpack.c.bf16 %v2154_v21, %v2147_v15  ;;  %v2265_v49 = vmax.f32 %v1700_v46, 0.0  ;;  %v2140_v62 = vmax.f32 %v1888_v57, 0.0  ;;  %3847 = vmatprep.mubr.bf16.mxu1 %v12468_v44  ;;  %4130 = vmatprep.mubr.bf16.mxu0 %v9518_v17 }
 0x208   : > { %v1704_v16 = vadd.f32 %v1703_v50, %v9433_v63  ;;  %v1909_v8 = vadd.f32 %v7895_v27, %v9782_v48  ;;  %v1705_v10 = vpop.f32.mrf.mxu0  ;;  %v1900_v55 = vpop.f32.mrf.mxu1 }
 0x209   : > { %12466 = vst [vmem:[#allocation142_spill] sm:$0xff] %v9868_v0  ;;  %12467 = vst [vmem:[#allocation143_spill] sm:$0xff] %v9870_v43  ;;  %v9876_v42 = vpack.c.bf16 %v2140_v62, %v2133_v9  ;;  %v9878_v53 = vpack.c.bf16 %v2265_v49, %v2258_v1  ;;  %v1706_v33 = vadd.f32 %v1705_v10, %v9442_v22 }
 0x20a   : > { %v1901_v21 = vadd.f32 %v1900_v55, %v9782_v48  ;;  %v1707_v15 = vpop.f32.mrf.mxu0  ;;  %v7896_v41 = vpop.f32.mrf.mxu1  ;;  %v2175_v46 = vmax.f32 %v1909_v8, 0.0  ;;  %v2271_v50 = vmax.f32 %v1704_v16, 0.0 }
 0x20b   : > { %12469 = vst [vmem:[#allocation144_spill] sm:$0xff] %v9876_v42  ;;  %12470 = vst [vmem:[#allocation145_spill] sm:$0xff] %v9878_v53  ;;  %v1708_v57 = vadd.f32 %v1707_v15, %v9433_v63  ;;  %v1912_v17 = vadd.f32 %v7896_v41, %v9782_v48  ;;  %v2272_v9 = vmax.f32 %v1706_v33, 0.0  ;;  %v12471_v53 = vld [vmem:[#allocation66_spill] sm:$0xff] }
 0x20c   : > { %v1709_v44 = vpop.f32.mrf.mxu0  ;;  %v1903_v27 = vpop.f32.mrf.mxu1  ;;  %v2161_v49 = vmax.f32 %v1901_v21, 0.0 }
 0x20d   : > { %v2278_v58 = vmax.f32 %v1708_v57, 0.0  ;;  %v2182_v0 = vmax.f32 %v1912_v17, 0.0  ;;  %v1710_v62 = vadd.f32 %v1709_v44, %v9442_v22  ;;  %v1904_v1 = vadd.f32 %v1903_v27, %v9782_v48  ;;  %v12474_v57 = vld [vmem:[#allocation73_spill] sm:$0xff] }
 0x20e   : > { %v1713_v10 = vpop.f32.mrf.mxu0  ;;  %v7899_v55 = vpop.f32.mrf.mxu1  ;;  %3848 = vmatmul.mubr.bf16.gmra.mxu1 %v12471_v53  ;;  %4131 = vmatmul.mubr.bf16.gmra.mxu0 %v9507_v18 }
 0x20f   : > { %v9888_v8 = vpack.c.bf16 %v2278_v58, %v2271_v50  ;;  %v9890_v15 = vpack.c.bf16 %v2182_v0, %v2175_v46  ;;  %v2279_v16 = vmax.f32 %v1710_v62, 0.0  ;;  %v2168_v41 = vmax.f32 %v1904_v1, 0.0  ;;  %3857 = vmatprep.mubr.bf16.mxu1 %v12474_v57  ;;  %4140 = vmatprep.mubr.bf16.mxu0 %v9545_v45 }
 0x210   : > { %v1714_v17 = vadd.f32 %v1713_v10, %v9433_v63  ;;  %v1925_v44 = vadd.f32 %v7899_v55, %v9782_v48  ;;  %v1715_v33 = vpop.f32.mrf.mxu0  ;;  %v1916_v21 = vpop.f32.mrf.mxu1 }
 0x211   : > { %12472 = vst [vmem:[#allocation146_spill] sm:$0xff] %v9888_v8  ;;  %12473 = vst [vmem:[#allocation147_spill] sm:$0xff] %v9890_v15  ;;  %v9896_v27 = vpack.c.bf16 %v2168_v41, %v2161_v49  ;;  %v9898_v53 = vpack.c.bf16 %v2279_v16, %v2272_v9  ;;  %v1716_v58 = vadd.f32 %v1715_v33, %v9442_v22 }
 0x212   : > { %v1917_v0 = vadd.f32 %v1916_v21, %v9782_v48  ;;  %v1717_v46 = vpop.f32.mrf.mxu0  ;;  %v7900_v50 = vpop.f32.mrf.mxu1  ;;  %v2203_v62 = vmax.f32 %v1925_v44, 0.0  ;;  %v2285_v10 = vmax.f32 %v1714_v17, 0.0 }
 0x213   : > { %12475 = vst [vmem:[#allocation148_spill] sm:$0xff] %v9896_v27  ;;  %12476 = vst [vmem:[#allocation149_spill] sm:$0xff] %v9898_v53  ;;  %v1718_v1 = vadd.f32 %v1717_v46, %v9433_v63  ;;  %v1928_v45 = vadd.f32 %v7900_v50, %v9782_v48  ;;  %v2286_v16 = vmax.f32 %v1716_v58, 0.0  ;;  %v12477_v53 = vld [vmem:[#allocation70_spill] sm:$0xff] }
 0x214   : > { %v1719_v57 = vpop.f32.mrf.mxu0  ;;  %v1919_v55 = vpop.f32.mrf.mxu1  ;;  %v2189_v41 = vmax.f32 %v1917_v0, 0.0 }
 0x215   : > { %v2292_v18 = vmax.f32 %v1718_v1, 0.0  ;;  %v2210_v8 = vmax.f32 %v1928_v45, 0.0  ;;  %v1720_v49 = vadd.f32 %v1719_v57, %v9442_v22  ;;  %v1920_v9 = vadd.f32 %v1919_v55, %v9782_v48  ;;  %v12480_v1 = vld [vmem:[#allocation77_spill] sm:$0xff] }
 0x216   : > { %v1723_v33 = vpop.f32.mrf.mxu0  ;;  %v7903_v21 = vpop.f32.mrf.mxu1  ;;  %3858 = vmatmul.mubr.bf16.gmra.mxu1 %v12477_v53  ;;  %4141 = vmatmul.mubr.bf16.gmra.mxu0 %v9537_v60 }
 0x217   : > { %v9908_v44 = vpack.c.bf16 %v2292_v18, %v2285_v10  ;;  %v9910_v46 = vpack.c.bf16 %v2210_v8, %v2203_v62  ;;  %v2293_v17 = vmax.f32 %v1720_v49, 0.0  ;;  %v2196_v50 = vmax.f32 %v1920_v9, 0.0  ;;  %3867 = vmatprep.mubr.bf16.mxu1 %v12480_v1  ;;  %4150 = vmatprep.mubr.bf16.mxu0 %v9571_v31 }
 0x218   : > { %v1724_v45 = vadd.f32 %v1723_v33, %v9433_v63  ;;  %v1941_v57 = vadd.f32 %v7903_v21, %v9782_v48  ;;  %v1725_v58 = vpop.f32.mrf.mxu0  ;;  %v1932_v0 = vpop.f32.mrf.mxu1 }
 0x219   : > { %12478 = vst [vmem:[#allocation150_spill] sm:$0xff] %v9908_v44  ;;  %12479 = vst [vmem:[#allocation151_spill] sm:$0xff] %v9910_v46  ;;  %v9916_v55 = vpack.c.bf16 %v2196_v50, %v2189_v41  ;;  %v9918_v53 = vpack.c.bf16 %v2293_v17, %v2286_v16  ;;  %v1726_v18 = vadd.f32 %v1725_v58, %v9442_v22 }
 0x21a   : > { %v1933_v8 = vadd.f32 %v1932_v0, %v9782_v48  ;;  %v1727_v62 = vpop.f32.mrf.mxu0  ;;  %v7904_v10 = vpop.f32.mrf.mxu1  ;;  %v2231_v49 = vmax.f32 %v1941_v57, 0.0  ;;  %v2299_v33 = vmax.f32 %v1724_v45, 0.0 }
 0x21b   : > { %12481 = vst [vmem:[#allocation152_spill] sm:$0xff] %v9916_v55  ;;  %12482 = vst [vmem:[#allocation153_spill] sm:$0xff] %v9918_v53  ;;  %v1728_v9 = vadd.f32 %v1727_v62, %v9433_v63  ;;  %v1944_v31 = vadd.f32 %v7904_v10, %v9782_v48  ;;  %v2300_v17 = vmax.f32 %v1726_v18, 0.0  ;;  %v12483_v53 = vld [vmem:[#allocation74_spill] sm:$0xff] }
 0x21c   : > { %v1729_v1 = vpop.f32.mrf.mxu0  ;;  %v1935_v21 = vpop.f32.mrf.mxu1  ;;  %v2217_v50 = vmax.f32 %v1933_v8, 0.0 }
 0x21d   : > { %v2306_v60 = vmax.f32 %v1728_v9, 0.0  ;;  %v2238_v44 = vmax.f32 %v1944_v31, 0.0  ;;  %v1730_v41 = vadd.f32 %v1729_v1, %v9442_v22  ;;  %v1936_v16 = vadd.f32 %v1935_v21, %v9782_v48  ;;  %v12486_v9 = vld [vmem:[#allocation81_spill] sm:$0xff] }
 0x21e   : > { %v1733_v58 = vpop.f32.mrf.mxu0  ;;  %v7907_v0 = vpop.f32.mrf.mxu1  ;;  %3868 = vmatmul.mubr.bf16.gmra.mxu1 %v12483_v53  ;;  %4151 = vmatmul.mubr.bf16.gmra.mxu0 %v9557_v59 }
 0x21f   : > { %v9928_v57 = vpack.c.bf16 %v2306_v60, %v2299_v33  ;;  %v9930_v62 = vpack.c.bf16 %v2238_v44, %v2231_v49  ;;  %v2307_v45 = vmax.f32 %v1730_v41, 0.0  ;;  %v2224_v10 = vmax.f32 %v1936_v16, 0.0  ;;  %3877 = vmatprep.mubr.bf16.mxu1 %v12486_v9  ;;  %4160 = vmatprep.mubr.bf16.mxu0 %v9591_v37 }
 0x220   : > { %v1734_v31 = vadd.f32 %v1733_v58, %v9433_v63  ;;  %v1957_v1 = vadd.f32 %v7907_v0, %v9782_v48  ;;  %v1735_v18 = vpop.f32.mrf.mxu0  ;;  %v1948_v8 = vpop.f32.mrf.mxu1 }
 0x221   : > { %12484 = vst [vmem:[#allocation154_spill] sm:$0xff] %v9928_v57  ;;  %12485 = vst [vmem:[#allocation155_spill] sm:$0xff] %v9930_v62  ;;  %v9936_v21 = vpack.c.bf16 %v2224_v10, %v2217_v50  ;;  %v9938_v53 = vpack.c.bf16 %v2307_v45, %v2300_v17  ;;  %v1736_v60 = vadd.f32 %v1735_v18, %v9442_v22 }
 0x222   : > { %v1949_v44 = vadd.f32 %v1948_v8, %v9782_v48  ;;  %v1737_v49 = vpop.f32.mrf.mxu0  ;;  %v7908_v33 = vpop.f32.mrf.mxu1  ;;  %v2259_v41 = vmax.f32 %v1957_v1, 0.0  ;;  %v2313_v58 = vmax.f32 %v1734_v31, 0.0 }
 0x223   : > { %12487 = vst [vmem:[#allocation156_spill] sm:$0xff] %v9936_v21  ;;  %12488 = vst [vmem:[#allocation157_spill] sm:$0xff] %v9938_v53  ;;  %v1738_v16 = vadd.f32 %v1737_v49, %v9433_v63  ;;  %v1960_v37 = vadd.f32 %v7908_v33, %v9782_v48  ;;  %v2314_v45 = vmax.f32 %v1736_v60, 0.0  ;;  %v12489_v53 = vld [vmem:[#allocation78_spill] sm:$0xff] }
 0x224   : > { %v1739_v9 = vpop.f32.mrf.mxu0  ;;  %v1951_v0 = vpop.f32.mrf.mxu1  ;;  %v2245_v10 = vmax.f32 %v1949_v44, 0.0 }
 0x225   : > { %v2320_v59 = vmax.f32 %v1738_v16, 0.0  ;;  %v2266_v57 = vmax.f32 %v1960_v37, 0.0  ;;  %v1740_v50 = vadd.f32 %v1739_v9, %v9442_v22  ;;  %v1952_v17 = vadd.f32 %v1951_v0, %v9782_v48  ;;  %v12492_v16 = vld [vmem:[#allocation5_spill] sm:$0xff] }
 0x226   : > { %v1743_v18 = vpop.f32.mrf.mxu0  ;;  %v7911_v8 = vpop.f32.mrf.mxu1  ;;  %3878 = vmatmul.mubr.bf16.gmra.mxu1 %v12489_v53  ;;  %4161 = vmatmul.mubr.bf16.gmra.mxu0 %v9583_v24 }
 0x227   : > { %v9948_v1 = vpack.c.bf16 %v2320_v59, %v2313_v58  ;;  %v9950_v49 = vpack.c.bf16 %v2266_v57, %v2259_v41  ;;  %v2321_v31 = vmax.f32 %v1740_v50, 0.0  ;;  %v2252_v33 = vmax.f32 %v1952_v17, 0.0  ;;  %3887 = vmatprep.mubr.bf16.mxu1 %v12492_v16  ;;  %4170 = vmatprep.mubr.bf16.mxu0 %v9617_v19 }
 0x228   : > { %v1744_v37 = vadd.f32 %v1743_v18, %v9433_v63  ;;  %v1973_v9 = vadd.f32 %v7911_v8, %v9782_v48  ;;  %v1745_v60 = vpop.f32.mrf.mxu0  ;;  %v1964_v44 = vpop.f32.mrf.mxu1 }
 0x229   : > { %12490 = vst [vmem:[#allocation158_spill] sm:$0xff] %v9948_v1  ;;  %12491 = vst [vmem:[#allocation159_spill] sm:$0xff] %v9950_v49  ;;  %v9956_v0 = vpack.c.bf16 %v2252_v33, %v2245_v10  ;;  %v9958_v53 = vpack.c.bf16 %v2321_v31, %v2314_v45  ;;  %v1746_v59 = vadd.f32 %v1745_v60, %v9442_v22 }
 0x22a   : > { %v1965_v57 = vadd.f32 %v1964_v44, %v9782_v48  ;;  %v1747_v41 = vpop.f32.mrf.mxu0  ;;  %v7912_v58 = vpop.f32.mrf.mxu1  ;;  %v2287_v50 = vmax.f32 %v1973_v9, 0.0  ;;  %v2327_v18 = vmax.f32 %v1744_v37, 0.0 }
 0x22b   : > { %12493 = vst [vmem:[#allocation160_spill] sm:$0xff] %v9956_v0  ;;  %12494 = vst [vmem:[#allocation161_spill] sm:$0xff] %v9958_v53  ;;  %v1748_v17 = vadd.f32 %v1747_v41, %v9433_v63  ;;  %v1976_v19 = vadd.f32 %v7912_v58, %v9782_v48  ;;  %v2328_v31 = vmax.f32 %v1746_v59, 0.0  ;;  %v12495_v53 = vld [vmem:[#allocation3_spill] sm:$0xff] }
 0x22c   : > { %v1749_v16 = vpop.f32.mrf.mxu0  ;;  %v1967_v8 = vpop.f32.mrf.mxu1  ;;  %v2273_v33 = vmax.f32 %v1965_v57, 0.0 }
 0x22d   : > { %v2334_v24 = vmax.f32 %v1748_v17, 0.0  ;;  %v2294_v1 = vmax.f32 %v1976_v19, 0.0  ;;  %v1750_v10 = vadd.f32 %v1749_v16, %v9442_v22  ;;  %v1968_v45 = vadd.f32 %v1967_v8, %v9782_v48  ;;  %v12498_v17 = vld [vmem:[#allocation9_spill] sm:$0xff] }
 0x22e   : > { %v1753_v60 = vpop.f32.mrf.mxu0  ;;  %v7915_v44 = vpop.f32.mrf.mxu1  ;;  %3888 = vmatmul.mubr.bf16.gmra.mxu1 %v12495_v53  ;;  %4171 = vmatmul.mubr.bf16.gmra.mxu0 %v9609_v54 }
 0x22f   : > { %v9968_v9 = vpack.c.bf16 %v2334_v24, %v2327_v18  ;;  %v9970_v41 = vpack.c.bf16 %v2294_v1, %v2287_v50  ;;  %v2335_v37 = vmax.f32 %v1750_v10, 0.0  ;;  %v2280_v58 = vmax.f32 %v1968_v45, 0.0  ;;  %3897 = vmatprep.mubr.bf16.mxu1 %v12498_v17  ;;  %4180 = vmatprep.mubr.bf16.mxu0 %v9649_v4 }
 0x230   : > { %v1754_v19 = vadd.f32 %v1753_v60, %v9433_v63  ;;  %v1989_v16 = vadd.f32 %v7915_v44, %v9782_v48  ;;  %v1755_v59 = vpop.f32.mrf.mxu0  ;;  %v1980_v57 = vpop.f32.mrf.mxu1 }
 0x231   : > { %12496 = vst [vmem:[#allocation162_spill] sm:$0xff] %v9968_v9  ;;  %12497 = vst [vmem:[#allocation163_spill] sm:$0xff] %v9970_v41  ;;  %v9976_v8 = vpack.c.bf16 %v2280_v58, %v2273_v33  ;;  %v9978_v53 = vpack.c.bf16 %v2335_v37, %v2328_v31  ;;  %v1756_v24 = vadd.f32 %v1755_v59, %v9442_v22 }
 0x232   : > { %v1981_v1 = vadd.f32 %v1980_v57, %v9782_v48  ;;  %v1757_v50 = vpop.f32.mrf.mxu0  ;;  %v7916_v18 = vpop.f32.mrf.mxu1  ;;  %v2315_v10 = vmax.f32 %v1989_v16, 0.0  ;;  %v2341_v60 = vmax.f32 %v1754_v19, 0.0 }
 0x233   : > { %12499 = vst [vmem:[#allocation164_spill] sm:$0xff] %v9976_v8  ;;  %12500 = vst [vmem:[#allocation165_spill] sm:$0xff] %v9978_v53  ;;  %v1758_v45 = vadd.f32 %v1757_v50, %v9433_v63  ;;  %v1992_v4 = vadd.f32 %v7916_v18, %v9782_v48  ;;  %v2342_v37 = vmax.f32 %v1756_v24, 0.0  ;;  %v12501_v53 = vld [vmem:[#allocation7_spill] sm:$0xff] }
 0x234   : > { %v1759_v17 = vpop.f32.mrf.mxu0  ;;  %v1983_v44 = vpop.f32.mrf.mxu1  ;;  %v2301_v58 = vmax.f32 %v1981_v1, 0.0 }
 0x235   : > { %v2348_v54 = vmax.f32 %v1758_v45, 0.0  ;;  %v2322_v9 = vmax.f32 %v1992_v4, 0.0  ;;  %v1760_v33 = vadd.f32 %v1759_v17, %v9442_v22  ;;  %v1984_v31 = vadd.f32 %v1983_v44, %v9782_v48  ;;  %v12504_v45 = vld [vmem:[#allocation13_spill] sm:$0xff] }
 0x236   : > { %v1763_v59 = vpop.f32.mrf.mxu0  ;;  %v7919_v57 = vpop.f32.mrf.mxu1  ;;  %3898 = vmatmul.mubr.bf16.gmra.mxu1 %v12501_v53  ;;  %4181 = vmatmul.mubr.bf16.gmra.mxu0 %v9641_v30 }
 0x237   : > { %v9988_v16 = vpack.c.bf16 %v2348_v54, %v2341_v60  ;;  %v9990_v50 = vpack.c.bf16 %v2322_v9, %v2315_v10  ;;  %v2349_v19 = vmax.f32 %v1760_v33, 0.0  ;;  %v2308_v18 = vmax.f32 %v1984_v31, 0.0  ;;  %3907 = vmatprep.mubr.bf16.mxu1 %v12504_v45  ;;  %4190 = vmatprep.mubr.bf16.mxu0 %v9681_v28 }
 0x238   : > { %v1764_v4 = vadd.f32 %v1763_v59, %v9433_v63  ;;  %v2005_v17 = vadd.f32 %v7919_v57, %v9782_v48  ;;  %v1765_v24 = vpop.f32.mrf.mxu0  ;;  %v1996_v1 = vpop.f32.mrf.mxu1 }
 0x239   : > { %12502 = vst [vmem:[#allocation166_spill] sm:$0xff] %v9988_v16  ;;  %12503 = vst [vmem:[#allocation167_spill] sm:$0xff] %v9990_v50  ;;  %v9996_v44 = vpack.c.bf16 %v2308_v18, %v2301_v58  ;;  %v9998_v53 = vpack.c.bf16 %v2349_v19, %v2342_v37  ;;  %v1766_v54 = vadd.f32 %v1765_v24, %v9442_v22 }
 0x23a   : > { %v1997_v9 = vadd.f32 %v1996_v1, %v9782_v48  ;;  %v1767_v10 = vpop.f32.mrf.mxu0  ;;  %v7920_v60 = vpop.f32.mrf.mxu1  ;;  %v2343_v33 = vmax.f32 %v2005_v17, 0.0  ;;  %v2355_v59 = vmax.f32 %v1764_v4, 0.0 }
 0x23b   : > { %12505 = vst [vmem:[#allocation168_spill] sm:$0xff] %v9996_v44  ;;  %12506 = vst [vmem:[#allocation169_spill] sm:$0xff] %v9998_v53  ;;  %v1768_v31 = vadd.f32 %v1767_v10, %v9433_v63  ;;  %v2008_v28 = vadd.f32 %v7920_v60, %v9782_v48  ;;  %v2356_v19 = vmax.f32 %v1766_v54, 0.0  ;;  %v12507_v53 = vld [vmem:[#allocation11_spill] sm:$0xff] }
 0x23c   : > { %v1769_v45 = vpop.f32.mrf.mxu0  ;;  %v1999_v57 = vpop.f32.mrf.mxu1  ;;  %v2329_v18 = vmax.f32 %v1997_v9, 0.0 }
 0x23d   : > { %v2362_v30 = vmax.f32 %v1768_v31, 0.0  ;;  %v2350_v16 = vmax.f32 %v2008_v28, 0.0  ;;  %v1770_v58 = vadd.f32 %v1769_v45, %v9442_v22  ;;  %v2000_v37 = vadd.f32 %v1999_v57, %v9782_v48  ;;  %v12510_v31 = vld [vmem:[#allocation17_spill] sm:$0xff] }
 0x23e   : > { %v1773_v24 = vpop.f32.mrf.mxu0  ;;  %v7923_v1 = vpop.f32.mrf.mxu1  ;;  %3908 = vmatmul.mubr.bf16.gmra.mxu1 %v12507_v53  ;;  %4191 = vmatmul.mubr.bf16.gmra.mxu0 %v9673_v5 }
 0x23f   : > { %v10008_v17 = vpack.c.bf16 %v2362_v30, %v2355_v59  ;;  %v10010_v10 = vpack.c.bf16 %v2350_v16, %v2343_v33  ;;  %v2363_v4 = vmax.f32 %v1770_v58, 0.0  ;;  %v2336_v60 = vmax.f32 %v2000_v37, 0.0  ;;  %3917 = vmatprep.mubr.bf16.mxu1 %v12510_v31  ;;  %4200 = vmatprep.mubr.bf16.mxu0 %v9713_v26 }
 0x240   : > { %v1774_v28 = vadd.f32 %v1773_v24, %v9433_v63  ;;  %v2021_v45 = vadd.f32 %v7923_v1, %v9782_v48  ;;  %v1775_v54 = vpop.f32.mrf.mxu0  ;;  %v2012_v9 = vpop.f32.mrf.mxu1 }
 0x241   : > { %12508 = vst [vmem:[#allocation170_spill] sm:$0xff] %v10008_v17  ;;  %12509 = vst [vmem:[#allocation171_spill] sm:$0xff] %v10010_v10  ;;  %v10016_v57 = vpack.c.bf16 %v2336_v60, %v2329_v18  ;;  %v10018_v53 = vpack.c.bf16 %v2363_v4, %v2356_v19  ;;  %v1776_v30 = vadd.f32 %v1775_v54, %v9442_v22  ;;  %v12513_v17 = vld [vmem:[#allocation15_spill] sm:$0xff] }
 0x242   : > { %v2013_v16 = vadd.f32 %v2012_v9, %v9782_v48  ;;  %v1777_v33 = vpop.f32.mrf.mxu0  ;;  %v7924_v59 = vpop.f32.mrf.mxu1  ;;  %v2371_v58 = vmax.f32 %v2021_v45, 0.0  ;;  %v2369_v24 = vmax.f32 %v1774_v28, 0.0 }
 0x243   : > { %12511 = vst [vmem:[#allocation172_spill] sm:$0xff] %v10016_v57  ;;  %12512 = vst [vmem:[#allocation173_spill] sm:$0xff] %v10018_v53  ;;  %v1778_v37 = vadd.f32 %v1777_v33, %v9433_v63  ;;  %v2024_v26 = vadd.f32 %v7924_v59, %v9782_v48  ;;  %v2370_v4 = vmax.f32 %v1776_v30, 0.0 }
 0x244   : > { %v1779_v31 = vpop.f32.mrf.mxu0  ;;  %v2015_v1 = vpop.f32.mrf.mxu1  ;;  %v2357_v60 = vmax.f32 %v2013_v16, 0.0 }
 0x245   : > { %v2376_v5 = vmax.f32 %v1778_v37, 0.0  ;;  %v2378_v10 = vmax.f32 %v2024_v26, 0.0  ;;  %v1780_v18 = vadd.f32 %v1779_v31, %v9442_v22  ;;  %v2016_v19 = vadd.f32 %v2015_v1, %v9782_v48  ;;  %v12516_v37 = vld [vmem:[#allocation21_spill] sm:$0xff] }
 0x246   : > { %v1783_v54 = vpop.f32.mrf.mxu0  ;;  %v7927_v9 = vpop.f32.mrf.mxu1  ;;  %3918 = vmatmul.mubr.bf16.gmra.mxu1 %v12513_v17  ;;  %4201 = vmatmul.mubr.bf16.gmra.mxu0 %v9705_v2 }
 0x247   : > { %v10028_v45 = vpack.c.bf16 %v2376_v5, %v2369_v24  ;;  %v10030_v33 = vpack.c.bf16 %v2378_v10, %v2371_v58  ;;  %v2377_v28 = vmax.f32 %v1780_v18, 0.0  ;;  %v2364_v59 = vmax.f32 %v2016_v19, 0.0  ;;  %3927 = vmatprep.mubr.bf16.mxu1 %v12516_v37  ;;  %4210 = vmatprep.mubr.bf16.mxu0 %v9745_v25 }
 0x248   : > { %v1784_v26 = vadd.f32 %v1783_v54, %v9433_v63  ;;  %v2037_v31 = vadd.f32 %v7927_v9, %v9782_v48  ;;  %v1785_v30 = vpop.f32.mrf.mxu0  ;;  %v2028_v16 = vpop.f32.mrf.mxu1 }
 0x249   : > { %12514 = vst [vmem:[#allocation174_spill] sm:$0xff] %v10028_v45  ;;  %12515 = vst [vmem:[#allocation175_spill] sm:$0xff] %v10030_v33  ;;  %v10036_v1 = vpack.c.bf16 %v2364_v59, %v2357_v60  ;;  %v10038_v17 = vpack.c.bf16 %v2377_v28, %v2370_v4  ;;  %v1786_v5 = vadd.f32 %v1785_v30, %v9442_v22 }
 0x24a   : > { %v2029_v10 = vadd.f32 %v2028_v16, %v9782_v48  ;;  %v1787_v58 = vpop.f32.mrf.mxu0  ;;  %v7928_v24 = vpop.f32.mrf.mxu1  ;;  %v2399_v18 = vmax.f32 %v2037_v31, 0.0  ;;  %v2383_v54 = vmax.f32 %v1784_v26, 0.0 }
 0x24b   : > { %12517 = vst [vmem:[#allocation176_spill] sm:$0xff] %v10036_v1  ;;  %12518 = vst [vmem:[#allocation177_spill] sm:$0xff] %v10038_v17  ;;  %v1788_v19 = vadd.f32 %v1787_v58, %v9433_v63  ;;  %v2040_v25 = vadd.f32 %v7928_v24, %v9782_v48  ;;  %v2384_v28 = vmax.f32 %v1786_v5, 0.0  ;;  %v12519_v1 = vld [vmem:[#allocation19_spill] sm:$0xff] }
 0x24c   : > { %v1789_v37 = vpop.f32.mrf.mxu0  ;;  %v2031_v9 = vpop.f32.mrf.mxu1  ;;  %v2385_v59 = vmax.f32 %v2029_v10, 0.0 }
 0x24d   : > { %v2390_v2 = vmax.f32 %v1788_v19, 0.0  ;;  %v2406_v33 = vmax.f32 %v2040_v25, 0.0  ;;  %v1790_v60 = vadd.f32 %v1789_v37, %v9442_v22  ;;  %v2032_v4 = vadd.f32 %v2031_v9, %v9782_v48  ;;  %v12521_v19 = vld [vmem:[#allocation25_spill] sm:$0xff] }
 0x24e   : > { %v1793_v30 = vpop.f32.mrf.mxu0  ;;  %v3689_v16 = vpop.f32.mrf.mxu1  ;;  %3928 = vmatmul.mubr.bf16.gmra.mxu1 %v12519_v1  ;;  %4211 = vmatmul.mubr.bf16.gmra.mxu0 %v9737_v3  ;;  %v12523_v1 = vld [vmem:[#allocation23_spill] sm:$0xff] }
 0x24f   : > { %v10048_v31 = vpack.c.bf16 %v2390_v2, %v2383_v54  ;;  %v10050_v58 = vpack.c.bf16 %v2406_v33, %v2399_v18  ;;  %v2391_v26 = vmax.f32 %v1790_v60, 0.0  ;;  %v2392_v24 = vmax.f32 %v2032_v4, 0.0  ;;  %3937 = vmatprep.mubr.bf16.mxu1 %v12521_v19  ;;  %4220 = vmatprep.mubr.bf16.mxu0 %v9773_v39 }
 0x250   : > { %v1795_v25 = vpop.f32.mrf.mxu0  ;;  %v3691_v48 = vpop.f32.mrf.mxu1  ;;  %v1794_v5 = vadd.f32 %v1793_v30, %v9433_v63 }
 0x251   : > { %12520 = vst [vmem:[#allocation178_spill] sm:$0xff] %v10048_v31  ;;  %v10054_v37 = vpack.c.bf16 %v2392_v24, %v2385_v59  ;;  %v10057_v10 = vpack.c.bf16 %v2391_v26, %v2384_v28  ;;  %v1796_v2 = vadd.f32 %v1795_v25, %v9442_v22 }
 0x252   : > { %v1797_v9 = vpop.f32.mrf.mxu0  ;;  %v3693_v3 = vpop.f32.mrf.mxu1  ;;  %v2397_v60 = vmax.f32 %v1794_v5, 0.0 }
 0x253   : > { %12522 = vst [vmem:[#allocation179_spill] sm:$0xff] %v10057_v10  ;;  %v1798_v33 = vadd.f32 %v1797_v9, %v9433_v63  ;;  %v2398_v28 = vmax.f32 %v1796_v2, 0.0 }
 0x254   : > { %v1799_v18 = vpop.f32.mrf.mxu0  ;;  %v3695_v54 = vpop.f32.mrf.mxu1 }
 0x255   : > { %v2404_v4 = vmax.f32 %v1798_v33, 0.0  ;;  %v1800_v39 = vadd.f32 %v1799_v18, %v9442_v22 }
 0x256   : > { %v3699_v19 = vpop.f32.mrf.mxu1  ;;  %3938 = vmatmul.mubr.bf16.gmra.mxu1 %v12523_v1  ;;  %v3982_v59 = vpop.f32.mrf.mxu0  ;;  %4221 = vmatmul.mubr.bf16.gmra.mxu0 %v9763_v12 }
 0x257   : > { %v10064_v30 = vpack.c.bf16 %v2404_v4, %v2397_v60  ;;  %v2405_v26 = vmax.f32 %v1800_v39, 0.0  ;;  %v10066_v24 = vadd.f32 %v3982_v59, %v3689_v16  ;;  %4230 = vmatprep.mubr.bf16.mxu0 %v9796_v61  ;;  %4273 = vmatprep.mubr.bf16.mxu1 %v9490_v34  ;;  %v8238_v39 = vld [vmem:[%s12111_s3 + $0xb0] ss:$12 sps:$4 sm:$0xff]  }
 0x258   : > { %v3701_v63 = vpop.f32.mrf.mxu1  ;;  %v3984_v25 = vpop.f32.mrf.mxu0 }
 0x259   : > { %12524 = vst [vmem:[#allocation180_spill] sm:$0xff] %v10064_v30  ;;  %v10070_v5 = vadd.f32 %v3984_v25, %v3691_v48  ;;  %v10072_v22 = vpack.c.bf16 %v2405_v26, %v2398_v28  ;;  %v12526_v48 = vld [vmem:[#allocation83_spill] sm:$0xff] }
 0x25a   : > { %v3703_v9 = vpop.f32.mrf.mxu1  ;;  %v3986_v33 = vpop.f32.mrf.mxu0 }
 0x25b   : > { %12525 = vst [vmem:[#allocation181_spill] sm:$0xff] %v10072_v22  ;;  %v10074_v18 = vadd.f32 %v3986_v33, %v3693_v3 }
 0x25c   : > { %v3705_v2 = vpop.f32.mrf.mxu1  ;;  %v3988_v60 = vpop.f32.mrf.mxu0 }
 0x25d   : > { %v10079_v16 = vadd.f32 %v3988_v60, %v3695_v54  ;;  %v8240_v54 = vld [vmem:[%s12111_s3 + $0x98] ss:$12 sps:$4 sm:$0xff]  }
 0x25e   : > { %v3709_v4 = vpop.f32.mrf.mxu1  ;;  %v3992_v59 = vpop.f32.mrf.mxu0  ;;  %4231 = vmatmul.mubr.bf16.gmra.mxu0 %v9788_v52  ;;  %4274 = vmatmul.mubr.bf16.vlgmr.msra.gmra.mxu1 %v12526_v48 }
 0x25f   : > { %v10083_v28 = vadd.f32 %v3992_v59, %v3699_v19  ;;  %4283 = vmatprep.mubr.bf16.mxu1 %v9523_v7  ;;  %4566 = vmatprep.mubr.bf16.mxu0 %v12339_v11  ;;  %v8239_v7 = vld [vmem:[%s12111_s3 + $0x230] ss:$12 sps:$4 sm:$0xff]  }
 0x260   : > { %v3711_v3 = vpop.f32.mrf.mxu1  ;;  %v3994_v26 = vpop.f32.mrf.mxu0  ;;  %4828 = vmatpush1.bf16.msra.mxu1 %v8238_v39  ;;  %v8242_v39 = vld [vmem:[%s12111_s3 + $0x80] ss:$12 sps:$4 sm:$0xff]  }
 0x261   : > { %v10090_v25 = vadd.f32 %v3994_v26, %v3701_v63  ;;  %4829 = vmatprep.subr.bf16.mxu1 %v12339_v11 }
 0x262   : > { %v3713_v33 = vpop.f32.mrf.mxu1  ;;  %v3996_v60 = vpop.f32.mrf.mxu0 }
 0x263   : > { %v10093_v48 = vadd.f32 %v3996_v60, %v3703_v9 }
 0x264   : > { %v3715_v19 = vpop.f32.mrf.mxu1  ;;  %v3998_v59 = vpop.f32.mrf.mxu0  ;;  %4830 = vmatpush1.bf16.msra.mxu1 %v8240_v54 }
 0x265   : > { %v10101_v63 = vadd.f32 %v3998_v59, %v3705_v2  ;;  %4831 = vmatprep.subr.bf16.mxu1 %v12339_v11  ;;  %v8241_v2 = vld [vmem:[%s12111_s3 + $0x218] ss:$12 sps:$4 sm:$0xff]   ;;  %v8244_v59 = vld [vmem:[%s12111_s3 + $0x68] ss:$12 sps:$4 sm:$0xff]  }
 0x266   : > { %v3719_v26 = vpop.f32.mrf.mxu1  ;;  %v4002_v52 = vpop.f32.mrf.mxu0  ;;  %4284 = vmatmul.mubr.bf16.gmra.mxu1 %v9509_v51  ;;  %7727 = vmatmul.mubr.msk.bf16.vlgmr.msra.gmra.mxu0 %vm3566_vm3, %v9816_v36 }
 0x267   : > { %v10107_v9 = vadd.f32 %v4002_v52, %v3709_v4  ;;  %4293 = vmatprep.mubr.bf16.mxu1 %v9547_v6  ;;  %4576 = vmatprep.mubr.bf16.mxu0 %v12339_v11 }
 0x268   : > { %v3721_v54 = vpop.f32.mrf.mxu1  ;;  %v4004_v60 = vpop.f32.mrf.mxu0  ;;  %5069 = vmatpush1.bf16.msra.mxu0 %v8239_v7  ;;  %4832 = vmatpush1.bf16.msra.mxu1 %v8242_v39  ;;  %v8243_v39 = vld [vmem:[%s12111_s3 + $0x200] ss:$12 sps:$4 sm:$0xff]  }
 0x269   : > { %v10117_v51 = vadd.f32 %v4004_v60, %v3711_v3  ;;  %5070 = vmatprep.subr.bf16.mxu0 %v12339_v11  ;;  %4833 = vmatprep.subr.bf16.mxu1 %v12339_v11  ;;  %v8246_v3 = vld [vmem:[%s12111_s3 + $0x50] ss:$12 sps:$4 sm:$0xff]  }
 0x26a   : > { %v3723_v52 = vpop.f32.mrf.mxu1  ;;  %v4006_v4 = vpop.f32.mrf.mxu0 }
 0x26b   : > { %v10121_v6 = vadd.f32 %v4006_v4, %v3713_v33 }
 0x26c   : > { %v3725_v7 = vpop.f32.mrf.mxu1  ;;  %v4008_v36 = vpop.f32.mrf.mxu0  ;;  %5071 = vmatpush1.bf16.msra.mxu0 %v8241_v2  ;;  %4834 = vmatpush1.bf16.msra.mxu1 %v8244_v59 }
 0x26d   : > { %v10129_v60 = vadd.f32 %v4008_v36, %v3715_v19  ;;  %5072 = vmatprep.subr.bf16.mxu0 %v12339_v11  ;;  %4835 = vmatprep.subr.bf16.mxu1 %v12339_v11  ;;  %v8245_v19 = vld [vmem:[%s12111_s3 + $0x1e8] ss:$12 sps:$4 sm:$0xff]  }
 0x26e   : > { %v3729_v33 = vpop.f32.mrf.mxu1  ;;  %v4012_v4 = vpop.f32.mrf.mxu0  ;;  %4294 = vmatmul.mubr.bf16.gmra.mxu1 %v9539_v29  ;;  %7728 = vmatmul.mubr.msk.bf16.gmra.mxu0 %vm3566_vm3, %v9810_v56 }
 0x26f   : > { %v10136_v2 = vadd.f32 %v4012_v4, %v3719_v26  ;;  %4303 = vmatprep.mubr.bf16.mxu1 %v9573_v40  ;;  %4586 = vmatprep.mubr.bf16.mxu0 %v12339_v11  ;;  %v8248_v40 = vld [vmem:[%s12111_s3 + $0x38] ss:$12 sps:$4 sm:$0xff]  }
 0x270   : > { %v3731_v59 = vpop.f32.mrf.mxu1  ;;  %v4014_v36 = vpop.f32.mrf.mxu0  ;;  %5073 = vmatpush1.bf16.msra.mxu0 %v8243_v39  ;;  %4836 = vmatpush1.bf16.msra.mxu1 %v8246_v3 }
 0x271   : > { %v10143_v34 = vadd.f32 %v4014_v36, %v3721_v54  ;;  %5074 = vmatprep.subr.bf16.mxu0 %v12339_v11  ;;  %4837 = vmatprep.subr.bf16.mxu1 %v12339_v11  ;;  %v8247_v54 = vld [vmem:[%s12111_s3 + $0x1d0] ss:$12 sps:$4 sm:$0xff]  }
 0x272   : > { %v3733_v26 = vpop.f32.mrf.mxu1  ;;  %v4016_v4 = vpop.f32.mrf.mxu0 }
 0x273   : > { %v10147_v29 = vadd.f32 %v4016_v4, %v3723_v52 }
 0x274   : > { %v3735_v39 = vpop.f32.mrf.mxu1  ;;  %v4018_v56 = vpop.f32.mrf.mxu0  ;;  %5075 = vmatpush1.bf16.msra.mxu0 %v8245_v19  ;;  %4838 = vmatpush1.bf16.msra.mxu1 %v8248_v40  ;;  %v8249_v40 = vld [vmem:[%s12111_s3 + $0x1b8] ss:$12 sps:$4 sm:$0xff]  }
 0x275   : > { %v10155_v3 = vadd.f32 %v4018_v56, %v3725_v7  ;;  %5076 = vmatprep.subr.bf16.mxu0 %v12339_v11  ;;  %4839 = vmatprep.subr.bf16.mxu1 %v12339_v11 }
 0x276   : > { %v3739_v36 = vpop.f32.mrf.mxu1  ;;  %v4022_v61 = vpop.f32.mrf.mxu0  ;;  %4304 = vmatmul.mubr.bf16.gmra.mxu1 %v9559_v35  ;;  %7729 = vmatmul.mubr.msk.bf16.gmra.mxu0 %vm3566_vm3, %v9836_v23 }
 0x277   : > { %v10161_v52 = vadd.f32 %v4022_v61, %v3729_v33  ;;  %4313 = vmatprep.mubr.bf16.mxu1 %v9593_v38  ;;  %4596 = vmatprep.mubr.bf16.mxu0 %v12339_v11 }
 0x278   : > { %v3741_v19 = vpop.f32.mrf.mxu1  ;;  %v4024_v4 = vpop.f32.mrf.mxu0  ;;  %5077 = vmatpush1.bf16.msra.mxu0 %v8247_v54 }
 0x279   : > { %v10169_v56 = vadd.f32 %v4024_v4, %v3731_v59  ;;  %5078 = vmatprep.subr.bf16.mxu0 %v12339_v11 }
 0x27a   : > { %v3743_v7 = vpop.f32.mrf.mxu1  ;;  %v4026_v61 = vpop.f32.mrf.mxu0 }
 0x27b   : > { %v10172_v33 = vadd.f32 %v4026_v61, %v3733_v26 }
 0x27c   : > { %v3745_v38 = vpop.f32.mrf.mxu1  ;;  %v4028_v35 = vpop.f32.mrf.mxu0  ;;  %5079 = vmatpush1.bf16.msra.mxu0 %v8249_v40 }
 0x27d   : > { %v10174_v23 = vadd.f32 %v4028_v35, %v3735_v39  ;;  %5080 = vmatprep.subr.bf16.mxu0 %v12339_v11  ;;  %v8250_v35 = vld [vmem:[%s12111_s3 + $0x20] ss:$12 sps:$4 sm:$0xff]  }
 0x27e   : > { %v3749_v54 = vpop.f32.mrf.mxu1  ;;  %v4032_v12 = vpop.f32.mrf.mxu0  ;;  %4314 = vmatmul.mubr.bf16.gmra.mxu1 %v9585_v13  ;;  %7730 = vmatmul.mubr.msk.bf16.gmra.mxu0 %vm3566_vm3, %v9830_v14 }
 0x27f   : > { %v10180_v59 = vadd.f32 %v4032_v12, %v3739_v36  ;;  %4323 = vmatprep.mubr.bf16.mxu1 %v9622_v47  ;;  %4606 = vmatprep.mubr.bf16.mxu0 %v12339_v11 }
 0x280   : > { %v3751_v26 = vpop.f32.mrf.mxu1  ;;  %v4034_v4 = vpop.f32.mrf.mxu0  ;;  %4840 = vmatpush1.bf16.msra.mxu1 %v8250_v35  ;;  %v12529_v35 = vld [vmem:[#allocation109_spill] sm:$0xff] }
 0x281   : > { %v10184_v40 = vadd.f32 %v4034_v4, %v3741_v19  ;;  %4841 = vmatprep.subr.bf16.mxu1 %v12339_v11  ;;  %v8251_v19 = vld [vmem:[%s12111_s3 + $0x1a0] ss:$12 sps:$4 sm:$0xff]  }
 0x282   : > { %v3753_v39 = vpop.f32.mrf.mxu1  ;;  %v4036_v61 = vpop.f32.mrf.mxu0  ;;  %5081 = vmatpush1.bf16.msra.mxu0 %v8251_v19 }
 0x283   : > { %v10189_v13 = vadd.f32 %v4036_v61, %v3743_v7  ;;  %5082 = vmatprep.subr.bf16.mxu0 %v12339_v11 }
 0x284   : > { %v3755_v14 = vpop.f32.mrf.mxu1  ;;  %v4038_v12 = vpop.f32.mrf.mxu0 }
 0x285   : > { %v10192_v36 = vadd.f32 %v4038_v12, %v3745_v38 }
 0x286   : > { %v3759_v4 = vpop.f32.mrf.mxu1  ;;  %v4042_v47 = vpop.f32.mrf.mxu0  ;;  %4324 = vmatmul.mubr.bf16.gmra.mxu1 %v9611_v20  ;;  %7731 = vmatmul.mubr.msk.bf16.gmra.mxu0 %vm3566_vm3, %v9856_v32  ;;  %v8252_v20 = vld [vmem:[%s12111_s3 + $0x8] ss:$12 sps:$4 sm:$0xff]  }
 0x287   : > { %12527 = vst [vmem:[#allocation182_spill] sm:$0xff] %v10192_v36  ;;  %v10200_v7 = vadd.f32 %v4042_v47, %v3749_v54  ;;  %4333 = vmatprep.mubr.bf16.mxu1 %v12529_v35  ;;  %4616 = vmatprep.mubr.bf16.mxu0 %v12339_v11 }
 0x288   : > { %v3761_v61 = vpop.f32.mrf.mxu1  ;;  %v4044_v38 = vpop.f32.mrf.mxu0  ;;  %4842 = vmatpush1.bf16.msra.mxu1 %v8252_v20 }
 0x289   : > { %12528 = vst [vmem:[#allocation183_spill] sm:$0xff] %v10200_v7  ;;  %v10204_v12 = vadd.f32 %v4044_v38, %v3751_v26  ;;  %4843 = vmatprep.subr.bf16.mxu1 %v12339_v11  ;;  %v12532_v38 = vld [vmem:[#allocation107_spill] sm:$0xff]  ;;  %v8253_v7 = vld [vmem:[%s12111_s3 + $0x170] ss:$12 sps:$4 sm:$0xff]  }
 0x28a   : > { %v3763_v1 = vpop.f32.mrf.mxu1  ;;  %v4046_v36 = vpop.f32.mrf.mxu0 }
 0x28b   : > { %12530 = vst [vmem:[#allocation184_spill] sm:$0xff] %v10204_v12  ;;  %v10210_v32 = vadd.f32 %v4046_v36, %v3753_v39  ;;  %v12533_v12 = vld [vmem:[#allocation139_spill] sm:$0xff]  ;;  %v12535_v36 = vld [vmem:[#allocation113_spill] sm:$0xff] }
 0x28c   : > { %v3765_v47 = vpop.f32.mrf.mxu1  ;;  %v4048_v54 = vpop.f32.mrf.mxu0  ;;  %4844 = vmatpush2.bf16.msra.mxu1 %v8253_v7 }
 0x28d   : > { %v10212_v35 = vadd.f32 %v4048_v54, %v3755_v14  ;;  %4845 = vmatprep.subr.bf16.mxu1 %v12339_v11 }
 0x28e   : > { %v3769_v19 = vpop.f32.mrf.mxu1  ;;  %v4052_v26 = vpop.f32.mrf.mxu0  ;;  %4334 = vmatmul.mubr.bf16.gmra.mxu1 %v12532_v38  ;;  %7732 = vmatmul.mubr.msk.bf16.gmra.mxu0 %vm3566_vm3, %v12533_v12  ;;  %v8254_v38 = vld [vmem:[%s12111_s3 + $0x188] ss:$12 sps:$4 sm:$0xff]  }
 0x28f   : > { %12531 = vst [vmem:[#allocation185_spill] sm:$0xff] %v10212_v35  ;;  %v10221_v39 = vadd.f32 %v4052_v26, %v3759_v4  ;;  %4343 = vmatprep.mubr.bf16.mxu1 %v12535_v36  ;;  %4626 = vmatprep.mubr.bf16.mxu0 %v12339_v11  ;;  %v8255_v4 = vld [vmem:[%s12111_s3 + $0x158] ss:$12 sps:$4 sm:$0xff]  }
 0x290   : > { %v3771_v20 = vpop.f32.mrf.mxu1  ;;  %v4054_v14 = vpop.f32.mrf.mxu0  ;;  %5083 = vmatpush1.bf16.msra.mxu0 %v8254_v38  ;;  %4846 = vmatpush2.bf16.msra.mxu1 %v8255_v4 }
 0x291   : > { %12534 = vst [vmem:[#allocation186_spill] sm:$0xff] %v10221_v39  ;;  %v10225_v54 = vadd.f32 %v4054_v14, %v3761_v61  ;;  %5084 = vmatprep.subr.bf16.mxu0 %v12339_v11  ;;  %4847 = vmatprep.subr.bf16.mxu1 %v12339_v11 }
 0x292   : > { %v3773_v12 = vpop.f32.mrf.mxu1  ;;  %v4056_v35 = vpop.f32.mrf.mxu0 }
 0x293   : > { %12536 = vst [vmem:[#allocation187_spill] sm:$0xff] %v10225_v54  ;;  %v10234_v26 = vadd.f32 %v4056_v35, %v3763_v1  ;;  %v12538_v54 = vld [vmem:[#allocation111_spill] sm:$0xff]  ;;  %v8257_v35 = vld [vmem:[%s12111_s3 + $0x2f0] ss:$12 sps:$4 sm:$0xff]  }
 0x294   : > { %v3775_v36 = vpop.f32.mrf.mxu1  ;;  %v4058_v39 = vpop.f32.mrf.mxu0  ;;  %v8256_v1 = vld [vmem:[%s12111_s3 + $0x140] ss:$12 sps:$4 sm:$0xff]   ;;  %5085 = vmatpush2.bf16.msra.mxu0 %v8257_v35 }
 0x295   : > { %v10237_v7 = vadd.f32 %v4058_v39, %v3765_v47  ;;  %v12540_v47 = vld [vmem:[#allocation117_spill] sm:$0xff]  ;;  %4848 = vmatpush2.bf16.msra.mxu1 %v8256_v1  ;;  %5086 = vmatprep.subr.bf16.mxu0 %v12339_v11 }
 0x296   : > { %v3779_v61 = vpop.f32.mrf.mxu1  ;;  %v4062_v14 = vpop.f32.mrf.mxu0  ;;  %4344 = vmatmul.mubr.bf16.gmra.mxu1 %v12538_v54  ;;  %7733 = vmatmul.mubr.msk.bf16.gmra.mxu0 %vm3566_vm3, %v9876_v42 }
 0x297   : > { %12537 = vst [vmem:[#allocation188_spill] sm:$0xff] %v10237_v7  ;;  %v10249_v38 = vadd.f32 %v4062_v14, %v3769_v19  ;;  %4353 = vmatprep.mubr.bf16.mxu1 %v12540_v47  ;;  %4636 = vmatprep.mubr.bf16.mxu0 %v12339_v11  ;;  %v8258_v19 = vld [vmem:[%s12111_s3 + $0x128] ss:$12 sps:$4 sm:$0xff]   ;;  %v8259_v14 = vld [vmem:[%s12111_s3 + $0x2d8] ss:$12 sps:$4 sm:$0xff]  }
 0x298   : > { %v3781_v39 = vpop.f32.mrf.mxu1  ;;  %v4064_v4 = vpop.f32.mrf.mxu0  ;;  %4849 = vmatprep.subr.bf16.mxu1 %v12339_v11  ;;  %5087 = vmatpush2.bf16.msra.mxu0 %v8259_v14 }
 0x299   : > { %12539 = vst [vmem:[#allocation189_spill] sm:$0xff] %v10249_v38  ;;  %v10253_v54 = vadd.f32 %v4064_v4, %v3771_v20  ;;  %4850 = vmatpush2.bf16.msra.mxu1 %v8258_v19  ;;  %5088 = vmatprep.subr.bf16.mxu0 %v12339_v11  ;;  %v12544_v38 = vld [vmem:[#allocation115_spill] sm:$0xff]  ;;  %v12546_v19 = vld [vmem:[#allocation121_spill] sm:$0xff] }
 0x29a   : > { %v3783_v42 = vpop.f32.mrf.mxu1  ;;  %v4066_v7 = vpop.f32.mrf.mxu0  ;;  %4851 = vmatprep.subr.bf16.mxu1 %v12339_v11 }
 0x29b   : > { %12541 = vst [vmem:[#allocation190_spill] sm:$0xff] %v10253_v54  ;;  %v10263_v47 = vadd.f32 %v4066_v7, %v3773_v12  ;;  %v8260_v12 = vld [vmem:[%s12111_s3 + $0x110] ss:$12 sps:$4 sm:$0xff]  }
 0x29c   : > { %v3785_v1 = vpop.f32.mrf.mxu1  ;;  %v4068_v35 = vpop.f32.mrf.mxu0 }
 0x29d   : > { %12542 = vst [vmem:[#allocation191_spill] sm:$0xff] %v10263_v47  ;;  %v10265_v20 = vadd.f32 %v4068_v35, %v3775_v36  ;;  %v8261_v36 = vld [vmem:[%s12111_s3 + $0x2c0] ss:$12 sps:$4 sm:$0xff]   ;;  %4852 = vmatpush2.bf16.msra.mxu1 %v8260_v12 }
 0x29e   : > { %v3789_v4 = vpop.f32.mrf.mxu1  ;;  %v4072_v54 = vpop.f32.mrf.mxu0  ;;  %4354 = vmatmul.mubr.bf16.gmra.mxu1 %v12544_v38  ;;  %7734 = vmatmul.mubr.msk.bf16.gmra.mxu0 %vm3566_vm3, %v9870_v43 }
 0x29f   : > { %12543 = vst [vmem:[#allocation192_spill] sm:$0xff] %v10265_v20  ;;  %v10278_v7 = vadd.f32 %v4072_v54, %v3779_v61  ;;  %4363 = vmatprep.mubr.bf16.mxu1 %v12546_v19  ;;  %4646 = vmatprep.mubr.bf16.mxu0 %v12339_v11  ;;  %v8262_v54 = vld [vmem:[%s12111_s3 + $0xf8] ss:$12 sps:$4 sm:$0xff]   ;;  %v8263_v61 = vld [vmem:[%s12111_s3 + $0x2a8] ss:$12 sps:$4 sm:$0xff]  }
 0x2a0   : > { %v3791_v14 = vpop.f32.mrf.mxu1  ;;  %v4074_v35 = vpop.f32.mrf.mxu0  ;;  %5089 = vmatpush2.bf16.msra.mxu0 %v8261_v36  ;;  %4853 = vmatprep.subr.bf16.mxu1 %v12339_v11 }
 0x2a1   : > { %12545 = vst [vmem:[#allocation193_spill] sm:$0xff] %v10278_v7  ;;  %v10282_v38 = vadd.f32 %v4074_v35, %v3781_v39  ;;  %5090 = vmatprep.subr.bf16.mxu0 %v12339_v11  ;;  %4854 = vmatpush2.bf16.msra.mxu1 %v8262_v54  ;;  %v12550_v7 = vld [vmem:[#allocation119_spill] sm:$0xff]  ;;  %v12552_v54 = vld [vmem:[#allocation125_spill] sm:$0xff] }
 0x2a2   : > { %v3793_v43 = vpop.f32.mrf.mxu1  ;;  %v4076_v20 = vpop.f32.mrf.mxu0  ;;  %4855 = vmatprep.subr.bf16.mxu1 %v12339_v11 }
 0x2a3   : > { %12547 = vst [vmem:[#allocation194_spill] sm:$0xff] %v10282_v38  ;;  %v10292_v19 = vadd.f32 %v4076_v20, %v3783_v42  ;;  %v8264_v42 = vld [vmem:[%s12111_s3 + $0xe0] ss:$12 sps:$4 sm:$0xff]  }
 0x2a4   : > { %v3795_v12 = vpop.f32.mrf.mxu1  ;;  %v4078_v36 = vpop.f32.mrf.mxu0  ;;  %5091 = vmatpush2.bf16.msra.mxu0 %v8263_v61 }
 0x2a5   : > { %12548 = vst [vmem:[#allocation195_spill] sm:$0xff] %v10292_v19  ;;  %v10294_v39 = vadd.f32 %v4078_v36, %v3785_v1  ;;  %5092 = vmatprep.subr.bf16.mxu0 %v12339_v11  ;;  %v8265_v1 = vld [vmem:[%s12111_s3 + $0x290] ss:$12 sps:$4 sm:$0xff]   ;;  %4856 = vmatpush2.bf16.msra.mxu1 %v8264_v42 }
 0x2a6   : > { %v3799_v35 = vpop.f32.mrf.mxu1  ;;  %v4082_v38 = vpop.f32.mrf.mxu0  ;;  %4364 = vmatmul.mubr.bf16.gmra.mxu1 %v12550_v7  ;;  %7735 = vmatmul.mubr.msk.bf16.gmra.mxu0 %vm3566_vm3, %v9896_v27 }
 0x2a7   : > { %12549 = vst [vmem:[#allocation196_spill] sm:$0xff] %v10294_v39  ;;  %v10307_v20 = vadd.f32 %v4082_v38, %v3789_v4  ;;  %4373 = vmatprep.mubr.bf16.mxu1 %v12552_v54  ;;  %4656 = vmatprep.mubr.bf16.mxu0 %v12339_v11  ;;  %v8266_v38 = vld [vmem:[%s12111_s3 + $0xc8] ss:$12 sps:$4 sm:$0xff]   ;;  %v8267_v4 = vld [vmem:[%s12111_s3 + $0x278] ss:$12 sps:$4 sm:$0xff]  }
 0x2a8   : > { %v3801_v61 = vpop.f32.mrf.mxu1  ;;  %v4084_v36 = vpop.f32.mrf.mxu0  ;;  %5093 = vmatpush2.bf16.msra.mxu0 %v8265_v1  ;;  %4857 = vmatprep.subr.bf16.mxu1 %v12339_v11 }
 0x2a9   : > { %12551 = vst [vmem:[#allocation197_spill] sm:$0xff] %v10307_v20  ;;  %v10311_v7 = vadd.f32 %v4084_v36, %v3791_v14  ;;  %5094 = vmatprep.subr.bf16.mxu0 %v12339_v11  ;;  %4858 = vmatpush2.bf16.msra.mxu1 %v8266_v38  ;;  %v12556_v20 = vld [vmem:[#allocation123_spill] sm:$0xff]  ;;  %v12558_v38 = vld [vmem:[#allocation129_spill] sm:$0xff] }
 0x2aa   : > { %v3803_v27 = vpop.f32.mrf.mxu1  ;;  %v4086_v39 = vpop.f32.mrf.mxu0  ;;  %5309 = vmatprep.subr.bf16.mxu1 %v12339_v11 }
 0x2ab   : > { %12553 = vst [vmem:[#allocation198_spill] sm:$0xff] %v10311_v7  ;;  %v10321_v54 = vadd.f32 %v4086_v39, %v3793_v43  ;;  %v8268_v43 = vld [vmem:[%s12111_s3 + $0x260] ss:$12 sps:$4 sm:$0xff]  }
 0x2ac   : > { %v3805_v42 = vpop.f32.mrf.mxu1  ;;  %v4088_v1 = vpop.f32.mrf.mxu0  ;;  %5095 = vmatpush2.bf16.msra.mxu0 %v8267_v4 }
 0x2ad   : > { %12554 = vst [vmem:[#allocation199_spill] sm:$0xff] %v10321_v54  ;;  %v10323_v14 = vadd.f32 %v4088_v1, %v3795_v12  ;;  %5096 = vmatprep.subr.bf16.mxu0 %v12339_v11 }
 0x2ae   : > { %v3809_v36 = vpop.f32.mrf.mxu1  ;;  %v4092_v7 = vpop.f32.mrf.mxu0  ;;  %4374 = vmatmul.mubr.bf16.gmra.mxu1 %v12556_v20  ;;  %7736 = vmatmul.mubr.msk.bf16.gmra.mxu0 %vm3566_vm3, %v9890_v15  ;;  %v8269_v15 = vld [vmem:[%s12111_s3 + $0x248] ss:$12 sps:$4 sm:$0xff]  }
 0x2af   : > { %12555 = vst [vmem:[#allocation200_spill] sm:$0xff] %v10323_v14  ;;  %v10333_v39 = vadd.f32 %v4092_v7, %v3799_v35  ;;  %4383 = vmatprep.mubr.bf16.mxu1 %v12558_v38  ;;  %4666 = vmatprep.mubr.bf16.mxu0 %v12339_v11 }
 0x2b0   : > { %v3811_v12 = vpop.f32.mrf.mxu1  ;;  %v4094_v4 = vpop.f32.mrf.mxu0  ;;  %5097 = vmatpush2.bf16.msra.mxu0 %v8268_v43  ;;  %v12562_v43 = vld [vmem:[#allocation127_spill] sm:$0xff] }
 0x2b1   : > { %12557 = vst [vmem:[#allocation201_spill] sm:$0xff] %v10333_v39  ;;  %v10337_v1 = vadd.f32 %v4094_v4, %v3801_v61  ;;  %5098 = vmatprep.subr.bf16.mxu0 %v12339_v11  ;;  %v12563_v4 = vld [vmem:[#allocation133_spill] sm:$0xff] }
 0x2b2   : > { %v3813_v20 = vpop.f32.mrf.mxu1  ;;  %v4096_v14 = vpop.f32.mrf.mxu0 }
 0x2b3   : > { %12559 = vst [vmem:[#allocation202_spill] sm:$0xff] %v10337_v1  ;;  %v10343_v54 = vadd.f32 %v4096_v14, %v3803_v27 }
 0x2b4   : > { %v3815_v7 = vpop.f32.mrf.mxu1  ;;  %v4098_v35 = vpop.f32.mrf.mxu0  ;;  %5099 = vmatpush2.bf16.msra.mxu0 %v8269_v15 }
 0x2b5   : > { %12560 = vst [vmem:[#allocation203_spill] sm:$0xff] %v10343_v54  ;;  %v10345_v38 = vadd.f32 %v4098_v35, %v3805_v42 }
 0x2b6   : > { %v3819_v39 = vpop.f32.mrf.mxu1  ;;  %v4102_v19 = vpop.f32.mrf.mxu0  ;;  %4384 = vmatmul.mubr.bf16.gmra.mxu1 %v12562_v43  ;;  %7737 = vmatmul.mubr.msk.bf16.gmra.mxu0 %vm3566_vm3, %v9916_v55 }
 0x2b7   : > { %12561 = vst [vmem:[#allocation204_spill] sm:$0xff] %v10345_v38  ;;  %v10350_v61 = vadd.f32 %v4102_v19, %v3809_v36  ;;  %4393 = vmatprep.mubr.bf16.mxu1 %v12563_v4  ;;  %4676 = vmatprep.mubr.bf16.mxu0 %v12339_v11  ;;  %v12567_v19 = vld [vmem:[#allocation130_spill] sm:$0xff]  ;;  %v12568_v4 = vld [vmem:[#allocation137_spill] sm:$0xff] }
 0x2b8   : > { %v3821_v27 = vpop.f32.mrf.mxu1  ;;  %v4104_v14 = vpop.f32.mrf.mxu0 }
 0x2b9   : > { %v10354_v54 = vadd.f32 %v4104_v14, %v3811_v12 }
 0x2ba   : > { %v3823_v15 = vpop.f32.mrf.mxu1  ;;  %v4106_v42 = vpop.f32.mrf.mxu0 }
 0x2bb   : > { %12564 = vst [vmem:[#allocation205_spill] sm:$0xff] %v10354_v54  ;;  %v10356_v35 = vadd.f32 %v4106_v42, %v3813_v20 }
 0x2bc   : > { %v3825_v38 = vpop.f32.mrf.mxu1  ;;  %v4108_v1 = vpop.f32.mrf.mxu0 }
 0x2bd   : > { %12565 = vst [vmem:[#allocation206_spill] sm:$0xff] %v10356_v35  ;;  %v10358_v43 = vadd.f32 %v4108_v1, %v3815_v7 }
 0x2be   : > { %v3829_v47 = vpop.f32.mrf.mxu1  ;;  %v4112_v55 = vpop.f32.mrf.mxu0  ;;  %4394 = vmatmul.mubr.bf16.gmra.mxu1 %v12567_v19  ;;  %7738 = vmatmul.mubr.msk.bf16.gmra.mxu0 %vm3566_vm3, %v9910_v46 }
 0x2bf   : > { %12566 = vst [vmem:[#allocation207_spill] sm:$0xff] %v10358_v43  ;;  %v10363_v36 = vadd.f32 %v4112_v55, %v3819_v39  ;;  %4403 = vmatprep.mubr.bf16.mxu1 %v12568_v4  ;;  %4686 = vmatprep.mubr.bf16.mxu0 %v12339_v11  ;;  %v12572_v55 = vld [vmem:[#allocation134_spill] sm:$0xff]  ;;  %v12573_v4 = vld [vmem:[#allocation141_spill] sm:$0xff] }
 0x2c0   : > { %v3831_v12 = vpop.f32.mrf.mxu1  ;;  %v4114_v20 = vpop.f32.mrf.mxu0 }
 0x2c1   : > { %v10367_v14 = vadd.f32 %v4114_v20, %v3821_v27 }
 0x2c2   : > { %v3833_v42 = vpop.f32.mrf.mxu1  ;;  %v4116_v1 = vpop.f32.mrf.mxu0 }
 0x2c3   : > { %12569 = vst [vmem:[#allocation208_spill] sm:$0xff] %v10367_v14  ;;  %v10369_v7 = vadd.f32 %v4116_v1, %v3823_v15 }
 0x2c4   : > { %v3835_v43 = vpop.f32.mrf.mxu1  ;;  %v4118_v35 = vpop.f32.mrf.mxu0 }
 0x2c5   : > { %12570 = vst [vmem:[#allocation209_spill] sm:$0xff] %v10369_v7  ;;  %v10371_v19 = vadd.f32 %v4118_v35, %v3825_v38 }
 0x2c6   : > { %v3839_v54 = vpop.f32.mrf.mxu1  ;;  %v4122_v46 = vpop.f32.mrf.mxu0  ;;  %4404 = vmatmul.mubr.bf16.gmra.mxu1 %v12572_v55  ;;  %7739 = vmatmul.mubr.msk.bf16.gmra.mxu0 %vm3566_vm3, %v9936_v21 }
 0x2c7   : > { %12571 = vst [vmem:[#allocation210_spill] sm:$0xff] %v10371_v19  ;;  %v10376_v39 = vadd.f32 %v4122_v46, %v3829_v47  ;;  %4413 = vmatprep.mubr.bf16.mxu1 %v12573_v4  ;;  %4696 = vmatprep.mubr.bf16.mxu0 %v12339_v11  ;;  %v12577_v46 = vld [vmem:[#allocation138_spill] sm:$0xff]  ;;  %v12578_v4 = vld [vmem:[#allocation145_spill] sm:$0xff] }
 0x2c8   : > { %v3841_v27 = vpop.f32.mrf.mxu1  ;;  %v4124_v15 = vpop.f32.mrf.mxu0 }
 0x2c9   : > { %v10380_v20 = vadd.f32 %v4124_v15, %v3831_v12 }
 0x2ca   : > { %v3843_v1 = vpop.f32.mrf.mxu1  ;;  %v4126_v38 = vpop.f32.mrf.mxu0 }
 0x2cb   : > { %12574 = vst [vmem:[#allocation211_spill] sm:$0xff] %v10380_v20  ;;  %v10382_v35 = vadd.f32 %v4126_v38, %v3833_v42 }
 0x2cc   : > { %v3845_v19 = vpop.f32.mrf.mxu1  ;;  %v4128_v7 = vpop.f32.mrf.mxu0 }
 0x2cd   : > { %12575 = vst [vmem:[#allocation212_spill] sm:$0xff] %v10382_v35  ;;  %v10384_v55 = vadd.f32 %v4128_v7, %v3835_v43 }
 0x2ce   : > { %v3849_v14 = vpop.f32.mrf.mxu1  ;;  %v4132_v21 = vpop.f32.mrf.mxu0  ;;  %4414 = vmatmul.mubr.bf16.gmra.mxu1 %v12577_v46  ;;  %7740 = vmatmul.mubr.msk.bf16.gmra.mxu0 %vm3566_vm3, %v9930_v62 }
 0x2cf   : > { %12576 = vst [vmem:[#allocation213_spill] sm:$0xff] %v10384_v55  ;;  %v10389_v47 = vadd.f32 %v4132_v21, %v3839_v54  ;;  %4423 = vmatprep.mubr.bf16.mxu1 %v12578_v4  ;;  %4706 = vmatprep.mubr.bf16.mxu0 %v12339_v11  ;;  %v12582_v21 = vld [vmem:[#allocation142_spill] sm:$0xff]  ;;  %v12583_v4 = vld [vmem:[#allocation149_spill] sm:$0xff] }
 0x2d0   : > { %v3851_v12 = vpop.f32.mrf.mxu1  ;;  %v4134_v42 = vpop.f32.mrf.mxu0 }
 0x2d1   : > { %v10393_v15 = vadd.f32 %v4134_v42, %v3841_v27 }
 0x2d2   : > { %v3853_v38 = vpop.f32.mrf.mxu1  ;;  %v4136_v43 = vpop.f32.mrf.mxu0 }
 0x2d3   : > { %12579 = vst [vmem:[#allocation214_spill] sm:$0xff] %v10393_v15  ;;  %v10395_v7 = vadd.f32 %v4136_v43, %v3843_v1 }
 0x2d4   : > { %v3855_v55 = vpop.f32.mrf.mxu1  ;;  %v4138_v35 = vpop.f32.mrf.mxu0 }
 0x2d5   : > { %12580 = vst [vmem:[#allocation215_spill] sm:$0xff] %v10395_v7  ;;  %v10397_v46 = vadd.f32 %v4138_v35, %v3845_v19 }
 0x2d6   : > { %v3859_v20 = vpop.f32.mrf.mxu1  ;;  %v4142_v62 = vpop.f32.mrf.mxu0  ;;  %4424 = vmatmul.mubr.bf16.gmra.mxu1 %v12582_v21  ;;  %7741 = vmatmul.mubr.msk.bf16.gmra.mxu0 %vm3566_vm3, %v9956_v0 }
 0x2d7   : > { %12581 = vst [vmem:[#allocation216_spill] sm:$0xff] %v10397_v46  ;;  %v10402_v54 = vadd.f32 %v4142_v62, %v3849_v14  ;;  %4433 = vmatprep.mubr.bf16.mxu1 %v12583_v4  ;;  %4716 = vmatprep.mubr.bf16.mxu0 %v12339_v11  ;;  %v12587_v62 = vld [vmem:[#allocation146_spill] sm:$0xff]  ;;  %v12588_v4 = vld [vmem:[#allocation153_spill] sm:$0xff] }
 0x2d8   : > { %v3861_v27 = vpop.f32.mrf.mxu1  ;;  %v4144_v1 = vpop.f32.mrf.mxu0 }
 0x2d9   : > { %v10406_v42 = vadd.f32 %v4144_v1, %v3851_v12 }
 0x2da   : > { %v3863_v43 = vpop.f32.mrf.mxu1  ;;  %v4146_v19 = vpop.f32.mrf.mxu0 }
 0x2db   : > { %12584 = vst [vmem:[#allocation217_spill] sm:$0xff] %v10406_v42  ;;  %v10408_v35 = vadd.f32 %v4146_v19, %v3853_v38 }
 0x2dc   : > { %v3865_v46 = vpop.f32.mrf.mxu1  ;;  %v4148_v7 = vpop.f32.mrf.mxu0 }
 0x2dd   : > { %12585 = vst [vmem:[#allocation218_spill] sm:$0xff] %v10408_v35  ;;  %v10410_v21 = vadd.f32 %v4148_v7, %v3855_v55 }
 0x2de   : > { %v3869_v15 = vpop.f32.mrf.mxu1  ;;  %v4152_v0 = vpop.f32.mrf.mxu0  ;;  %4434 = vmatmul.mubr.bf16.gmra.mxu1 %v12587_v62  ;;  %7742 = vmatmul.mubr.msk.bf16.gmra.mxu0 %vm3566_vm3, %v9950_v49 }
 0x2df   : > { %12586 = vst [vmem:[#allocation219_spill] sm:$0xff] %v10410_v21  ;;  %v10415_v14 = vadd.f32 %v4152_v0, %v3859_v20  ;;  %4443 = vmatprep.mubr.bf16.mxu1 %v12588_v4  ;;  %4726 = vmatprep.mubr.bf16.mxu0 %v12339_v11  ;;  %v12592_v0 = vld [vmem:[#allocation150_spill] sm:$0xff]  ;;  %v12593_v4 = vld [vmem:[#allocation157_spill] sm:$0xff] }
 0x2e0   : > { %v3871_v12 = vpop.f32.mrf.mxu1  ;;  %v4154_v38 = vpop.f32.mrf.mxu0 }
 0x2e1   : > { %v10419_v1 = vadd.f32 %v4154_v38, %v3861_v27 }
 0x2e2   : > { %v3873_v19 = vpop.f32.mrf.mxu1  ;;  %v4156_v55 = vpop.f32.mrf.mxu0 }
 0x2e3   : > { %12589 = vst [vmem:[#allocation220_spill] sm:$0xff] %v10419_v1  ;;  %v10421_v7 = vadd.f32 %v4156_v55, %v3863_v43 }
 0x2e4   : > { %v3875_v21 = vpop.f32.mrf.mxu1  ;;  %v4158_v35 = vpop.f32.mrf.mxu0 }
 0x2e5   : > { %12590 = vst [vmem:[#allocation221_spill] sm:$0xff] %v10421_v7  ;;  %v10423_v62 = vadd.f32 %v4158_v35, %v3865_v46 }
 0x2e6   : > { %v3879_v42 = vpop.f32.mrf.mxu1  ;;  %v4162_v49 = vpop.f32.mrf.mxu0  ;;  %4444 = vmatmul.mubr.bf16.gmra.mxu1 %v12592_v0  ;;  %7743 = vmatmul.mubr.msk.bf16.gmra.mxu0 %vm3566_vm3, %v9976_v8 }
 0x2e7   : > { %12591 = vst [vmem:[#allocation222_spill] sm:$0xff] %v10423_v62  ;;  %v10428_v20 = vadd.f32 %v4162_v49, %v3869_v15  ;;  %4453 = vmatprep.mubr.bf16.mxu1 %v12593_v4  ;;  %4736 = vmatprep.mubr.bf16.mxu0 %v12339_v11  ;;  %v12597_v49 = vld [vmem:[#allocation154_spill] sm:$0xff]  ;;  %v12598_v4 = vld [vmem:[#allocation161_spill] sm:$0xff] }
 0x2e8   : > { %v3881_v27 = vpop.f32.mrf.mxu1  ;;  %v4164_v43 = vpop.f32.mrf.mxu0 }
 0x2e9   : > { %v10432_v38 = vadd.f32 %v4164_v43, %v3871_v12 }
 0x2ea   : > { %v3883_v55 = vpop.f32.mrf.mxu1  ;;  %v4166_v46 = vpop.f32.mrf.mxu0 }
 0x2eb   : > { %12594 = vst [vmem:[#allocation223_spill] sm:$0xff] %v10432_v38  ;;  %v10434_v35 = vadd.f32 %v4166_v46, %v3873_v19 }
 0x2ec   : > { %v3885_v62 = vpop.f32.mrf.mxu1  ;;  %v4168_v7 = vpop.f32.mrf.mxu0 }
 0x2ed   : > { %12595 = vst [vmem:[#allocation224_spill] sm:$0xff] %v10434_v35  ;;  %v10436_v0 = vadd.f32 %v4168_v7, %v3875_v21 }
 0x2ee   : > { %v3889_v1 = vpop.f32.mrf.mxu1  ;;  %v4172_v8 = vpop.f32.mrf.mxu0  ;;  %4454 = vmatmul.mubr.bf16.gmra.mxu1 %v12597_v49  ;;  %7744 = vmatmul.mubr.msk.bf16.gmra.mxu0 %vm3566_vm3, %v9970_v41 }
 0x2ef   : > { %12596 = vst [vmem:[#allocation225_spill] sm:$0xff] %v10436_v0  ;;  %v10441_v15 = vadd.f32 %v4172_v8, %v3879_v42  ;;  %4463 = vmatprep.mubr.bf16.mxu1 %v12598_v4  ;;  %4746 = vmatprep.mubr.bf16.mxu0 %v12339_v11  ;;  %v12602_v8 = vld [vmem:[#allocation158_spill] sm:$0xff]  ;;  %v12603_v4 = vld [vmem:[#allocation165_spill] sm:$0xff] }
 0x2f0   : > { %v3891_v12 = vpop.f32.mrf.mxu1  ;;  %v4174_v19 = vpop.f32.mrf.mxu0 }
 0x2f1   : > { %v10445_v43 = vadd.f32 %v4174_v19, %v3881_v27 }
 0x2f2   : > { %v3893_v46 = vpop.f32.mrf.mxu1  ;;  %v4176_v21 = vpop.f32.mrf.mxu0 }
 0x2f3   : > { %12599 = vst [vmem:[#allocation226_spill] sm:$0xff] %v10445_v43  ;;  %v10447_v7 = vadd.f32 %v4176_v21, %v3883_v55 }
 0x2f4   : > { %v3895_v0 = vpop.f32.mrf.mxu1  ;;  %v4178_v35 = vpop.f32.mrf.mxu0 }
 0x2f5   : > { %12600 = vst [vmem:[#allocation227_spill] sm:$0xff] %v10447_v7  ;;  %v10449_v49 = vadd.f32 %v4178_v35, %v3885_v62 }
 0x2f6   : > { %v3899_v38 = vpop.f32.mrf.mxu1  ;;  %v4182_v41 = vpop.f32.mrf.mxu0  ;;  %4464 = vmatmul.mubr.bf16.gmra.mxu1 %v12602_v8  ;;  %7745 = vmatmul.mubr.msk.bf16.gmra.mxu0 %vm3566_vm3, %v9996_v44 }
 0x2f7   : > { %12601 = vst [vmem:[#allocation228_spill] sm:$0xff] %v10449_v49  ;;  %v10454_v42 = vadd.f32 %v4182_v41, %v3889_v1  ;;  %4473 = vmatprep.mubr.bf16.mxu1 %v12603_v4  ;;  %4756 = vmatprep.mubr.bf16.mxu0 %v12339_v11  ;;  %v12607_v41 = vld [vmem:[#allocation162_spill] sm:$0xff]  ;;  %v12608_v4 = vld [vmem:[#allocation169_spill] sm:$0xff] }
 0x2f8   : > { %v3901_v27 = vpop.f32.mrf.mxu1  ;;  %v4184_v55 = vpop.f32.mrf.mxu0 }
 0x2f9   : > { %v10458_v19 = vadd.f32 %v4184_v55, %v3891_v12 }
 0x2fa   : > { %v3903_v21 = vpop.f32.mrf.mxu1  ;;  %v4186_v62 = vpop.f32.mrf.mxu0 }
 0x2fb   : > { %12604 = vst [vmem:[#allocation229_spill] sm:$0xff] %v10458_v19  ;;  %v10460_v35 = vadd.f32 %v4186_v62, %v3893_v46 }
 0x2fc   : > { %v3905_v49 = vpop.f32.mrf.mxu1  ;;  %v4188_v7 = vpop.f32.mrf.mxu0 }
 0x2fd   : > { %12605 = vst [vmem:[#allocation230_spill] sm:$0xff] %v10460_v35  ;;  %v10462_v8 = vadd.f32 %v4188_v7, %v3895_v0 }
 0x2fe   : > { %v3909_v43 = vpop.f32.mrf.mxu1  ;;  %v4192_v44 = vpop.f32.mrf.mxu0  ;;  %4474 = vmatmul.mubr.bf16.gmra.mxu1 %v12607_v41  ;;  %7746 = vmatmul.mubr.msk.bf16.gmra.mxu0 %vm3566_vm3, %v9990_v50 }
 0x2ff   : > { %12606 = vst [vmem:[#allocation231_spill] sm:$0xff] %v10462_v8  ;;  %v10467_v1 = vadd.f32 %v4192_v44, %v3899_v38  ;;  %4483 = vmatprep.mubr.bf16.mxu1 %v12608_v4  ;;  %4766 = vmatprep.mubr.bf16.mxu0 %v12339_v11  ;;  %v12611_v44 = vld [vmem:[#allocation166_spill] sm:$0xff] }
 0x300   : > { %v3911_v12 = vpop.f32.mrf.mxu1  ;;  %v4194_v46 = vpop.f32.mrf.mxu0 }
 0x301   : > { %v10471_v55 = vadd.f32 %v4194_v46, %v3901_v27 }
 0x302   : > { %v3913_v62 = vpop.f32.mrf.mxu1  ;;  %v4196_v0 = vpop.f32.mrf.mxu0 }
 0x303   : > { %v10473_v7 = vadd.f32 %v4196_v0, %v3903_v21 }
 0x304   : > { %v3915_v8 = vpop.f32.mrf.mxu1  ;;  %v4198_v35 = vpop.f32.mrf.mxu0 }
 0x305   : > { %12609 = vst [vmem:[#allocation232_spill] sm:$0xff] %v10473_v7  ;;  %v10475_v41 = vadd.f32 %v4198_v35, %v3905_v49  ;;  %v10489_v35 = vld [vmem:[%s12111_s3 + $0x488] ss:$12 sps:$4 sm:$0x3f]  }
 0x306   : > { %v3919_v19 = vpop.f32.mrf.mxu1  ;;  %v4202_v50 = vpop.f32.mrf.mxu0  ;;  %4484 = vmatmul.mubr.bf16.gmra.mxu1 %v12611_v44  ;;  %7747 = vmatmul.mubr.msk.bf16.gmra.mxu0 %vm3566_vm3, %v10016_v57 }
 0x307   : > { %12610 = vst [vmem:[#allocation233_spill] sm:$0xff] %v10475_v41  ;;  %v10480_v38 = vadd.f32 %v4202_v50, %v3909_v43  ;;  %4493 = vmatprep.mubr.bf16.mxu1 %v10018_v53  ;;  %4776 = vmatprep.mubr.bf16.mxu0 %v12339_v11 }
 0x308   : > { %v3921_v27 = vpop.f32.mrf.mxu1  ;;  %v4204_v21 = vpop.f32.mrf.mxu0  ;;  %7996 = vmatprep.subr.msk.bf16.mxu0 %vm3645_vm2, %v10489_v35 }
 0x309   : > { %12612 = vst [vmem:[#allocation234_spill] sm:$0xff] %v10480_v38  ;;  %v10484_v46 = vadd.f32 %v4204_v21, %v3911_v12  ;;  %v12616_v12 = vld [vmem:[#allocation170_spill] sm:$0xff]  ;;  %v12617_v21 = vld [vmem:[#allocation171_spill] sm:$0xff] }
 0x30a   : > { %v3923_v0 = vpop.f32.mrf.mxu1  ;;  %v4206_v49 = vpop.f32.mrf.mxu0 }
 0x30b   : > { %12613 = vst [vmem:[#allocation235_spill] sm:$0xff] %v10484_v46  ;;  %v10491_v44 = vadd.f32 %v4206_v49, %v3913_v62 }
 0x30c   : > { %v3925_v4 = vpop.f32.mrf.mxu1  ;;  %v4208_v50 = vpop.f32.mrf.mxu0 }
 0x30d   : > { %12614 = vst [vmem:[#allocation236_spill] sm:$0xff] %v10491_v44  ;;  %v10495_v43 = vadd.f32 %v4208_v50, %v3915_v8 }
 0x30e   : > { %v3929_v53 = vpop.f32.mrf.mxu1  ;;  %v4212_v57 = vpop.f32.mrf.mxu0  ;;  %4494 = vmatmul.mubr.bf16.gmra.mxu1 %v12616_v12  ;;  %7748 = vmatmul.mubr.msk.bf16.gmra.mxu0 %vm3566_vm3, %v12617_v21 }
 0x30f   : > { %12615 = vst [vmem:[#allocation237_spill] sm:$0xff] %v10495_v43  ;;  %v10500_v46 = vadd.f32 %v4212_v57, %v3919_v19  ;;  %4503 = vmatprep.mubr.bf16.mxu1 %v10038_v17  ;;  %4786 = vmatprep.mubr.bf16.mxu0 %v12339_v11  ;;  %v12620_v57 = vld [vmem:[#allocation176_spill] sm:$0xff] }
 0x310   : > { %v3931_v62 = vpop.f32.mrf.mxu1  ;;  %v4214_v49 = vpop.f32.mrf.mxu0 }
 0x311   : > { %v10504_v44 = vadd.f32 %v4214_v49, %v3921_v27 }
 0x312   : > { %v3933_v38 = vpop.f32.mrf.mxu1  ;;  %v4216_v8 = vpop.f32.mrf.mxu0 }
 0x313   : > { %v10506_v50 = vadd.f32 %v4216_v8, %v3923_v0 }
 0x314   : > { %v3935_v43 = vpop.f32.mrf.mxu1  ;;  %v4218_v41 = vpop.f32.mrf.mxu0 }
 0x315   : > { %12618 = vst [vmem:[#allocation238_spill] sm:$0xff] %v10506_v50  ;;  %v10508_v12 = vadd.f32 %v4218_v41, %v3925_v4 }
 0x316   : > { %v3939_v7 = vpop.f32.mrf.mxu1  ;;  %v4222_v21 = vpop.f32.mrf.mxu0  ;;  %4504 = vmatmul.mubr.bf16.gmra.mxu1 %v10028_v45  ;;  %7749 = vmatmul.mubr.msk.bf16.gmra.mxu0 %vm3566_vm3, %v12620_v57 }
 0x317   : > { %12619 = vst [vmem:[#allocation239_spill] sm:$0xff] %v10508_v12  ;;  %v10513_v19 = vadd.f32 %v4222_v21, %v3929_v53  ;;  %4513 = vmatprep.mubr.bf16.mxu1 %v10057_v10  ;;  %4796 = vmatprep.mubr.bf16.mxu0 %v12339_v11  ;;  %v12621_v53 = vld [vmem:[#allocation175_spill] sm:$0xff] }
 0x318   : > { %v3941_v27 = vpop.f32.mrf.mxu1  ;;  %v4224_v0 = vpop.f32.mrf.mxu0 }
 0x319   : > { %v10517_v49 = vadd.f32 %v4224_v0, %v3931_v62 }
 0x31a   : > { %v3943_v8 = vpop.f32.mrf.mxu1  ;;  %v4226_v4 = vpop.f32.mrf.mxu0 }
 0x31b   : > { %v10519_v41 = vadd.f32 %v4226_v4, %v3933_v38 }
 0x31c   : > { %v3945_v17 = vpop.f32.mrf.mxu1  ;;  %v4228_v12 = vpop.f32.mrf.mxu0 }
 0x31d   : > { %v10521_v45 = vadd.f32 %v4228_v12, %v3935_v43 }
 0x31e   : > { %v4232_v50 = vpop.f32.mrf.mxu0  ;;  %v4275_v57 = vpop.f32.mrf.mxu1  ;;  %4514 = vmatmul.mubr.bf16.gmra.mxu1 %v10048_v31  ;;  %7750 = vmatmul.mubr.msk.bf16.gmra.mxu0 %vm3566_vm3, %v12621_v53 }
 0x31f   : > { %v10526_v21 = vadd.f32 %v4232_v50, %v3939_v7  ;;  %v4276_v62 = vadd.f32 %v4275_v57, %v10066_v24  ;;  %4523 = vmatprep.mubr.bf16.mxu1 %v10072_v22  ;;  %4806 = vmatprep.mubr.bf16.mxu0 %v12339_v11 }
 0x320   : > { %v4234_v38 = vpop.f32.mrf.mxu0  ;;  %v4277_v0 = vpop.f32.mrf.mxu1 }
 0x321   : > { %12622 = vst [vmem:[#allocation240_spill] sm:$0xff] %v10526_v21  ;;  %v10531_v4 = vadd.f32 %v4234_v38, %v3941_v27  ;;  %v4278_v43 = vadd.f32 %v4277_v0, %v10070_v5 }
 0x322   : > { %v4236_v12 = vpop.f32.mrf.mxu0  ;;  %v4279_v10 = vpop.f32.mrf.mxu1 }
 0x323   : > { %v10534_v31 = vadd.f32 %v4236_v12, %v3943_v8  ;;  %v4280_v53 = vadd.f32 %v4279_v10, %v10074_v18  ;;  %v12623_v8 = vld [vmem:[#allocation4_spill] sm:$0xff] }
 0x324   : > { %v4238_v7 = vpop.f32.mrf.mxu0  ;;  %v4281_v50 = vpop.f32.mrf.mxu1 }
 0x325   : > { %v10537_v21 = vadd.f32 %v4238_v7, %v3945_v17  ;;  %v4282_v24 = vadd.f32 %v4281_v50, %v10079_v16 }
 0x326   : > { %v4285_v57 = vpop.f32.mrf.mxu1  ;;  %4524 = vmatmul.mubr.bf16.gmra.mxu1 %v10064_v30  ;;  %v4568_v22 = vpop.f32.mrf.mxu0  ;;  %7751 = vmatmul.mubr.msk.bf16.gmra.mxu0 %vm3566_vm3, %v10054_v37 }
 0x327   : > { %v4286_v5 = vadd.f32 %v4285_v57, %v10083_v28  ;;  %v4569_v27 = vadd.f32 %v4568_v22, %v4276_v62  ;;  %4859 = vmatprep.mubr.bf16.mxu1 %v12623_v8  ;;  %4816 = vmatprep.mubr.bf16.mxu0 %v12339_v11  ;;  %v8270_v22 = vld [vmem:[%s12111_s3 + $0x3b0] ss:$12 sps:$4 sm:$0xff]  }
 0x328   : > { %v4287_v10 = vpop.f32.mrf.mxu1  ;;  %v4570_v18 = vpop.f32.mrf.mxu0 }
 0x329   : > { %v4288_v17 = vadd.f32 %v4287_v10, %v10090_v25  ;;  %v4571_v38 = vadd.f32 %v4570_v18, %v4278_v43  ;;  %v12624_v25 = vld [vmem:[#allocation2_spill] sm:$0xff]  ;;  %v12625_v18 = vld [vmem:[#allocation8_spill] sm:$0xff] }
 0x32a   : > { %v4289_v16 = vpop.f32.mrf.mxu1  ;;  %v4572_v0 = vpop.f32.mrf.mxu0 }
 0x32b   : > { %v4290_v12 = vadd.f32 %v4289_v16, %v10093_v48  ;;  %v4573_v7 = vadd.f32 %v4572_v0, %v4280_v53  ;;  %v5844_v43 = vrot.slane %v4571_v38, 1  ;;  %v12626_v16 = vld [vmem:[#allocation28_spill] sm:$0xff] }
 0x32c   : > { %v4291_v50 = vpop.f32.mrf.mxu1  ;;  %v4574_v30 = vpop.f32.mrf.mxu0 }
 0x32d   : > { %v4292_v28 = vadd.f32 %v4291_v50, %v10101_v63  ;;  %v4575_v62 = vadd.f32 %v4574_v30, %v4282_v24  ;;  %v8272_v30 = vld [vmem:[%s12111_s3 + $0x398] ss:$12 sps:$4 sm:$0xff]  }
 0x32e   : > { %v4295_v57 = vpop.f32.mrf.mxu1  ;;  %v4578_v8 = vpop.f32.mrf.mxu0  ;;  %7752 = vmatmul.mubr.msk.bf16.gmra.mxu0 %vm3566_vm3, %v10050_v58  ;;  %4860 = vmatmul.mubr.bf16.vlgmr.msra.gmra.mxu1 %v12624_v25 }
 0x32f   : > { %v5845_v48 = vrot.slane %v4575_v62, 1  ;;  %v4296_v53 = vadd.f32 %v4295_v57, %v10107_v9  ;;  %v4579_v10 = vadd.f32 %v4578_v8, %v4286_v5  ;;  %4867 = vmatprep.mubr.bf16.mxu1 %v12625_v18  ;;  %5100 = vmatprep.mubr.bf16.mxu0 %v12626_v16 }
 0x330   : > { %v4297_v0 = vpop.f32.mrf.mxu1  ;;  %v4580_v63 = vpop.f32.mrf.mxu0  ;;  %5310 = vmatpush1.bf16.msra.mxu1 %v8270_v22 }
 0x331   : > { %v5846_v24 = vsel %vm5843_vm4, %v5844_v43, %v5845_v48  ;;  %v4298_v50 = vadd.f32 %v4297_v0, %v10117_v51  ;;  %v4581_v38 = vadd.f32 %v4580_v63, %v4288_v17  ;;  %5311 = vmatprep.subr.bf16.mxu1 %v12339_v11  ;;  %v8273_v43 = vld [vmem:[%s12111_s3 + $0x380] ss:$12 sps:$4 sm:$0xff]  }
 0x332   : > { %v10564_v9 = vadd.f32 %v5846_v24, %v4569_v27  ;;  %v4299_v5 = vpop.f32.mrf.mxu1  ;;  %v4582_v62 = vpop.f32.mrf.mxu0  ;;  %v3653_v27 = vsel %vm3645_vm2, %v10489_v35, 0  ;;  %v12627_v63 = vld [vmem:[#allocation6_spill] sm:$0xff] }
 0x333   : > { %v5847_v57 = vrot.slane %v4581_v38, 1  ;;  %v4300_v8 = vadd.f32 %v4299_v5, %v10121_v6  ;;  %v4583_v25 = vadd.f32 %v4582_v62, %v4290_v12  ;;  %v12629_v5 = vld [vmem:[#allocation12_spill] sm:$0xff] }
 0x334   : > { %v4301_v22 = vpop.f32.mrf.mxu1  ;;  %v4584_v18 = vpop.f32.mrf.mxu0  ;;  %5312 = vmatpush1.bf16.msra.mxu1 %v8272_v30  ;;  %v12628_v30 = vld [vmem:[#allocation27_spill] sm:$0xff] }
 0x335   : > { %v5848_v51 = vsel %vm5843_vm4, %v5845_v48, %v5847_v57  ;;  %v4302_v17 = vadd.f32 %v4301_v22, %v10129_v60  ;;  %v4585_v16 = vadd.f32 %v4584_v18, %v4292_v28  ;;  %5313 = vmatprep.subr.bf16.mxu1 %v12339_v11  ;;  %v12630_v60 = vld [vmem:[#allocation32_spill] sm:$0xff] }
 0x336   : > { %v10575_v0 = vadd.f32 %v5848_v51, %v4573_v7  ;;  %v4305_v6 = vpop.f32.mrf.mxu1  ;;  %v4588_v12 = vpop.f32.mrf.mxu0  ;;  %4868 = vmatmul.mubr.bf16.gmra.mxu1 %v12627_v63  ;;  %5101 = vmatmul.mubr.bf16.vlgmr.msra.gmra.mxu0 %v12628_v30  ;;  %v8274_v7 = vld [vmem:[%s12111_s3 + $0x368] ss:$12 sps:$4 sm:$0xff]  }
 0x337   : > { %v5849_v24 = vrot.slane %v4585_v16, 1  ;;  %v4306_v38 = vadd.f32 %v4305_v6, %v10136_v2  ;;  %v4589_v48 = vadd.f32 %v4588_v12, %v4296_v53  ;;  %4875 = vmatprep.mubr.bf16.mxu1 %v12629_v5  ;;  %5108 = vmatprep.mubr.bf16.mxu0 %v12630_v60 }
 0x338   : > { %v4307_v28 = vpop.f32.mrf.mxu1  ;;  %v4590_v35 = vpop.f32.mrf.mxu0  ;;  %7930 = vmatpush3.bf16.msra.mxu0 %v3653_v27  ;;  %5314 = vmatpush1.bf16.msra.mxu1 %v8273_v43 }
 0x339   : > { %v5850_v62 = vsel %vm5843_vm4, %v5847_v57, %v5849_v24  ;;  %v4308_v22 = vadd.f32 %v4307_v28, %v10143_v34  ;;  %v4591_v18 = vadd.f32 %v4590_v35, %v4298_v50  ;;  %5315 = vmatprep.subr.bf16.mxu1 %v12339_v11  ;;  %v8275_v57 = vld [vmem:[%s12111_s3 + $0x350] ss:$12 sps:$4 sm:$0xff]  }
 0x33a   : > { %v10588_v2 = vadd.f32 %v5850_v62, %v4579_v10  ;;  %v4309_v53 = vpop.f32.mrf.mxu1  ;;  %v4592_v51 = vpop.f32.mrf.mxu0 }
 0x33b   : > { %v5851_v16 = vrot.slane %v4591_v18, 1  ;;  %v4310_v6 = vadd.f32 %v4309_v53, %v10147_v29  ;;  %v4593_v27 = vadd.f32 %v4592_v51, %v4300_v8  ;;  %v12631_v29 = vld [vmem:[#allocation10_spill] sm:$0xff]  ;;  %v12632_v8 = vld [vmem:[#allocation31_spill] sm:$0xff] }
 0x33c   : > { %v4311_v43 = vpop.f32.mrf.mxu1  ;;  %v4594_v12 = vpop.f32.mrf.mxu0  ;;  %5316 = vmatpush1.bf16.msra.mxu1 %v8274_v7  ;;  %v12633_v7 = vld [vmem:[#allocation16_spill] sm:$0xff] }
 0x33d   : > { %v5852_v34 = vsel %vm5843_vm4, %v5849_v24, %v5851_v16  ;;  %v4312_v50 = vadd.f32 %v4311_v43, %v10155_v3  ;;  %v4595_v63 = vadd.f32 %v4594_v12, %v4302_v17  ;;  %5317 = vmatprep.subr.bf16.mxu1 %v12339_v11  ;;  %v12634_v24 = vld [vmem:[#allocation36_spill] sm:$0xff] }
 0x33e   : > { %v10597_v10 = vadd.f32 %v5852_v34, %v4583_v25  ;;  %v4315_v30 = vpop.f32.mrf.mxu1  ;;  %v4598_v5 = vpop.f32.mrf.mxu0  ;;  %4876 = vmatmul.mubr.bf16.gmra.mxu1 %v12631_v29  ;;  %5109 = vmatmul.mubr.bf16.gmra.mxu0 %v12632_v8  ;;  %v12635_v29 = vld [vmem:[#allocation14_spill] sm:$0xff] }
 0x33f   : > { %v5853_v60 = vrot.slane %v4595_v63, 1  ;;  %v4316_v28 = vadd.f32 %v4315_v30, %v10161_v52  ;;  %v4599_v35 = vadd.f32 %v4598_v5, %v4306_v38  ;;  %4883 = vmatprep.mubr.bf16.mxu1 %v12633_v7  ;;  %5116 = vmatprep.mubr.bf16.mxu0 %v12634_v24 }
 0x340   : > { %v4317_v3 = vpop.f32.mrf.mxu1  ;;  %v4600_v17 = vpop.f32.mrf.mxu0  ;;  %5318 = vmatpush1.bf16.msra.mxu1 %v8275_v57 }
 0x341   : > { %v5854_v25 = vsel %vm5843_vm4, %v5851_v16, %v5853_v60  ;;  %v4318_v62 = vadd.f32 %v4317_v3, %v10169_v56  ;;  %v4601_v18 = vadd.f32 %v4600_v17, %v4308_v22  ;;  %5319 = vmatprep.subr.bf16.mxu1 %v12339_v11 }
 0x342   : > { %v10607_v53 = vadd.f32 %v5854_v25, %v4589_v48  ;;  %v4319_v51 = vpop.f32.mrf.mxu1  ;;  %v4602_v43 = vpop.f32.mrf.mxu0  ;;  %v12636_v48 = vld [vmem:[#allocation35_spill] sm:$0xff] }
 0x343   : > { %v5855_v52 = vrot.slane %v4601_v18, 1  ;;  %v4320_v38 = vadd.f32 %v4319_v51, %v10172_v33  ;;  %v4603_v12 = vadd.f32 %v4602_v43, %v4310_v6  ;;  %v8276_v33 = vld [vmem:[%s12111_s3 + $0x338] ss:$12 sps:$4 sm:$0xff]  }
 0x344   : > { %v4321_v34 = vpop.f32.mrf.mxu1  ;;  %v4604_v63 = vpop.f32.mrf.mxu0  ;;  %5320 = vmatpush1.bf16.msra.mxu1 %v8276_v33  ;;  %v12642_v33 = vld [vmem:[#allocation183_spill] sm:$0xff] }
 0x345   : > { %v5856_v30 = vsel %vm5843_vm4, %v5853_v60, %v5855_v52  ;;  %v4322_v57 = vadd.f32 %v4321_v34, %v10174_v23  ;;  %v4605_v16 = vadd.f32 %v4604_v63, %v4312_v50  ;;  %v12637_v60 = vld [vmem:[#allocation20_spill] sm:$0xff]  ;;  %5321 = vmatprep.subr.bf16.mxu1 %v12339_v11 }
 0x346   : > { %v10612_v5 = vadd.f32 %v5856_v30, %v4593_v27  ;;  %v4325_v56 = vpop.f32.mrf.mxu1  ;;  %v4608_v22 = vpop.f32.mrf.mxu0  ;;  %4884 = vmatmul.mubr.bf16.gmra.mxu1 %v12635_v29  ;;  %5117 = vmatmul.mubr.bf16.gmra.mxu0 %v12636_v48  ;;  %v12638_v23 = vld [vmem:[#allocation40_spill] sm:$0xff]  ;;  %v12640_v29 = vld [vmem:[#allocation18_spill] sm:$0xff] }
 0x347   : > { %v5857_v6 = vrot.slane %v4605_v16, 1  ;;  %v4326_v8 = vadd.f32 %v4325_v56, %v10180_v59  ;;  %v4609_v7 = vadd.f32 %v4608_v22, %v4316_v28  ;;  %4891 = vmatprep.mubr.bf16.mxu1 %v12637_v60  ;;  %5124 = vmatprep.mubr.bf16.mxu0 %v12638_v23  ;;  %v12639_v16 = vld [vmem:[#allocation182_spill] sm:$0xff]  ;;  %v12644_v23 = vld [vmem:[#allocation44_spill] sm:$0xff] }
 0x348   : > { %v4327_v27 = vpop.f32.mrf.mxu1  ;;  %v4610_v50 = vpop.f32.mrf.mxu0 }
 0x349   : > { %v5858_v24 = vsel %vm5843_vm4, %v5855_v52, %v5857_v6  ;;  %v4328_v3 = vadd.f32 %v4327_v27, %v10184_v40  ;;  %v4611_v17 = vadd.f32 %v4610_v50, %v4318_v62 }
 0x34a   : > { %v10625_v25 = vadd.f32 %v5858_v24, %v4599_v35  ;;  %v4329_v18 = vpop.f32.mrf.mxu1  ;;  %v4612_v51 = vpop.f32.mrf.mxu0  ;;  %v12641_v35 = vld [vmem:[#allocation39_spill] sm:$0xff] }
 0x34b   : > { %v5859_v59 = vrot.slane %v4611_v17, 1  ;;  %v4330_v28 = vadd.f32 %v4329_v18, %v10189_v13  ;;  %v4613_v43 = vadd.f32 %v4612_v51, %v4320_v38  ;;  %v12643_v38 = vld [vmem:[#allocation24_spill] sm:$0xff] }
 0x34c   : > { %v4331_v34 = vpop.f32.mrf.mxu1  ;;  %v4614_v63 = vpop.f32.mrf.mxu0 }
 0x34d   : > { %v5860_v30 = vsel %vm5843_vm4, %v5857_v6, %v5859_v59  ;;  %v4332_v56 = vadd.f32 %v4331_v34, %v12639_v16  ;;  %v4615_v52 = vadd.f32 %v4614_v63, %v4322_v57 }
 0x34e   : > { %v10630_v22 = vadd.f32 %v5860_v30, %v4603_v12  ;;  %v4335_v40 = vpop.f32.mrf.mxu1  ;;  %v4618_v62 = vpop.f32.mrf.mxu0  ;;  %4892 = vmatmul.mubr.bf16.gmra.mxu1 %v12640_v29  ;;  %5125 = vmatmul.mubr.bf16.gmra.mxu0 %v12641_v35  ;;  %v12645_v12 = vld [vmem:[#allocation184_spill] sm:$0xff] }
 0x34f   : > { %v5861_v48 = vrot.slane %v4615_v52, 1  ;;  %v4336_v60 = vadd.f32 %v4335_v40, %v12642_v33  ;;  %v4619_v13 = vadd.f32 %v4618_v62, %v4326_v8  ;;  %4899 = vmatprep.mubr.bf16.mxu1 %v12643_v38  ;;  %5132 = vmatprep.mubr.bf16.mxu0 %v12644_v23  ;;  %v12646_v40 = vld [vmem:[#allocation185_spill] sm:$0xff]  ;;  %v12649_v38 = vld [vmem:[#allocation186_spill] sm:$0xff] }
 0x350   : > { %v4337_v6 = vpop.f32.mrf.mxu1  ;;  %v4620_v27 = vpop.f32.mrf.mxu0 }
 0x351   : > { %v5862_v57 = vsel %vm5843_vm4, %v5859_v59, %v5861_v48  ;;  %v4338_v50 = vadd.f32 %v4337_v6, %v12645_v12  ;;  %v4621_v24 = vadd.f32 %v4620_v27, %v4328_v3  ;;  %v12647_v3 = vld [vmem:[#allocation22_spill] sm:$0xff]  ;;  %v12651_v27 = vld [vmem:[#allocation48_spill] sm:$0xff]  ;;  %v12652_v12 = vld [vmem:[#allocation187_spill] sm:$0xff] }
 0x352   : > { %v10639_v17 = vadd.f32 %v5862_v57, %v4609_v7  ;;  %v4339_v18 = vpop.f32.mrf.mxu1  ;;  %v4622_v51 = vpop.f32.mrf.mxu0  ;;  %v12648_v7 = vld [vmem:[#allocation43_spill] sm:$0xff] }
 0x353   : > { %v5863_v34 = vrot.slane %v4621_v24, 1  ;;  %v4340_v63 = vadd.f32 %v4339_v18, %v10210_v32  ;;  %v4623_v30 = vadd.f32 %v4622_v51, %v4330_v28  ;;  %v8277_v32 = vld [vmem:[%s12111_s3 + $0x320] ss:$12 sps:$4 sm:$0xff]  }
 0x354   : > { %v4341_v8 = vpop.f32.mrf.mxu1  ;;  %v4624_v16 = vpop.f32.mrf.mxu0  ;;  %5322 = vmatpush1.bf16.msra.mxu1 %v8277_v32 }
 0x355   : > { %v5864_v52 = vsel %vm5843_vm4, %v5861_v48, %v5863_v34  ;;  %v4342_v62 = vadd.f32 %v4341_v8, %v12646_v40  ;;  %v4625_v29 = vadd.f32 %v4624_v16, %v4332_v56  ;;  %v12650_v48 = vld [vmem:[#allocation29_spill] sm:$0xff]  ;;  %5323 = vmatprep.subr.bf16.mxu1 %v12339_v11 }
 0x356   : > { %v10644_v35 = vadd.f32 %v5864_v52, %v4613_v43  ;;  %v4345_v59 = vpop.f32.mrf.mxu1  ;;  %v4628_v33 = vpop.f32.mrf.mxu0  ;;  %4900 = vmatmul.mubr.bf16.gmra.mxu1 %v12647_v3  ;;  %5133 = vmatmul.mubr.bf16.gmra.mxu0 %v12648_v7 }
 0x357   : > { %v5865_v28 = vrot.slane %v4625_v29, 1  ;;  %v4346_v23 = vadd.f32 %v4345_v59, %v12649_v38  ;;  %v4629_v6 = vadd.f32 %v4628_v33, %v4336_v60  ;;  %4907 = vmatprep.mubr.bf16.mxu1 %v12650_v48  ;;  %5140 = vmatprep.mubr.bf16.mxu0 %v12651_v27  ;;  %v8278_v60 = vld [vmem:[%s12111_s3 + $0x308] ss:$12 sps:$4 sm:$0xff]   ;;  %v12654_v48 = vld [vmem:[#allocation26_spill] sm:$0xff] }
 0x358   : > { %v4347_v43 = vpop.f32.mrf.mxu1  ;;  %v4630_v56 = vpop.f32.mrf.mxu0  ;;  %5324 = vmatpush1.bf16.msra.mxu1 %v8278_v60  ;;  %v12655_v27 = vld [vmem:[#allocation47_spill] sm:$0xff] }
 0x359   : > { %v5866_v57 = vsel %vm5843_vm4, %v5863_v34, %v5865_v28  ;;  %v4348_v24 = vadd.f32 %v4347_v43, %v12652_v12  ;;  %v4631_v18 = vadd.f32 %v4630_v56, %v4338_v50  ;;  %v12653_v50 = vld [vmem:[#allocation188_spill] sm:$0xff]  ;;  %5325 = vmatprep.subr.bf16.mxu1 %v12339_v11  ;;  %v12656_v43 = vld [vmem:[#allocation189_spill] sm:$0xff] }
 0x35a   : > { %v10657_v51 = vadd.f32 %v5866_v57, %v4619_v13  ;;  %v4349_v8 = vpop.f32.mrf.mxu1  ;;  %v4632_v16 = vpop.f32.mrf.mxu0  ;;  %v12657_v57 = vld [vmem:[#allocation33_spill] sm:$0xff] }
 0x35b   : > { %v5867_v52 = vrot.slane %v4631_v18, 1  ;;  %v4350_v40 = vadd.f32 %v4349_v8, %v10234_v26  ;;  %v4633_v29 = vadd.f32 %v4632_v16, %v4340_v63  ;;  %v8279_v26 = vld [vmem:[%s12111_s3 + $0x470] ss:$12 sps:$4 sm:$0xff]   ;;  %v12659_v8 = vld [vmem:[#allocation190_spill] sm:$0xff] }
 0x35c   : > { %v4351_v59 = vpop.f32.mrf.mxu1  ;;  %v4634_v33 = vpop.f32.mrf.mxu0  ;;  %5326 = vmatpush2.bf16.msra.mxu1 %v8279_v26 }
 0x35d   : > { %v5868_v34 = vsel %vm5843_vm4, %v5865_v28, %v5867_v52  ;;  %v4352_v3 = vadd.f32 %v4351_v59, %v12653_v50  ;;  %v4635_v7 = vadd.f32 %v4634_v33, %v4342_v62  ;;  %v12658_v62 = vld [vmem:[#allocation52_spill] sm:$0xff]  ;;  %5327 = vmatprep.subr.bf16.mxu1 %v12339_v11 }
 0x35e   : > { %v10666_v13 = vadd.f32 %v5868_v34, %v4623_v30  ;;  %v4355_v32 = vpop.f32.mrf.mxu1  ;;  %v4638_v38 = vpop.f32.mrf.mxu0  ;;  %4908 = vmatmul.mubr.bf16.gmra.mxu1 %v12654_v48  ;;  %5141 = vmatmul.mubr.bf16.gmra.mxu0 %v12655_v27 }
 0x35f   : > { %v5869_v63 = vrot.slane %v4635_v7, 1  ;;  %v4356_v28 = vadd.f32 %v4355_v32, %v12656_v43  ;;  %v4639_v56 = vadd.f32 %v4638_v38, %v4346_v23  ;;  %4915 = vmatprep.mubr.bf16.mxu1 %v12657_v57  ;;  %5148 = vmatprep.mubr.bf16.mxu0 %v12658_v62  ;;  %v8280_v23 = vld [vmem:[%s12111_s3 + $0x458] ss:$12 sps:$4 sm:$0xff]   ;;  %v12660_v7 = vld [vmem:[#allocation191_spill] sm:$0xff] }
 0x360   : > { %v4357_v30 = vpop.f32.mrf.mxu1  ;;  %v4640_v12 = vpop.f32.mrf.mxu0  ;;  %5328 = vmatpush2.bf16.msra.mxu1 %v8280_v23 }
 0x361   : > { %v5870_v18 = vsel %vm5843_vm4, %v5867_v52, %v5869_v63  ;;  %v4358_v16 = vadd.f32 %v4357_v30, %v12659_v8  ;;  %v4641_v60 = vadd.f32 %v4640_v12, %v4348_v24  ;;  %v12661_v24 = vld [vmem:[#allocation192_spill] sm:$0xff]  ;;  %5329 = vmatprep.subr.bf16.mxu1 %v12339_v11  ;;  %v12663_v30 = vld [vmem:[#allocation30_spill] sm:$0xff]  ;;  %v12664_v12 = vld [vmem:[#allocation51_spill] sm:$0xff] }
 0x362   : > { %v10679_v59 = vadd.f32 %v5870_v18, %v4629_v6  ;;  %v4359_v33 = vpop.f32.mrf.mxu1  ;;  %v4642_v34 = vpop.f32.mrf.mxu0  ;;  %v12665_v8 = vld [vmem:[#allocation193_spill] sm:$0xff] }
 0x363   : > { %v5871_v50 = vrot.slane %v4641_v60, 1  ;;  %v4360_v32 = vadd.f32 %v4359_v33, %v12660_v7  ;;  %v4643_v38 = vadd.f32 %v4642_v34, %v4350_v40  ;;  %v8281_v40 = vld [vmem:[%s12111_s3 + $0x440] ss:$12 sps:$4 sm:$0xff]   ;;  %v12666_v33 = vld [vmem:[#allocation37_spill] sm:$0xff] }
 0x364   : > { %v4361_v48 = vpop.f32.mrf.mxu1  ;;  %v4644_v27 = vpop.f32.mrf.mxu0  ;;  %5330 = vmatpush2.bf16.msra.mxu1 %v8281_v40  ;;  %v12668_v7 = vld [vmem:[#allocation194_spill] sm:$0xff] }
 0x365   : > { %v5872_v52 = vsel %vm5843_vm4, %v5869_v63, %v5871_v50  ;;  %v4362_v26 = vadd.f32 %v4361_v48, %v12661_v24  ;;  %v4645_v43 = vadd.f32 %v4644_v27, %v4352_v3  ;;  %v12667_v3 = vld [vmem:[#allocation56_spill] sm:$0xff]  ;;  %5331 = vmatprep.subr.bf16.mxu1 %v12339_v11 }
 0x366   : > { %v10688_v6 = vadd.f32 %v5872_v52, %v4633_v29  ;;  %v4365_v57 = vpop.f32.mrf.mxu1  ;;  %v4648_v62 = vpop.f32.mrf.mxu0  ;;  %4916 = vmatmul.mubr.bf16.gmra.mxu1 %v12663_v30  ;;  %5149 = vmatmul.mubr.bf16.gmra.mxu0 %v12664_v12 }
 0x367   : > { %v5873_v18 = vrot.slane %v4645_v43, 1  ;;  %v4366_v63 = vadd.f32 %v4365_v57, %v12665_v8  ;;  %v4649_v60 = vadd.f32 %v4648_v62, %v4356_v28  ;;  %4923 = vmatprep.mubr.bf16.mxu1 %v12666_v33  ;;  %5156 = vmatprep.mubr.bf16.mxu0 %v12667_v3  ;;  %v8282_v28 = vld [vmem:[%s12111_s3 + $0x428] ss:$12 sps:$4 sm:$0xff]  }
 0x368   : > { %12662 = vst [vmem:[#allocation4_spill] sm:$0xff] %v10688_v6  ;;  %v4367_v29 = vpop.f32.mrf.mxu1  ;;  %v4650_v34 = vpop.f32.mrf.mxu0  ;;  %v12670_v62 = vld [vmem:[#allocation195_spill] sm:$0xff]  ;;  %5332 = vmatpush2.bf16.msra.mxu1 %v8282_v28  ;;  %v12676_v28 = vld [vmem:[#allocation41_spill] sm:$0xff] }
 0x369   : > { %v5874_v23 = vsel %vm5843_vm4, %v5871_v50, %v5873_v18  ;;  %v4368_v48 = vadd.f32 %v4367_v29, %v12668_v7  ;;  %v4651_v27 = vadd.f32 %v4650_v34, %v4358_v16  ;;  %v12671_v16 = vld [vmem:[#allocation196_spill] sm:$0xff]  ;;  %5333 = vmatprep.subr.bf16.mxu1 %v12339_v11  ;;  %v12674_v7 = vld [vmem:[#allocation55_spill] sm:$0xff] }
 0x36a   : > { %v10701_v52 = vadd.f32 %v5874_v23, %v4639_v56  ;;  %v4369_v24 = vpop.f32.mrf.mxu1  ;;  %v4652_v43 = vpop.f32.mrf.mxu0  ;;  %v12673_v23 = vld [vmem:[#allocation34_spill] sm:$0xff] }
 0x36b   : > { %v5875_v57 = vrot.slane %v4651_v27, 1  ;;  %v4370_v30 = vadd.f32 %v4369_v24, %v12670_v62  ;;  %v4653_v12 = vadd.f32 %v4652_v43, %v4360_v32  ;;  %v8283_v32 = vld [vmem:[%s12111_s3 + $0x410] ss:$12 sps:$4 sm:$0xff]  }
 0x36c   : > { %12669 = vst [vmem:[#allocation2_spill] sm:$0xff] %v10701_v52  ;;  %v4371_v40 = vpop.f32.mrf.mxu1  ;;  %v4654_v8 = vpop.f32.mrf.mxu0  ;;  %v12675_v24 = vld [vmem:[#allocation197_spill] sm:$0xff]  ;;  %5334 = vmatpush2.bf16.msra.mxu1 %v8283_v32 }
 0x36d   : > { %v5876_v50 = vsel %vm5843_vm4, %v5873_v18, %v5875_v57  ;;  %v4372_v33 = vadd.f32 %v4371_v40, %v12671_v16  ;;  %v4655_v3 = vadd.f32 %v4654_v8, %v4362_v26  ;;  %v12677_v26 = vld [vmem:[#allocation60_spill] sm:$0xff]  ;;  %v12678_v8 = vld [vmem:[#allocation198_spill] sm:$0xff]  ;;  %5335 = vmatprep.subr.bf16.mxu1 %v12339_v11 }
 0x36e   : > { %v10710_v56 = vadd.f32 %v5876_v50, %v4643_v38  ;;  %v4375_v29 = vpop.f32.mrf.mxu1  ;;  %v4658_v34 = vpop.f32.mrf.mxu0  ;;  %4924 = vmatmul.mubr.bf16.gmra.mxu1 %v12673_v23  ;;  %5157 = vmatmul.mubr.bf16.gmra.mxu0 %v12674_v7 }
 0x36f   : > { %v5877_v27 = vrot.slane %v4655_v3, 1  ;;  %v4376_v18 = vadd.f32 %v4375_v29, %v12675_v24  ;;  %v4659_v43 = vadd.f32 %v4658_v34, %v4366_v63  ;;  %4931 = vmatprep.mubr.bf16.mxu1 %v12676_v28  ;;  %5164 = vmatprep.mubr.bf16.mxu0 %v12677_v26  ;;  %v8284_v63 = vld [vmem:[%s12111_s3 + $0x3f8] ss:$12 sps:$4 sm:$0xff]   ;;  %v12680_v34 = vld [vmem:[#allocation199_spill] sm:$0xff] }
 0x370   : > { %12672 = vst [vmem:[#allocation8_spill] sm:$0xff] %v10710_v56  ;;  %v4377_v38 = vpop.f32.mrf.mxu1  ;;  %v4660_v62 = vpop.f32.mrf.mxu0  ;;  %5336 = vmatpush2.bf16.msra.mxu1 %v8284_v63  ;;  %v12694_v56 = vld [vmem:[#allocation63_spill] sm:$0xff] }
 0x371   : > { %v5878_v40 = vsel %vm5843_vm4, %v5875_v57, %v5877_v27  ;;  %v4378_v50 = vadd.f32 %v4377_v38, %v12678_v8  ;;  %v4661_v16 = vadd.f32 %v4660_v62, %v4368_v48  ;;  %v12681_v48 = vld [vmem:[#allocation200_spill] sm:$0xff]  ;;  %5337 = vmatprep.subr.bf16.mxu1 %v12339_v11 }
 0x372   : > { %v10723_v23 = vadd.f32 %v5878_v40, %v4649_v60  ;;  %v4379_v3 = vpop.f32.mrf.mxu1  ;;  %v4662_v7 = vpop.f32.mrf.mxu0 }
 0x373   : > { %v5879_v29 = vrot.slane %v4661_v16, 1  ;;  %v4380_v24 = vadd.f32 %v4379_v3, %v12680_v34  ;;  %v4663_v28 = vadd.f32 %v4662_v7, %v4370_v30  ;;  %v12684_v16 = vld [vmem:[#allocation59_spill] sm:$0xff]  ;;  %v12685_v7 = vld [vmem:[#allocation201_spill] sm:$0xff] }
 0x374   : > { %12679 = vst [vmem:[#allocation28_spill] sm:$0xff] %v10723_v23  ;;  %v4381_v32 = vpop.f32.mrf.mxu1  ;;  %v4664_v26 = vpop.f32.mrf.mxu0  ;;  %v12683_v23 = vld [vmem:[#allocation38_spill] sm:$0xff]  ;;  %v12686_v34 = vld [vmem:[#allocation45_spill] sm:$0xff] }
 0x375   : > { %v5880_v57 = vsel %vm5843_vm4, %v5877_v27, %v5879_v29  ;;  %v4382_v38 = vadd.f32 %v4381_v32, %v12681_v48  ;;  %v4665_v62 = vadd.f32 %v4664_v26, %v4372_v33  ;;  %v8285_v30 = vld [vmem:[%s12111_s3 + $0x3e0] ss:$12 sps:$4 sm:$0xff]   ;;  %v12687_v33 = vld [vmem:[#allocation64_spill] sm:$0xff] }
 0x376   : > { %v10732_v60 = vadd.f32 %v5880_v57, %v4653_v12  ;;  %v4385_v40 = vpop.f32.mrf.mxu1  ;;  %v4668_v8 = vpop.f32.mrf.mxu0  ;;  %4932 = vmatmul.mubr.bf16.gmra.mxu1 %v12683_v23  ;;  %5165 = vmatmul.mubr.bf16.gmra.mxu0 %v12684_v16  ;;  %v12688_v23 = vld [vmem:[#allocation202_spill] sm:$0xff] }
 0x377   : > { %v5881_v3 = vrot.slane %v4665_v62, 1  ;;  %v4386_v27 = vadd.f32 %v4385_v40, %v12685_v7  ;;  %v4669_v63 = vadd.f32 %v4668_v8, %v4376_v18  ;;  %4939 = vmatprep.mubr.bf16.mxu1 %v12686_v34  ;;  %5172 = vmatprep.mubr.bf16.mxu0 %v12687_v33  ;;  %v8286_v18 = vld [vmem:[%s12111_s3 + $0x3c8] ss:$12 sps:$4 sm:$0xff]  }
 0x378   : > { %12682 = vst [vmem:[#allocation6_spill] sm:$0xff] %v10732_v60  ;;  %v4387_v12 = vpop.f32.mrf.mxu1  ;;  %v4670_v32 = vpop.f32.mrf.mxu0  ;;  %5338 = vmatpush2.bf16.msra.mxu1 %v8285_v30  ;;  %v12690_v8 = vld [vmem:[#allocation203_spill] sm:$0xff] }
 0x379   : > { %v5882_v26 = vsel %vm5843_vm4, %v5879_v29, %v5881_v3  ;;  %v4388_v57 = vadd.f32 %v4387_v12, %v12688_v23  ;;  %v4671_v48 = vadd.f32 %v4670_v32, %v4378_v50  ;;  %5339 = vmatprep.subr.bf16.mxu1 %v12339_v11  ;;  %v12691_v50 = vld [vmem:[#allocation204_spill] sm:$0xff] }
 0x37a   : > { %v10745_v16 = vadd.f32 %v5882_v26, %v4659_v43  ;;  %v4389_v62 = vpop.f32.mrf.mxu1  ;;  %v4672_v60 = vpop.f32.mrf.mxu0 }
 0x37b   : > { %v5883_v40 = vrot.slane %v4671_v48, 1  ;;  %v4390_v7 = vadd.f32 %v4389_v62, %v12690_v8  ;;  %v4673_v34 = vadd.f32 %v4672_v60, %v4380_v24  ;;  %v12695_v60 = vld [vmem:[#allocation49_spill] sm:$0xff] }
 0x37c   : > { %12689 = vst [vmem:[#allocation27_spill] sm:$0xff] %v10745_v16  ;;  %v4391_v30 = vpop.f32.mrf.mxu1  ;;  %v4674_v33 = vpop.f32.mrf.mxu0  ;;  %5340 = vmatpush2.bf16.msra.mxu1 %v8286_v18  ;;  %v12693_v16 = vld [vmem:[#allocation42_spill] sm:$0xff]  ;;  %v12696_v18 = vld [vmem:[#allocation68_spill] sm:$0xff] }
 0x37d   : > { %v5884_v29 = vsel %vm5843_vm4, %v5881_v3, %v5883_v40  ;;  %v4392_v12 = vadd.f32 %v4391_v30, %v12691_v50  ;;  %v4675_v32 = vadd.f32 %v4674_v33, %v4382_v38 }
 0x37e   : > { %v10753_v43 = vadd.f32 %v5884_v29, %v4663_v28  ;;  %v4395_v26 = vpop.f32.mrf.mxu1  ;;  %v4678_v23 = vpop.f32.mrf.mxu0  ;;  %4940 = vmatmul.mubr.bf16.gmra.mxu1 %v12693_v16  ;;  %5173 = vmatmul.mubr.bf16.gmra.mxu0 %v12694_v56  ;;  %v12697_v28 = vld [vmem:[#allocation205_spill] sm:$0xff] }
 0x37f   : > { %v5885_v48 = vrot.slane %v4675_v32, 1  ;;  %v4396_v62 = vadd.f32 %v4395_v26, %v10350_v61  ;;  %v4679_v24 = vadd.f32 %v4678_v23, %v4386_v27  ;;  %4947 = vmatprep.mubr.bf16.mxu1 %v12695_v60  ;;  %5180 = vmatprep.mubr.bf16.mxu0 %v12696_v18  ;;  %v12698_v32 = vld [vmem:[#allocation206_spill] sm:$0xff]  ;;  %v12699_v60 = vld [vmem:[#allocation207_spill] sm:$0xff] }
 0x380   : > { %12692 = vst [vmem:[#allocation12_spill] sm:$0xff] %v10753_v43  ;;  %v4397_v3 = vpop.f32.mrf.mxu1  ;;  %v4680_v8 = vpop.f32.mrf.mxu0 }
 0x381   : > { %v5886_v38 = vsel %vm5843_vm4, %v5883_v40, %v5885_v48  ;;  %v4398_v30 = vadd.f32 %v4397_v3, %v12697_v28  ;;  %v4681_v33 = vadd.f32 %v4680_v8, %v4388_v57  ;;  %v12701_v57 = vld [vmem:[#allocation46_spill] sm:$0xff] }
 0x382   : > { %v10762_v29 = vadd.f32 %v5886_v38, %v4669_v63  ;;  %v4399_v16 = vpop.f32.mrf.mxu1  ;;  %v4682_v50 = vpop.f32.mrf.mxu0  ;;  %v12702_v63 = vld [vmem:[#allocation67_spill] sm:$0xff] }
 0x383   : > { %v5887_v56 = vrot.slane %v4681_v33, 1  ;;  %v4400_v43 = vadd.f32 %v4399_v16, %v12698_v32  ;;  %v4683_v61 = vadd.f32 %v4682_v50, %v4390_v7  ;;  %v12703_v7 = vld [vmem:[#allocation53_spill] sm:$0xff]  ;;  %v12704_v33 = vld [vmem:[#allocation72_spill] sm:$0xff] }
 0x384   : > { %v4401_v27 = vpop.f32.mrf.mxu1  ;;  %v4684_v26 = vpop.f32.mrf.mxu0 }
 0x385   : > { %v5888_v23 = vsel %vm5843_vm4, %v5885_v48, %v5887_v56  ;;  %v4402_v18 = vadd.f32 %v4401_v27, %v12699_v60  ;;  %v4685_v52 = vadd.f32 %v4684_v26, %v4392_v12 }
 0x386   : > { %v10767_v6 = vadd.f32 %v5888_v23, %v4673_v34  ;;  %v4405_v40 = vpop.f32.mrf.mxu1  ;;  %v4688_v3 = vpop.f32.mrf.mxu0  ;;  %4948 = vmatmul.mubr.bf16.gmra.mxu1 %v12701_v57  ;;  %5181 = vmatmul.mubr.bf16.gmra.mxu0 %v12702_v63  ;;  %v12705_v34 = vld [vmem:[#allocation208_spill] sm:$0xff]  ;;  %v12707_v63 = vld [vmem:[#allocation210_spill] sm:$0xff] }
 0x387   : > { %v5889_v8 = vrot.slane %v4685_v52, 1  ;;  %v4406_v38 = vadd.f32 %v4405_v40, %v10363_v36  ;;  %v4689_v28 = vadd.f32 %v4688_v3, %v4396_v62  ;;  %4955 = vmatprep.mubr.bf16.mxu1 %v12703_v7  ;;  %5188 = vmatprep.mubr.bf16.mxu0 %v12704_v33  ;;  %v12706_v52 = vld [vmem:[#allocation209_spill] sm:$0xff] }
 0x388   : > { %12700 = vst [vmem:[#allocation32_spill] sm:$0xff] %v10767_v6  ;;  %v4407_v48 = vpop.f32.mrf.mxu1  ;;  %v4690_v16 = vpop.f32.mrf.mxu0 }
 0x389   : > { %v5890_v12 = vsel %vm5843_vm4, %v5887_v56, %v5889_v8  ;;  %v4408_v50 = vadd.f32 %v4407_v48, %v12705_v34  ;;  %v4691_v32 = vadd.f32 %v4690_v16, %v4398_v30  ;;  %v12709_v30 = vld [vmem:[#allocation50_spill] sm:$0xff] }
 0x38a   : > { %v10776_v27 = vadd.f32 %v5890_v12, %v4679_v24  ;;  %v4409_v26 = vpop.f32.mrf.mxu1  ;;  %v4692_v23 = vpop.f32.mrf.mxu0  ;;  %v12710_v24 = vld [vmem:[#allocation71_spill] sm:$0xff] }
 0x38b   : > { %v5891_v60 = vrot.slane %v4691_v32, 1  ;;  %v4410_v57 = vadd.f32 %v4409_v26, %v12706_v52  ;;  %v4693_v36 = vadd.f32 %v4692_v23, %v4400_v43  ;;  %v12711_v43 = vld [vmem:[#allocation57_spill] sm:$0xff]  ;;  %v12712_v32 = vld [vmem:[#allocation76_spill] sm:$0xff] }
 0x38c   : > { %v4411_v62 = vpop.f32.mrf.mxu1  ;;  %v4694_v40 = vpop.f32.mrf.mxu0 }
 0x38d   : > { %v5892_v3 = vsel %vm5843_vm4, %v5889_v8, %v5891_v60  ;;  %v4412_v7 = vadd.f32 %v4411_v62, %v12707_v63  ;;  %v4695_v33 = vadd.f32 %v4694_v40, %v4402_v18 }
 0x38e   : > { %v10781_v6 = vadd.f32 %v5892_v3, %v4683_v61  ;;  %v4415_v56 = vpop.f32.mrf.mxu1  ;;  %v4698_v48 = vpop.f32.mrf.mxu0  ;;  %4956 = vmatmul.mubr.bf16.gmra.mxu1 %v12709_v30  ;;  %5189 = vmatmul.mubr.bf16.gmra.mxu0 %v12710_v24  ;;  %v12713_v61 = vld [vmem:[#allocation211_spill] sm:$0xff]  ;;  %v12716_v24 = vld [vmem:[#allocation213_spill] sm:$0xff] }
 0x38f   : > { %v5893_v16 = vrot.slane %v4695_v33, 1  ;;  %v4416_v12 = vadd.f32 %v4415_v56, %v10376_v39  ;;  %v4699_v34 = vadd.f32 %v4698_v48, %v4406_v38  ;;  %4963 = vmatprep.mubr.bf16.mxu1 %v12711_v43  ;;  %5196 = vmatprep.mubr.bf16.mxu0 %v12712_v32  ;;  %v12715_v33 = vld [vmem:[#allocation212_spill] sm:$0xff] }
 0x390   : > { %12708 = vst [vmem:[#allocation10_spill] sm:$0xff] %v10781_v6  ;;  %v4417_v8 = vpop.f32.mrf.mxu1  ;;  %v4700_v26 = vpop.f32.mrf.mxu0 }
 0x391   : > { %v5894_v18 = vsel %vm5843_vm4, %v5891_v60, %v5893_v16  ;;  %v4418_v23 = vadd.f32 %v4417_v8, %v12713_v61  ;;  %v4701_v52 = vadd.f32 %v4700_v26, %v4408_v50  ;;  %v12718_v50 = vld [vmem:[#allocation54_spill] sm:$0xff] }
 0x392   : > { %v10790_v62 = vadd.f32 %v5894_v18, %v4689_v28  ;;  %v4419_v40 = vpop.f32.mrf.mxu1  ;;  %v4702_v3 = vpop.f32.mrf.mxu0  ;;  %v12719_v28 = vld [vmem:[#allocation75_spill] sm:$0xff] }
 0x393   : > { %v5895_v63 = vrot.slane %v4701_v52, 1  ;;  %v4420_v30 = vadd.f32 %v4419_v40, %v12715_v33  ;;  %v4703_v39 = vadd.f32 %v4702_v3, %v4410_v57  ;;  %v12720_v57 = vld [vmem:[#allocation61_spill] sm:$0xff]  ;;  %v12721_v52 = vld [vmem:[#allocation80_spill] sm:$0xff] }
 0x394   : > { %12714 = vst [vmem:[#allocation31_spill] sm:$0xff] %v10790_v62  ;;  %v4421_v38 = vpop.f32.mrf.mxu1  ;;  %v4704_v56 = vpop.f32.mrf.mxu0 }
 0x395   : > { %v5896_v48 = vsel %vm5843_vm4, %v5893_v16, %v5895_v63  ;;  %v4422_v43 = vadd.f32 %v4421_v38, %v12716_v24  ;;  %v4705_v32 = vadd.f32 %v4704_v56, %v4412_v7 }
 0x396   : > { %v10795_v6 = vadd.f32 %v5896_v48, %v4693_v36  ;;  %v4425_v60 = vpop.f32.mrf.mxu1  ;;  %v4708_v8 = vpop.f32.mrf.mxu0  ;;  %4964 = vmatmul.mubr.bf16.gmra.mxu1 %v12718_v50  ;;  %5197 = vmatmul.mubr.bf16.gmra.mxu0 %v12719_v28  ;;  %v12722_v36 = vld [vmem:[#allocation214_spill] sm:$0xff]  ;;  %v12725_v28 = vld [vmem:[#allocation216_spill] sm:$0xff] }
 0x397   : > { %v5897_v26 = vrot.slane %v4705_v32, 1  ;;  %v4426_v18 = vadd.f32 %v4425_v60, %v10389_v47  ;;  %v4709_v61 = vadd.f32 %v4708_v8, %v4416_v12  ;;  %4971 = vmatprep.mubr.bf16.mxu1 %v12720_v57  ;;  %5204 = vmatprep.mubr.bf16.mxu0 %v12721_v52  ;;  %v12724_v32 = vld [vmem:[#allocation215_spill] sm:$0xff] }
 0x398   : > { %12717 = vst [vmem:[#allocation16_spill] sm:$0xff] %v10795_v6  ;;  %v4427_v16 = vpop.f32.mrf.mxu1  ;;  %v4710_v40 = vpop.f32.mrf.mxu0 }
 0x399   : > { %v5898_v7 = vsel %vm5843_vm4, %v5895_v63, %v5897_v26  ;;  %v4428_v3 = vadd.f32 %v4427_v16, %v12722_v36  ;;  %v4711_v33 = vadd.f32 %v4710_v40, %v4418_v23  ;;  %v12727_v23 = vld [vmem:[#allocation58_spill] sm:$0xff] }
 0x39a   : > { %v10804_v38 = vadd.f32 %v5898_v7, %v4699_v34  ;;  %v4429_v56 = vpop.f32.mrf.mxu1  ;;  %v4712_v48 = vpop.f32.mrf.mxu0  ;;  %v12728_v34 = vld [vmem:[#allocation79_spill] sm:$0xff] }
 0x39b   : > { %v5899_v24 = vrot.slane %v4711_v33, 1  ;;  %v4430_v50 = vadd.f32 %v4429_v56, %v12724_v32  ;;  %v4713_v47 = vadd.f32 %v4712_v48, %v4420_v30  ;;  %v12729_v30 = vld [vmem:[#allocation65_spill] sm:$0xff]  ;;  %v12730_v33 = vld [vmem:[#allocation84_spill] sm:$0xff] }
 0x39c   : > { %12723 = vst [vmem:[#allocation36_spill] sm:$0xff] %v10804_v38  ;;  %v4431_v12 = vpop.f32.mrf.mxu1  ;;  %v4714_v60 = vpop.f32.mrf.mxu0 }
 0x39d   : > { %v5900_v8 = vsel %vm5843_vm4, %v5897_v26, %v5899_v24  ;;  %v4432_v57 = vadd.f32 %v4431_v12, %v12725_v28  ;;  %v4715_v52 = vadd.f32 %v4714_v60, %v4422_v43 }
 0x39e   : > { %v10809_v6 = vadd.f32 %v5900_v8, %v4703_v39  ;;  %v4435_v63 = vpop.f32.mrf.mxu1  ;;  %v4718_v16 = vpop.f32.mrf.mxu0  ;;  %4972 = vmatmul.mubr.bf16.gmra.mxu1 %v12727_v23  ;;  %5205 = vmatmul.mubr.bf16.gmra.mxu0 %v12728_v34  ;;  %v12731_v39 = vld [vmem:[#allocation217_spill] sm:$0xff]  ;;  %v12734_v34 = vld [vmem:[#allocation219_spill] sm:$0xff] }
 0x39f   : > { %v5901_v40 = vrot.slane %v4715_v52, 1  ;;  %v4436_v7 = vadd.f32 %v4435_v63, %v10402_v54  ;;  %v4719_v36 = vadd.f32 %v4718_v16, %v4426_v18  ;;  %4979 = vmatprep.mubr.bf16.mxu1 %v12729_v30  ;;  %5212 = vmatprep.mubr.bf16.mxu0 %v12730_v33  ;;  %v12733_v52 = vld [vmem:[#allocation218_spill] sm:$0xff] }
 0x3a0   : > { %12726 = vst [vmem:[#allocation14_spill] sm:$0xff] %v10809_v6  ;;  %v4437_v26 = vpop.f32.mrf.mxu1  ;;  %v4720_v56 = vpop.f32.mrf.mxu0 }
 0x3a1   : > { %v5902_v43 = vsel %vm5843_vm4, %v5899_v24, %v5901_v40  ;;  %v4438_v48 = vadd.f32 %v4437_v26, %v12731_v39  ;;  %v4721_v32 = vadd.f32 %v4720_v56, %v4428_v3  ;;  %v12736_v3 = vld [vmem:[#allocation62_spill] sm:$0xff] }
 0x3a2   : > { %v10818_v12 = vadd.f32 %v5902_v43, %v4709_v61  ;;  %v4439_v60 = vpop.f32.mrf.mxu1  ;;  %v4722_v8 = vpop.f32.mrf.mxu0  ;;  %v12737_v61 = vld [vmem:[#allocation82_spill] sm:$0xff] }
 0x3a3   : > { %v5903_v28 = vrot.slane %v4721_v32, 1  ;;  %v4440_v23 = vadd.f32 %v4439_v60, %v12733_v52  ;;  %v4723_v54 = vadd.f32 %v4722_v8, %v4430_v50  ;;  %v12738_v50 = vld [vmem:[#allocation69_spill] sm:$0xff]  ;;  %v12739_v32 = vld [vmem:[#allocation88_spill] sm:$0xff] }
 0x3a4   : > { %12732 = vst [vmem:[#allocation35_spill] sm:$0xff] %v10818_v12  ;;  %v4441_v18 = vpop.f32.mrf.mxu1  ;;  %v4724_v63 = vpop.f32.mrf.mxu0 }
 0x3a5   : > { %v5904_v16 = vsel %vm5843_vm4, %v5901_v40, %v5903_v28  ;;  %v4442_v30 = vadd.f32 %v4441_v18, %v12734_v34  ;;  %v4725_v33 = vadd.f32 %v4724_v63, %v4432_v57 }
 0x3a6   : > { %v10823_v6 = vadd.f32 %v5904_v16, %v4713_v47  ;;  %v4445_v24 = vpop.f32.mrf.mxu1  ;;  %v4728_v26 = vpop.f32.mrf.mxu0  ;;  %4980 = vmatmul.mubr.bf16.gmra.mxu1 %v12736_v3  ;;  %5213 = vmatmul.mubr.bf16.gmra.mxu0 %v12737_v61  ;;  %v12740_v47 = vld [vmem:[#allocation220_spill] sm:$0xff]  ;;  %v12743_v61 = vld [vmem:[#allocation222_spill] sm:$0xff] }
 0x3a7   : > { %v5905_v56 = vrot.slane %v4725_v33, 1  ;;  %v4446_v43 = vadd.f32 %v4445_v24, %v10415_v14  ;;  %v4729_v39 = vadd.f32 %v4728_v26, %v4436_v7  ;;  %4987 = vmatprep.mubr.bf16.mxu1 %v12738_v50  ;;  %5220 = vmatprep.mubr.bf16.mxu0 %v12739_v32  ;;  %v12742_v33 = vld [vmem:[#allocation221_spill] sm:$0xff] }
 0x3a8   : > { %12735 = vst [vmem:[#allocation20_spill] sm:$0xff] %v10823_v6  ;;  %v4447_v40 = vpop.f32.mrf.mxu1  ;;  %v4730_v60 = vpop.f32.mrf.mxu0 }
 0x3a9   : > { %v5906_v57 = vsel %vm5843_vm4, %v5903_v28, %v5905_v56  ;;  %v4448_v8 = vadd.f32 %v4447_v40, %v12740_v47  ;;  %v4731_v52 = vadd.f32 %v4730_v60, %v4438_v48  ;;  %v12745_v48 = vld [vmem:[#allocation66_spill] sm:$0xff] }
 0x3aa   : > { %v10832_v18 = vadd.f32 %v5906_v57, %v4719_v36  ;;  %v4449_v63 = vpop.f32.mrf.mxu1  ;;  %v4732_v16 = vpop.f32.mrf.mxu0  ;;  %v12746_v36 = vld [vmem:[#allocation86_spill] sm:$0xff] }
 0x3ab   : > { %v5907_v34 = vrot.slane %v4731_v52, 1  ;;  %v4450_v3 = vadd.f32 %v4449_v63, %v12742_v33  ;;  %v4733_v14 = vadd.f32 %v4732_v16, %v4440_v23  ;;  %v12747_v23 = vld [vmem:[#allocation73_spill] sm:$0xff]  ;;  %v12748_v52 = vld [vmem:[#allocation92_spill] sm:$0xff] }
 0x3ac   : > { %12741 = vst [vmem:[#allocation40_spill] sm:$0xff] %v10832_v18  ;;  %v4451_v7 = vpop.f32.mrf.mxu1  ;;  %v4734_v24 = vpop.f32.mrf.mxu0  ;;  %v12871_v18 = vld [vmem:[#allocation130_spill] sm:$0xff] }
 0x3ad   : > { %v5908_v26 = vsel %vm5843_vm4, %v5905_v56, %v5907_v34  ;;  %v4452_v50 = vadd.f32 %v4451_v7, %v12743_v61  ;;  %v4735_v32 = vadd.f32 %v4734_v24, %v4442_v30 }
 0x3ae   : > { %v10837_v6 = vadd.f32 %v5908_v26, %v4723_v54  ;;  %v4455_v28 = vpop.f32.mrf.mxu1  ;;  %v4738_v40 = vpop.f32.mrf.mxu0  ;;  %4988 = vmatmul.mubr.bf16.gmra.mxu1 %v12745_v48  ;;  %5221 = vmatmul.mubr.bf16.gmra.mxu0 %v12746_v36  ;;  %v12749_v54 = vld [vmem:[#allocation223_spill] sm:$0xff]  ;;  %v12752_v36 = vld [vmem:[#allocation225_spill] sm:$0xff] }
 0x3af   : > { %v5909_v60 = vrot.slane %v4735_v32, 1  ;;  %v4456_v57 = vadd.f32 %v4455_v28, %v10428_v20  ;;  %v4739_v47 = vadd.f32 %v4738_v40, %v4446_v43  ;;  %4995 = vmatprep.mubr.bf16.mxu1 %v12747_v23  ;;  %5228 = vmatprep.mubr.bf16.mxu0 %v12748_v52  ;;  %v12751_v32 = vld [vmem:[#allocation224_spill] sm:$0xff] }
 0x3b0   : > { %12744 = vst [vmem:[#allocation182_spill] sm:$0xff] %v10837_v6  ;;  %v4457_v56 = vpop.f32.mrf.mxu1  ;;  %v4740_v63 = vpop.f32.mrf.mxu0 }
 0x3b1   : > { %v5910_v30 = vsel %vm5843_vm4, %v5907_v34, %v5909_v60  ;;  %v4458_v16 = vadd.f32 %v4457_v56, %v12749_v54  ;;  %v4741_v33 = vadd.f32 %v4740_v63, %v4448_v8  ;;  %v12754_v8 = vld [vmem:[#allocation70_spill] sm:$0xff] }
 0x3b2   : > { %v10846_v7 = vadd.f32 %v5910_v30, %v4729_v39  ;;  %v4459_v24 = vpop.f32.mrf.mxu1  ;;  %v4742_v26 = vpop.f32.mrf.mxu0  ;;  %v12755_v39 = vld [vmem:[#allocation90_spill] sm:$0xff] }
 0x3b3   : > { %v5911_v61 = vrot.slane %v4741_v33, 1  ;;  %v4460_v48 = vadd.f32 %v4459_v24, %v12751_v32  ;;  %v4743_v20 = vadd.f32 %v4742_v26, %v4450_v3  ;;  %v12756_v3 = vld [vmem:[#allocation77_spill] sm:$0xff]  ;;  %v12757_v33 = vld [vmem:[#allocation96_spill] sm:$0xff] }
 0x3b4   : > { %12750 = vst [vmem:[#allocation18_spill] sm:$0xff] %v10846_v7  ;;  %v4461_v43 = vpop.f32.mrf.mxu1  ;;  %v4744_v28 = vpop.f32.mrf.mxu0 }
 0x3b5   : > { %v5912_v40 = vsel %vm5843_vm4, %v5909_v60, %v5911_v61  ;;  %v4462_v23 = vadd.f32 %v4461_v43, %v12752_v36  ;;  %v4745_v52 = vadd.f32 %v4744_v28, %v4452_v50 }
 0x3b6   : > { %v10851_v6 = vadd.f32 %v5912_v40, %v4733_v14  ;;  %v4465_v34 = vpop.f32.mrf.mxu1  ;;  %v4748_v56 = vpop.f32.mrf.mxu0  ;;  %4996 = vmatmul.mubr.bf16.gmra.mxu1 %v12754_v8  ;;  %5229 = vmatmul.mubr.bf16.gmra.mxu0 %v12755_v39  ;;  %v12758_v14 = vld [vmem:[#allocation226_spill] sm:$0xff]  ;;  %v12761_v39 = vld [vmem:[#allocation228_spill] sm:$0xff] }
 0x3b7   : > { %v5913_v63 = vrot.slane %v4745_v52, 1  ;;  %v4466_v30 = vadd.f32 %v4465_v34, %v10441_v15  ;;  %v4749_v54 = vadd.f32 %v4748_v56, %v4456_v57  ;;  %5003 = vmatprep.mubr.bf16.mxu1 %v12756_v3  ;;  %5236 = vmatprep.mubr.bf16.mxu0 %v12757_v33  ;;  %v12760_v52 = vld [vmem:[#allocation227_spill] sm:$0xff] }
 0x3b8   : > { %12753 = vst [vmem:[#allocation39_spill] sm:$0xff] %v10851_v6  ;;  %v4467_v60 = vpop.f32.mrf.mxu1  ;;  %v4750_v24 = vpop.f32.mrf.mxu0 }
 0x3b9   : > { %v5914_v50 = vsel %vm5843_vm4, %v5911_v61, %v5913_v63  ;;  %v4468_v26 = vadd.f32 %v4467_v60, %v12758_v14  ;;  %v4751_v32 = vadd.f32 %v4750_v24, %v4458_v16  ;;  %v12763_v16 = vld [vmem:[#allocation74_spill] sm:$0xff] }
 0x3ba   : > { %v10860_v43 = vadd.f32 %v5914_v50, %v4739_v47  ;;  %v4469_v28 = vpop.f32.mrf.mxu1  ;;  %v4752_v40 = vpop.f32.mrf.mxu0  ;;  %v12764_v47 = vld [vmem:[#allocation94_spill] sm:$0xff] }
 0x3bb   : > { %v5915_v36 = vrot.slane %v4751_v32, 1  ;;  %v4470_v8 = vadd.f32 %v4469_v28, %v12760_v52  ;;  %v4753_v15 = vadd.f32 %v4752_v40, %v4460_v48  ;;  %v12765_v48 = vld [vmem:[#allocation81_spill] sm:$0xff]  ;;  %v12766_v32 = vld [vmem:[#allocation100_spill] sm:$0xff] }
 0x3bc   : > { %12759 = vst [vmem:[#allocation183_spill] sm:$0xff] %v10860_v43  ;;  %v4471_v57 = vpop.f32.mrf.mxu1  ;;  %v4754_v34 = vpop.f32.mrf.mxu0 }
 0x3bd   : > { %v5916_v56 = vsel %vm5843_vm4, %v5913_v63, %v5915_v36  ;;  %v4472_v3 = vadd.f32 %v4471_v57, %v12761_v39  ;;  %v4755_v33 = vadd.f32 %v4754_v34, %v4462_v23 }
 0x3be   : > { %v10865_v6 = vadd.f32 %v5916_v56, %v4743_v20  ;;  %v4475_v61 = vpop.f32.mrf.mxu1  ;;  %v4758_v60 = vpop.f32.mrf.mxu0  ;;  %5004 = vmatmul.mubr.bf16.gmra.mxu1 %v12763_v16  ;;  %5237 = vmatmul.mubr.bf16.gmra.mxu0 %v12764_v47  ;;  %v12767_v20 = vld [vmem:[#allocation229_spill] sm:$0xff]  ;;  %v12770_v47 = vld [vmem:[#allocation231_spill] sm:$0xff] }
 0x3bf   : > { %v5917_v24 = vrot.slane %v4755_v33, 1  ;;  %v4476_v50 = vadd.f32 %v4475_v61, %v10454_v42  ;;  %v4759_v14 = vadd.f32 %v4758_v60, %v4466_v30  ;;  %5011 = vmatprep.mubr.bf16.mxu1 %v12765_v48  ;;  %5244 = vmatprep.mubr.bf16.mxu0 %v12766_v32  ;;  %v12769_v33 = vld [vmem:[#allocation230_spill] sm:$0xff] }
 0x3c0   : > { %12762 = vst [vmem:[#allocation24_spill] sm:$0xff] %v10865_v6  ;;  %v4477_v63 = vpop.f32.mrf.mxu1  ;;  %v4760_v28 = vpop.f32.mrf.mxu0 }
 0x3c1   : > { %v5918_v23 = vsel %vm5843_vm4, %v5915_v36, %v5917_v24  ;;  %v4478_v40 = vadd.f32 %v4477_v63, %v12767_v20  ;;  %v4761_v52 = vadd.f32 %v4760_v28, %v4468_v26  ;;  %v12772_v26 = vld [vmem:[#allocation78_spill] sm:$0xff] }
 0x3c2   : > { %v10874_v57 = vadd.f32 %v5918_v23, %v4749_v54  ;;  %v4479_v34 = vpop.f32.mrf.mxu1  ;;  %v4762_v56 = vpop.f32.mrf.mxu0  ;;  %v12773_v54 = vld [vmem:[#allocation98_spill] sm:$0xff] }
 0x3c3   : > { %v5919_v39 = vrot.slane %v4761_v52, 1  ;;  %v4480_v16 = vadd.f32 %v4479_v34, %v12769_v33  ;;  %v4763_v42 = vadd.f32 %v4762_v56, %v4470_v8  ;;  %v12774_v8 = vld [vmem:[#allocation5_spill] sm:$0xff]  ;;  %v12775_v52 = vld [vmem:[#allocation104_spill] sm:$0xff] }
 0x3c4   : > { %12768 = vst [vmem:[#allocation44_spill] sm:$0xff] %v10874_v57  ;;  %v4481_v30 = vpop.f32.mrf.mxu1  ;;  %v4764_v61 = vpop.f32.mrf.mxu0 }
 0x3c5   : > { %v5920_v60 = vsel %vm5843_vm4, %v5917_v24, %v5919_v39  ;;  %v4482_v48 = vadd.f32 %v4481_v30, %v12770_v47  ;;  %v4765_v32 = vadd.f32 %v4764_v61, %v4472_v3  ;;  %v12777_v47 = vld [vmem:[#allocation232_spill] sm:$0xff] }
 0x3c6   : > { %v10879_v6 = vadd.f32 %v5920_v60, %v4753_v15  ;;  %v4485_v36 = vpop.f32.mrf.mxu1  ;;  %v4768_v63 = vpop.f32.mrf.mxu0  ;;  %5012 = vmatmul.mubr.bf16.gmra.mxu1 %v12772_v26  ;;  %5245 = vmatmul.mubr.bf16.gmra.mxu0 %v12773_v54  ;;  %v12778_v26 = vld [vmem:[#allocation233_spill] sm:$0xff] }
 0x3c7   : > { %v5921_v28 = vrot.slane %v4765_v32, 1  ;;  %v4486_v23 = vadd.f32 %v4485_v36, %v10467_v1  ;;  %v4769_v20 = vadd.f32 %v4768_v63, %v4476_v50  ;;  %5019 = vmatprep.mubr.bf16.mxu1 %v12774_v8  ;;  %5252 = vmatprep.mubr.bf16.mxu0 %v12775_v52 }
 0x3c8   : > { %12771 = vst [vmem:[#allocation184_spill] sm:$0xff] %v10879_v6  ;;  %v4487_v24 = vpop.f32.mrf.mxu1  ;;  %v4770_v34 = vpop.f32.mrf.mxu0 }
 0x3c9   : > { %v5922_v3 = vsel %vm5843_vm4, %v5919_v39, %v5921_v28  ;;  %v4488_v15 = vadd.f32 %v4487_v24, %v10471_v55  ;;  %v4771_v56 = vadd.f32 %v4770_v34, %v4478_v40  ;;  %v12780_v40 = vld [vmem:[#allocation3_spill] sm:$0xff]  ;;  %v12782_v34 = vld [vmem:[#allocation234_spill] sm:$0xff] }
 0x3ca   : > { %v10888_v33 = vadd.f32 %v5922_v3, %v4759_v14  ;;  %v4489_v30 = vpop.f32.mrf.mxu1  ;;  %v4772_v61 = vpop.f32.mrf.mxu0  ;;  %v12781_v14 = vld [vmem:[#allocation102_spill] sm:$0xff] }
 0x3cb   : > { %v5923_v60 = vrot.slane %v4771_v56, 1  ;;  %v4490_v32 = vadd.f32 %v4489_v30, %v12777_v47  ;;  %v4773_v1 = vadd.f32 %v4772_v61, %v4480_v16  ;;  %v12783_v16 = vld [vmem:[#allocation9_spill] sm:$0xff]  ;;  %v12784_v30 = vld [vmem:[#allocation108_spill] sm:$0xff] }
 0x3cc   : > { %12776 = vst [vmem:[#allocation185_spill] sm:$0xff] %v10888_v33  ;;  %v4491_v50 = vpop.f32.mrf.mxu1  ;;  %v4774_v36 = vpop.f32.mrf.mxu0 }
 0x3cd   : > { %v5924_v63 = vsel %vm5843_vm4, %v5921_v28, %v5923_v60  ;;  %v4492_v54 = vadd.f32 %v4491_v50, %v12778_v26  ;;  %v4775_v8 = vadd.f32 %v4774_v36, %v4482_v48 }
 0x3ce   : > { %v10893_v52 = vadd.f32 %v5924_v63, %v4763_v42  ;;  %v4495_v39 = vpop.f32.mrf.mxu1  ;;  %v4778_v55 = vpop.f32.mrf.mxu0  ;;  %5020 = vmatmul.mubr.bf16.gmra.mxu1 %v12780_v40  ;;  %5253 = vmatmul.mubr.bf16.gmra.mxu0 %v12781_v14  ;;  %v12785_v42 = vld [vmem:[#allocation235_spill] sm:$0xff] }
 0x3cf   : > { %v5925_v24 = vrot.slane %v4775_v8, 1  ;;  %v4496_v3 = vadd.f32 %v4495_v39, %v12782_v34  ;;  %v4779_v56 = vadd.f32 %v4778_v55, %v4486_v23  ;;  %5027 = vmatprep.mubr.bf16.mxu1 %v12783_v16  ;;  %5260 = vmatprep.mubr.bf16.mxu0 %v12784_v30  ;;  %v12787_v8 = vld [vmem:[#allocation236_spill] sm:$0xff]  ;;  %v12788_v16 = vld [vmem:[#allocation237_spill] sm:$0xff] }
 0x3d0   : > { %12779 = vst [vmem:[#allocation22_spill] sm:$0xff] %v10893_v52  ;;  %v4497_v28 = vpop.f32.mrf.mxu1  ;;  %v4780_v61 = vpop.f32.mrf.mxu0 }
 0x3d1   : > { %v5926_v48 = vsel %vm5843_vm4, %v5923_v60, %v5925_v24  ;;  %v4498_v47 = vadd.f32 %v4497_v28, %v12785_v42  ;;  %v4781_v50 = vadd.f32 %v4780_v61, %v4488_v15  ;;  %v12790_v15 = vld [vmem:[#allocation7_spill] sm:$0xff] }
 0x3d2   : > { %v10902_v36 = vadd.f32 %v5926_v48, %v4769_v20  ;;  %v4499_v63 = vpop.f32.mrf.mxu1  ;;  %v4782_v26 = vpop.f32.mrf.mxu0  ;;  %v12791_v20 = vld [vmem:[#allocation106_spill] sm:$0xff] }
 0x3d3   : > { %v5927_v40 = vrot.slane %v4781_v50, 1  ;;  %v4500_v14 = vadd.f32 %v4499_v63, %v12787_v8  ;;  %v4783_v39 = vadd.f32 %v4782_v26, %v4490_v32  ;;  %v12792_v32 = vld [vmem:[#allocation13_spill] sm:$0xff]  ;;  %v12793_v50 = vld [vmem:[#allocation112_spill] sm:$0xff] }
 0x3d4   : > { %12786 = vst [vmem:[#allocation43_spill] sm:$0xff] %v10902_v36  ;;  %v4501_v23 = vpop.f32.mrf.mxu1  ;;  %v4784_v55 = vpop.f32.mrf.mxu0 }
 0x3d5   : > { %v5928_v34 = vsel %vm5843_vm4, %v5925_v24, %v5927_v40  ;;  %v4502_v30 = vadd.f32 %v4501_v23, %v12788_v16  ;;  %v4785_v52 = vadd.f32 %v4784_v55, %v4492_v54 }
 0x3d6   : > { %v10907_v33 = vadd.f32 %v5928_v34, %v4773_v1  ;;  %v4505_v60 = vpop.f32.mrf.mxu1  ;;  %v4788_v28 = vpop.f32.mrf.mxu0  ;;  %5028 = vmatmul.mubr.bf16.gmra.mxu1 %v12790_v15  ;;  %5261 = vmatmul.mubr.bf16.gmra.mxu0 %v12791_v20  ;;  %v12796_v15 = vld [vmem:[#allocation239_spill] sm:$0xff] }
 0x3d7   : > { %v5929_v61 = vrot.slane %v4785_v52, 1  ;;  %v4506_v48 = vadd.f32 %v4505_v60, %v10500_v46  ;;  %v4789_v42 = vadd.f32 %v4788_v28, %v4496_v3  ;;  %5035 = vmatprep.mubr.bf16.mxu1 %v12792_v32  ;;  %5268 = vmatprep.mubr.bf16.mxu0 %v12793_v50  ;;  %v12795_v52 = vld [vmem:[#allocation238_spill] sm:$0xff] }
 0x3d8   : > { %12789 = vst [vmem:[#allocation186_spill] sm:$0xff] %v10907_v33  ;;  %v4507_v24 = vpop.f32.mrf.mxu1  ;;  %v4790_v63 = vpop.f32.mrf.mxu0 }
 0x3d9   : > { %v5930_v54 = vsel %vm5843_vm4, %v5927_v40, %v5929_v61  ;;  %v4508_v1 = vadd.f32 %v4507_v24, %v10504_v44  ;;  %v4791_v26 = vadd.f32 %v4790_v63, %v4498_v47  ;;  %v12798_v47 = vld [vmem:[#allocation11_spill] sm:$0xff] }
 0x3da   : > { %v10916_v8 = vadd.f32 %v5930_v54, %v4779_v56  ;;  %v4509_v23 = vpop.f32.mrf.mxu1  ;;  %v4792_v55 = vpop.f32.mrf.mxu0  ;;  %v12799_v56 = vld [vmem:[#allocation110_spill] sm:$0xff] }
 0x3db   : > { %v5931_v34 = vrot.slane %v4791_v26, 1  ;;  %v4510_v16 = vadd.f32 %v4509_v23, %v12795_v52  ;;  %v4793_v46 = vadd.f32 %v4792_v55, %v4500_v14  ;;  %v12800_v14 = vld [vmem:[#allocation17_spill] sm:$0xff]  ;;  %v12801_v26 = vld [vmem:[#allocation116_spill] sm:$0xff] }
 0x3dc   : > { %12794 = vst [vmem:[#allocation29_spill] sm:$0xff] %v10916_v8  ;;  %v4511_v3 = vpop.f32.mrf.mxu1  ;;  %v4794_v60 = vpop.f32.mrf.mxu0 }
 0x3dd   : > { %v5932_v28 = vsel %vm5843_vm4, %v5929_v61, %v5931_v34  ;;  %v4512_v20 = vadd.f32 %v4511_v3, %v12796_v15  ;;  %v4795_v32 = vadd.f32 %v4794_v60, %v4502_v30 }
 0x3de   : > { %v10921_v50 = vadd.f32 %v5932_v28, %v4783_v39  ;;  %v4515_v40 = vpop.f32.mrf.mxu1  ;;  %v4798_v44 = vpop.f32.mrf.mxu0  ;;  %5036 = vmatmul.mubr.bf16.gmra.mxu1 %v12798_v47  ;;  %5269 = vmatmul.mubr.bf16.gmra.mxu0 %v12799_v56 }
 0x3df   : > { %v5933_v24 = vrot.slane %v4795_v32, 1  ;;  %v4516_v63 = vadd.f32 %v4515_v40, %v10513_v19  ;;  %v4799_v54 = vadd.f32 %v4798_v44, %v4506_v48  ;;  %5043 = vmatprep.mubr.bf16.mxu1 %v12800_v14  ;;  %5276 = vmatprep.mubr.bf16.mxu0 %v12801_v26  ;;  %v12806_v26 = vld [vmem:[#allocation240_spill] sm:$0xff] }
 0x3e0   : > { %12797 = vst [vmem:[#allocation48_spill] sm:$0xff] %v10921_v50  ;;  %v4517_v61 = vpop.f32.mrf.mxu1  ;;  %v4800_v23 = vpop.f32.mrf.mxu0 }
 0x3e1   : > { %v5934_v30 = vsel %vm5843_vm4, %v5931_v34, %v5933_v24  ;;  %v4518_v39 = vadd.f32 %v4517_v61, %v10517_v49  ;;  %v4801_v55 = vadd.f32 %v4800_v23, %v4508_v1  ;;  %v12804_v1 = vld [vmem:[#allocation15_spill] sm:$0xff]  ;;  %v12808_v23 = vld [vmem:[#allocation120_spill] sm:$0xff] }
 0x3e2   : > { %v10930_v52 = vadd.f32 %v5934_v30, %v4789_v42  ;;  %v4519_v3 = vpop.f32.mrf.mxu1  ;;  %v4802_v60 = vpop.f32.mrf.mxu0  ;;  %v12805_v42 = vld [vmem:[#allocation114_spill] sm:$0xff] }
 0x3e3   : > { %v5935_v28 = vrot.slane %v4801_v55, 1  ;;  %v4520_v15 = vadd.f32 %v4519_v3, %v10519_v41  ;;  %v4803_v19 = vadd.f32 %v4802_v60, %v4510_v16  ;;  %v12807_v16 = vld [vmem:[#allocation21_spill] sm:$0xff] }
 0x3e4   : > { %12802 = vst [vmem:[#allocation187_spill] sm:$0xff] %v10930_v52  ;;  %v4521_v48 = vpop.f32.mrf.mxu1  ;;  %v4804_v32 = vpop.f32.mrf.mxu0 }
 0x3e5   : > { %v5936_v40 = vsel %vm5843_vm4, %v5933_v24, %v5935_v28  ;;  %v4522_v44 = vadd.f32 %v4521_v48, %v10521_v45  ;;  %v4805_v47 = vadd.f32 %v4804_v32, %v4512_v20 }
 0x3e6   : > { %v10935_v56 = vadd.f32 %v5936_v40, %v4793_v46  ;;  %v4525_v34 = vpop.f32.mrf.mxu1  ;;  %v4808_v49 = vpop.f32.mrf.mxu0  ;;  %5044 = vmatmul.mubr.bf16.gmra.mxu1 %v12804_v1  ;;  %5277 = vmatmul.mubr.bf16.gmra.mxu0 %v12805_v42 }
 0x3e7   : > { %v5937_v14 = vrot.slane %v4805_v47, 1  ;;  %v4526_v61 = vadd.f32 %v4525_v34, %v12806_v26  ;;  %v4809_v41 = vadd.f32 %v4808_v49, %v4516_v63  ;;  %5051 = vmatprep.mubr.bf16.mxu1 %v12807_v16  ;;  %5284 = vmatprep.mubr.bf16.mxu0 %v12808_v23  ;;  %v12813_v23 = vld [vmem:[#allocation25_spill] sm:$0xff] }
 0x3e8   : > { %12803 = vst [vmem:[#allocation188_spill] sm:$0xff] %v10935_v56  ;;  %v4527_v24 = vpop.f32.mrf.mxu1  ;;  %v4810_v30 = vpop.f32.mrf.mxu0 }
 0x3e9   : > { %v5938_v45 = vsel %vm5843_vm4, %v5935_v28, %v5937_v14  ;;  %v4528_v46 = vadd.f32 %v4527_v24, %v10531_v4  ;;  %v4811_v20 = vadd.f32 %v4810_v30, %v4518_v39  ;;  %v12811_v39 = vld [vmem:[#allocation19_spill] sm:$0xff] }
 0x3ea   : > { %v10944_v55 = vadd.f32 %v5938_v45, %v4799_v54  ;;  %v4529_v3 = vpop.f32.mrf.mxu1  ;;  %v4812_v60 = vpop.f32.mrf.mxu0  ;;  %v12812_v54 = vld [vmem:[#allocation118_spill] sm:$0xff] }
 0x3eb   : > { %v5939_v48 = vrot.slane %v4811_v20, 1  ;;  %v4530_v32 = vadd.f32 %v4529_v3, %v10534_v31  ;;  %v4813_v40 = vadd.f32 %v4812_v60, %v4520_v15  ;;  %v12814_v31 = vld [vmem:[#allocation124_spill] sm:$0xff] }
 0x3ec   : > { %12809 = vst [vmem:[#allocation26_spill] sm:$0xff] %v10944_v55  ;;  %v4531_v63 = vpop.f32.mrf.mxu1  ;;  %v4814_v47 = vpop.f32.mrf.mxu0  ;;  %v12851_v55 = vld [vmem:[#allocation111_spill] sm:$0xff] }
 0x3ed   : > { %v5940_v34 = vsel %vm5843_vm4, %v5937_v14, %v5939_v48  ;;  %v4532_v49 = vadd.f32 %v4531_v63, %v10537_v21  ;;  %v4815_v1 = vadd.f32 %v4814_v47, %v4522_v44 }
 0x3ee   : > { %v10949_v42 = vadd.f32 %v5940_v34, %v4803_v19  ;;  %v4818_v28 = vpop.f32.mrf.mxu0  ;;  %v4861_v4 = vpop.f32.mrf.mxu1  ;;  %5052 = vmatmul.mubr.bf16.gmra.mxu1 %v12811_v39  ;;  %5285 = vmatmul.mubr.bf16.gmra.mxu0 %v12812_v54  ;;  %v12818_v39 = vld [vmem:[#allocation122_spill] sm:$0xff]  ;;  %v12820_v54 = vld [vmem:[#allocation85_spill] sm:$0xff] }
 0x3ef   : > { %v5941_v26 = vrot.slane %v4815_v1, 1  ;;  %v4819_v16 = vadd.f32 %v4818_v28, %v4526_v61  ;;  %5059 = vmatprep.mubr.bf16.mxu1 %v12813_v23  ;;  %5292 = vmatprep.mubr.bf16.mxu0 %v12814_v31  ;;  %v12817_v1 = vld [vmem:[#allocation23_spill] sm:$0xff] }
 0x3f0   : > { %12810 = vst [vmem:[#allocation47_spill] sm:$0xff] %v10949_v42  ;;  %v4820_v15 = vpop.f32.mrf.mxu0  ;;  %v4863_v24 = vpop.f32.mrf.mxu1 }
 0x3f1   : > { %v5942_v14 = vsel %vm5843_vm4, %v5939_v48, %v5941_v26  ;;  %v4821_v21 = vadd.f32 %v4820_v15, %v4528_v46  ;;  %v12819_v48 = vld [vmem:[#allocation128_spill] sm:$0xff] }
 0x3f2   : > { %v10956_v44 = vadd.f32 %v5942_v14, %v4809_v41  ;;  %v4822_v19 = vpop.f32.mrf.mxu0  ;;  %v4864_v30 = vpop.f32.mrf.mxu1 }
 0x3f3   : > { %v5943_v45 = vrot.slane %v4821_v21, 1  ;;  %v4823_v20 = vadd.f32 %v4822_v19, %v4530_v32 }
 0x3f4   : > { %12815 = vst [vmem:[#allocation189_spill] sm:$0xff] %v10956_v44  ;;  %v4824_v3 = vpop.f32.mrf.mxu0  ;;  %v4866_v60 = vpop.f32.mrf.mxu1  ;;  %v12847_v44 = vld [vmem:[#allocation107_spill] sm:$0xff] }
 0x3f5   : > { %v5944_v63 = vsel %vm5843_vm4, %v5941_v26, %v5943_v45  ;;  %v4825_v61 = vadd.f32 %v4824_v3, %v4532_v49  ;;  %v12823_v3 = vld [vmem:[#allocation126_spill] sm:$0xff]  ;;  %v12824_v60 = vld [vmem:[#allocation83_spill] sm:$0xff] }
 0x3f6   : > { %v10959_v47 = vadd.f32 %v5944_v63, %v4813_v40  ;;  %v4869_v34 = vpop.f32.mrf.mxu1  ;;  %5060 = vmatmul.mubr.bf16.gmra.mxu1 %v12817_v1  ;;  %v5102_v28 = vpop.f32.mrf.mxu0  ;;  %5293 = vmatmul.mubr.bf16.gmra.mxu0 %v12818_v39 }
 0x3f7   : > { %v5945_v46 = vrot.slane %v4825_v61, 1  ;;  %v10963_v41 = vadd.f32 %v5102_v28, %v4861_v4  ;;  %5300 = vmatprep.mubr.bf16.mxu0 %v12819_v48  ;;  %5341 = vmatprep.mubr.bf16.mxu1 %v12820_v54  ;;  %v12825_v61 = vld [vmem:[#allocation89_spill] sm:$0xff] }
 0x3f8   : > { %12816 = vst [vmem:[#allocation33_spill] sm:$0xff] %v10959_v47  ;;  %v4871_v32 = vpop.f32.mrf.mxu1  ;;  %v5104_v23 = vpop.f32.mrf.mxu0 }
 0x3f9   : > { %v5946_v26 = vsel %vm5843_vm4, %v5943_v45, %v5945_v46  ;;  %v10968_v49 = vadd.f32 %v5945_v46, %v4823_v20  ;;  %v12826_v45 = vld [vmem:[#allocation132_spill] sm:$0xff]  ;;  %v12827_v32 = vld [vmem:[#allocation87_spill] sm:$0xff] }
 0x3fa   : > { %v10970_v40 = vadd.f32 %v5946_v26, %v4819_v16  ;;  %v4872_v31 = vpop.f32.mrf.mxu1  ;;  %v5105_v15 = vpop.f32.mrf.mxu0  ;;  %v12828_v23 = vld [vmem:[#allocation131_spill] sm:$0xff]  ;;  %v12829_v26 = vld [vmem:[#allocation93_spill] sm:$0xff] }
 0x3fb   : > { %12821 = vst [vmem:[#allocation52_spill] sm:$0xff] %v10968_v49  ;;  %v10972_v24 = vadd.f32 %v5105_v15, %v4864_v30  ;;  %v12830_v15 = vld [vmem:[#allocation136_spill] sm:$0xff]  ;;  %v12843_v49 = vld [vmem:[#allocation103_spill] sm:$0xff] }
 0x3fc   : > { %12822 = vst [vmem:[#allocation190_spill] sm:$0xff] %v10970_v40  ;;  %v4874_v14 = vpop.f32.mrf.mxu1  ;;  %v5107_v21 = vpop.f32.mrf.mxu0 }
 0x3fe   : > { %v4877_v4 = vpop.f32.mrf.mxu1  ;;  %v5110_v19 = vpop.f32.mrf.mxu0  ;;  %5301 = vmatmul.mubr.bf16.gmra.mxu0 %v12823_v3  ;;  %5342 = vmatmul.mubr.bf16.vlgmr.msra.gmra.mxu1 %v12824_v60 }
 0x3ff   : > { %v10976_v63 = vadd.f32 %v5110_v19, %v4869_v34  ;;  %5349 = vmatprep.mubr.bf16.mxu1 %v12825_v61  ;;  %7931 = vmatprep.mubr.msk.bf16.mxu0 %vm3566_vm3, %v12826_v45 }
 0x400   : > { %v4879_v16 = vpop.f32.mrf.mxu1  ;;  %v5112_v20 = vpop.f32.mrf.mxu0 }
 0x401   : > { %v12831_v20 = vld [vmem:[#allocation91_spill] sm:$0xff] }
 0x402   : > { %v4880_v1 = vpop.f32.mrf.mxu1  ;;  %v5113_v30 = vpop.f32.mrf.mxu0 }
 0x403   : > { %v10981_v28 = vadd.f32 %v5113_v30, %v4872_v31  ;;  %v12832_v30 = vld [vmem:[#allocation135_spill] sm:$0xff] }
 0x404   : > { %v4882_v39 = vpop.f32.mrf.mxu1  ;;  %v5115_v46 = vpop.f32.mrf.mxu0 }
 0x405   : > { %v12833_v39 = vld [vmem:[#allocation97_spill] sm:$0xff]  ;;  %v12834_v46 = vld [vmem:[#allocation140_spill] sm:$0xff] }
 0x406   : > { %v4885_v48 = vpop.f32.mrf.mxu1  ;;  %v5118_v54 = vpop.f32.mrf.mxu0  ;;  %5350 = vmatmul.mubr.bf16.gmra.mxu1 %v12827_v32  ;;  %7932 = vmatmul.mubr.msk.bf16.vlgmr.msra.gmra.mxu0 %vm3566_vm3, %v12828_v23 }
 0x407   : > { %v10986_v34 = vadd.f32 %v5118_v54, %v4877_v4  ;;  %5357 = vmatprep.mubr.bf16.mxu1 %v12829_v26  ;;  %7935 = vmatprep.mubr.msk.bf16.mxu0 %vm3566_vm3, %v12830_v15 }
 0x408   : > { %v4887_v14 = vpop.f32.mrf.mxu1  ;;  %v5120_v21 = vpop.f32.mrf.mxu0 }
 0x40a   : > { %v4888_v31 = vpop.f32.mrf.mxu1  ;;  %v5121_v19 = vpop.f32.mrf.mxu0 }
 0x40b   : > { %v10991_v3 = vadd.f32 %v5121_v19, %v4880_v1 }
 0x40c   : > { %v4890_v60 = vpop.f32.mrf.mxu1  ;;  %v5123_v61 = vpop.f32.mrf.mxu0 }
 0x40d   : > { %v12835_v60 = vld [vmem:[#allocation95_spill] sm:$0xff] }
 0x40e   : > { %v4893_v45 = vpop.f32.mrf.mxu1  ;;  %v5126_v16 = vpop.f32.mrf.mxu0  ;;  %5358 = vmatmul.mubr.bf16.gmra.mxu1 %v12831_v20  ;;  %7936 = vmatmul.mubr.msk.bf16.gmra.mxu0 %vm3566_vm3, %v12832_v30  ;;  %v12836_v61 = vld [vmem:[#allocation139_spill] sm:$0xff]  ;;  %v12838_v20 = vld [vmem:[#allocation144_spill] sm:$0xff] }
 0x40f   : > { %v10996_v4 = vadd.f32 %v5126_v16, %v4885_v48  ;;  %5365 = vmatprep.mubr.bf16.mxu1 %v12833_v39  ;;  %7939 = vmatprep.mubr.msk.bf16.mxu0 %vm3566_vm3, %v12834_v46  ;;  %v12837_v16 = vld [vmem:[#allocation101_spill] sm:$0xff] }
 0x410   : > { %v4895_v54 = vpop.f32.mrf.mxu1  ;;  %v5128_v32 = vpop.f32.mrf.mxu0 }
 0x412   : > { %v4896_v1 = vpop.f32.mrf.mxu1  ;;  %v5129_v23 = vpop.f32.mrf.mxu0 }
 0x413   : > { %v11001_v26 = vadd.f32 %v5129_v23, %v4888_v31 }
 0x414   : > { %v4898_v15 = vpop.f32.mrf.mxu1  ;;  %v5131_v14 = vpop.f32.mrf.mxu0 }
 0x416   : > { %v4901_v21 = vpop.f32.mrf.mxu1  ;;  %v5134_v19 = vpop.f32.mrf.mxu0  ;;  %5366 = vmatmul.mubr.bf16.gmra.mxu1 %v12835_v60  ;;  %7940 = vmatmul.mubr.msk.bf16.gmra.mxu0 %vm3566_vm3, %v12836_v61  ;;  %v12839_v60 = vld [vmem:[#allocation99_spill] sm:$0xff] }
 0x417   : > { %v11006_v48 = vadd.f32 %v5134_v19, %v4893_v45  ;;  %5373 = vmatprep.mubr.bf16.mxu1 %v12837_v16  ;;  %7943 = vmatprep.mubr.msk.bf16.mxu0 %vm3566_vm3, %v12838_v20  ;;  %v12840_v61 = vld [vmem:[#allocation143_spill] sm:$0xff]  ;;  %v12841_v19 = vld [vmem:[#allocation105_spill] sm:$0xff]  ;;  %v12842_v16 = vld [vmem:[#allocation148_spill] sm:$0xff] }
 0x418   : > { %v4903_v30 = vpop.f32.mrf.mxu1  ;;  %v5136_v39 = vpop.f32.mrf.mxu0 }
 0x41a   : > { %v4904_v31 = vpop.f32.mrf.mxu1  ;;  %v5137_v46 = vpop.f32.mrf.mxu0 }
 0x41b   : > { %v11011_v54 = vadd.f32 %v5137_v46, %v4896_v1 }
 0x41c   : > { %v4906_v32 = vpop.f32.mrf.mxu1  ;;  %v5139_v23 = vpop.f32.mrf.mxu0 }
 0x41e   : > { %v4909_v15 = vpop.f32.mrf.mxu1  ;;  %v5142_v14 = vpop.f32.mrf.mxu0  ;;  %5374 = vmatmul.mubr.bf16.gmra.mxu1 %v12839_v60  ;;  %7944 = vmatmul.mubr.msk.bf16.gmra.mxu0 %vm3566_vm3, %v12840_v61  ;;  %v12844_v61 = vld [vmem:[#allocation147_spill] sm:$0xff] }
 0x41f   : > { %v11016_v45 = vadd.f32 %v5142_v14, %v4901_v21  ;;  %5381 = vmatprep.mubr.bf16.mxu1 %v12841_v19  ;;  %7947 = vmatprep.mubr.msk.bf16.mxu0 %vm3566_vm3, %v12842_v16  ;;  %v12845_v14 = vld [vmem:[#allocation109_spill] sm:$0xff]  ;;  %v12846_v19 = vld [vmem:[#allocation152_spill] sm:$0xff] }
 0x420   : > { %v4911_v20 = vpop.f32.mrf.mxu1  ;;  %v5144_v30 = vpop.f32.mrf.mxu0 }
 0x422   : > { %v4912_v1 = vpop.f32.mrf.mxu1  ;;  %v5145_v39 = vpop.f32.mrf.mxu0 }
 0x423   : > { %v11021_v46 = vadd.f32 %v5145_v39, %v4904_v31 }
 0x424   : > { %v4914_v32 = vpop.f32.mrf.mxu1  ;;  %v5147_v23 = vpop.f32.mrf.mxu0 }
 0x426   : > { %v4917_v40 = vpop.f32.mrf.mxu1  ;;  %v5150_v60 = vpop.f32.mrf.mxu0  ;;  %5382 = vmatmul.mubr.bf16.gmra.mxu1 %v12843_v49  ;;  %7948 = vmatmul.mubr.msk.bf16.gmra.mxu0 %vm3566_vm3, %v12844_v61  ;;  %v12848_v61 = vld [vmem:[#allocation151_spill] sm:$0xff] }
 0x427   : > { %v11026_v21 = vadd.f32 %v5150_v60, %v4909_v15  ;;  %5389 = vmatprep.mubr.bf16.mxu1 %v12845_v14  ;;  %7951 = vmatprep.mubr.msk.bf16.mxu0 %vm3566_vm3, %v12846_v19  ;;  %v12849_v60 = vld [vmem:[#allocation113_spill] sm:$0xff]  ;;  %v12850_v14 = vld [vmem:[#allocation156_spill] sm:$0xff] }
 0x428   : > { %v4919_v16 = vpop.f32.mrf.mxu1  ;;  %v5152_v20 = vpop.f32.mrf.mxu0 }
 0x42a   : > { %v4920_v31 = vpop.f32.mrf.mxu1  ;;  %v5153_v30 = vpop.f32.mrf.mxu0 }
 0x42b   : > { %v11031_v39 = vadd.f32 %v5153_v30, %v4912_v1 }
 0x42c   : > { %v4922_v32 = vpop.f32.mrf.mxu1  ;;  %v5155_v23 = vpop.f32.mrf.mxu0 }
 0x42e   : > { %v4925_v47 = vpop.f32.mrf.mxu1  ;;  %v5158_v49 = vpop.f32.mrf.mxu0  ;;  %5390 = vmatmul.mubr.bf16.gmra.mxu1 %v12847_v44  ;;  %7952 = vmatmul.mubr.msk.bf16.gmra.mxu0 %vm3566_vm3, %v12848_v61  ;;  %v12852_v61 = vld [vmem:[#allocation155_spill] sm:$0xff] }
 0x42f   : > { %v11036_v15 = vadd.f32 %v5158_v49, %v4917_v40  ;;  %5397 = vmatprep.mubr.bf16.mxu1 %v12849_v60  ;;  %7955 = vmatprep.mubr.msk.bf16.mxu0 %vm3566_vm3, %v12850_v14  ;;  %v12853_v49 = vld [vmem:[#allocation117_spill] sm:$0xff]  ;;  %v12854_v60 = vld [vmem:[#allocation160_spill] sm:$0xff] }
 0x430   : > { %v4927_v19 = vpop.f32.mrf.mxu1  ;;  %v5160_v16 = vpop.f32.mrf.mxu0 }
 0x432   : > { %v4928_v1 = vpop.f32.mrf.mxu1  ;;  %v5161_v20 = vpop.f32.mrf.mxu0 }
 0x433   : > { %v11041_v30 = vadd.f32 %v5161_v20, %v4920_v31  ;;  %v8289_v31 = vld [vmem:[%s12113_s5 + $0x74] ss:$8 sps:$4 sm:$0xff]  }
 0x434   : > { %v4930_v32 = vpop.f32.mrf.mxu1  ;;  %v5163_v23 = vpop.f32.mrf.mxu0  ;;  %6543 = vmatprep.subr.bf16.mxu0 %v8289_v31  ;;  %v12857_v31 = vld [vmem:[#allocation121_spill] sm:$0xff] }
 0x436   : > { %v4933_v42 = vpop.f32.mrf.mxu1  ;;  %v5166_v44 = vpop.f32.mrf.mxu0  ;;  %5398 = vmatmul.mubr.bf16.gmra.mxu1 %v12851_v55  ;;  %7956 = vmatmul.mubr.msk.bf16.gmra.mxu0 %vm3566_vm3, %v12852_v61  ;;  %v8287_v55 = vld [vmem:[%s12113_s5 + $0x70] ss:$8 sps:$4 sm:$0xff]  }
 0x437   : > { %v11046_v40 = vadd.f32 %v5166_v44, %v4925_v47  ;;  %5405 = vmatprep.mubr.bf16.mxu1 %v12853_v49  ;;  %7959 = vmatprep.mubr.msk.bf16.mxu0 %vm3566_vm3, %v12854_v60  ;;  %v8292_v44 = vld [vmem:[%s12113_s5 + $0x64] ss:$8 sps:$4 sm:$0xff]  }
 0x438   : > { %v4935_v14 = vpop.f32.mrf.mxu1  ;;  %v5168_v19 = vpop.f32.mrf.mxu0  ;;  %6544 = vmatpush1.bf16.msra.mxu0 %v8287_v55  ;;  %v12855_v60 = vld [vmem:[#allocation115_spill] sm:$0xff] }
 0x439   : > { %v12856_v14 = vld [vmem:[#allocation159_spill] sm:$0xff]  ;;  %6545 = vmatprep.subr.bf16.mxu0 %v8292_v44 }
 0x43a   : > { %v4936_v16 = vpop.f32.mrf.mxu1  ;;  %v5169_v20 = vpop.f32.mrf.mxu0  ;;  %v8298_v44 = vld [vmem:[%s12113_s5 + $0x44] ss:$8 sps:$4 sm:$0xff]  }
 0x43b   : > { %v11057_v32 = vadd.f32 %v5169_v20, %v4928_v1  ;;  %v8290_v1 = vld [vmem:[%s12113_s5 + $0x60] ss:$8 sps:$4 sm:$0xff]   ;;  %v12858_v20 = vld [vmem:[#allocation164_spill] sm:$0xff] }
 0x43c   : > { %v4938_v47 = vpop.f32.mrf.mxu1  ;;  %v5171_v23 = vpop.f32.mrf.mxu0  ;;  %6546 = vmatpush1.bf16.msra.mxu0 %v8290_v1 }
 0x43d   : > { %v8295_v23 = vld [vmem:[%s12113_s5 + $0x54] ss:$8 sps:$4 sm:$0xff]  }
 0x43e   : > { %v4941_v61 = vpop.f32.mrf.mxu1  ;;  %v5174_v49 = vpop.f32.mrf.mxu0  ;;  %5406 = vmatmul.mubr.bf16.gmra.mxu1 %v12855_v60  ;;  %7960 = vmatmul.mubr.msk.bf16.gmra.mxu0 %vm3566_vm3, %v12856_v14 }
 0x43f   : > { %v11068_v19 = vadd.f32 %v5174_v49, %v4933_v42  ;;  %5413 = vmatprep.mubr.bf16.mxu1 %v12857_v31  ;;  %7963 = vmatprep.mubr.msk.bf16.mxu0 %vm3566_vm3, %v12858_v20  ;;  %v8293_v42 = vld [vmem:[%s12113_s5 + $0x50] ss:$8 sps:$4 sm:$0xff]  }
 0x440   : > { %v4943_v55 = vpop.f32.mrf.mxu1  ;;  %v5176_v47 = vpop.f32.mrf.mxu0  ;;  %6547 = vmatprep.subr.bf16.mxu0 %v8295_v23  ;;  %v12861_v23 = vld [vmem:[#allocation125_spill] sm:$0xff] }
 0x441   : > { %6548 = vmatpush1.bf16.msra.mxu0 %v8293_v42  ;;  %v12859_v55 = vld [vmem:[#allocation119_spill] sm:$0xff] }
 0x442   : > { %v4944_v60 = vpop.f32.mrf.mxu1  ;;  %v5177_v14 = vpop.f32.mrf.mxu0  ;;  %v12860_v47 = vld [vmem:[#allocation163_spill] sm:$0xff]  ;;  %6549 = vmatprep.subr.bf16.mxu0 %v8298_v44 }
 0x443   : > { %v11079_v49 = vadd.f32 %v5177_v14, %v4936_v16  ;;  %v8296_v16 = vld [vmem:[%s12113_s5 + $0x40] ss:$8 sps:$4 sm:$0xff]   ;;  %v8304_v44 = vld [vmem:[%s12113_s5 + $0x24] ss:$8 sps:$4 sm:$0xff]  }
 0x444   : > { %v4946_v31 = vpop.f32.mrf.mxu1  ;;  %v5179_v56 = vpop.f32.mrf.mxu0 }
 0x445   : > { %v12862_v56 = vld [vmem:[#allocation168_spill] sm:$0xff]  ;;  %6550 = vmatpush1.bf16.msra.mxu0 %v8296_v16 }
 0x446   : > { %v4949_v1 = vpop.f32.mrf.mxu1  ;;  %v5182_v20 = vpop.f32.mrf.mxu0  ;;  %5414 = vmatmul.mubr.bf16.gmra.mxu1 %v12859_v55  ;;  %7964 = vmatmul.mubr.msk.bf16.gmra.mxu0 %vm3566_vm3, %v12860_v47  ;;  %v8301_v55 = vld [vmem:[%s12113_s5 + $0x34] ss:$8 sps:$4 sm:$0xff]  }
 0x447   : > { %v11090_v14 = vadd.f32 %v5182_v20, %v4941_v61  ;;  %5421 = vmatprep.mubr.bf16.mxu1 %v12861_v23  ;;  %7967 = vmatprep.mubr.msk.bf16.mxu0 %vm3566_vm3, %v12862_v56  ;;  %v8299_v61 = vld [vmem:[%s12113_s5 + $0x30] ss:$8 sps:$4 sm:$0xff]  }
 0x448   : > { %v4951_v42 = vpop.f32.mrf.mxu1  ;;  %v5184_v31 = vpop.f32.mrf.mxu0  ;;  %6551 = vmatprep.subr.bf16.mxu0 %v8301_v55  ;;  %v12865_v55 = vld [vmem:[#allocation129_spill] sm:$0xff] }
 0x449   : > { %6552 = vmatpush1.bf16.msra.mxu0 %v8299_v61  ;;  %v12863_v42 = vld [vmem:[#allocation123_spill] sm:$0xff] }
 0x44a   : > { %v4952_v47 = vpop.f32.mrf.mxu1  ;;  %v5185_v52 = vpop.f32.mrf.mxu0  ;;  %v12864_v31 = vld [vmem:[#allocation167_spill] sm:$0xff]  ;;  %6553 = vmatprep.subr.bf16.mxu0 %v8304_v44 }
 0x44b   : > { %v11101_v20 = vadd.f32 %v5185_v52, %v4944_v60  ;;  %v8302_v52 = vld [vmem:[%s12113_s5 + $0x20] ss:$8 sps:$4 sm:$0xff]   ;;  %v8310_v44 = vld [vmem:[%s12113_s5 + $0x4] ss:$8 sps:$4 sm:$0xff]  }
 0x44c   : > { %v4954_v23 = vpop.f32.mrf.mxu1  ;;  %v5187_v50 = vpop.f32.mrf.mxu0 }
 0x44d   : > { %v12866_v50 = vld [vmem:[#allocation172_spill] sm:$0xff]  ;;  %6554 = vmatpush1.bf16.msra.mxu0 %v8302_v52 }
 0x44e   : > { %v4957_v16 = vpop.f32.mrf.mxu1  ;;  %v5190_v56 = vpop.f32.mrf.mxu0  ;;  %5422 = vmatmul.mubr.bf16.gmra.mxu1 %v12863_v42  ;;  %7968 = vmatmul.mubr.msk.bf16.gmra.mxu0 %vm3566_vm3, %v12864_v31  ;;  %v8307_v42 = vld [vmem:[%s12113_s5 + $0x14] ss:$8 sps:$4 sm:$0xff]  }
 0x44f   : > { %v11112_v60 = vadd.f32 %v5190_v56, %v4949_v1  ;;  %5429 = vmatprep.mubr.bf16.mxu1 %v12865_v55  ;;  %7971 = vmatprep.mubr.msk.bf16.mxu0 %vm3566_vm3, %v12866_v50  ;;  %v8305_v1 = vld [vmem:[%s12113_s5 + $0x10] ss:$8 sps:$4 sm:$0xff]  }
 0x450   : > { %v4959_v61 = vpop.f32.mrf.mxu1  ;;  %v5192_v23 = vpop.f32.mrf.mxu0  ;;  %6555 = vmatprep.subr.bf16.mxu0 %v8307_v42  ;;  %v12869_v42 = vld [vmem:[#allocation133_spill] sm:$0xff] }
 0x451   : > { %6556 = vmatpush1.bf16.msra.mxu0 %v8305_v1  ;;  %v12867_v61 = vld [vmem:[#allocation127_spill] sm:$0xff] }
 0x452   : > { %v4960_v31 = vpop.f32.mrf.mxu1  ;;  %v5193_v8 = vpop.f32.mrf.mxu0  ;;  %v12868_v23 = vld [vmem:[#allocation171_spill] sm:$0xff]  ;;  %6557 = vmatprep.subr.bf16.mxu0 %v8310_v44 }
 0x453   : > { %v11123_v56 = vadd.f32 %v5193_v8, %v4952_v47  ;;  %v8308_v8 = vld [vmem:[%s12113_s5] ss:$8 sps:$4 sm:$0xff]  }
 0x454   : > { %v4962_v55 = vpop.f32.mrf.mxu1  ;;  %v5195_v33 = vpop.f32.mrf.mxu0 }
 0x455   : > { %v12870_v33 = vld [vmem:[#allocation176_spill] sm:$0xff]  ;;  %6558 = vmatpush1.bf16.msra.mxu0 %v8308_v8 }
 0x456   : > { %v4965_v52 = vpop.f32.mrf.mxu1  ;;  %v5198_v50 = vpop.f32.mrf.mxu0  ;;  %5430 = vmatmul.mubr.bf16.gmra.mxu1 %v12867_v61  ;;  %7972 = vmatmul.mubr.msk.bf16.gmra.mxu0 %vm3566_vm3, %v12868_v23 }
 0x457   : > { %v11134_v47 = vadd.f32 %v5198_v50, %v4957_v16  ;;  %5437 = vmatprep.mubr.bf16.mxu1 %v12869_v42  ;;  %7975 = vmatprep.mubr.msk.bf16.mxu0 %vm3566_vm3, %v12870_v33  ;;  %v12872_v16 = vld [vmem:[#allocation175_spill] sm:$0xff]  ;;  %v12873_v42 = vld [vmem:[#allocation137_spill] sm:$0xff] }
 0x458   : > { %v4967_v1 = vpop.f32.mrf.mxu1  ;;  %v5200_v55 = vpop.f32.mrf.mxu0 }
 0x45a   : > { %v4968_v36 = vpop.f32.mrf.mxu1  ;;  %v5201_v61 = vpop.f32.mrf.mxu0 }
 0x45b   : > { %v11139_v6 = vadd.f32 %v5201_v61, %v4960_v31 }
 0x45c   : > { %v4970_v23 = vpop.f32.mrf.mxu1  ;;  %v5203_v57 = vpop.f32.mrf.mxu0 }
 0x45d   : > { %v12875_v23 = vld [vmem:[#allocation134_spill] sm:$0xff] }
 0x45e   : > { %v4973_v43 = vpop.f32.mrf.mxu1  ;;  %v5206_v7 = vpop.f32.mrf.mxu0  ;;  %5438 = vmatmul.mubr.bf16.gmra.mxu1 %v12871_v18  ;;  %7976 = vmatmul.mubr.msk.bf16.gmra.mxu0 %vm3566_vm3, %v12872_v16 }
 0x45f   : > { %v11144_v50 = vadd.f32 %v5206_v7, %v4965_v52  ;;  %5445 = vmatprep.mubr.bf16.mxu1 %v12873_v42  ;;  %7979 = vmatprep.mubr.msk.bf16.mxu0 %vm3566_vm3, %v10054_v37  ;;  %v12877_v52 = vld [vmem:[#allocation141_spill] sm:$0xff] }
 0x460   : > { %v4975_v44 = vpop.f32.mrf.mxu1  ;;  %v5208_v8 = vpop.f32.mrf.mxu0 }
 0x462   : > { %v4976_v31 = vpop.f32.mrf.mxu1  ;;  %v5209_v33 = vpop.f32.mrf.mxu0 }
 0x463   : > { %v11149_v1 = vadd.f32 %v5209_v33, %v4968_v36 }
 0x464   : > { %v4978_v57 = vpop.f32.mrf.mxu1  ;;  %v5211_v55 = vpop.f32.mrf.mxu0 }
 0x465   : > { %12874 = vst [vmem:[#allocation191_spill] sm:$0xff] %v11149_v1 }
 0x466   : > { %v4981_v61 = vpop.f32.mrf.mxu1  ;;  %v5214_v18 = vpop.f32.mrf.mxu0  ;;  %5446 = vmatmul.mubr.bf16.gmra.mxu1 %v12875_v23  ;;  %7980 = vmatmul.mubr.msk.bf16.gmra.mxu0 %vm3566_vm3, %v10050_v58  ;;  %v12879_v23 = vld [vmem:[#allocation138_spill] sm:$0xff]  ;;  %v12881_v58 = vld [vmem:[#allocation145_spill] sm:$0xff] }
 0x467   : > { %v11154_v7 = vadd.f32 %v5214_v18, %v4973_v43  ;;  %5453 = vmatprep.mubr.bf16.mxu1 %v12877_v52  ;;  %6575 = vmatprep.mubr.bf16.mxu0 %v12339_v11 }
 0x468   : > { %v4983_v37 = vpop.f32.mrf.mxu1  ;;  %v5216_v16 = vpop.f32.mrf.mxu0 }
 0x469   : > { %12876 = vst [vmem:[#allocation192_spill] sm:$0xff] %v11154_v7 }
 0x46a   : > { %v4984_v42 = vpop.f32.mrf.mxu1  ;;  %v5217_v36 = vpop.f32.mrf.mxu0 }
 0x46b   : > { %v11158_v44 = vadd.f32 %v5217_v36, %v4976_v31 }
 0x46c   : > { %v4986_v8 = vpop.f32.mrf.mxu1  ;;  %v5219_v33 = vpop.f32.mrf.mxu0 }
 0x46d   : > { %12878 = vst [vmem:[#allocation30_spill] sm:$0xff] %v11158_v44  ;;  %v12883_v8 = vld [vmem:[#allocation142_spill] sm:$0xff]  ;;  %v12885_v44 = vld [vmem:[#allocation149_spill] sm:$0xff] }
 0x46e   : > { %v4989_v57 = vpop.f32.mrf.mxu1  ;;  %v5222_v55 = vpop.f32.mrf.mxu0  ;;  %5454 = vmatmul.mubr.bf16.gmra.mxu1 %v12879_v23 }
 0x46f   : > { %v11161_v12 = vadd.f32 %v5222_v55, %v4981_v61  ;;  %5461 = vmatprep.mubr.bf16.mxu1 %v12881_v58 }
 0x470   : > { %v4991_v43 = vpop.f32.mrf.mxu1  ;;  %v5224_v18 = vpop.f32.mrf.mxu0 }
 0x471   : > { %12880 = vst [vmem:[#allocation51_spill] sm:$0xff] %v11161_v12 }
 0x472   : > { %v4992_v52 = vpop.f32.mrf.mxu1  ;;  %v5225_v38 = vpop.f32.mrf.mxu0 }
 0x473   : > { %v11164_v37 = vadd.f32 %v5225_v38, %v4984_v42 }
 0x474   : > { %v4994_v16 = vpop.f32.mrf.mxu1  ;;  %v5227_v7 = vpop.f32.mrf.mxu0 }
 0x475   : > { %12882 = vst [vmem:[#allocation193_spill] sm:$0xff] %v11164_v37  ;;  %v12887_v16 = vld [vmem:[#allocation146_spill] sm:$0xff]  ;;  %v12889_v37 = vld [vmem:[#allocation153_spill] sm:$0xff] }
 0x476   : > { %v4997_v31 = vpop.f32.mrf.mxu1  ;;  %v5230_v36 = vpop.f32.mrf.mxu0  ;;  %5462 = vmatmul.mubr.bf16.gmra.mxu1 %v12883_v8 }
 0x477   : > { %v11167_v33 = vadd.f32 %v5230_v36, %v4989_v57  ;;  %5469 = vmatprep.mubr.bf16.mxu1 %v12885_v44 }
 0x478   : > { %v4999_v61 = vpop.f32.mrf.mxu1  ;;  %v5232_v55 = vpop.f32.mrf.mxu0 }
 0x479   : > { %12884 = vst [vmem:[#allocation37_spill] sm:$0xff] %v11167_v33 }
 0x47a   : > { %v5000_v23 = vpop.f32.mrf.mxu1  ;;  %v5233_v58 = vpop.f32.mrf.mxu0 }
 0x47b   : > { %v11170_v43 = vadd.f32 %v5233_v58, %v4992_v52 }
 0x47c   : > { %v5002_v18 = vpop.f32.mrf.mxu1  ;;  %v5235_v12 = vpop.f32.mrf.mxu0 }
 0x47d   : > { %12886 = vst [vmem:[#allocation56_spill] sm:$0xff] %v11170_v43  ;;  %v12891_v18 = vld [vmem:[#allocation150_spill] sm:$0xff]  ;;  %v12893_v43 = vld [vmem:[#allocation157_spill] sm:$0xff] }
 0x47e   : > { %v5005_v38 = vpop.f32.mrf.mxu1  ;;  %v5238_v42 = vpop.f32.mrf.mxu0  ;;  %5470 = vmatmul.mubr.bf16.gmra.mxu1 %v12887_v16 }
 0x47f   : > { %v11173_v7 = vadd.f32 %v5238_v42, %v4997_v31  ;;  %5477 = vmatprep.mubr.bf16.mxu1 %v12889_v37 }
 0x480   : > { %v5007_v57 = vpop.f32.mrf.mxu1  ;;  %v5240_v36 = vpop.f32.mrf.mxu0 }
 0x481   : > { %12888 = vst [vmem:[#allocation194_spill] sm:$0xff] %v11173_v7 }
 0x482   : > { %v5008_v8 = vpop.f32.mrf.mxu1  ;;  %v5241_v44 = vpop.f32.mrf.mxu0 }
 0x483   : > { %v11176_v61 = vadd.f32 %v5241_v44, %v5000_v23 }
 0x484   : > { %v5010_v55 = vpop.f32.mrf.mxu1  ;;  %v5243_v33 = vpop.f32.mrf.mxu0 }
 0x485   : > { %12890 = vst [vmem:[#allocation195_spill] sm:$0xff] %v11176_v61  ;;  %v12895_v55 = vld [vmem:[#allocation154_spill] sm:$0xff]  ;;  %v12897_v61 = vld [vmem:[#allocation161_spill] sm:$0xff] }
 0x486   : > { %v5013_v52 = vpop.f32.mrf.mxu1  ;;  %v5246_v58 = vpop.f32.mrf.mxu0  ;;  %5478 = vmatmul.mubr.bf16.gmra.mxu1 %v12891_v18 }
 0x487   : > { %v11179_v12 = vadd.f32 %v5246_v58, %v5005_v38  ;;  %5485 = vmatprep.mubr.bf16.mxu1 %v12893_v43 }
 0x488   : > { %v5015_v31 = vpop.f32.mrf.mxu1  ;;  %v5248_v42 = vpop.f32.mrf.mxu0 }
 0x489   : > { %12892 = vst [vmem:[#allocation196_spill] sm:$0xff] %v11179_v12 }
 0x48a   : > { %v5016_v16 = vpop.f32.mrf.mxu1  ;;  %v5249_v37 = vpop.f32.mrf.mxu0 }
 0x48b   : > { %v11182_v57 = vadd.f32 %v5249_v37, %v5008_v8 }
 0x48c   : > { %v5018_v36 = vpop.f32.mrf.mxu1  ;;  %v5251_v7 = vpop.f32.mrf.mxu0 }
 0x48d   : > { %12894 = vst [vmem:[#allocation34_spill] sm:$0xff] %v11182_v57  ;;  %v12899_v36 = vld [vmem:[#allocation158_spill] sm:$0xff]  ;;  %v12901_v57 = vld [vmem:[#allocation165_spill] sm:$0xff] }
 0x48e   : > { %v5021_v23 = vpop.f32.mrf.mxu1  ;;  %v5254_v44 = vpop.f32.mrf.mxu0  ;;  %5486 = vmatmul.mubr.bf16.gmra.mxu1 %v12895_v55 }
 0x48f   : > { %v11185_v33 = vadd.f32 %v5254_v44, %v5013_v52  ;;  %5493 = vmatprep.mubr.bf16.mxu1 %v12897_v61 }
 0x490   : > { %v5023_v38 = vpop.f32.mrf.mxu1  ;;  %v5256_v58 = vpop.f32.mrf.mxu0 }
 0x491   : > { %12896 = vst [vmem:[#allocation55_spill] sm:$0xff] %v11185_v33 }
 0x492   : > { %v5024_v18 = vpop.f32.mrf.mxu1  ;;  %v5257_v43 = vpop.f32.mrf.mxu0 }
 0x493   : > { %v11188_v31 = vadd.f32 %v5257_v43, %v5016_v16 }
 0x494   : > { %v5026_v42 = vpop.f32.mrf.mxu1  ;;  %v5259_v12 = vpop.f32.mrf.mxu0 }
 0x495   : > { %12898 = vst [vmem:[#allocation197_spill] sm:$0xff] %v11188_v31  ;;  %v12903_v42 = vld [vmem:[#allocation162_spill] sm:$0xff]  ;;  %v12905_v31 = vld [vmem:[#allocation169_spill] sm:$0xff] }
 0x496   : > { %v5029_v8 = vpop.f32.mrf.mxu1  ;;  %v5262_v37 = vpop.f32.mrf.mxu0  ;;  %5494 = vmatmul.mubr.bf16.gmra.mxu1 %v12899_v36 }
 0x497   : > { %v11191_v7 = vadd.f32 %v5262_v37, %v5021_v23  ;;  %5501 = vmatprep.mubr.bf16.mxu1 %v12901_v57 }
 0x498   : > { %v5031_v52 = vpop.f32.mrf.mxu1  ;;  %v5264_v44 = vpop.f32.mrf.mxu0 }
 0x499   : > { %12900 = vst [vmem:[#allocation41_spill] sm:$0xff] %v11191_v7 }
 0x49a   : > { %v5032_v55 = vpop.f32.mrf.mxu1  ;;  %v5265_v61 = vpop.f32.mrf.mxu0 }
 0x49b   : > { %v11194_v38 = vadd.f32 %v5265_v61, %v5024_v18 }
 0x49c   : > { %v5034_v58 = vpop.f32.mrf.mxu1  ;;  %v5267_v33 = vpop.f32.mrf.mxu0 }
 0x49d   : > { %12902 = vst [vmem:[#allocation60_spill] sm:$0xff] %v11194_v38  ;;  %v12907_v58 = vld [vmem:[#allocation166_spill] sm:$0xff]  ;;  %v12909_v38 = vld [vmem:[#allocation173_spill] sm:$0xff] }
 0x49e   : > { %v5037_v16 = vpop.f32.mrf.mxu1  ;;  %v5270_v43 = vpop.f32.mrf.mxu0  ;;  %5502 = vmatmul.mubr.bf16.gmra.mxu1 %v12903_v42 }
 0x49f   : > { %v11197_v12 = vadd.f32 %v5270_v43, %v5029_v8  ;;  %5509 = vmatprep.mubr.bf16.mxu1 %v12905_v31 }
 0x4a0   : > { %v5039_v23 = vpop.f32.mrf.mxu1  ;;  %v5272_v37 = vpop.f32.mrf.mxu0 }
 0x4a1   : > { %12904 = vst [vmem:[#allocation198_spill] sm:$0xff] %v11197_v12 }
 0x4a2   : > { %v5040_v36 = vpop.f32.mrf.mxu1  ;;  %v5273_v57 = vpop.f32.mrf.mxu0 }
 0x4a3   : > { %v11200_v52 = vadd.f32 %v5273_v57, %v5032_v55 }
 0x4a4   : > { %v5042_v44 = vpop.f32.mrf.mxu1  ;;  %v5275_v7 = vpop.f32.mrf.mxu0 }
 0x4a5   : > { %12906 = vst [vmem:[#allocation199_spill] sm:$0xff] %v11200_v52  ;;  %v12911_v44 = vld [vmem:[#allocation170_spill] sm:$0xff]  ;;  %v12913_v52 = vld [vmem:[#allocation177_spill] sm:$0xff] }
 0x4a6   : > { %v5045_v18 = vpop.f32.mrf.mxu1  ;;  %v5278_v61 = vpop.f32.mrf.mxu0  ;;  %5510 = vmatmul.mubr.bf16.gmra.mxu1 %v12907_v58 }
 0x4a7   : > { %v11203_v33 = vadd.f32 %v5278_v61, %v5037_v16  ;;  %5517 = vmatprep.mubr.bf16.mxu1 %v12909_v38 }
 0x4a8   : > { %v5047_v8 = vpop.f32.mrf.mxu1  ;;  %v5280_v43 = vpop.f32.mrf.mxu0 }
 0x4a9   : > { %12908 = vst [vmem:[#allocation200_spill] sm:$0xff] %v11203_v33 }
 0x4aa   : > { %v5048_v42 = vpop.f32.mrf.mxu1  ;;  %v5281_v31 = vpop.f32.mrf.mxu0 }
 0x4ab   : > { %v11206_v23 = vadd.f32 %v5281_v31, %v5040_v36 }
 0x4ac   : > { %v5050_v37 = vpop.f32.mrf.mxu1  ;;  %v5283_v12 = vpop.f32.mrf.mxu0 }
 0x4ad   : > { %12910 = vst [vmem:[#allocation38_spill] sm:$0xff] %v11206_v23  ;;  %v12915_v37 = vld [vmem:[#allocation174_spill] sm:$0xff]  ;;  %v12917_v23 = vld [vmem:[#allocation179_spill] sm:$0xff] }
 0x4ae   : > { %v5053_v55 = vpop.f32.mrf.mxu1  ;;  %v5286_v57 = vpop.f32.mrf.mxu0  ;;  %5518 = vmatmul.mubr.bf16.gmra.mxu1 %v12911_v44 }
 0x4af   : > { %v11209_v7 = vadd.f32 %v5286_v57, %v5045_v18  ;;  %5525 = vmatprep.mubr.bf16.mxu1 %v12913_v52 }
 0x4b0   : > { %v5055_v16 = vpop.f32.mrf.mxu1  ;;  %v5288_v61 = vpop.f32.mrf.mxu0 }
 0x4b1   : > { %12912 = vst [vmem:[#allocation59_spill] sm:$0xff] %v11209_v7 }
 0x4b2   : > { %v5056_v58 = vpop.f32.mrf.mxu1  ;;  %v5289_v38 = vpop.f32.mrf.mxu0 }
 0x4b3   : > { %v11212_v8 = vadd.f32 %v5289_v38, %v5048_v42 }
 0x4b4   : > { %v5058_v43 = vpop.f32.mrf.mxu1  ;;  %v5291_v33 = vpop.f32.mrf.mxu0 }
 0x4b5   : > { %12914 = vst [vmem:[#allocation201_spill] sm:$0xff] %v11212_v8  ;;  %v12919_v43 = vld [vmem:[#allocation178_spill] sm:$0xff]  ;;  %v12921_v8 = vld [vmem:[#allocation181_spill] sm:$0xff] }
 0x4b6   : > { %v5061_v36 = vpop.f32.mrf.mxu1  ;;  %v5294_v31 = vpop.f32.mrf.mxu0  ;;  %5526 = vmatmul.mubr.bf16.gmra.mxu1 %v12915_v37 }
 0x4b7   : > { %v11215_v12 = vadd.f32 %v5294_v31, %v5053_v55  ;;  %5533 = vmatprep.mubr.bf16.mxu1 %v12917_v23 }
 0x4b8   : > { %v5063_v18 = vpop.f32.mrf.mxu1  ;;  %v5296_v57 = vpop.f32.mrf.mxu0 }
 0x4b9   : > { %12916 = vst [vmem:[#allocation45_spill] sm:$0xff] %v11215_v12 }
 0x4ba   : > { %v5064_v44 = vpop.f32.mrf.mxu1  ;;  %v5297_v52 = vpop.f32.mrf.mxu0 }
 0x4bb   : > { %v11218_v16 = vadd.f32 %v5297_v52, %v5056_v58  ;;  %v12923_v52 = vld [vmem:[#allocation180_spill] sm:$0xff] }
 0x4bc   : > { %v5066_v61 = vpop.f32.mrf.mxu1  ;;  %v5299_v7 = vpop.f32.mrf.mxu0 }
 0x4bd   : > { %12918 = vst [vmem:[#allocation64_spill] sm:$0xff] %v11218_v16 }
 0x4be   : > { %v5302_v42 = vpop.f32.mrf.mxu0  ;;  %v5343_v38 = vpop.f32.mrf.mxu1  ;;  %5534 = vmatmul.mubr.bf16.gmra.mxu1 %v12919_v43 }
 0x4bf   : > { %v11221_v33 = vadd.f32 %v5302_v42, %v5061_v36  ;;  %5541 = vmatprep.mubr.bf16.mxu1 %v12921_v8  ;;  %v5344_v36 = vadd.f32 %v5343_v38, %v10963_v41 }
 0x4c0   : > { %v5304_v55 = vpop.f32.mrf.mxu0  ;;  %v5345_v31 = vpop.f32.mrf.mxu1 }
 0x4c1   : > { %12920 = vst [vmem:[#allocation202_spill] sm:$0xff] %v11221_v33 }
 0x4c2   : > { %v5305_v37 = vpop.f32.mrf.mxu0  ;;  %v5346_v23 = vpop.f32.mrf.mxu1 }
 0x4c3   : > { %v11224_v18 = vadd.f32 %v5305_v37, %v5064_v44  ;;  %v5347_v31 = vadd.f32 %v5346_v23, %v10972_v24  ;;  %v11236_v24 = vld [vmem:[%s12112_s4] ss:$0 sm:$0xff] }
 0x4c4   : > { %v5307_v57 = vpop.f32.mrf.mxu0  ;;  %v5348_v12 = vpop.f32.mrf.mxu1 }
 0x4c5   : > { %12922 = vst [vmem:[#allocation203_spill] sm:$0xff] %v11224_v18 }
 0x4c6   : > { %v5351_v58 = vpop.f32.mrf.mxu1  ;;  %5542 = vmatmul.mubr.bf16.gmra.mxu1 %v12923_v52  ;;  %v7933_v7 = vpop.f32.mrf.mxu0 }
 0x4c7   : > { %v5352_v61 = vadd.f32 %v5351_v58, %v10976_v63 }
 0x4c8   : > { %v5353_v16 = vpop.f32.mrf.mxu1  ;;  %v5584_v43 = vpop.f32.mrf.mxu0 }
 0x4c9   : > { %v5593_v42 = vadd.f32 %v7933_v7, %v5352_v61  ;;  %v5585_v33 = vadd.f32 %v5584_v43, %v5344_v36 }
 0x4ca   : > { %v5354_v8 = vpop.f32.mrf.mxu1  ;;  %v7934_v55 = vpop.f32.mrf.mxu0 }
 0x4cb   : > { %v5355_v44 = vadd.f32 %v5354_v8, %v10981_v28  ;;  %v6106_v52 = vrot.slane %v5593_v42, 2  ;;  %v6103_v63 = vrot.slane %v5585_v33, 2 }
 0x4cc   : > { %v5356_v37 = vpop.f32.mrf.mxu1  ;;  %v5587_v12 = vpop.f32.mrf.mxu0 }
 0x4cd   : > { %v5596_v57 = vadd.f32 %v7934_v55, %v5355_v44  ;;  %v5588_v18 = vadd.f32 %v5587_v12, %v5347_v31 }
 0x4ce   : > { %v5359_v1 = vpop.f32.mrf.mxu1  ;;  %v7937_v62 = vpop.f32.mrf.mxu0 }
 0x4cf   : > { %v6108_v16 = vrot.slane %v5596_v57, 2  ;;  %v6104_v58 = vrot.slane %v5588_v18, 2  ;;  %v5360_v41 = vadd.f32 %v5359_v1, %v10986_v34 }
 0x4d0   : > { %v5361_v38 = vpop.f32.mrf.mxu1  ;;  %v5600_v7 = vpop.f32.mrf.mxu0 }
 0x4d1   : > { %v6109_v61 = vsel %vm3645_vm2, %v6106_v52, %v6108_v16  ;;  %v6105_v28 = vsel %vm3645_vm2, %v6103_v63, %v6104_v58  ;;  %v6107_v23 = vsel %vm3645_vm2, %v6104_v58, %v6106_v52  ;;  %v5601_v43 = vadd.f32 %v5600_v7, %v5360_v41 }
 0x4d2   : > { %v6260_v33 = vadd.f32 %v6109_v61, %v10588_v2  ;;  %v6258_v18 = vadd.f32 %v6105_v28, %v10564_v9  ;;  %v6259_v34 = vadd.f32 %v6107_v23, %v10575_v0  ;;  %v5362_v1 = vpop.f32.mrf.mxu1  ;;  %v7938_v36 = vpop.f32.mrf.mxu0 }
 0x4d3   : > { %v6110_v42 = vrot.slane %v5601_v43, 2  ;;  %v5363_v8 = vadd.f32 %v5362_v1, %v10991_v3 }
 0x4d4   : > { %v6317_v55 = vadd.f32 %v11236_v24, %v6258_v18  ;;  %v6318_v31 = vadd.f32 %v11236_v24, %v6259_v34  ;;  %v5364_v44 = vpop.f32.mrf.mxu1  ;;  %v5603_v37 = vpop.f32.mrf.mxu0  ;;  %v6319_v2 = vadd.f32 %v11236_v24, %v6260_v33 }
 0x4d5   : > { %v6111_v12 = vsel %vm3645_vm2, %v6108_v16, %v6110_v42  ;;  %v5604_v57 = vadd.f32 %v5603_v37, %v5363_v8 }
 0x4d6   : > { %v6369_v52 = vmax.f32 %v6317_v55, 0.0  ;;  %v6370_v9 = vmax.f32 %v6318_v31, 0.0  ;;  %v6261_v0 = vadd.f32 %v6111_v12, %v10597_v10  ;;  %v5367_v63 = vpop.f32.mrf.mxu1  ;;  %v7941_v7 = vpop.f32.mrf.mxu0  ;;  %v6371_v16 = vmax.f32 %v6319_v2, 0.0 }
 0x4d7   : > { %v6112_v58 = vrot.slane %v5604_v57, 2  ;;  %v5368_v41 = vadd.f32 %v5367_v63, %v10996_v4 }
 0x4d8   : > { %v6421_v3 = vpack.c.bf16 %v6370_v9, %v6369_v52  ;;  %v6320_v38 = vadd.f32 %v11236_v24, %v6261_v0  ;;  %v5369_v61 = vpop.f32.mrf.mxu1  ;;  %v5616_v4 = vpop.f32.mrf.mxu0 }
 0x4d9   : > { %v6113_v28 = vsel %vm3645_vm2, %v6110_v42, %v6112_v58  ;;  %v5609_v23 = vadd.f32 %v7937_v62, %v5368_v41 }
 0x4da   : > { %v6372_v43 = vmax.f32 %v6320_v38, 0.0  ;;  %v6262_v33 = vadd.f32 %v6113_v28, %v10607_v53  ;;  %v5370_v18 = vpop.f32.mrf.mxu1  ;;  %6576 = vmatmul.mubr.bf16.vlgmr.msra.gmra.mxu0 %v6421_v3  ;;  %v7942_v12 = vpop.f32.mrf.mxu0 }
 0x4db   : > { %v6114_v34 = vrot.slane %v5609_v23, 2  ;;  %v5371_v10 = vadd.f32 %v5370_v18, %v11001_v26  ;;  %6585 = vmatprep.mubr.bf16.mxu0 %v12339_v11 }
 0x4dc   : > { %v5372_v1 = vpop.f32.mrf.mxu1  ;;  %v6422_v8 = vpack.c.bf16 %v6372_v43, %v6371_v16  ;;  %v6321_v42 = vadd.f32 %v11236_v24, %v6262_v33  ;;  %v5619_v41 = vpop.f32.mrf.mxu0 }
 0x4dd   : > { %v6115_v55 = vsel %vm3645_vm2, %v6112_v58, %v6114_v34  ;;  %v5612_v31 = vadd.f32 %v7938_v36, %v5371_v10 }
 0x4de   : > { %v6263_v62 = vadd.f32 %v6115_v55, %v10612_v5  ;;  %v5375_v44 = vpop.f32.mrf.mxu1  ;;  %v6373_v36 = vmax.f32 %v6321_v42, 0.0  ;;  %v7945_v33 = vpop.f32.mrf.mxu0 }
 0x4df   : > { %v6116_v37 = vrot.slane %v5612_v31, 2  ;;  %v5376_v53 = vadd.f32 %v5375_v44, %v11006_v48 }
 0x4e0   : > { %v5377_v57 = vpop.f32.mrf.mxu1  ;;  %v6322_v26 = vadd.f32 %v11236_v24, %v6263_v62  ;;  %v5632_v42 = vpop.f32.mrf.mxu0 }
 0x4e1   : > { %v6117_v2 = vsel %vm3645_vm2, %v6114_v34, %v6116_v37  ;;  %v5617_v52 = vadd.f32 %v5616_v4, %v5376_v53 }
 0x4e2   : > { %v6264_v9 = vadd.f32 %v6117_v2, %v10625_v25  ;;  %v5378_v0 = vpop.f32.mrf.mxu1  ;;  %6586 = vmatmul.mubr.bf16.gmra.mxu0 %v6422_v8  ;;  %v6374_v63 = vmax.f32 %v6322_v26, 0.0  ;;  %v7946_v2 = vpop.f32.mrf.mxu0 }
 0x4e3   : > { %v6118_v58 = vrot.slane %v5617_v52, 2  ;;  %v5379_v5 = vadd.f32 %v5378_v0, %v11011_v54  ;;  %6595 = vmatprep.mubr.bf16.mxu0 %v12339_v11 }
 0x4e4   : > { %v5380_v48 = vpop.f32.mrf.mxu1  ;;  %v6423_v3 = vpack.c.bf16 %v6374_v63, %v6373_v36  ;;  %v6323_v25 = vadd.f32 %v11236_v24, %v6264_v9 }
 0x4e5   : > { %v6119_v38 = vsel %vm3645_vm2, %v6116_v37, %v6118_v58  ;;  %v5620_v61 = vadd.f32 %v5619_v41, %v5379_v5  ;;  %v5635_v41 = vpop.f32.mrf.mxu0 }
 0x4e6   : > { %v6265_v28 = vadd.f32 %v6119_v38, %v10630_v22  ;;  %v5383_v23 = vpop.f32.mrf.mxu1  ;;  %v6375_v8 = vmax.f32 %v6323_v25, 0.0 }
 0x4e7   : > { %v6120_v16 = vrot.slane %v5620_v61, 2  ;;  %v5384_v43 = vadd.f32 %v5383_v23, %v11016_v45 }
 0x4e8   : > { %v5385_v18 = vpop.f32.mrf.mxu1  ;;  %v6324_v54 = vadd.f32 %v11236_v24, %v6265_v28 }
 0x4e9   : > { %v6121_v34 = vsel %vm3645_vm2, %v6118_v58, %v6120_v16  ;;  %v5625_v10 = vadd.f32 %v7941_v7, %v5384_v43 }
 0x4ea   : > { %v6266_v4 = vadd.f32 %v6121_v34, %v10639_v17  ;;  %v5386_v1 = vpop.f32.mrf.mxu1  ;;  %6596 = vmatmul.mubr.bf16.gmra.mxu0 %v6423_v3  ;;  %v6376_v55 = vmax.f32 %v6324_v54, 0.0 }
 0x4eb   : > { %v6122_v22 = vrot.slane %v5625_v10, 2  ;;  %v5387_v31 = vadd.f32 %v5386_v1, %v11021_v46  ;;  %6605 = vmatprep.mubr.bf16.mxu0 %v12339_v11 }
 0x4ec   : > { %v5388_v45 = vpop.f32.mrf.mxu1  ;;  %v6424_v62 = vpack.c.bf16 %v6376_v55, %v6375_v8  ;;  %v6325_v17 = vadd.f32 %v11236_v24, %v6266_v4 }
 0x4ed   : > { %v6123_v44 = vsel %vm3645_vm2, %v6120_v16, %v6122_v22  ;;  %v5628_v37 = vadd.f32 %v7942_v12, %v5387_v31  ;;  %v7949_v16 = vpop.f32.mrf.mxu0  ;;  %v12924_v45 = vld [vmem:[#allocation4_spill] sm:$0xff] }
 0x4ee   : > { %v6267_v53 = vadd.f32 %v6123_v44, %v10644_v35  ;;  %v5391_v7 = vpop.f32.mrf.mxu1  ;;  %v6377_v12 = vmax.f32 %v6325_v17, 0.0 }
 0x4ef   : > { %v6124_v57 = vrot.slane %v5628_v37, 2  ;;  %v5392_v26 = vadd.f32 %v5391_v7, %v11026_v21  ;;  %v5648_v55 = vpop.f32.mrf.mxu0 }
 0x4f0   : > { %v5393_v52 = vpop.f32.mrf.mxu1  ;;  %v6326_v46 = vadd.f32 %v11236_v24, %v6267_v53 }
 0x4f1   : > { %v6125_v9 = vsel %vm3645_vm2, %v6122_v22, %v6124_v57  ;;  %v5633_v0 = vadd.f32 %v5632_v42, %v5392_v26  ;;  %v7950_v53 = vpop.f32.mrf.mxu0  ;;  %v12925_v26 = vld [vmem:[#allocation2_spill] sm:$0xff] }
 0x4f2   : > { %v6268_v36 = vadd.f32 %v6125_v9, %v10657_v51  ;;  %v5394_v63 = vpop.f32.mrf.mxu1  ;;  %6606 = vmatmul.mubr.bf16.gmra.mxu0 %v6424_v62  ;;  %v6378_v58 = vmax.f32 %v6326_v46, 0.0 }
 0x4f3   : > { %v6126_v35 = vrot.slane %v5633_v0, 2  ;;  %v5395_v5 = vadd.f32 %v5394_v63, %v11031_v39  ;;  %6615 = vmatprep.mubr.bf16.mxu0 %v12339_v11  ;;  %v5651_v63 = vpop.f32.mrf.mxu0 }
 0x4f4   : > { %v5396_v21 = vpop.f32.mrf.mxu1  ;;  %v6425_v48 = vpack.c.bf16 %v6378_v58, %v6377_v12  ;;  %v6327_v51 = vadd.f32 %v11236_v24, %v6268_v36 }
 0x4f5   : > { %v6127_v3 = vsel %vm3645_vm2, %v6124_v57, %v6126_v35  ;;  %v5636_v38 = vadd.f32 %v5635_v41, %v5395_v5  ;;  %v12926_v5 = vld [vmem:[#allocation8_spill] sm:$0xff] }
 0x4f6   : > { %v6269_v61 = vadd.f32 %v6127_v3, %v10666_v13  ;;  %v5399_v28 = vpop.f32.mrf.mxu1  ;;  %v6379_v4 = vmax.f32 %v6327_v51, 0.0 }
 0x4f7   : > { %v6128_v23 = vrot.slane %v5636_v38, 2  ;;  %v5400_v25 = vadd.f32 %v5399_v28, %v11036_v15 }
 0x4f8   : > { %v5401_v43 = vpop.f32.mrf.mxu1  ;;  %v6328_v39 = vadd.f32 %v11236_v24, %v6269_v61  ;;  %v7953_v61 = vpop.f32.mrf.mxu0 }
 0x4f9   : > { %v6129_v18 = vsel %vm3645_vm2, %v6126_v35, %v6128_v23  ;;  %v5641_v54 = vadd.f32 %v7945_v33, %v5400_v25  ;;  %v12927_v25 = vld [vmem:[#allocation28_spill] sm:$0xff] }
 0x4fa   : > { %v6270_v34 = vadd.f32 %v6129_v18, %v10679_v59  ;;  %v5402_v10 = vpop.f32.mrf.mxu1  ;;  %6616 = vmatmul.mubr.bf16.gmra.mxu0 %v6425_v48  ;;  %v6380_v1 = vmax.f32 %v6328_v39, 0.0 }
 0x4fb   : > { %v6130_v13 = vrot.slane %v5641_v54, 2  ;;  %v5403_v8 = vadd.f32 %v5402_v10, %v11041_v30  ;;  %6625 = vmatprep.mubr.bf16.mxu0 %v12339_v11 }
 0x4fc   : > { %v5404_v15 = vpop.f32.mrf.mxu1  ;;  %v6426_v22 = vpack.c.bf16 %v6380_v1, %v6379_v4  ;;  %v6329_v59 = vadd.f32 %v11236_v24, %v6270_v34  ;;  %v5664_v4 = vpop.f32.mrf.mxu0 }
 0x4fd   : > { %v6131_v31 = vsel %vm3645_vm2, %v6128_v23, %v6130_v13  ;;  %v5644_v42 = vadd.f32 %v7946_v2, %v5403_v8 }
 0x4fe   : > { %v6271_v62 = vadd.f32 %v6131_v31, %v12924_v45  ;;  %v5407_v33 = vpop.f32.mrf.mxu1  ;;  %v6381_v2 = vmax.f32 %v6329_v59, 0.0  ;;  %v7954_v45 = vpop.f32.mrf.mxu0 }
 0x4ff   : > { %v6132_v44 = vrot.slane %v5644_v42, 2  ;;  %v5408_v37 = vadd.f32 %v5407_v33, %v11046_v40 }
 0x500   : > { %v5409_v7 = vpop.f32.mrf.mxu1  ;;  %v6330_v30 = vadd.f32 %v11236_v24, %v6271_v62 }
 0x501   : > { %v6133_v17 = vsel %vm3645_vm2, %v6130_v13, %v6132_v44  ;;  %v5649_v57 = vadd.f32 %v5648_v55, %v5408_v37  ;;  %v12928_v55 = vld [vmem:[#allocation6_spill] sm:$0xff] }
 0x502   : > { %v6272_v52 = vadd.f32 %v6133_v17, %v12925_v26  ;;  %v5410_v46 = vpop.f32.mrf.mxu1  ;;  %6626 = vmatmul.mubr.bf16.gmra.mxu0 %v6426_v22  ;;  %v6382_v9 = vmax.f32 %v6330_v30, 0.0  ;;  %v5667_v26 = vpop.f32.mrf.mxu0 }
 0x503   : > { %v6134_v0 = vrot.slane %v5649_v57, 2  ;;  %v5411_v36 = vadd.f32 %v5410_v46, %v11057_v32  ;;  %6635 = vmatprep.mubr.bf16.mxu0 %v12339_v11 }
 0x504   : > { %v5412_v40 = vpop.f32.mrf.mxu1  ;;  %v6427_v12 = vpack.c.bf16 %v6382_v9, %v6381_v2  ;;  %v6331_v48 = vadd.f32 %v11236_v24, %v6272_v52  ;;  %v12930_v9 = vld [vmem:[#allocation12_spill] sm:$0xff] }
 0x505   : > { %v6135_v58 = vsel %vm3645_vm2, %v6132_v44, %v6134_v0  ;;  %v5652_v35 = vadd.f32 %v5651_v63, %v5411_v36  ;;  %v12929_v44 = vld [vmem:[#allocation27_spill] sm:$0xff] }
 0x506   : > { %v6273_v41 = vadd.f32 %v6135_v58, %v12926_v5  ;;  %v5415_v21 = vpop.f32.mrf.mxu1  ;;  %v6383_v18 = vmax.f32 %v6331_v48, 0.0  ;;  %v7957_v58 = vpop.f32.mrf.mxu0 }
 0x507   : > { %v6136_v3 = vrot.slane %v5652_v35, 2  ;;  %v5416_v38 = vadd.f32 %v5415_v21, %v11068_v19 }
 0x508   : > { %v5417_v28 = vpop.f32.mrf.mxu1  ;;  %v6332_v32 = vadd.f32 %v11236_v24, %v6273_v41 }
 0x509   : > { %v6137_v51 = vsel %vm3645_vm2, %v6134_v0, %v6136_v3  ;;  %v5657_v23 = vadd.f32 %v7949_v16, %v5416_v38 }
 0x50a   : > { %v6274_v43 = vadd.f32 %v6137_v51, %v12927_v25  ;;  %v5418_v39 = vpop.f32.mrf.mxu1  ;;  %6636 = vmatmul.mubr.bf16.gmra.mxu0 %v6427_v12  ;;  %v6384_v54 = vmax.f32 %v6332_v32, 0.0  ;;  %v5680_v51 = vpop.f32.mrf.mxu0 }
 0x50b   : > { %v6138_v34 = vrot.slane %v5657_v23, 2  ;;  %v5419_v10 = vadd.f32 %v5418_v39, %v11079_v49  ;;  %6645 = vmatprep.mubr.bf16.mxu0 %v12339_v11  ;;  %v12931_v39 = vld [vmem:[#allocation32_spill] sm:$0xff] }
 0x50c   : > { %v5420_v19 = vpop.f32.mrf.mxu1  ;;  %v6428_v1 = vpack.c.bf16 %v6384_v54, %v6383_v18  ;;  %v6333_v22 = vadd.f32 %v11236_v24, %v6274_v43 }
 0x50d   : > { %v6139_v13 = vsel %vm3645_vm2, %v6136_v3, %v6138_v34  ;;  %v5660_v8 = vadd.f32 %v7950_v53, %v5419_v10  ;;  %v7958_v10 = vpop.f32.mrf.mxu0 }
 0x50e   : > { %v6275_v15 = vadd.f32 %v6139_v13, %v12928_v55  ;;  %v5423_v16 = vpop.f32.mrf.mxu1  ;;  %v6385_v53 = vmax.f32 %v6333_v22, 0.0 }
 0x50f   : > { %v6140_v31 = vrot.slane %v5660_v8, 2  ;;  %v5424_v42 = vadd.f32 %v5423_v16, %v11090_v14 }
 0x510   : > { %v5425_v62 = vpop.f32.mrf.mxu1  ;;  %v6334_v49 = vadd.f32 %v11236_v24, %v6275_v15 }
 0x511   : > { %v6141_v33 = vsel %vm3645_vm2, %v6138_v34, %v6140_v31  ;;  %v5665_v59 = vadd.f32 %v5664_v4, %v5424_v42 }
 0x512   : > { %v6276_v37 = vadd.f32 %v6141_v33, %v12929_v44  ;;  %v5426_v7 = vpop.f32.mrf.mxu1  ;;  %6646 = vmatmul.mubr.bf16.gmra.mxu0 %v6428_v1  ;;  %v6386_v30 = vmax.f32 %v6334_v49, 0.0  ;;  %v12932_v49 = vld [vmem:[#allocation10_spill] sm:$0xff] }
 0x513   : > { %v6142_v17 = vrot.slane %v5665_v59, 2  ;;  %v5427_v57 = vadd.f32 %v5426_v7, %v11101_v20  ;;  %6655 = vmatprep.mubr.bf16.mxu0 %v12339_v11 }
 0x514   : > { %v5428_v14 = vpop.f32.mrf.mxu1  ;;  %v6429_v52 = vpack.c.bf16 %v6386_v30, %v6385_v53  ;;  %v6335_v63 = vadd.f32 %v11236_v24, %v6276_v37 }
 0x515   : > { %v6143_v46 = vsel %vm3645_vm2, %v6140_v31, %v6142_v17  ;;  %v5668_v2 = vadd.f32 %v5667_v26, %v5427_v57  ;;  %v5683_v31 = vpop.f32.mrf.mxu0  ;;  %v12933_v57 = vld [vmem:[#allocation31_spill] sm:$0xff] }
 0x516   : > { %v6277_v0 = vadd.f32 %v6143_v46, %v12930_v9  ;;  %v5431_v36 = vpop.f32.mrf.mxu1  ;;  %v6387_v3 = vmax.f32 %v6335_v63, 0.0  ;;  %v12934_v9 = vld [vmem:[#allocation191_spill] sm:$0xff] }
 0x517   : > { %v6144_v40 = vrot.slane %v5668_v2, 2  ;;  %v5432_v12 = vadd.f32 %v5431_v36, %v11112_v60  ;;  %v7961_v7 = vpop.f32.mrf.mxu0 }
 0x518   : > { %v5433_v35 = vpop.f32.mrf.mxu1  ;;  %v6336_v20 = vadd.f32 %v11236_v24, %v6277_v0 }
 0x519   : > { %v6145_v5 = vsel %vm3645_vm2, %v6142_v17, %v6144_v40  ;;  %v5673_v41 = vadd.f32 %v7953_v61, %v5432_v12  ;;  %v5696_v36 = vpop.f32.mrf.mxu0  ;;  %v12935_v35 = vld [vmem:[#allocation16_spill] sm:$0xff] }
 0x51a   : > { %v6278_v21 = vadd.f32 %v6145_v5, %v10762_v29  ;;  %v5434_v48 = vpop.f32.mrf.mxu1  ;;  %6656 = vmatmul.mubr.bf16.gmra.mxu0 %v6429_v52  ;;  %v6388_v38 = vmax.f32 %v6336_v20, 0.0 }
 0x51b   : > { %v6146_v28 = vrot.slane %v5673_v41, 2  ;;  %v5435_v32 = vadd.f32 %v5434_v48, %v11123_v56  ;;  %6665 = vmatprep.mubr.bf16.mxu0 %v12339_v11 }
 0x51c   : > { %v5436_v60 = vpop.f32.mrf.mxu1  ;;  %v6430_v23 = vpack.c.bf16 %v6388_v38, %v6387_v3  ;;  %v6337_v29 = vadd.f32 %v11236_v24, %v6278_v21  ;;  %v12936_v21 = vld [vmem:[#allocation192_spill] sm:$0xff]  ;;  %v7962_v3 = vpop.f32.mrf.mxu0 }
 0x51d   : > { %v6147_v25 = vsel %vm3645_vm2, %v6144_v40, %v6146_v28  ;;  %v5676_v43 = vadd.f32 %v7954_v45, %v5435_v32  ;;  %v12937_v60 = vld [vmem:[#allocation36_spill] sm:$0xff] }
 0x51e   : > { %v6279_v18 = vadd.f32 %v6147_v25, %v12931_v39  ;;  %v5439_v61 = vpop.f32.mrf.mxu1  ;;  %v6389_v55 = vmax.f32 %v6337_v29, 0.0 }
 0x51f   : > { %v6148_v54 = vrot.slane %v5676_v43, 2  ;;  %v5440_v34 = vadd.f32 %v5439_v61, %v11134_v47  ;;  %v12938_v61 = vld [vmem:[#allocation30_spill] sm:$0xff] }
 0x520   : > { %v5441_v4 = vpop.f32.mrf.mxu1  ;;  %v6338_v56 = vadd.f32 %v11236_v24, %v6279_v18 }
 0x521   : > { %v6149_v19 = vsel %vm3645_vm2, %v6146_v28, %v6148_v54  ;;  %v5681_v1 = vadd.f32 %v5680_v51, %v5440_v34 }
 0x522   : > { %v6280_v13 = vadd.f32 %v6149_v19, %v10776_v27  ;;  %v5442_v8 = vpop.f32.mrf.mxu1  ;;  %6666 = vmatmul.mubr.bf16.gmra.mxu0 %v6430_v23  ;;  %v6390_v15 = vmax.f32 %v6338_v56, 0.0  ;;  %v12939_v19 = vld [vmem:[#allocation14_spill] sm:$0xff] }
 0x523   : > { %v6150_v16 = vrot.slane %v5681_v1, 2  ;;  %v5443_v22 = vadd.f32 %v5442_v8, %v11139_v6  ;;  %6675 = vmatprep.mubr.bf16.mxu0 %v12339_v11 }
 0x524   : > { %v5444_v47 = vpop.f32.mrf.mxu1  ;;  %v6431_v42 = vpack.c.bf16 %v6390_v15, %v6389_v55  ;;  %v6339_v27 = vadd.f32 %v11236_v24, %v6280_v13  ;;  %v12940_v15 = vld [vmem:[#allocation51_spill] sm:$0xff] }
 0x525   : > { %v6151_v45 = vsel %vm3645_vm2, %v6148_v54, %v6150_v16  ;;  %v5684_v62 = vadd.f32 %v5683_v31, %v5443_v22  ;;  %v5699_v54 = vpop.f32.mrf.mxu0 }
 0x526   : > { %v6281_v33 = vadd.f32 %v6151_v45, %v12932_v49  ;;  %v5447_v59 = vpop.f32.mrf.mxu1  ;;  %v6391_v52 = vmax.f32 %v6339_v27, 0.0 }
 0x527   : > { %v6152_v44 = vrot.slane %v5684_v62, 2  ;;  %v5448_v37 = vadd.f32 %v5447_v59, %v11144_v50  ;;  %v7965_v22 = vpop.f32.mrf.mxu0  ;;  %v12941_v62 = vld [vmem:[#allocation35_spill] sm:$0xff] }
 0x528   : > { %v5449_v53 = vpop.f32.mrf.mxu1  ;;  %v6340_v6 = vadd.f32 %v11236_v24, %v6281_v33 }
 0x529   : > { %v6153_v30 = vsel %vm3645_vm2, %v6150_v16, %v6152_v44  ;;  %v5689_v17 = vadd.f32 %v7957_v58, %v5448_v37  ;;  %v12942_v37 = vld [vmem:[#allocation193_spill] sm:$0xff] }
 0x52a   : > { %v6282_v26 = vadd.f32 %v6153_v30, %v12933_v57  ;;  %v5450_v14 = vpop.f32.mrf.mxu1  ;;  %6676 = vmatmul.mubr.bf16.gmra.mxu0 %v6431_v42  ;;  %v6392_v46 = vmax.f32 %v6340_v6, 0.0  ;;  %v5712_v6 = vpop.f32.mrf.mxu0 }
 0x52b   : > { %v6154_v2 = vrot.slane %v5689_v17, 2  ;;  %v5451_v0 = vadd.f32 %v5450_v14, %v12934_v9  ;;  %6685 = vmatprep.mubr.bf16.mxu0 %v12339_v11  ;;  %v12943_v14 = vld [vmem:[#allocation20_spill] sm:$0xff]  ;;  %v12944_v9 = vld [vmem:[#allocation37_spill] sm:$0xff] }
 0x52c   : > { %v5452_v50 = vpop.f32.mrf.mxu1  ;;  %v6432_v63 = vpack.c.bf16 %v6392_v46, %v6391_v52  ;;  %v6341_v5 = vadd.f32 %v11236_v24, %v6282_v26 }
 0x52d   : > { %v6155_v40 = vsel %vm3645_vm2, %v6152_v44, %v6154_v2  ;;  %v5692_v12 = vadd.f32 %v7958_v10, %v5451_v0 }
 0x52e   : > { %v6283_v20 = vadd.f32 %v6155_v40, %v12935_v35  ;;  %v5455_v58 = vpop.f32.mrf.mxu1  ;;  %v6393_v43 = vmax.f32 %v6341_v5, 0.0  ;;  %v12945_v35 = vld [vmem:[#allocation40_spill] sm:$0xff] }
 0x52f   : > { %v6156_v41 = vrot.slane %v5692_v12, 2  ;;  %v5456_v48 = vadd.f32 %v5455_v58, %v12936_v21 }
 0x530   : > { %v5457_v38 = vpop.f32.mrf.mxu1  ;;  %v6342_v28 = vadd.f32 %v11236_v24, %v6283_v20 }
 0x531   : > { %v6157_v32 = vsel %vm3645_vm2, %v6154_v2, %v6156_v41  ;;  %v5697_v51 = vadd.f32 %v5696_v36, %v5456_v48  ;;  %v7966_v36 = vpop.f32.mrf.mxu0  ;;  %v12946_v48 = vld [vmem:[#allocation56_spill] sm:$0xff] }
 0x532   : > { %v6284_v23 = vadd.f32 %v6157_v32, %v12937_v60  ;;  %v5458_v25 = vpop.f32.mrf.mxu1  ;;  %6686 = vmatmul.mubr.bf16.gmra.mxu0 %v6432_v63  ;;  %v6394_v39 = vmax.f32 %v6342_v28, 0.0 }
 0x533   : > { %v6158_v18 = vrot.slane %v5697_v51, 2  ;;  %v5459_v29 = vadd.f32 %v5458_v25, %v12938_v61  ;;  %6695 = vmatprep.mubr.bf16.mxu0 %v12339_v11  ;;  %v5715_v38 = vpop.f32.mrf.mxu0  ;;  %v12948_v61 = vld [vmem:[#allocation194_spill] sm:$0xff] }
 0x534   : > { %v5460_v34 = vpop.f32.mrf.mxu1  ;;  %v6433_v10 = vpack.c.bf16 %v6394_v39, %v6393_v43  ;;  %v6343_v8 = vadd.f32 %v11236_v24, %v6284_v23  ;;  %v12947_v23 = vld [vmem:[#allocation182_spill] sm:$0xff] }
 0x535   : > { %v6159_v4 = vsel %vm3645_vm2, %v6156_v41, %v6158_v18  ;;  %v5700_v56 = vadd.f32 %v5699_v54, %v5459_v29  ;;  %v7969_v54 = vpop.f32.mrf.mxu0 }
 0x536   : > { %v6285_v1 = vadd.f32 %v6159_v4, %v12939_v19  ;;  %v5463_v13 = vpop.f32.mrf.mxu1  ;;  %v6395_v59 = vmax.f32 %v6343_v8, 0.0  ;;  %v12949_v19 = vld [vmem:[#allocation18_spill] sm:$0xff] }
 0x537   : > { %v6160_v55 = vrot.slane %v5700_v56, 2  ;;  %v5464_v16 = vadd.f32 %v5463_v13, %v12940_v15 }
 0x538   : > { %v5465_v31 = vpop.f32.mrf.mxu1  ;;  %v6344_v47 = vadd.f32 %v11236_v24, %v6285_v1 }
 0x539   : > { %v6161_v42 = vsel %vm3645_vm2, %v6158_v18, %v6160_v55  ;;  %v5705_v45 = vadd.f32 %v7961_v7, %v5464_v16  ;;  %v12950_v16 = vld [vmem:[#allocation195_spill] sm:$0xff] }
 0x53a   : > { %v6286_v49 = vadd.f32 %v6161_v42, %v12941_v62  ;;  %v5466_v33 = vpop.f32.mrf.mxu1  ;;  %6696 = vmatmul.mubr.bf16.gmra.mxu0 %v6433_v10  ;;  %v6396_v27 = vmax.f32 %v6344_v47, 0.0  ;;  %v5728_v47 = vpop.f32.mrf.mxu0 }
 0x53b   : > { %v6162_v44 = vrot.slane %v5705_v45, 2  ;;  %v5467_v53 = vadd.f32 %v5466_v33, %v12942_v37  ;;  %6705 = vmatprep.mubr.bf16.mxu0 %v12339_v11  ;;  %v12951_v33 = vld [vmem:[#allocation39_spill] sm:$0xff]  ;;  %v12952_v37 = vld [vmem:[#allocation196_spill] sm:$0xff] }
 0x53c   : > { %v5468_v30 = vpop.f32.mrf.mxu1  ;;  %v6434_v17 = vpack.c.bf16 %v6396_v27, %v6395_v59  ;;  %v6345_v46 = vadd.f32 %v11236_v24, %v6286_v49 }
 0x53d   : > { %v6163_v57 = vsel %vm3645_vm2, %v6160_v55, %v6162_v44  ;;  %v5708_v26 = vadd.f32 %v7962_v3, %v5467_v53 }
 0x53e   : > { %v6287_v52 = vadd.f32 %v6163_v57, %v12943_v14  ;;  %v5471_v7 = vpop.f32.mrf.mxu1  ;;  %v6397_v5 = vmax.f32 %v6345_v46, 0.0  ;;  %v12953_v14 = vld [vmem:[#allocation183_spill] sm:$0xff] }
 0x53f   : > { %v6164_v2 = vrot.slane %v5708_v26, 2  ;;  %v5472_v0 = vadd.f32 %v5471_v7, %v12944_v9 }
 0x540   : > { %v5473_v50 = vpop.f32.mrf.mxu1  ;;  %v6346_v63 = vadd.f32 %v11236_v24, %v6287_v52 }
 0x541   : > { %v6165_v40 = vsel %vm3645_vm2, %v6162_v44, %v6164_v2  ;;  %v5713_v12 = vadd.f32 %v5712_v6, %v5472_v0  ;;  %v7970_v6 = vpop.f32.mrf.mxu0  ;;  %v12954_v0 = vld [vmem:[#allocation34_spill] sm:$0xff] }
 0x542   : > { %v6288_v20 = vadd.f32 %v6165_v40, %v12945_v35  ;;  %v5474_v58 = vpop.f32.mrf.mxu1  ;;  %6706 = vmatmul.mubr.bf16.gmra.mxu0 %v6434_v17  ;;  %v6398_v41 = vmax.f32 %v6346_v63, 0.0 }
 0x543   : > { %v6166_v21 = vrot.slane %v5713_v12, 2  ;;  %v5475_v3 = vadd.f32 %v5474_v58, %v12946_v48  ;;  %6715 = vmatprep.mubr.bf16.mxu0 %v12339_v11  ;;  %v5731_v50 = vpop.f32.mrf.mxu0  ;;  %v12956_v48 = vld [vmem:[#allocation55_spill] sm:$0xff] }
 0x544   : > { %v5476_v28 = vpop.f32.mrf.mxu1  ;;  %v6435_v32 = vpack.c.bf16 %v6398_v41, %v6397_v5  ;;  %v6347_v39 = vadd.f32 %v11236_v24, %v6288_v20  ;;  %v12955_v20 = vld [vmem:[#allocation24_spill] sm:$0xff] }
 0x545   : > { %v6167_v51 = vsel %vm3645_vm2, %v6164_v2, %v6166_v21  ;;  %v5716_v60 = vadd.f32 %v5715_v38, %v5475_v3  ;;  %v7973_v38 = vpop.f32.mrf.mxu0 }
 0x546   : > { %v6289_v25 = vadd.f32 %v6167_v51, %v12947_v23  ;;  %v5479_v43 = vpop.f32.mrf.mxu1  ;;  %v6399_v8 = vmax.f32 %v6347_v39, 0.0  ;;  %v12957_v23 = vld [vmem:[#allocation44_spill] sm:$0xff] }
 0x547   : > { %v6168_v18 = vrot.slane %v5716_v60, 2  ;;  %v5480_v29 = vadd.f32 %v5479_v43, %v12948_v61 }
 0x548   : > { %v5481_v34 = vpop.f32.mrf.mxu1  ;;  %v6348_v10 = vadd.f32 %v11236_v24, %v6289_v25 }
 0x549   : > { %v6169_v4 = vsel %vm3645_vm2, %v6166_v21, %v6168_v18  ;;  %v5721_v56 = vadd.f32 %v7965_v22, %v5480_v29  ;;  %v12958_v29 = vld [vmem:[#allocation197_spill] sm:$0xff] }
 0x54a   : > { %v6290_v1 = vadd.f32 %v6169_v4, %v12949_v19  ;;  %v5482_v13 = vpop.f32.mrf.mxu1  ;;  %6716 = vmatmul.mubr.bf16.gmra.mxu0 %v6435_v32  ;;  %v6400_v55 = vmax.f32 %v6348_v10, 0.0  ;;  %v5744_v10 = vpop.f32.mrf.mxu0 }
 0x54b   : > { %v6170_v15 = vrot.slane %v5721_v56, 2  ;;  %v5483_v31 = vadd.f32 %v5482_v13, %v12950_v16  ;;  %6725 = vmatprep.mubr.bf16.mxu0 %v12339_v11  ;;  %v12959_v13 = vld [vmem:[#allocation184_spill] sm:$0xff]  ;;  %v12960_v16 = vld [vmem:[#allocation41_spill] sm:$0xff] }
 0x54c   : > { %v5484_v42 = vpop.f32.mrf.mxu1  ;;  %v6436_v45 = vpack.c.bf16 %v6400_v55, %v6399_v8  ;;  %v6349_v27 = vadd.f32 %v11236_v24, %v6290_v1 }
 0x54d   : > { %v6171_v62 = vsel %vm3645_vm2, %v6168_v18, %v6170_v15  ;;  %v5724_v49 = vadd.f32 %v7966_v36, %v5483_v31 }
 0x54e   : > { %v6291_v59 = vadd.f32 %v6171_v62, %v12951_v33  ;;  %v5487_v22 = vpop.f32.mrf.mxu1  ;;  %v6401_v46 = vmax.f32 %v6349_v27, 0.0  ;;  %v12961_v33 = vld [vmem:[#allocation185_spill] sm:$0xff] }
 0x54f   : > { %v6172_v44 = vrot.slane %v5724_v49, 2  ;;  %v5488_v53 = vadd.f32 %v5487_v22, %v12952_v37 }
 0x550   : > { %v5489_v30 = vpop.f32.mrf.mxu1  ;;  %v6350_v17 = vadd.f32 %v11236_v24, %v6291_v59 }
 0x551   : > { %v6173_v57 = vsel %vm3645_vm2, %v6170_v15, %v6172_v44  ;;  %v5729_v26 = vadd.f32 %v5728_v47, %v5488_v53  ;;  %v7974_v47 = vpop.f32.mrf.mxu0  ;;  %v12962_v53 = vld [vmem:[#allocation60_spill] sm:$0xff] }
 0x552   : > { %v6292_v52 = vadd.f32 %v6173_v57, %v12953_v14  ;;  %v5490_v7 = vpop.f32.mrf.mxu1  ;;  %6726 = vmatmul.mubr.bf16.gmra.mxu0 %v6436_v45  ;;  %v6402_v2 = vmax.f32 %v6350_v17, 0.0 }
 0x553   : > { %v6174_v9 = vrot.slane %v5729_v26, 2  ;;  %v5491_v36 = vadd.f32 %v5490_v7, %v12954_v0  ;;  %6735 = vmatprep.mubr.bf16.mxu0 %v12339_v11  ;;  %v5747_v30 = vpop.f32.mrf.mxu0  ;;  %v12964_v0 = vld [vmem:[#allocation198_spill] sm:$0xff] }
 0x554   : > { %v5492_v63 = vpop.f32.mrf.mxu1  ;;  %v6437_v40 = vpack.c.bf16 %v6402_v2, %v6401_v46  ;;  %v6351_v41 = vadd.f32 %v11236_v24, %v6292_v52  ;;  %v12963_v52 = vld [vmem:[#allocation22_spill] sm:$0xff] }
 0x555   : > { %v6175_v12 = vsel %vm3645_vm2, %v6172_v44, %v6174_v9  ;;  %v5732_v35 = vadd.f32 %v5731_v50, %v5491_v36  ;;  %v7977_v50 = vpop.f32.mrf.mxu0 }
 0x556   : > { %v6293_v58 = vadd.f32 %v6175_v12, %v12955_v20  ;;  %v5495_v5 = vpop.f32.mrf.mxu1  ;;  %v6403_v39 = vmax.f32 %v6351_v41, 0.0  ;;  %v12965_v20 = vld [vmem:[#allocation43_spill] sm:$0xff] }
 0x557   : > { %v6176_v21 = vrot.slane %v5732_v35, 2  ;;  %v5496_v3 = vadd.f32 %v5495_v5, %v12956_v48 }
 0x558   : > { %v5497_v28 = vpop.f32.mrf.mxu1  ;;  %v6352_v32 = vadd.f32 %v11236_v24, %v6293_v58 }
 0x559   : > { %v6177_v51 = vsel %vm3645_vm2, %v6174_v9, %v6176_v21  ;;  %v5737_v60 = vadd.f32 %v7969_v54, %v5496_v3  ;;  %v12966_v3 = vld [vmem:[#allocation199_spill] sm:$0xff] }
 0x55a   : > { %v6294_v25 = vadd.f32 %v6177_v51, %v12957_v23  ;;  %v5498_v43 = vpop.f32.mrf.mxu1  ;;  %6736 = vmatmul.mubr.bf16.gmra.mxu0 %v6437_v40  ;;  %v6404_v18 = vmax.f32 %v6352_v32, 0.0  ;;  %v5760_v32 = vpop.f32.mrf.mxu0 }
 0x55b   : > { %v6178_v61 = vrot.slane %v5737_v60, 2  ;;  %v5499_v34 = vadd.f32 %v5498_v43, %v12958_v29  ;;  %6745 = vmatprep.mubr.bf16.mxu0 %v12339_v11  ;;  %v12967_v43 = vld [vmem:[#allocation186_spill] sm:$0xff]  ;;  %v12968_v29 = vld [vmem:[#allocation200_spill] sm:$0xff] }
 0x55c   : > { %v5500_v4 = vpop.f32.mrf.mxu1  ;;  %v6438_v56 = vpack.c.bf16 %v6404_v18, %v6403_v39  ;;  %v6353_v55 = vadd.f32 %v11236_v24, %v6294_v25 }
 0x55d   : > { %v6179_v19 = vsel %vm3645_vm2, %v6176_v21, %v6178_v61  ;;  %v5740_v1 = vadd.f32 %v7970_v6, %v5499_v34 }
 0x55e   : > { %v6295_v8 = vadd.f32 %v6179_v19, %v12959_v13  ;;  %v5503_v54 = vpop.f32.mrf.mxu1  ;;  %v6405_v27 = vmax.f32 %v6353_v55, 0.0  ;;  %v12969_v13 = vld [vmem:[#allocation29_spill] sm:$0xff] }
 0x55f   : > { %v6180_v15 = vrot.slane %v5740_v1, 2  ;;  %v5504_v31 = vadd.f32 %v5503_v54, %v12960_v16 }
 0x560   : > { %v5505_v42 = vpop.f32.mrf.mxu1  ;;  %v6354_v45 = vadd.f32 %v11236_v24, %v6295_v8 }
 0x561   : > { %v6181_v62 = vsel %vm3645_vm2, %v6178_v61, %v6180_v15  ;;  %v5745_v49 = vadd.f32 %v5744_v10, %v5504_v31  ;;  %v7978_v10 = vpop.f32.mrf.mxu0  ;;  %v12970_v31 = vld [vmem:[#allocation38_spill] sm:$0xff] }
 0x562   : > { %v6296_v59 = vadd.f32 %v6181_v62, %v12961_v33  ;;  %v5506_v22 = vpop.f32.mrf.mxu1  ;;  %6746 = vmatmul.mubr.bf16.gmra.mxu0 %v6438_v56  ;;  %v6406_v44 = vmax.f32 %v6354_v45, 0.0 }
 0x563   : > { %v6182_v37 = vrot.slane %v5745_v49, 2  ;;  %v5507_v6 = vadd.f32 %v5506_v22, %v12962_v53  ;;  %6755 = vmatprep.mubr.bf16.mxu0 %v12339_v11  ;;  %v5763_v42 = vpop.f32.mrf.mxu0  ;;  %v12972_v53 = vld [vmem:[#allocation59_spill] sm:$0xff] }
 0x564   : > { %v5508_v17 = vpop.f32.mrf.mxu1  ;;  %v6439_v57 = vpack.c.bf16 %v6406_v44, %v6405_v27  ;;  %v6355_v2 = vadd.f32 %v11236_v24, %v6296_v59  ;;  %v12971_v59 = vld [vmem:[#allocation48_spill] sm:$0xff] }
 0x565   : > { %v6183_v26 = vsel %vm3645_vm2, %v6180_v15, %v6182_v37  ;;  %v5748_v14 = vadd.f32 %v5747_v30, %v5507_v6  ;;  %v7981_v30 = vpop.f32.mrf.mxu0 }
 0x566   : > { %v6297_v7 = vadd.f32 %v6183_v26, %v12963_v52  ;;  %v5511_v46 = vpop.f32.mrf.mxu1  ;;  %v6407_v41 = vmax.f32 %v6355_v2, 0.0  ;;  %v12973_v52 = vld [vmem:[#allocation187_spill] sm:$0xff] }
 0x567   : > { %v6184_v9 = vrot.slane %v5748_v14, 2  ;;  %v5512_v36 = vadd.f32 %v5511_v46, %v12964_v0 }
 0x568   : > { %v5513_v63 = vpop.f32.mrf.mxu1  ;;  %v6356_v40 = vadd.f32 %v11236_v24, %v6297_v7 }
 0x569   : > { %v6185_v12 = vsel %vm3645_vm2, %v6182_v37, %v6184_v9  ;;  %v5753_v35 = vadd.f32 %v7973_v38, %v5512_v36  ;;  %v12974_v36 = vld [vmem:[#allocation201_spill] sm:$0xff] }
 0x56a   : > { %v6298_v58 = vadd.f32 %v6185_v12, %v12965_v20  ;;  %v5514_v5 = vpop.f32.mrf.mxu1  ;;  %6756 = vmatmul.mubr.bf16.gmra.mxu0 %v6439_v57  ;;  %v6408_v21 = vmax.f32 %v6356_v40, 0.0  ;;  %v5776_v40 = vpop.f32.mrf.mxu0 }
 0x56b   : > { %v6186_v48 = vrot.slane %v5753_v35, 2  ;;  %v5515_v28 = vadd.f32 %v5514_v5, %v12966_v3  ;;  %6765 = vmatprep.mubr.bf16.mxu0 %v12339_v11  ;;  %v12975_v5 = vld [vmem:[#allocation188_spill] sm:$0xff]  ;;  %v12976_v3 = vld [vmem:[#allocation45_spill] sm:$0xff] }
 0x56c   : > { %v5516_v51 = vpop.f32.mrf.mxu1  ;;  %v6440_v60 = vpack.c.bf16 %v6408_v21, %v6407_v41  ;;  %v6357_v18 = vadd.f32 %v11236_v24, %v6298_v58 }
 0x56d   : > { %v6187_v23 = vsel %vm3645_vm2, %v6184_v9, %v6186_v48  ;;  %v5756_v25 = vadd.f32 %v7974_v47, %v5515_v28 }
 0x56e   : > { %v6299_v39 = vadd.f32 %v6187_v23, %v12967_v43  ;;  %v5519_v38 = vpop.f32.mrf.mxu1  ;;  %v6409_v55 = vmax.f32 %v6357_v18, 0.0  ;;  %v12977_v43 = vld [vmem:[#allocation26_spill] sm:$0xff] }
 0x56f   : > { %v6188_v61 = vrot.slane %v5756_v25, 2  ;;  %v5520_v34 = vadd.f32 %v5519_v38, %v12968_v29 }
 0x570   : > { %v5521_v4 = vpop.f32.mrf.mxu1  ;;  %v6358_v56 = vadd.f32 %v11236_v24, %v6299_v39 }
 0x571   : > { %v6189_v19 = vsel %vm3645_vm2, %v6186_v48, %v6188_v61  ;;  %v5761_v1 = vadd.f32 %v5760_v32, %v5520_v34  ;;  %v7982_v32 = vpop.f32.mrf.mxu0  ;;  %v12978_v34 = vld [vmem:[#allocation64_spill] sm:$0xff] }
 0x572   : > { %v6300_v8 = vadd.f32 %v6189_v19, %v12969_v13  ;;  %v5522_v54 = vpop.f32.mrf.mxu1  ;;  %6766 = vmatmul.mubr.bf16.gmra.mxu0 %v6440_v60  ;;  %v6410_v15 = vmax.f32 %v6358_v56, 0.0  ;;  %v12979_v13 = vld [vmem:[#allocation47_spill] sm:$0xff] }
 0x573   : > { %v6190_v16 = vrot.slane %v5761_v1, 2  ;;  %v5523_v47 = vadd.f32 %v5522_v54, %v12970_v31  ;;  %6775 = vmatprep.mubr.bf16.mxu0 %v12339_v11  ;;  %v5779_v4 = vpop.f32.mrf.mxu0  ;;  %v12980_v31 = vld [vmem:[#allocation202_spill] sm:$0xff] }
 0x574   : > { %v5524_v45 = vpop.f32.mrf.mxu1  ;;  %v6441_v62 = vpack.c.bf16 %v6410_v15, %v6409_v55  ;;  %v6359_v44 = vadd.f32 %v11236_v24, %v6300_v8  ;;  %v8344_v55 = vld [vmem:[%s12112_s4] ss:$0 sm:$0xff] }
 0x575   : > { %v6191_v49 = vsel %vm3645_vm2, %v6188_v61, %v6190_v16  ;;  %v5764_v33 = vadd.f32 %v5763_v42, %v5523_v47 }
 0x576   : > { %v6301_v22 = vadd.f32 %v6191_v49, %v12971_v59  ;;  %v5527_v27 = vpop.f32.mrf.mxu1  ;;  %v6411_v2 = vmax.f32 %v6359_v44, 0.0 }
 0x577   : > { %v6192_v37 = vrot.slane %v5764_v33, 2  ;;  %v5528_v6 = vadd.f32 %v5527_v27, %v12972_v53  ;;  %v12981_v33 = vld [vmem:[#allocation189_spill] sm:$0xff]  ;;  %v12982_v53 = vld [vmem:[#allocation203_spill] sm:$0xff] }
 0x578   : > { %v5529_v17 = vpop.f32.mrf.mxu1  ;;  %v6360_v57 = vadd.f32 %v11236_v24, %v6301_v22 }
 0x579   : > { %v6193_v26 = vsel %vm3645_vm2, %v6190_v16, %v6192_v37  ;;  %v5769_v14 = vadd.f32 %v7977_v50, %v5528_v6 }
 0x57a   : > { %v6302_v7 = vadd.f32 %v6193_v26, %v12973_v52  ;;  %v5530_v46 = vpop.f32.mrf.mxu1  ;;  %6776 = vmatmul.mubr.bf16.gmra.mxu0 %v6441_v62  ;;  %v6412_v9 = vmax.f32 %v6360_v57, 0.0  ;;  %v12983_v52 = vld [vmem:[#allocation33_spill] sm:$0xff] }
 0x57b   : > { %v6194_v0 = vrot.slane %v5769_v14, 2  ;;  %v5531_v63 = vadd.f32 %v5530_v46, %v12974_v36  ;;  %6785 = vmatprep.mubr.bf16.mxu0 %v12339_v11 }
 0x57c   : > { %v5532_v12 = vpop.f32.mrf.mxu1  ;;  %v6442_v35 = vpack.c.bf16 %v6412_v9, %v6411_v2  ;;  %v6361_v21 = vadd.f32 %v11236_v24, %v6302_v7 }
 0x57d   : > { %v6195_v20 = vsel %vm3645_vm2, %v6192_v37, %v6194_v0  ;;  %v5772_v58 = vadd.f32 %v7978_v10, %v5531_v63  ;;  %v12985_v63 = vld [vmem:[#allocation190_spill] sm:$0xff] }
 0x57e   : > { %v6303_v41 = vadd.f32 %v6195_v20, %v12975_v5  ;;  %v5535_v50 = vpop.f32.mrf.mxu1  ;;  %v6413_v18 = vmax.f32 %v6361_v21, 0.0 }
 0x57f   : > { %v6196_v48 = vrot.slane %v5772_v58, 2  ;;  %v5536_v28 = vadd.f32 %v5535_v50, %v12976_v3 }
 0x580   : > { %v5537_v51 = vpop.f32.mrf.mxu1  ;;  %v6362_v60 = vadd.f32 %v11236_v24, %v6303_v41 }
 0x581   : > { %v6197_v23 = vsel %vm3645_vm2, %v6194_v0, %v6196_v48  ;;  %v5777_v25 = vadd.f32 %v5776_v40, %v5536_v28  ;;  %v12984_v0 = vld [vmem:[#allocation52_spill] sm:$0xff] }
 0x582   : > { %v6304_v39 = vadd.f32 %v6197_v23, %v12977_v43  ;;  %v5538_v38 = vpop.f32.mrf.mxu1  ;;  %6786 = vmatmul.mubr.bf16.gmra.mxu0 %v6442_v35  ;;  %v6414_v61 = vmax.f32 %v6362_v60, 0.0 }
 0x583   : > { %v6198_v29 = vrot.slane %v5777_v25, 2  ;;  %v5539_v10 = vadd.f32 %v5538_v38, %v12978_v34  ;;  %6795 = vmatprep.mubr.bf16.mxu0 %v12339_v11 }
 0x584   : > { %v5540_v56 = vpop.f32.mrf.mxu1  ;;  %v6443_v19 = vpack.c.bf16 %v6414_v61, %v6413_v18  ;;  %v6363_v15 = vadd.f32 %v8344_v55, %v6304_v39 }
 0x585   : > { %v6199_v1 = vsel %vm3645_vm2, %v6196_v48, %v6198_v29  ;;  %v5780_v24 = vadd.f32 %v5779_v4, %v5539_v10 }
 0x586   : > { %v6305_v8 = vadd.f32 %v6199_v1, %v12979_v13  ;;  %v5543_v54 = vpop.f32.mrf.mxu1  ;;  %v6415_v27 = vmax.f32 %v6363_v15, 0.0 }
 0x587   : > { %v6200_v16 = vrot.slane %v5780_v24, 2  ;;  %v5544_v47 = vadd.f32 %v5543_v54, %v12980_v31 }
 0x588   : > { %v5545_v42 = vpop.f32.mrf.mxu1  ;;  %v6364_v45 = vadd.f32 %v8344_v55, %v6305_v8 }
 0x589   : > { %v6201_v62 = vsel %vm3645_vm2, %v6198_v29, %v6200_v16  ;;  %v5785_v49 = vadd.f32 %v7981_v30, %v5544_v47 }
 0x58a   : > { %v6306_v59 = vadd.f32 %v6201_v62, %v12981_v33  ;;  %v5546_v22 = vpop.f32.mrf.mxu1  ;;  %6796 = vmatmul.mubr.bf16.gmra.mxu0 %v6443_v19  ;;  %v6416_v44 = vmax.f32 %v6364_v45, 0.0  ;;  %v6867_v45 = vld [vmem:[%s12114_s6 + $0xf8] sm:$0xff]  ;;  %v6866_v62 = vld [vmem:[%s12114_s6 + $0xf0] sm:$0xff] }
 0x58b   : > { %v6202_v37 = vrot.slane %v5785_v49, 2  ;;  %v5547_v6 = vadd.f32 %v5546_v22, %v12982_v53  ;;  %6805 = vmatprep.mubr.bf16.mxu0 %v12339_v11  ;;  %v6865_v49 = vld [vmem:[%s12114_s6 + $0xe8] sm:$0xff] }
 0x58c   : > { %v5548_v17 = vpop.f32.mrf.mxu1  ;;  %v6444_v57 = vpack.c.bf16 %v6416_v44, %v6415_v27  ;;  %v6365_v46 = vadd.f32 %v8344_v55, %v6306_v59  ;;  %v6864_v59 = vld [vmem:[%s12114_s6 + $0xe0] sm:$0xff]  ;;  %v7045_v27 = vld [vmem:[%s12116_s8 + $0x8] sm:$0xff]  ;;  %v6863_v44 = vld [vmem:[%s12114_s6 + $0xd8] sm:$0xff] }
 0x58d   : > { %v6203_v26 = vsel %vm3645_vm2, %v6200_v16, %v6202_v37  ;;  %v5788_v14 = vadd.f32 %v7982_v32, %v5547_v6  ;;  %7129 = vmatprep.mubr.f32.mxu1 %v7045_v27  ;;  %v6862_v6 = vld [vmem:[%s12114_s6 + $0xd0] sm:$0xff] }
 0x58e   : > { %v6307_v7 = vadd.f32 %v6203_v26, %v12983_v52  ;;  %v6417_v12 = vmax.f32 %v6365_v46, 0.0  ;;  %v6860_v52 = vld [vmem:[%s12114_s6 + $0xc0] sm:$0xff]  ;;  %v6859_v46 = vld [vmem:[%s12114_s6 + $0xb8] sm:$0xff] }
 0x58f   : > { %v6204_v30 = vrot.slane %v5788_v14, 2 }
 0x590   : > { %v6366_v2 = vadd.f32 %v8344_v55, %v6307_v7 }
 0x591   : > { %v6205_v9 = vsel %vm3645_vm2, %v6202_v37, %v6204_v30  ;;  %v6309_v36 = vadd.f32 %v6204_v30, %v12984_v0 }
 0x592   : > { %v6308_v40 = vadd.f32 %v6205_v9, %v12985_v63  ;;  %6806 = vmatmul.mubr.bf16.gmra.mxu0 %v6444_v57  ;;  %v6418_v35 = vmax.f32 %v6366_v2, 0.0  ;;  %v6861_v57 = vld [vmem:[%s12114_s6 + $0xc8] sm:$0xff]  ;;  %v6858_v9 = vld [vmem:[%s12114_s6 + $0xb0] sm:$0xff] }
 0x593   : > { %v6368_v20 = vadd.f32 %v8344_v55, %v6309_v36  ;;  %6815 = vmatprep.mubr.bf16.mxu0 %v12339_v11  ;;  %v6857_v36 = vld [vmem:[%s12114_s6 + $0xa8] sm:$0xff] }
 0x594   : > { %v6445_v58 = vpack.c.bf16 %v6418_v35, %v6417_v12  ;;  %v6367_v5 = vadd.f32 %v8344_v55, %v6308_v40  ;;  %v6856_v12 = vld [vmem:[%s12114_s6 + $0xa0] sm:$0xff] }
 0x595   : > { %v6420_v41 = vmax.f32 %v6368_v20, 0.0  ;;  %v6855_v20 = vld [vmem:[%s12114_s6 + $0x98] sm:$0xff] }
 0x596   : > { %v6419_v50 = vmax.f32 %v6367_v5, 0.0 }
 0x598   : > { %v6446_v21 = vpack.c.bf16 %v6420_v41, %v6419_v50  ;;  %v6854_v41 = vld [vmem:[%s12114_s6 + $0x90] sm:$0xff] }
 0x59a   : > { %v11460_v48 = vpop.f32.mrf.mxu0  ;;  %6816 = vmatmul.mubr.bf16.gmra.mxu0 %v6445_v58 }
 0x59b   : > { %6825 = vmatprep.mubr.bf16.mxu0 %v12339_v11 }
 0x59c   : > { %v11463_v3 = vpop.f32.mrf.mxu0 }
 0x59e   : > { %v11465_v28 = vpop.f32.mrf.mxu0 }
 0x5a0   : > { %v11467_v32 = vpop.f32.mrf.mxu0 }
 0x5a2   : > { %v11469_v51 = vpop.f32.mrf.mxu0  ;;  %6826 = vmatmul.mubr.bf16.gmra.mxu0 %v6446_v21  ;;  %v6853_v21 = vld [vmem:[%s12114_s6 + $0x88] sm:$0xff] }
 0x5a4   : > { %v11471_v60 = vpop.f32.mrf.mxu0 }
 0x5a6   : > { %v11473_v23 = vpop.f32.mrf.mxu0 }
 0x5a8   : > { %v11475_v25 = vpop.f32.mrf.mxu0 }
 0x5aa   : > { %v11477_v43 = vpop.f32.mrf.mxu0 }
 0x5ac   : > { %v11479_v39 = vpop.f32.mrf.mxu0 }
 0x5ae   : > { %v11481_v11 = vpop.f32.mrf.mxu0 }
 0x5b0   : > { %v11483_v38 = vpop.f32.mrf.mxu0 }
 0x5b2   : > { %v11485_v18 = vpop.f32.mrf.mxu0 }
 0x5b4   : > { %v11487_v61 = vpop.f32.mrf.mxu0 }
 0x5b6   : > { %v11489_v29 = vpop.f32.mrf.mxu0 }
 0x5b8   : > { %v11491_v34 = vpop.f32.mrf.mxu0 }
 0x5ba   : > { %v11493_v10 = vpop.f32.mrf.mxu0 }
 0x5bc   : > { %v11495_v4 = vpop.f32.mrf.mxu0 }
 0x5be   : > { %v11497_v56 = vpop.f32.mrf.mxu0 }
 0x5c0   : > { %v6623_v19 = vpop.f32.mrf.mxu0 }
 0x5c2   : > { %v6627_v1 = vpop.f32.mrf.mxu0 }
 0x5c4   : > { %v6629_v24 = vpop.f32.mrf.mxu0 }
 0x5c5   : > { %v6961_v50 = vmul.f32 %v6857_v36, %v6629_v24  ;;  %v6958_v24 = vmul.f32 %v6854_v41, %v11497_v56  ;;  %v6848_v56 = vld [vmem:[%s12114_s6 + $0x60] sm:$0xff] }
 0x5c6   : > { %v6631_v13 = vpop.f32.mrf.mxu0 }
 0x5c7   : > { %v6962_v58 = vmul.f32 %v6858_v9, %v6631_v13  ;;  %v6852_v13 = vld [vmem:[%s12114_s6 + $0x80] sm:$0xff] }
 0x5c8   : > { %v6633_v8 = vpop.f32.mrf.mxu0 }
 0x5c9   : > { %v6963_v35 = vmul.f32 %v6859_v46, %v6633_v8  ;;  %v6960_v8 = vmul.f32 %v6856_v12, %v6627_v1  ;;  %v6850_v1 = vld [vmem:[%s12114_s6 + $0x70] sm:$0xff] }
 0x5ca   : > { %v6637_v54 = vpop.f32.mrf.mxu0 }
 0x5cb   : > { %v6964_v63 = vmul.f32 %v6860_v52, %v6637_v54 }
 0x5cc   : > { %v6639_v55 = vpop.f32.mrf.mxu0 }
 0x5cd   : > { %v6965_v0 = vmul.f32 %v6861_v57, %v6639_v55  ;;  %v6959_v55 = vmul.f32 %v6855_v20, %v6623_v19  ;;  %v6849_v19 = vld [vmem:[%s12114_s6 + $0x68] sm:$0xff] }
 0x5ce   : > { %v6641_v15 = vpop.f32.mrf.mxu0 }
 0x5cf   : > { %v6966_v30 = vmul.f32 %v6862_v6, %v6641_v15  ;;  %v6851_v15 = vld [vmem:[%s12114_s6 + $0x78] sm:$0xff] }
 0x5d0   : > { %v6643_v16 = vpop.f32.mrf.mxu0 }
 0x5d1   : > { %v6967_v7 = vmul.f32 %v6863_v44, %v6643_v16 }
 0x5d2   : > { %v6647_v31 = vpop.f32.mrf.mxu0 }
 0x5d3   : > { %v6968_v26 = vmul.f32 %v6864_v59, %v6647_v31  ;;  %v6957_v31 = vmul.f32 %v6853_v21, %v11495_v4  ;;  %v6847_v4 = vld [vmem:[%s12114_s6 + $0x58] sm:$0xff]  ;;  %v6952_v59 = vmul.f32 %v6848_v56, %v11485_v18  ;;  %v6842_v18 = vld [vmem:[%s12114_s6 + $0x30] sm:$0xff]  ;;  %v6896_v56 = vld [vmem:[%s12114_s6 + $0x1e0] sm:$0xff] }
 0x5d4   : > { %v6649_v47 = vpop.f32.mrf.mxu0  ;;  %v6951_v27 = vmul.f32 %v6847_v4, %v11483_v38  ;;  %v6841_v38 = vld [vmem:[%s12114_s6 + $0x28] sm:$0xff]  ;;  %v6946_v52 = vmul.f32 %v6842_v18, %v11473_v23  ;;  %v6836_v23 = vld [vmem:[%s12114_s6] sm:$0xff]  ;;  %v6895_v4 = vld [vmem:[%s12114_s6 + $0x1d8] sm:$0xff] }
 0x5d5   : > { %v6969_v17 = vmul.f32 %v6865_v49, %v6649_v47  ;;  %v6956_v47 = vmul.f32 %v6852_v13, %v11493_v10  ;;  %v6846_v10 = vld [vmem:[%s12114_s6 + $0x50] sm:$0xff]  ;;  %v6945_v46 = vmul.f32 %v6841_v38, %v11471_v60  ;;  %v6891_v18 = vld [vmem:[%s12114_s6 + $0x1b8] sm:$0xff] }
 0x5d6   : > { %v6651_v42 = vpop.f32.mrf.mxu0  ;;  %v6950_v44 = vmul.f32 %v6846_v10, %v11481_v11  ;;  %v6840_v11 = vld [vmem:[%s12114_s6 + $0x20] sm:$0xff] }
 0x5d7   : > { %v6970_v37 = vmul.f32 %v6866_v62, %v6651_v42  ;;  %v6954_v62 = vmul.f32 %v6850_v1, %v11489_v29  ;;  %v6844_v29 = vld [vmem:[%s12114_s6 + $0x40] sm:$0xff]  ;;  %v6899_v1 = vld [vmem:[%s12114_s6 + $0x1f8] sm:$0xff] }
 0x5d8   : > { %v6653_v33 = vpop.f32.mrf.mxu0 }
 0x5d9   : > { %v6971_v22 = vmul.f32 %v6867_v45, %v6653_v33  ;;  %v6955_v45 = vmul.f32 %v6851_v15, %v11491_v34  ;;  %v6953_v33 = vmul.f32 %v6849_v19, %v11487_v61  ;;  %v6845_v34 = vld [vmem:[%s12114_s6 + $0x48] sm:$0xff]  ;;  %v6843_v61 = vld [vmem:[%s12114_s6 + $0x38] sm:$0xff] }
 0x5da   : > { %v11517_v53 = vpop.f32.mrf.mxu0  ;;  %v6949_v6 = vmul.f32 %v6845_v34, %v11479_v39  ;;  %v6839_v39 = vld [vmem:[%s12114_s6 + $0x18] sm:$0xff]  ;;  %v6897_v19 = vld [vmem:[%s12114_s6 + $0x1e8] sm:$0xff] }
 0x5db   : > { %7065 = vmatprep.subr.mxu1 %v6971_v22 }
 0x5dc   : > { %v11525_v14 = vpop.f32.mrf.mxu0  ;;  %7066 = vmatpush1.msra.mxu1 %v6970_v37 }
 0x5dd   : > { %7067 = vmatprep.subr.mxu1 %v6969_v17  ;;  %v6948_v17 = vmul.f32 %v6844_v29, %v11477_v43  ;;  %v6838_v43 = vld [vmem:[%s12114_s6 + $0x10] sm:$0xff] }
 0x5de   : > { %v11533_v2 = vpop.f32.mrf.mxu0  ;;  %7068 = vmatpush1.msra.mxu1 %v6968_v26  ;;  %v6947_v26 = vmul.f32 %v6843_v61, %v11475_v25  ;;  %v6837_v25 = vld [vmem:[%s12114_s6 + $0x8] sm:$0xff]  ;;  %v6942_v36 = vmul.f32 %v6838_v43, %v11465_v28  ;;  %v6892_v61 = vld [vmem:[%s12114_s6 + $0x1c0] sm:$0xff] }
 0x5df   : > { %7069 = vmatprep.subr.mxu1 %v6967_v7  ;;  %v6888_v43 = vld [vmem:[%s12114_s6 + $0x1a0] sm:$0xff] }
 0x5e0   : > { %v11541_v40 = vpop.f32.mrf.mxu0  ;;  %7070 = vmatpush1.msra.mxu1 %v6966_v30  ;;  %v6944_v30 = vmul.f32 %v6840_v11, %v11469_v51  ;;  %v6940_v51 = vmul.f32 %v6836_v23, %v11460_v48 }
 0x5e1   : > { %7071 = vmatprep.subr.mxu1 %v6965_v0  ;;  %v6943_v0 = vmul.f32 %v6839_v39, %v11467_v32 }
 0x5e2   : > { %v11549_v5 = vpop.f32.mrf.mxu0  ;;  %7072 = vmatpush1.msra.mxu1 %v6964_v63  ;;  %v6941_v63 = vmul.f32 %v6837_v25, %v11463_v3  ;;  %v6887_v25 = vld [vmem:[%s12114_s6 + $0x198] sm:$0xff] }
 0x5e3   : > { %7073 = vmatprep.subr.mxu1 %v6963_v35 }
 0x5e4   : > { %v11557_v54 = vpop.f32.mrf.mxu0  ;;  %7074 = vmatpush1.msra.mxu1 %v6962_v58 }
 0x5e5   : > { %7075 = vmatprep.subr.mxu1 %v6961_v50 }
 0x5e6   : > { %v11566_v16 = vpop.f32.mrf.mxu0  ;;  %7076 = vmatpush1.msra.mxu1 %v6960_v8 }
 0x5e7   : > { %7077 = vmatprep.subr.mxu1 %v6959_v55 }
 0x5e8   : > { %v11576_v42 = vpop.f32.mrf.mxu0  ;;  %7078 = vmatpush1.msra.mxu1 %v6958_v24 }
 0x5e9   : > { %7079 = vmatprep.subr.mxu1 %v6957_v31  ;;  %v6898_v31 = vld [vmem:[%s12114_s6 + $0x1f0] sm:$0xff] }
 0x5ea   : > { %v11586_v49 = vpop.f32.mrf.mxu0  ;;  %7080 = vmatpush1.msra.mxu1 %v6956_v47 }
 0x5eb   : > { %7081 = vmatprep.subr.mxu1 %v6955_v45 }
 0x5ec   : > { %v11596_v22 = vpop.f32.mrf.mxu0  ;;  %7082 = vmatpush1.msra.mxu1 %v6954_v62 }
 0x5ed   : > { %7083 = vmatprep.subr.mxu1 %v6953_v33  ;;  %v6894_v33 = vld [vmem:[%s12114_s6 + $0x1d0] sm:$0xff] }
 0x5ee   : > { %v11606_v37 = vpop.f32.mrf.mxu0  ;;  %7084 = vmatpush1.msra.mxu1 %v6952_v59  ;;  %v6893_v59 = vld [vmem:[%s12114_s6 + $0x1c8] sm:$0xff] }
 0x5ef   : > { %7085 = vmatprep.subr.mxu1 %v6951_v27 }
 0x5f0   : > { %v11616_v57 = vpop.f32.mrf.mxu0  ;;  %7086 = vmatpush1.msra.mxu1 %v6950_v44 }
 0x5f1   : > { %7087 = vmatprep.subr.mxu1 %v6949_v6 }
 0x5f2   : > { %v11626_v7 = vpop.f32.mrf.mxu0  ;;  %7088 = vmatpush1.msra.mxu1 %v6948_v17  ;;  %v6890_v17 = vld [vmem:[%s12114_s6 + $0x1b0] sm:$0xff] }
 0x5f3   : > { %7089 = vmatprep.subr.mxu1 %v6947_v26  ;;  %v6889_v26 = vld [vmem:[%s12114_s6 + $0x1a8] sm:$0xff] }
 0x5f4   : > { %v11636_v9 = vpop.f32.mrf.mxu0  ;;  %7090 = vmatpush1.msra.mxu1 %v6946_v52 }
 0x5f5   : > { %7091 = vmatprep.subr.mxu1 %v6945_v46 }
 0x5f6   : > { %v11643_v60 = vpop.f32.mrf.mxu0  ;;  %7092 = vmatpush1.msra.mxu1 %v6944_v30 }
 0x5f7   : > { %7093 = vmatprep.subr.mxu1 %v6943_v0  ;;  %v6886_v0 = vld [vmem:[%s12114_s6 + $0x190] sm:$0xff] }
 0x5f8   : > { %v11647_v12 = vpop.f32.mrf.mxu0  ;;  %7094 = vmatpush1.msra.mxu1 %v6942_v36 }
 0x5f9   : > { %7095 = vmatprep.subr.mxu1 %v6941_v63  ;;  %v6885_v63 = vld [vmem:[%s12114_s6 + $0x188] sm:$0xff] }
 0x5fa   : > { %v11649_v35 = vpop.f32.mrf.mxu0  ;;  %7096 = vmatpush1.msra.mxu1 %v6940_v51 }
 0x5fc   : > { %v11651_v20 = vpop.f32.mrf.mxu0 }
 0x5fe   : > { %v6701_v32 = vpop.f32.mrf.mxu0 }
 0x600   : > { %v6703_v58 = vpop.f32.mrf.mxu0 }
 0x602   : > { %v6707_v28 = vpop.f32.mrf.mxu0 }
 0x603   : > { %v6992_v51 = vmul.f32 %v6888_v43, %v6707_v28  ;;  %v6882_v28 = vld [vmem:[%s12114_s6 + $0x170] sm:$0xff] }
 0x604   : > { %v6709_v41 = vpop.f32.mrf.mxu0 }
 0x605   : > { %v6993_v36 = vmul.f32 %v6889_v26, %v6709_v41  ;;  %v6990_v41 = vmul.f32 %v6886_v0, %v6701_v32  ;;  %v6880_v32 = vld [vmem:[%s12114_s6 + $0x160] sm:$0xff] }
 0x606   : > { %v6711_v50 = vpop.f32.mrf.mxu0 }
 0x607   : > { %v6994_v30 = vmul.f32 %v6890_v17, %v6711_v50  ;;  %v6884_v50 = vld [vmem:[%s12114_s6 + $0x180] sm:$0xff] }
 0x608   : > { %v6713_v21 = vpop.f32.mrf.mxu0 }
 0x609   : > { %v6995_v46 = vmul.f32 %v6891_v18, %v6713_v21 }
 0x60a   : > { %v6717_v8 = vpop.f32.mrf.mxu0 }
 0x60b   : > { %v6996_v39 = vmul.f32 %v6892_v61, %v6717_v8  ;;  %v6991_v8 = vmul.f32 %v6887_v25, %v6703_v58  ;;  %v6881_v58 = vld [vmem:[%s12114_s6 + $0x168] sm:$0xff]  ;;  %v7047_v25 = vld [vmem:[%s12116_s8 + $0x18] sm:$0xff] }
 0x60c   : > { %v6719_v3 = vpop.f32.mrf.mxu0 }
 0x60d   : > { %v6997_v11 = vmul.f32 %v6893_v59, %v6719_v3  ;;  %v6883_v3 = vld [vmem:[%s12114_s6 + $0x178] sm:$0xff] }
 0x60e   : > { %v6721_v13 = vpop.f32.mrf.mxu0 }
 0x60f   : > { %v6998_v6 = vmul.f32 %v6894_v33, %v6721_v13 }
 0x610   : > { %v6723_v55 = vpop.f32.mrf.mxu0 }
 0x611   : > { %v6999_v44 = vmul.f32 %v6895_v4, %v6723_v55  ;;  %v6989_v55 = vmul.f32 %v6885_v63, %v11651_v20  ;;  %v6879_v20 = vld [vmem:[%s12114_s6 + $0x158] sm:$0xff] }
 0x612   : > { %v6727_v48 = vpop.f32.mrf.mxu0 }
 0x613   : > { %v7000_v29 = vmul.f32 %v6896_v56, %v6727_v48  ;;  %v6988_v48 = vmul.f32 %v6884_v50, %v11649_v35  ;;  %v6878_v35 = vld [vmem:[%s12114_s6 + $0x150] sm:$0xff] }
 0x614   : > { %v6729_v15 = vpop.f32.mrf.mxu0  ;;  %v6982_v4 = vmul.f32 %v6878_v35, %v11606_v37  ;;  %v6872_v37 = vld [vmem:[%s12114_s6 + $0x120] sm:$0xff] }
 0x615   : > { %v7001_v34 = vmul.f32 %v6897_v19, %v6729_v15  ;;  %v6985_v19 = vmul.f32 %v6881_v58, %v11636_v9  ;;  %v6875_v9 = vld [vmem:[%s12114_s6 + $0x138] sm:$0xff]  ;;  %v6928_v35 = vld [vmem:[%s12114_s6 + $0x2e0] sm:$0xff] }
 0x616   : > { %v6731_v24 = vpop.f32.mrf.mxu0 }
 0x617   : > { %v7002_v62 = vmul.f32 %v6898_v31, %v6731_v24  ;;  %v6987_v24 = vmul.f32 %v6883_v3, %v11647_v12  ;;  %v6877_v12 = vld [vmem:[%s12114_s6 + $0x148] sm:$0xff] }
 0x618   : > { %v6733_v47 = vpop.f32.mrf.mxu0  ;;  %v6981_v33 = vmul.f32 %v6877_v12, %v11596_v22  ;;  %v6871_v22 = vld [vmem:[%s12114_s6 + $0x118] sm:$0xff] }
 0x619   : > { %v7003_v45 = vmul.f32 %v6899_v1, %v6733_v47  ;;  %v6986_v1 = vmul.f32 %v6882_v28, %v11643_v60  ;;  %v6984_v47 = vmul.f32 %v6880_v32, %v11626_v7  ;;  %v6876_v60 = vld [vmem:[%s12114_s6 + $0x140] sm:$0xff]  ;;  %v6874_v7 = vld [vmem:[%s12114_s6 + $0x130] sm:$0xff]  ;;  %v6931_v32 = vld [vmem:[%s12114_s6 + $0x2f8] sm:$0xff] }
 0x61a   : > { %v11668_v10 = vpop.f32.mrf.mxu0  ;;  %v6978_v61 = vmul.f32 %v6874_v7, %v11566_v16  ;;  %v6868_v16 = vld [vmem:[%s12114_s6 + $0x100] sm:$0xff]  ;;  %v6927_v12 = vld [vmem:[%s12114_s6 + $0x2d8] sm:$0xff] }
 0x61b   : > { %7097 = vmatprep.subr.mxu1 %v7003_v45  ;;  %v6983_v45 = vmul.f32 %v6879_v20, %v11616_v57  ;;  %v6873_v57 = vld [vmem:[%s12114_s6 + $0x128] sm:$0xff] }
 0x61c   : > { %v11676_v27 = vpop.f32.mrf.mxu0  ;;  %7098 = vmatpush2.msra.mxu1 %v7002_v62  ;;  %v6977_v18 = vmul.f32 %v6873_v57, %v11557_v54  ;;  %v6929_v20 = vld [vmem:[%s12114_s6 + $0x2e8] sm:$0xff] }
 0x61d   : > { %7099 = vmatprep.subr.mxu1 %v7001_v34  ;;  %v6980_v34 = vmul.f32 %v6876_v60, %v11586_v49  ;;  %v6870_v49 = vld [vmem:[%s12114_s6 + $0x110] sm:$0xff] }
 0x61e   : > { %v11684_v38 = vpop.f32.mrf.mxu0  ;;  %7100 = vmatpush2.msra.mxu1 %v7000_v29  ;;  %v6979_v29 = vmul.f32 %v6875_v9, %v11576_v42  ;;  %v6869_v42 = vld [vmem:[%s12114_s6 + $0x108] sm:$0xff]  ;;  %v6974_v26 = vmul.f32 %v6870_v49, %v11533_v2 }
 0x61f   : > { %7101 = vmatprep.subr.mxu1 %v6999_v44  ;;  %v7049_v2 = vld [vmem:[%s12116_s8 + $0x28] sm:$0xff] }
 0x620   : > { %v11692_v52 = vpop.f32.mrf.mxu0  ;;  %7102 = vmatpush2.msra.mxu1 %v6998_v6  ;;  %v6976_v6 = vmul.f32 %v6872_v37, %v11549_v5  ;;  %v6972_v5 = vmul.f32 %v6868_v16, %v11517_v53  ;;  %v7048_v53 = vld [vmem:[%s12116_s8 + $0x20] sm:$0xff]  ;;  %v6921_v49 = vld [vmem:[%s12114_s6 + $0x2a8] sm:$0xff]  ;;  %v6919_v16 = vld [vmem:[%s12114_s6 + $0x298] sm:$0xff] }
 0x621   : > { %7103 = vmatprep.subr.mxu1 %v6997_v11  ;;  %v6975_v11 = vmul.f32 %v6871_v22, %v11541_v40  ;;  %v6922_v22 = vld [vmem:[%s12114_s6 + $0x2b0] sm:$0xff] }
 0x622   : > { %v11700_v23 = vpop.f32.mrf.mxu0  ;;  %7104 = vmatpush2.msra.mxu1 %v6996_v39  ;;  %v6973_v39 = vmul.f32 %v6869_v42, %v11525_v14  ;;  %v6920_v42 = vld [vmem:[%s12114_s6 + $0x2a0] sm:$0xff] }
 0x623   : > { %7105 = vmatprep.subr.mxu1 %v6995_v46  ;;  %v7044_v46 = vld [vmem:[%s12116_s8] sm:$0xff] }
 0x624   : > { %v11708_v21 = vpop.f32.mrf.mxu0  ;;  %7106 = vmatpush2.msra.mxu1 %v6994_v30 }
 0x625   : > { %7107 = vmatprep.subr.mxu1 %v6993_v36 }
 0x626   : > { %v11716_v13 = vpop.f32.mrf.mxu0  ;;  %7108 = vmatpush2.msra.mxu1 %v6992_v51 }
 0x627   : > { %7109 = vmatprep.subr.mxu1 %v6991_v8 }
 0x628   : > { %v11726_v15 = vpop.f32.mrf.mxu0  ;;  %7110 = vmatpush2.msra.mxu1 %v6990_v41 }
 0x629   : > { %7111 = vmatprep.subr.mxu1 %v6989_v55 }
 0x62a   : > { %v11736_v31 = vpop.f32.mrf.mxu0  ;;  %7112 = vmatpush2.msra.mxu1 %v6988_v48 }
 0x62b   : > { %7113 = vmatprep.subr.mxu1 %v6987_v24  ;;  %v6930_v24 = vld [vmem:[%s12114_s6 + $0x2f0] sm:$0xff] }
 0x62c   : > { %v11746_v56 = vpop.f32.mrf.mxu0  ;;  %7114 = vmatpush2.msra.mxu1 %v6986_v1 }
 0x62d   : > { %7115 = vmatprep.subr.mxu1 %v6985_v19 }
 0x62e   : > { %v11756_v62 = vpop.f32.mrf.mxu0  ;;  %7116 = vmatpush2.msra.mxu1 %v6984_v47 }
 0x62f   : > { %7117 = vmatprep.subr.mxu1 %v6983_v45  ;;  %v6926_v45 = vld [vmem:[%s12114_s6 + $0x2d0] sm:$0xff] }
 0x630   : > { %v11766_v59 = vpop.f32.mrf.mxu0  ;;  %7118 = vmatpush2.msra.mxu1 %v6982_v4  ;;  %v6925_v4 = vld [vmem:[%s12114_s6 + $0x2c8] sm:$0xff] }
 0x631   : > { %7119 = vmatprep.subr.mxu1 %v6981_v33  ;;  %v6924_v33 = vld [vmem:[%s12114_s6 + $0x2c0] sm:$0xff] }
 0x632   : > { %v11776_v44 = vpop.f32.mrf.mxu0  ;;  %7120 = vmatpush2.msra.mxu1 %v6980_v34  ;;  %v6923_v34 = vld [vmem:[%s12114_s6 + $0x2b8] sm:$0xff] }
 0x633   : > { %7121 = vmatprep.subr.mxu1 %v6979_v29 }
 0x634   : > { %v11786_v17 = vpop.f32.mrf.mxu0  ;;  %7122 = vmatpush2.msra.mxu1 %v6978_v61 }
 0x635   : > { %7123 = vmatprep.subr.mxu1 %v6977_v18 }
 0x636   : > { %v11793_v54 = vpop.f32.mrf.mxu0  ;;  %7124 = vmatpush2.msra.mxu1 %v6976_v6 }
 0x637   : > { %7125 = vmatprep.subr.mxu1 %v6975_v11 }
 0x638   : > { %v11797_v43 = vpop.f32.mrf.mxu0  ;;  %7126 = vmatpush2.msra.mxu1 %v6974_v26 }
 0x639   : > { %7127 = vmatprep.subr.mxu1 %v6973_v39  ;;  %v6918_v39 = vld [vmem:[%s12114_s6 + $0x290] sm:$0xff] }
 0x63a   : > { %v11805_v40 = vpop.f32.mrf.mxu0  ;;  %7128 = vmatpush2.msra.mxu1 %v6972_v5 }
 0x63b   : > { %7130 = vmatmul.mubr.f32.vlgmr.msra.gmra.mxu1 %v7044_v46  ;;  %v6917_v46 = vld [vmem:[%s12114_s6 + $0x288] sm:$0xff] }
 0x63c   : > { %v11807_v14 = vpop.f32.mrf.mxu0  ;;  %7135 = vmatprep.mubr.f32.mxu1 %v7049_v2 }
 0x63e   : > { %v6781_v30 = vpop.f32.mrf.mxu0 }
 0x63f   : > { %7136 = vmatmul.mubr.f32.gmra.mxu1 %v7048_v53  ;;  %v6916_v53 = vld [vmem:[%s12114_s6 + $0x280] sm:$0xff] }
 0x640   : > { %v6783_v0 = vpop.f32.mrf.mxu0  ;;  %7798 = vmatprep.mubr.msk.f32.mxu1 %vm7052_vm5, %v7047_v25 }
 0x641   : > { %v7023_v25 = vmul.f32 %v6919_v16, %v6783_v0  ;;  %v6913_v0 = vld [vmem:[%s12114_s6 + $0x268] sm:$0xff] }
 0x642   : > { %v6787_v36 = vpop.f32.mrf.mxu0 }
 0x643   : > { %v7024_v2 = vmul.f32 %v6920_v42, %v6787_v36  ;;  %v7021_v36 = vmul.f32 %v6917_v46, %v11807_v14  ;;  %v6932_v42 = vld [vmem:[%s12114_s6 + $0x300] sm:$0xff]  ;;  %v7051_v46 = vld [vmem:[%s12116_s8 + $0x38] sm:$0xff] }
 0x644   : > { %v6789_v63 = vpop.f32.mrf.mxu0 }
 0x645   : > { %v7025_v5 = vmul.f32 %v6921_v49, %v6789_v63  ;;  %v6914_v63 = vld [vmem:[%s12114_s6 + $0x270] sm:$0xff]  ;;  %v6933_v49 = vld [vmem:[%s12114_s6 + $0x308] sm:$0xff] }
 0x646   : > { %v6791_v51 = vpop.f32.mrf.mxu0  ;;  %v7018_v14 = vmul.f32 %v6914_v63, %v11793_v54  ;;  %v6908_v54 = vld [vmem:[%s12114_s6 + $0x240] sm:$0xff] }
 0x647   : > { %v7026_v11 = vmul.f32 %v6922_v22, %v6791_v51  ;;  %v6915_v51 = vld [vmem:[%s12114_s6 + $0x278] sm:$0xff]  ;;  %v7227_v63 = vld [vmem:[%s12115_s7 + $0x40] sm:$0xff] }
 0x648   : > { %v6793_v50 = vpop.f32.mrf.mxu0 }
 0x649   : > { %v7027_v6 = vmul.f32 %v6923_v34, %v6793_v50  ;;  %v7022_v50 = vmul.f32 %v6918_v39, %v6781_v30  ;;  %v6912_v30 = vld [vmem:[%s12114_s6 + $0x260] sm:$0xff] }
 0x64a   : > { %v6797_v8 = vpop.f32.mrf.mxu0 }
 0x64b   : > { %v7028_v18 = vmul.f32 %v6924_v33, %v6797_v8 }
 0x64c   : > { %v6799_v3 = vpop.f32.mrf.mxu0 }
 0x64d   : > { %v7029_v61 = vmul.f32 %v6925_v4, %v6799_v3  ;;  %v7020_v3 = vmul.f32 %v6916_v53, %v11805_v40  ;;  %v6910_v40 = vld [vmem:[%s12114_s6 + $0x250] sm:$0xff]  ;;  %v7232_v53 = vld [vmem:[%s12115_s7 + $0x68] sm:$0xff] }
 0x64e   : > { %v6801_v41 = vpop.f32.mrf.mxu0 }
 0x64f   : > { %v7030_v37 = vmul.f32 %v6926_v45, %v6801_v41  ;;  %v7019_v41 = vmul.f32 %v6915_v51, %v11797_v43  ;;  %v6909_v43 = vld [vmem:[%s12114_s6 + $0x248] sm:$0xff]  ;;  %v7230_v51 = vld [vmem:[%s12115_s7 + $0x58] sm:$0xff] }
 0x650   : > { %v6803_v28 = vpop.f32.mrf.mxu0 }
 0x651   : > { %v7031_v57 = vmul.f32 %v6927_v12, %v6803_v28  ;;  %v6911_v28 = vld [vmem:[%s12114_s6 + $0x258] sm:$0xff] }
 0x652   : > { %v6807_v55 = vpop.f32.mrf.mxu0  ;;  %v6903_v12 = vld [vmem:[%s12114_s6 + $0x218] sm:$0xff] }
 0x653   : > { %v7032_v7 = vmul.f32 %v6928_v35, %v6807_v55  ;;  %v7012_v35 = vmul.f32 %v6908_v54, %v11736_v31  ;;  %v6902_v31 = vld [vmem:[%s12114_s6 + $0x210] sm:$0xff]  ;;  %v7007_v4 = vmul.f32 %v6903_v12, %v11692_v52  ;;  %v6937_v52 = vld [vmem:[%s12114_s6 + $0x328] sm:$0xff] }
 0x654   : > { %v6809_v58 = vpop.f32.mrf.mxu0  ;;  %v7244_v54 = vld [vmem:[%s12115_s7 + $0xc8] sm:$0xff] }
 0x655   : > { %v7033_v9 = vmul.f32 %v6929_v20, %v6809_v58  ;;  %v7017_v58 = vmul.f32 %v6913_v0, %v11786_v17  ;;  %v7014_v17 = vmul.f32 %v6910_v40, %v11756_v62  ;;  %v6904_v62 = vld [vmem:[%s12114_s6 + $0x220] sm:$0xff]  ;;  %v7225_v0 = vld [vmem:[%s12115_s7 + $0x30] sm:$0xff]  ;;  %v7248_v40 = vld [vmem:[%s12115_s7 + $0xe8] sm:$0xff] }
 0x656   : > { %v6811_v48 = vpop.f32.mrf.mxu0 }
 0x657   : > { %v7034_v47 = vmul.f32 %v6930_v24, %v6811_v48  ;;  %v7016_v48 = vmul.f32 %v6912_v30, %v11776_v44  ;;  %v6907_v24 = vld [vmem:[%s12114_s6 + $0x238] sm:$0xff]  ;;  %v6906_v44 = vld [vmem:[%s12114_s6 + $0x230] sm:$0xff]  ;;  %v7223_v30 = vld [vmem:[%s12115_s7 + $0x20] sm:$0xff] }
 0x658   : > { %v6813_v1 = vpop.f32.mrf.mxu0 }
 0x659   : > { %v7035_v19 = vmul.f32 %v6931_v32, %v6813_v1  ;;  %v7015_v32 = vmul.f32 %v6911_v28, %v11766_v59  ;;  %v7013_v1 = vmul.f32 %v6909_v43, %v11746_v56  ;;  %v6905_v59 = vld [vmem:[%s12114_s6 + $0x228] sm:$0xff]  ;;  %v7010_v56 = vmul.f32 %v6906_v44, %v11716_v13  ;;  %v6900_v13 = vld [vmem:[%s12114_s6 + $0x200] sm:$0xff]  ;;  %v7221_v28 = vld [vmem:[%s12115_s7 + $0x10] sm:$0xff] }
 0x65a   : > { %v11831_v60 = vpop.f32.mrf.mxu0  ;;  %v7009_v45 = vmul.f32 %v6905_v59, %v11708_v21  ;;  %v6939_v21 = vld [vmem:[%s12114_s6 + $0x338] sm:$0x3f]  ;;  %v7004_v34 = vmul.f32 %v6900_v13, %v11668_v10  ;;  %v6934_v10 = vld [vmem:[%s12114_s6 + $0x310] sm:$0xff]  ;;  %v7239_v44 = vld [vmem:[%s12115_s7 + $0xa0] sm:$0xff] }
 0x65b   : > { %7142 = vmatprep.subr.mxu1 %v7035_v19  ;;  %v7011_v19 = vmul.f32 %v6907_v24, %v11726_v15  ;;  %v6901_v15 = vld [vmem:[%s12114_s6 + $0x208] sm:$0xff]  ;;  %v7036_v39 = vmul.f32 %v6932_v42, %v11831_v60  ;;  %v7233_v60 = vld [vmem:[%s12115_s7 + $0x70] sm:$0xff]  ;;  %v7246_v43 = vld [vmem:[%s12115_s7 + $0xd8] sm:$0xff] }
 0x65c   : > { %7143 = vmatpush1.msra.mxu1 %v7034_v47  ;;  %v11845_v29 = vpop.f32.mrf.mxu0  ;;  %v7242_v24 = vld [vmem:[%s12115_s7 + $0xb8] sm:$0xff]  ;;  %v7237_v59 = vld [vmem:[%s12115_s7 + $0x90] sm:$0xff] }
 0x65d   : > { %7144 = vmatprep.subr.mxu1 %v7033_v9  ;;  %v7008_v9 = vmul.f32 %v6904_v62, %v11700_v23  ;;  %v6938_v23 = vld [vmem:[%s12114_s6 + $0x330] sm:$0x3f]  ;;  %v7235_v62 = vld [vmem:[%s12115_s7 + $0x80] sm:$0xff] }
 0x65e   : > { %7145 = vmatpush1.msra.mxu1 %v7032_v7  ;;  %v11859_v26 = vpop.f32.mrf.mxu0  ;;  %v7006_v7 = vmul.f32 %v6902_v31, %v11684_v38  ;;  %v6936_v38 = vld [vmem:[%s12114_s6 + $0x320] sm:$0xff] }
 0x65f   : > { %7146 = vmatprep.subr.mxu1 %v7031_v57  ;;  %v7005_v57 = vmul.f32 %v6901_v15, %v11676_v27  ;;  %v6935_v27 = vld [vmem:[%s12114_s6 + $0x318] sm:$0xff]  ;;  %v7038_v16 = vmul.f32 %v6934_v10, %v11859_v26 }
 0x660   : > { %7147 = vmatpush1.msra.mxu1 %v7030_v37  ;;  %v11873_v8 = vpop.f32.mrf.mxu0  ;;  %v7234_v26 = vld [vmem:[%s12115_s7 + $0x78] sm:$0xff] }
 0x661   : > { %7148 = vmatprep.subr.mxu1 %v7029_v61 }
 0x662   : > { %7149 = vmatpush1.msra.mxu1 %v7028_v18  ;;  %v6827_v55 = vpop.f32.mrf.mxu0 }
 0x663   : > { %7150 = vmatprep.subr.mxu1 %v7027_v6  ;;  %v7040_v18 = vmul.f32 %v6936_v38, %v6827_v55  ;;  %v7039_v6 = vmul.f32 %v6935_v27, %v11873_v8  ;;  %v7228_v8 = vld [vmem:[%s12115_s7 + $0x48] sm:$0xff]  ;;  %v7219_v55 = vld [vmem:[%s12115_s7] sm:$0xff] }
 0x664   : > { %7151 = vmatpush1.msra.mxu1 %v7026_v11  ;;  %v6829_v20 = vpop.f32.mrf.mxu0  ;;  %v7037_v11 = vmul.f32 %v6933_v49, %v11845_v29  ;;  %v8354_v29 = vmov 0.0  }
 0x665   : > { %7152 = vmatprep.subr.mxu1 %v7025_v5  ;;  %v7041_v61 = vmul.f32 %v6937_v52, %v6829_v20  ;;  %v7046_v5 = vld [vmem:[%s12116_s8 + $0x10] sm:$0xff]  ;;  %v7240_v20 = vld [vmem:[%s12115_s7 + $0xa8] sm:$0xff] }
 0x666   : > { %7153 = vmatpush1.msra.mxu1 %v7024_v2  ;;  %v6831_v47 = vpop.f32.mrf.mxu0  ;;  %v7050_v2 = vld [vmem:[%s12116_s8 + $0x30] sm:$0xff] }
 0x667   : > { %7154 = vmatprep.subr.mxu1 %v7023_v25  ;;  %v7042_v22 = vmul.f32 %v6938_v23, %v6831_v47  ;;  %v7231_v25 = vld [vmem:[%s12115_s7 + $0x60] sm:$0xff] }
 0x668   : > { %7155 = vmatpush1.msra.mxu1 %v7022_v50  ;;  %v6833_v33 = vpop.f32.mrf.mxu0  ;;  %v7229_v50 = vld [vmem:[%s12115_s7 + $0x50] sm:$0xff] }
 0x669   : > { %7156 = vmatprep.subr.mxu1 %v7021_v36  ;;  %v7043_v37 = vmul.f32 %v6939_v21, %v6833_v33  ;;  %v7226_v36 = vld [vmem:[%s12115_s7 + $0x38] sm:$0xff]  ;;  %v7800_v21 = vld [vmem:[%s12117_s9] ss:$0 sm:$0xff] }
 0x66a   : > { %7157 = vmatpush1.msra.mxu1 %v7020_v3  ;;  %v7224_v3 = vld [vmem:[%s12115_s7 + $0x28] sm:$0xff] }
 0x66b   : > { %7158 = vmatprep.subr.mxu1 %v7019_v41  ;;  %v7222_v41 = vld [vmem:[%s12115_s7 + $0x18] sm:$0xff] }
 0x66c   : > { %7159 = vmatpush1.msra.mxu1 %v7018_v14  ;;  %v7220_v14 = vld [vmem:[%s12115_s7 + $0x8] sm:$0xff] }
 0x66d   : > { %7160 = vmatprep.subr.mxu1 %v7017_v58  ;;  %v7247_v58 = vld [vmem:[%s12115_s7 + $0xe0] sm:$0xff] }
 0x66e   : > { %7161 = vmatpush1.msra.mxu1 %v7016_v48  ;;  %v7245_v48 = vld [vmem:[%s12115_s7 + $0xd0] sm:$0xff] }
 0x66f   : > { %7162 = vmatprep.subr.mxu1 %v7015_v32  ;;  %v7243_v32 = vld [vmem:[%s12115_s7 + $0xc0] sm:$0xff] }
 0x670   : > { %7163 = vmatpush1.msra.mxu1 %v7014_v17  ;;  %v7241_v17 = vld [vmem:[%s12115_s7 + $0xb0] sm:$0xff] }
 0x671   : > { %7164 = vmatprep.subr.mxu1 %v7013_v1  ;;  %v7238_v1 = vld [vmem:[%s12115_s7 + $0x98] sm:$0xff] }
 0x672   : > { %7165 = vmatpush1.msra.mxu1 %v7012_v35  ;;  %v7236_v35 = vld [vmem:[%s12115_s7 + $0x88] sm:$0xff] }
 0x673   : > { %7166 = vmatprep.subr.mxu1 %v7011_v19 }
 0x674   : > { %7167 = vmatpush1.msra.mxu1 %v7010_v56 }
 0x675   : > { %7168 = vmatprep.subr.mxu1 %v7009_v45 }
 0x676   : > { %7169 = vmatpush1.msra.mxu1 %v7008_v9 }
 0x677   : > { %7170 = vmatprep.subr.mxu1 %v7007_v4 }
 0x678   : > { %7171 = vmatpush1.msra.mxu1 %v7006_v7 }
 0x679   : > { %7172 = vmatprep.subr.mxu1 %v7005_v57 }
 0x67a   : > { %7173 = vmatpush1.msra.mxu1 %v7004_v34 }
 0x67b   : > { %7796 = vmatprep.subr.msk.mxu1 %vm3645_vm2, %v7043_v37 }
 0x67c   : > { %7797 = vmatpush2.msk.msra.mxu1 %vm3645_vm2, %v7042_v22 }
 0x67d   : > { %7200 = vmatprep.subr.mxu1 %v7041_v61 }
 0x67e   : > { %7201 = vmatpush2.msra.mxu1 %v7040_v18 }
 0x67f   : > { %7202 = vmatprep.subr.mxu1 %v7039_v6 }
 0x680   : > { %7203 = vmatpush2.msra.mxu1 %v7038_v16 }
 0x681   : > { %7204 = vmatprep.subr.mxu1 %v7037_v11 }
 0x682   : > { %7205 = vmatpush2.msra.mxu1 %v7036_v39 }
 0x683   : > { %7207 = vmatmul.mubr.f32.vlgmr.msra.gmra.mxu1 %v7046_v5  ;;  %7263 = vmatprep.subr.mxu1 %v8354_v29 }
 0x684   : > { %7799 = vmatprep.mubr.msk.f32.mxu1 %vm7052_vm5, %v7051_v46  ;;  %7264 = vmatpush1.msra.mxu1 %v7234_v26 }
 0x685   : > { %7265 = vmatprep.subr.mxu1 %v8354_v29 }
 0x686   : > { %7266 = vmatpush1.msra.mxu1 %v7233_v60 }
 0x687   : > { %7213 = vmatmul.mubr.f32.gmra.mxu1 %v7050_v2  ;;  %7267 = vmatprep.subr.mxu1 %v8354_v29 }
 0x688   : > { %7268 = vmatpush1.msra.mxu1 %v7232_v53 }
 0x689   : > { %7269 = vmatprep.subr.mxu1 %v8354_v29 }
 0x68a   : > { %7270 = vmatpush1.msra.mxu1 %v7231_v25 }
 0x68b   : > { %7271 = vmatprep.subr.mxu1 %v8354_v29 }
 0x68c   : > { %7272 = vmatpush1.msra.mxu1 %v7230_v51 }
 0x68d   : > { %7273 = vmatprep.subr.mxu1 %v8354_v29 }
 0x68e   : > { %7274 = vmatpush1.msra.mxu1 %v7229_v50 }
 0x68f   : > { %7275 = vmatprep.subr.mxu1 %v8354_v29 }
 0x690   : > { %7276 = vmatpush1.msra.mxu1 %v7228_v8 }
 0x691   : > { %7277 = vmatprep.subr.mxu1 %v8354_v29 }
 0x692   : > { %7278 = vmatpush1.msra.mxu1 %v7227_v63 }
 0x693   : > { %7279 = vmatprep.subr.mxu1 %v8354_v29 }
 0x694   : > { %7280 = vmatpush1.msra.mxu1 %v7226_v36 }
 0x695   : > { %7281 = vmatprep.subr.mxu1 %v8354_v29 }
 0x696   : > { %7282 = vmatpush1.msra.mxu1 %v7225_v0 }
 0x697   : > { %7283 = vmatprep.subr.mxu1 %v8354_v29 }
 0x698   : > { %7284 = vmatpush1.msra.mxu1 %v7224_v3 }
 0x699   : > { %7285 = vmatprep.subr.mxu1 %v8354_v29 }
 0x69a   : > { %7286 = vmatpush1.msra.mxu1 %v7223_v30 }
 0x69b   : > { %7287 = vmatprep.subr.mxu1 %v8354_v29 }
 0x69c   : > { %7288 = vmatpush1.msra.mxu1 %v7222_v41 }
 0x69d   : > { %7289 = vmatprep.subr.mxu1 %v8354_v29 }
 0x69e   : > { %7290 = vmatpush1.msra.mxu1 %v7221_v28 }
 0x69f   : > { %7291 = vmatprep.subr.mxu1 %v8354_v29 }
 0x6a0   : > { %7292 = vmatpush1.msra.mxu1 %v7220_v14 }
 0x6a1   : > { %7293 = vmatprep.subr.mxu1 %v8354_v29 }
 0x6a2   : > { %7294 = vmatpush1.msra.mxu1 %v7219_v55 }
 0x6a3   : > { %7299 = vmatprep.subr.mxu1 %v8354_v29 }
 0x6a4   : > { %7300 = vmatpush2.msra.mxu1 %v7248_v40 }
 0x6a5   : > { %7301 = vmatprep.subr.mxu1 %v8354_v29 }
 0x6a6   : > { %7302 = vmatpush2.msra.mxu1 %v7247_v58 }
 0x6a7   : > { %7303 = vmatprep.subr.mxu1 %v8354_v29 }
 0x6a8   : > { %7304 = vmatpush2.msra.mxu1 %v7246_v43 }
 0x6a9   : > { %7305 = vmatprep.subr.mxu1 %v8354_v29 }
 0x6aa   : > { %7306 = vmatpush2.msra.mxu1 %v7245_v48 }
 0x6ab   : > { %7307 = vmatprep.subr.mxu1 %v8354_v29 }
 0x6ac   : > { %7308 = vmatpush2.msra.mxu1 %v7244_v54 }
 0x6ad   : > { %7309 = vmatprep.subr.mxu1 %v8354_v29 }
 0x6ae   : > { %7310 = vmatpush2.msra.mxu1 %v7243_v32 }
 0x6af   : > { %7311 = vmatprep.subr.mxu1 %v8354_v29 }
 0x6b0   : > { %7312 = vmatpush2.msra.mxu1 %v7242_v24 }
 0x6b1   : > { %7313 = vmatprep.subr.mxu1 %v8354_v29 }
 0x6b2   : > { %7314 = vmatpush2.msra.mxu1 %v7241_v17 }
 0x6b3   : > { %7315 = vmatprep.subr.mxu1 %v8354_v29 }
 0x6b4   : > { %7316 = vmatpush2.msra.mxu1 %v7240_v20 }
 0x6b5   : > { %7317 = vmatprep.subr.mxu1 %v8354_v29 }
 0x6b6   : > { %7318 = vmatpush2.msra.mxu1 %v7239_v44 }
 0x6b7   : > { %7319 = vmatprep.subr.mxu1 %v8354_v29 }
 0x6b8   : > { %7320 = vmatpush2.msra.mxu1 %v7238_v1 }
 0x6b9   : > { %7321 = vmatprep.subr.mxu1 %v8354_v29 }
 0x6ba   : > { %7322 = vmatpush2.msra.mxu1 %v7237_v59 }
 0x6bb   : > { %7323 = vmatprep.subr.mxu1 %v8354_v29 }
 0x6bc   : > { %7324 = vmatpush2.msra.mxu1 %v7236_v35 }
 0x6bd   : > { %7325 = vmatprep.subr.mxu1 %v8354_v29 }
 0x6be   : > { %7326 = vmatpush2.msra.mxu1 %v7235_v62 }
 0x6fb   : > { %v7131_v19 = vpop.f32.mrf.mxu1 }
 0x6fd   : > { %v7133_v12 = vpop.f32.mrf.mxu1 }
 0x6ff   : > { %v7137_v56 = vpop.f32.mrf.mxu1 }
 0x701   : > { %v7139_v47 = vpop.f32.mrf.mxu1 }
 0x743   : > { %v7208_v31 = vpop.f32.mrf.mxu1 }
 0x744   : > { %v7209_v9 = vadd.f32 %v7208_v31, %v7131_v19 }
 0x745   : > { %v7210_v45 = vpop.f32.mrf.mxu1 }
 0x746   : > { %v7211_v15 = vadd.f32 %v7210_v45, %v7133_v12 }
 0x747   : > { %v7214_v13 = vpop.f32.mrf.mxu1 }
 0x748   : > { %7801 = vmatprep.mubr.msk.f32.mxu1 %vm7256_vm6, %v7211_v15  ;;  %v7215_v33 = vadd.f32 %v7214_v13, %v7137_v56 }
 0x749   : > { %7328 = vmatmul.mubr.f32.vlgmr.msra.gmra.mxu1 %v7209_v9  ;;  %v7216_v4 = vpop.f32.mrf.mxu1 }
 0x74a   : > { %v7217_v7 = vadd.f32 %v7216_v4, %v7139_v47 }
 0x74c   : > { %7802 = vmatprep.mubr.msk.f32.mxu1 %vm7256_vm6, %v7217_v7 }
 0x74d   : > { %7333 = vmatmul.mubr.f32.gmra.mxu1 %v7215_v33 }
 0x809   : > { %v7329_v57 = vpop.f32.mrf.mxu1 }
 0x80a   : > { %v7330_v23 = vadd.f32 %v7800_v21, %v7329_v57 }
 0x80b   : > { %v7331_v34 = vpop.f32.mrf.mxu1 }
 0x80c   : > { %7339 = vst.msk [vmem:[%s359_s30] sm:$0xff] %vm7338_vm7, %v7330_v23 }
 0x80d   : > { %v7334_v52 = vpop.f32.mrf.mxu1 }
 0x80e   : > { %v7335_v38 = vadd.f32 %v7800_v21, %v7334_v52 }
 0x80f   : > { %v7336_v37 = vpop.f32.mrf.mxu1 }
 0x810   : > { %7340 = vst.msk [vmem:[%s359_s30 + $0x8] sm:$0xff] %vm7338_vm7, %v7335_v38 }
 0x811 PF: > { %s20_s13 = sadd.s32 1, %s8351_s13  }
 0x812   : > { %p17_p4 = scmp.ge.s32.totalorder %s20_s13, 4  }
 0x814   :  { %19 = sbr.rel (!%p17_p4) target bundleno = 1 (0x1), region = 90 }

</bundles_post_ra>
